<compile_context>
chip_gen: v5e
topology: v5e:2x2
jax: 0.10.0
libtpu: 0.0.40
codegen_flags: <defaults>
</compile_context>

<pallas_src>
import numpy as np
import jax
import jax.numpy as jnp
from jax import lax
from jax.experimental import pallas as pl
from jax.experimental.pallas import tpu as pltpu


# ---------------------------------------------------------------------------
# Padding helper: zero-pad to (H+3, W+2) and flatten spatial dims.
# Rows 0..H+1 reproduce the standard pad=1 halo; the extra bottom row keeps the
# last tap's flat window  x_flat[di*(W+2)+dj : ... + H*(W+2)]  in bounds.
# ---------------------------------------------------------------------------
def _pad_and_flatten(x_nhwc):
    N, H, W, C = x_nhwc.shape
    xp = jnp.pad(x_nhwc, ((0, 0), (1, 2), (1, 1), (0, 0)))
    return xp.reshape(N, (H + 3) * (W + 2), C)
    # TODO(synk): move the halo padding in-kernel for production sizes to avoid
    # the extra HBM round trip of the feature map.


# ---------------------------------------------------------------------------
# Kernel 1: conv_p1 + conv_c1 (3x3, folded BN, ReLU), concatenated weights.
# Input is the flattened padded block; each tap is a contiguous flat row window.
# ---------------------------------------------------------------------------
def _make_conv1_dual_kernel(H, W):
    Wp = W + 2
    EXT = H * Wp

    def kernel(x_ref, w_ref, b_ref, o_ref):
        C2 = o_ref.shape[2]
        acc = jnp.zeros((EXT, C2), jnp.float32)
        for t in range(9):                       # static unroll over the 3x3 taps
            di, dj = divmod(t, 3)
            off = di * Wp + dj
            xs = x_ref[0, pl.ds(off, EXT), :]    # contiguous flat window, no reshape
            acc = acc + jnp.dot(xs, w_ref[t], preferred_element_type=jnp.float32)
        y = jnp.maximum(acc + b_ref[...], 0.0)   # folded-BN bias + ReLU (f32)
        # drop the two pad columns once at the end
        y = y.reshape(H, Wp, C2)[:, :W, :].reshape(1, H * W, C2)
        o_ref[...] = y.astype(o_ref.dtype)

    return kernel


def conv1_dual(xp_flat, H, W, w, b, out_dtype=jnp.bfloat16):
    """xp_flat: (N, (H+3)*(W+2), Cin) bf16; w: (9, Cin, 2C) bf16; b: (1, 2C) f32."""
    N, M, Cin = xp_flat.shape
    C2 = w.shape[-1]
    return pl.pallas_call(
        _make_conv1_dual_kernel(H, W),
        out_shape=jax.ShapeDtypeStruct((N, H * W, C2), out_dtype),
        grid=(N,),
        in_specs=[
            pl.BlockSpec((1, M, Cin), lambda n: (n, 0, 0)),
            pl.BlockSpec((9, Cin, C2), lambda n: (0, 0, 0)),
            pl.BlockSpec((1, C2), lambda n: (0, 0)),
        ],
        out_specs=pl.BlockSpec((1, H * W, C2), lambda n: (n, 0, 0)),
        compiler_params=pltpu.CompilerParams(dimension_semantics=("parallel",)),
    )(xp_flat, w, b)


# ---------------------------------------------------------------------------
# Kernel 2: fused position attention (first C channels) + channel attention
# (last C channels), one kernel per batch element.  alpha/beta live in SMEM.
# ---------------------------------------------------------------------------
def _pam_cam_kernel(ab_ref, x_ref, wbcd_ref, bbcd_ref, o_ref):
    x = x_ref[0]                                   # (HW, 2C) bf16
    C2 = x.shape[1]
    C = C2 // 2
    K = (wbcd_ref.shape[1] - C) // 2
    xp = x[:, :C]                                  # PAM input
    xc = x[:, C:]                                  # CAM input

    # ---- position attention: fused B/C/D 1x1 projections in one matmul ----
    bcd = jnp.dot(xp, wbcd_ref[...], preferred_element_type=jnp.float32) + bbcd_ref[...]
    fb = bcd[:, :K]
    fc = bcd[:, K:2 * K]
    fd = bcd[:, 2 * K:]
    s = lax.dot_general(fb.astype(jnp.bfloat16), fc.astype(jnp.bfloat16),
                        (((1,), (1,)), ((), ())),
                        preferred_element_type=jnp.float32)          # (HW, HW)
    s = s - jnp.max(s, axis=-1, keepdims=True)
    es = jnp.exp(s)
    att = es * pl.reciprocal(jnp.sum(es, axis=-1, keepdims=True), approx=True)
    pe = jnp.dot(att.astype(jnp.bfloat16), fd.astype(jnp.bfloat16),
                 preferred_element_type=jnp.float32)                 # (HW, C)
    out_p = ab_ref[0] * pe + xp.astype(jnp.float32)                  # alpha residual
    # TODO(synk): flash-tile the (HW, HW) score matrix over query rows for
    # production resolutions (HW=4096 would need 64 MiB here).

    # ---- channel attention ----
    g = lax.dot_general(xc, xc, (((0,), (0,)), ((), ())),
                        preferred_element_type=jnp.float32)          # (C, C) = X^T X
    gn = jnp.max(g, axis=-1, keepdims=True) - g                      # rowmax - attention
    gn = gn - jnp.max(gn, axis=-1, keepdims=True)                    # softmax stability
    eg = jnp.exp(gn)
    attc = eg * pl.reciprocal(jnp.sum(eg, axis=-1, keepdims=True), approx=True)
    ce = lax.dot_general(xc, attc.astype(jnp.bfloat16), (((1,), (1,)), ((), ())),
                         preferred_element_type=jnp.float32)         # X @ att^T
    out_c = ab_ref[1] * ce + xc.astype(jnp.float32)                  # beta residual

    y = jnp.concatenate([out_p, out_c], axis=-1)                     # (HW, 2C)
    o_ref[...] = y[None].astype(o_ref.dtype)


def pam_cam(y1, wbcd, bbcd, alpha_beta):
    """y1: (N, HW, 2C) bf16 -> (N, HW, 2C) bf16."""
    N, HW, C2 = y1.shape
    C = C2 // 2
    KW = wbcd.shape[-1]
    return pl.pallas_call(
        _pam_cam_kernel,
        out_shape=jax.ShapeDtypeStruct((N, HW, C2), jnp.bfloat16),
        grid=(N,),
        in_specs=[
            pl.BlockSpec(memory_space=pltpu.MemorySpace.SMEM),       # [alpha, beta]
            pl.BlockSpec((1, HW, C2), lambda n: (n, 0, 0)),
            pl.BlockSpec((C, KW), lambda n: (0, 0)),
            pl.BlockSpec((1, KW), lambda n: (0, 0)),
        ],
        out_specs=pl.BlockSpec((1, HW, C2), lambda n: (n, 0, 0)),
        compiler_params=pltpu.CompilerParams(dimension_semantics=("parallel",)),
    )(alpha_beta, y1, wbcd, bbcd)


# ---------------------------------------------------------------------------
# Kernel 3: block-diagonal conv_p2/conv_c2 (3x3, folded BN, ReLU) with all three
# 1x1 heads fused into the epilogue as one lane-dense (2C, 128) matmul.
# ---------------------------------------------------------------------------
def _make_conv2_heads_kernel(H, W):
    Wp = W + 2
    EXT = H * Wp

    def kernel(x_ref, w2_ref, b2_ref, wh_ref, bh_ref, o_ref):
        C2 = x_ref.shape[2]
        CP = o_ref.shape[2]
        acc = jnp.zeros((EXT, C2), jnp.float32)
        for t in range(9):
            di, dj = divmod(t, 3)
            off = di * Wp + dj
            xs = x_ref[0, pl.ds(off, EXT), :]
            acc = acc + jnp.dot(xs, w2_ref[t], preferred_element_type=jnp.float32)
        p2c2 = jnp.maximum(acc + b2_ref[...], 0.0)          # [feat_p2 | feat_c2]
        # heads: cols [0:n)=out(p2+c2), [n:2n)=conv_p3(p2), [2n:3n)=conv_c3(c2)
        heads = jnp.dot(p2c2.astype(jnp.bfloat16), wh_ref[...],
                        preferred_element_type=jnp.float32) + bh_ref[...]
        y = heads.reshape(H, Wp, CP)[:, :W, :].reshape(1, H * W, CP)
        o_ref[...] = y.astype(o_ref.dtype)

    return kernel


def conv2_heads(xp_flat, H, W, w2, b2, wh, bh):
    N, M, C2 = xp_flat.shape
    CP = wh.shape[-1]
    return pl.pallas_call(
        _make_conv2_heads_kernel(H, W),
        out_shape=jax.ShapeDtypeStruct((N, H * W, CP), jnp.float32),
        grid=(N,),
        in_specs=[
            pl.BlockSpec((1, M, C2), lambda n: (n, 0, 0)),
            pl.BlockSpec((9, C2, C2), lambda n: (0, 0, 0)),
            pl.BlockSpec((1, C2), lambda n: (0, 0)),
            pl.BlockSpec((C2, CP), lambda n: (0, 0)),
            pl.BlockSpec((1, CP), lambda n: (0, 0)),
        ],
        out_specs=pl.BlockSpec((1, H * W, CP), lambda n: (n, 0, 0)),
        compiler_params=pltpu.CompilerParams(dimension_semantics=("parallel",)),
    )(xp_flat, w2, b2, wh, bh)


# ---------------------------------------------------------------------------
# Deterministic parameters (conv + folded eval-mode BN), packed for the kernels.
# ---------------------------------------------------------------------------
def build_params(key, cin, nclass):
    cinter = cin // 4
    K = max(cinter // 8, 1)
    counter = [0]

    def nrm(shape, std=1.0):
        counter[0] += 1
        return std * jax.random.normal(jax.random.fold_in(key, counter[0]), shape, jnp.float32)

    def conv3x3_bn(ci, co):
        w = nrm((3, 3, ci, co), float(np.sqrt(2.0 / (9 * ci))))
        gamma = 1.0 + 0.05 * nrm((co,))
        beta = 0.05 * nrm((co,))
        mean = 0.05 * nrm((co,))
        var = 1.0 + 0.1 * jnp.abs(nrm((co,)))
        scale = gamma * lax.rsqrt(var + 1e-5)
        wf = (w * scale[None, None, None, :]).reshape(9, ci, co)
        bf = beta - mean * scale
        return wf, bf

    def conv1x1(ci, co):
        w = nrm((ci, co), float(np.sqrt(1.0 / ci)))
        bias = 0.01 * nrm((co,))
        return w, bias

    # conv_p1 / conv_c1 concatenated along Cout -> one matmul per tap.
    wp1, bp1 = conv3x3_bn(cin, cinter)
    wc1, bc1 = conv3x3_bn(cin, cinter)
    w1 = jnp.concatenate([wp1, wc1], axis=-1).astype(jnp.bfloat16)       # (9, cin, 2C)
    b1 = jnp.concatenate([bp1, bc1])[None].astype(jnp.float32)           # (1, 2C)

    # conv_p2 / conv_c2 as one block-diagonal weight -> one matmul per tap.
    wp2, bp2 = conv3x3_bn(cinter, cinter)
    wc2, bc2 = conv3x3_bn(cinter, cinter)
    z = jnp.zeros((9, cinter, cinter), jnp.float32)
    w2 = jnp.concatenate([jnp.concatenate([wp2, z], axis=-1),
                          jnp.concatenate([z, wc2], axis=-1)], axis=1).astype(jnp.bfloat16)
    b2 = jnp.concatenate([bp2, bc2])[None].astype(jnp.float32)           # (1, 2C)

    # PAM B/C/D 1x1 projections fused into one (C, 2K+C) weight.
    wb, bb = conv1x1(cinter, K)
    wc_, bc_ = conv1x1(cinter, K)
    wd, bd = conv1x1(cinter, cinter)
    wbcd = jnp.concatenate([wb, wc_, wd], axis=-1).astype(jnp.bfloat16)  # (C, 2K+C)
    bbcd = jnp.concatenate([bb, bc_, bd])[None].astype(jnp.float32)

    # PyTorch initializes alpha/beta to 0; use 0.1 so the attention branches
    # actually contribute in this test.  Passed via SMEM.
    alpha_beta = jnp.array([0.1, 0.1], jnp.float32)

    # Three 1x1 heads folded into one lane-dense (2C, 128) weight.
    wo, bo = conv1x1(cinter, nclass)
    wp3, bp3 = conv1x1(cinter, nclass)
    wc3, bc3 = conv1x1(cinter, nclass)
    cp = max(128, 128 * ((3 * nclass + 127) // 128))
    top = jnp.concatenate([wo, wp3, jnp.zeros((cinter, cp - 2 * nclass), jnp.float32)], axis=-1)
    bot = jnp.concatenate([wo, jnp.zeros((cinter, nclass), jnp.float32), wc3,
                           jnp.zeros((cinter, cp - 3 * nclass), jnp.float32)], axis=-1)
    wh = jnp.concatenate([top, bot], axis=0).astype(jnp.bfloat16)        # (2C, 128)
    bh = jnp.concatenate([bo, bp3, bc3,
                          jnp.zeros((cp - 3 * nclass,), jnp.float32)])[None].astype(jnp.float32)

    return {"w1": w1, "b1": b1, "w2": w2, "b2": b2,
            "wbcd": wbcd, "bbcd": bbcd, "alpha_beta": alpha_beta,
            "wh": wh, "bh": bh}


# ---------------------------------------------------------------------------
# _DAHead forward (NCHW boundary).  Three pallas_calls total.
# ---------------------------------------------------------------------------
def da_head_forward(x_nchw, params, nclass):
    N, Cin, H, W = x_nchw.shape
    C2 = params["w1"].shape[-1]                     # 2 * inter_channels
    x = jnp.transpose(x_nchw, (0, 2, 3, 1)).astype(jnp.bfloat16)

    # conv_p1 / conv_c1 (3x3 + folded BN + ReLU) -> one (N, HW, 2C) tensor
    y1 = conv1_dual(_pad_and_flatten(x), H, W, params["w1"], params["b1"])

    # fused position + channel attention per batch element
    y2 = pam_cam(y1, params["wbcd"], params["bbcd"], params["alpha_beta"])

    # conv_p2 / conv_c2 + the three 1x1 heads, fully fused (feat_p2/feat_c2 stay
    # in VMEM).  Dropout(0.1) before the heads is identity in eval mode.
    y2 = _pad_and_flatten(y2.reshape(N, H, W, C2))
    heads = conv2_heads(y2, H, W, params["w2"], params["b2"], params["wh"], params["bh"])

    def to_nchw(y):
        return jnp.transpose(y.reshape(N, H, W, nclass), (0, 3, 1, 2))

    fusion_out = to_nchw(heads[:, :, 0:nclass])
    p_out = to_nchw(heads[:, :, nclass:2 * nclass])
    c_out = to_nchw(heads[:, :, 2 * nclass:3 * nclass])
    return fusion_out, p_out, c_out


if __name__ == "__main__":
    N, Cin, H, W, nclass = 2, 128, 16, 16, 8
    key = jax.random.PRNGKey(0)
    params = build_params(jax.random.fold_in(key, 1), Cin, nclass)
    x = jax.random.normal(jax.random.fold_in(key, 0), (N, Cin, H, W), jnp.float32)

    fwd = jax.jit(da_head_forward, static_argnums=(2,))
    outs = fwd(x, params, nclass)
    outs = [jax.block_until_ready(o) for o in outs]

    assert outs[0].shape == (N, nclass, H, W), outs[0].shape
    assert outs[1].shape == (N, nclass, H, W), outs[1].shape
    assert outs[2].shape == (N, nclass, H, W), outs[2].shape
    assert all(bool(jnp.isfinite(o).all()) for o in outs)
    print("KERNEL_OK")
</pallas_src>

<mosaic_0001>
module attributes {stable_mosaic.version = 11 : i64} {
  func.func @kernel(%arg0: i32, %arg1: memref<1x342x128xbf16, #tpu.memory_space<vmem>>, %arg2: memref<9x128x64xbf16, #tpu.memory_space<vmem>>, %arg3: memref<1x64xf32, #tpu.memory_space<vmem>>, %arg4: memref<1x256x64xbf16, #tpu.memory_space<vmem>>) attributes {dimension_semantics = [#tpu.dimension_semantics<parallel>], iteration_bounds = array<i64: 2>, scalar_prefetch = 0 : i64, scratch_operands = 0 : i64, tpu.core_type = #tpu.core_type<tc>, window_params = [{transform_indices = @transform_0, window_bounds = array<i64: 1, 342, 128>}, {pipeline_mode = #tpu.pipeline_mode<synchronous>, transform_indices = @transform_1, window_bounds = array<i64: 9, 128, 64>}, {pipeline_mode = #tpu.pipeline_mode<synchronous>, transform_indices = @transform_2, window_bounds = array<i64: 1, 64>}, {transform_indices = @transform_3, window_bounds = array<i64: 1, 256, 64>}]} {
    %cst = arith.constant 0.000000e+00 : f32
    %0 = vector.broadcast %cst : f32 to vector<288x64xf32>
    %c0 = arith.constant 0 : index
    %c0_0 = arith.constant 0 : index
    %c0_1 = arith.constant 0 : index
    %1 = vector.load %arg1[%c0, %c0_0, %c0_1] : memref<1x342x128xbf16, #tpu.memory_space<vmem>>, vector<1x288x128xbf16>
    %2 = vector.shape_cast %1 : vector<1x288x128xbf16> to vector<288x128xbf16>
    %c0_2 = arith.constant 0 : index
    %c0_3 = arith.constant 0 : index
    %c0_4 = arith.constant 0 : index
    %3 = vector.load %arg2[%c0_2, %c0_3, %c0_4] : memref<9x128x64xbf16, #tpu.memory_space<vmem>>, vector<1x128x64xbf16>
    %4 = vector.shape_cast %3 : vector<1x128x64xbf16> to vector<128x64xbf16>
    %cst_5 = arith.constant dense<0.000000e+00> : vector<288x64xf32>
    %5 = tpu.matmul %2, %4, %cst_5 {dimension_numbers = #tpu.dot_dimension_numbers<[1], [0], [0], [1], [0, 0, 1, 1], [], []>} : vector<288x128xbf16>, vector<128x64xbf16>, vector<288x64xf32> -> vector<288x64xf32>
    %6 = arith.addf %0, %5 : vector<288x64xf32>
    %c0_6 = arith.constant 0 : index
    %c1 = arith.constant 1 : index
    %c0_7 = arith.constant 0 : index
    %7 = vector.load %arg1[%c0_6, %c1, %c0_7] : memref<1x342x128xbf16, #tpu.memory_space<vmem>>, vector<1x288x128xbf16>
    %8 = vector.shape_cast %7 : vector<1x288x128xbf16> to vector<288x128xbf16>
    %c1_8 = arith.constant 1 : index
    %c0_9 = arith.constant 0 : index
    %c0_10 = arith.constant 0 : index
    %9 = vector.load %arg2[%c1_8, %c0_9, %c0_10] : memref<9x128x64xbf16, #tpu.memory_space<vmem>>, vector<1x128x64xbf16>
    %10 = vector.shape_cast %9 : vector<1x128x64xbf16> to vector<128x64xbf16>
    %cst_11 = arith.constant dense<0.000000e+00> : vector<288x64xf32>
    %11 = tpu.matmul %8, %10, %cst_11 {dimension_numbers = #tpu.dot_dimension_numbers<[1], [0], [0], [1], [0, 0, 1, 1], [], []>} : vector<288x128xbf16>, vector<128x64xbf16>, vector<288x64xf32> -> vector<288x64xf32>
    %12 = arith.addf %6, %11 : vector<288x64xf32>
    %c0_12 = arith.constant 0 : index
    %c2 = arith.constant 2 : index
    %c0_13 = arith.constant 0 : index
    %13 = vector.load %arg1[%c0_12, %c2, %c0_13] : memref<1x342x128xbf16, #tpu.memory_space<vmem>>, vector<1x288x128xbf16>
    %14 = vector.shape_cast %13 : vector<1x288x128xbf16> to vector<288x128xbf16>
    %c2_14 = arith.constant 2 : index
    %c0_15 = arith.constant 0 : index
    %c0_16 = arith.constant 0 : index
    %15 = vector.load %arg2[%c2_14, %c0_15, %c0_16] : memref<9x128x64xbf16, #tpu.memory_space<vmem>>, vector<1x128x64xbf16>
    %16 = vector.shape_cast %15 : vector<1x128x64xbf16> to vector<128x64xbf16>
    %cst_17 = arith.constant dense<0.000000e+00> : vector<288x64xf32>
    %17 = tpu.matmul %14, %16, %cst_17 {dimension_numbers = #tpu.dot_dimension_numbers<[1], [0], [0], [1], [0, 0, 1, 1], [], []>} : vector<288x128xbf16>, vector<128x64xbf16>, vector<288x64xf32> -> vector<288x64xf32>
    %18 = arith.addf %12, %17 : vector<288x64xf32>
    %c0_18 = arith.constant 0 : index
    %c18 = arith.constant 18 : index
    %c0_19 = arith.constant 0 : index
    %19 = vector.load %arg1[%c0_18, %c18, %c0_19] : memref<1x342x128xbf16, #tpu.memory_space<vmem>>, vector<1x288x128xbf16>
    %20 = vector.shape_cast %19 : vector<1x288x128xbf16> to vector<288x128xbf16>
    %c3 = arith.constant 3 : index
    %c0_20 = arith.constant 0 : index
    %c0_21 = arith.constant 0 : index
    %21 = vector.load %arg2[%c3, %c0_20, %c0_21] : memref<9x128x64xbf16, #tpu.memory_space<vmem>>, vector<1x128x64xbf16>
    %22 = vector.shape_cast %21 : vector<1x128x64xbf16> to vector<128x64xbf16>
    %cst_22 = arith.constant dense<0.000000e+00> : vector<288x64xf32>
    %23 = tpu.matmul %20, %22, %cst_22 {dimension_numbers = #tpu.dot_dimension_numbers<[1], [0], [0], [1], [0, 0, 1, 1], [], []>} : vector<288x128xbf16>, vector<128x64xbf16>, vector<288x64xf32> -> vector<288x64xf32>
    %24 = arith.addf %18, %23 : vector<288x64xf32>
    %c0_23 = arith.constant 0 : index
    %c19 = arith.constant 19 : index
    %c0_24 = arith.constant 0 : index
    %25 = vector.load %arg1[%c0_23, %c19, %c0_24] : memref<1x342x128xbf16, #tpu.memory_space<vmem>>, vector<1x288x128xbf16>
    %26 = vector.shape_cast %25 : vector<1x288x128xbf16> to vector<288x128xbf16>
    %c4 = arith.constant 4 : index
    %c0_25 = arith.constant 0 : index
    %c0_26 = arith.constant 0 : index
    %27 = vector.load %arg2[%c4, %c0_25, %c0_26] : memref<9x128x64xbf16, #tpu.memory_space<vmem>>, vector<1x128x64xbf16>
    %28 = vector.shape_cast %27 : vector<1x128x64xbf16> to vector<128x64xbf16>
    %cst_27 = arith.constant dense<0.000000e+00> : vector<288x64xf32>
    %29 = tpu.matmul %26, %28, %cst_27 {dimension_numbers = #tpu.dot_dimension_numbers<[1], [0], [0], [1], [0, 0, 1, 1], [], []>} : vector<288x128xbf16>, vector<128x64xbf16>, vector<288x64xf32> -> vector<288x64xf32>
    %30 = arith.addf %24, %29 : vector<288x64xf32>
    %c0_28 = arith.constant 0 : index
    %c20 = arith.constant 20 : index
    %c0_29 = arith.constant 0 : index
    %31 = vector.load %arg1[%c0_28, %c20, %c0_29] : memref<1x342x128xbf16, #tpu.memory_space<vmem>>, vector<1x288x128xbf16>
    %32 = vector.shape_cast %31 : vector<1x288x128xbf16> to vector<288x128xbf16>
    %c5 = arith.constant 5 : index
    %c0_30 = arith.constant 0 : index
    %c0_31 = arith.constant 0 : index
    %33 = vector.load %arg2[%c5, %c0_30, %c0_31] : memref<9x128x64xbf16, #tpu.memory_space<vmem>>, vector<1x128x64xbf16>
    %34 = vector.shape_cast %33 : vector<1x128x64xbf16> to vector<128x64xbf16>
    %cst_32 = arith.constant dense<0.000000e+00> : vector<288x64xf32>
    %35 = tpu.matmul %32, %34, %cst_32 {dimension_numbers = #tpu.dot_dimension_numbers<[1], [0], [0], [1], [0, 0, 1, 1], [], []>} : vector<288x128xbf16>, vector<128x64xbf16>, vector<288x64xf32> -> vector<288x64xf32>
    %36 = arith.addf %30, %35 : vector<288x64xf32>
    %c0_33 = arith.constant 0 : index
    %c36 = arith.constant 36 : index
    %c0_34 = arith.constant 0 : index
    %37 = vector.load %arg1[%c0_33, %c36, %c0_34] : memref<1x342x128xbf16, #tpu.memory_space<vmem>>, vector<1x288x128xbf16>
    %38 = vector.shape_cast %37 : vector<1x288x128xbf16> to vector<288x128xbf16>
    %c6 = arith.constant 6 : index
    %c0_35 = arith.constant 0 : index
    %c0_36 = arith.constant 0 : index
    %39 = vector.load %arg2[%c6, %c0_35, %c0_36] : memref<9x128x64xbf16, #tpu.memory_space<vmem>>, vector<1x128x64xbf16>
    %40 = vector.shape_cast %39 : vector<1x128x64xbf16> to vector<128x64xbf16>
    %cst_37 = arith.constant dense<0.000000e+00> : vector<288x64xf32>
    %41 = tpu.matmul %38, %40, %cst_37 {dimension_numbers = #tpu.dot_dimension_numbers<[1], [0], [0], [1], [0, 0, 1, 1], [], []>} : vector<288x128xbf16>, vector<128x64xbf16>, vector<288x64xf32> -> vector<288x64xf32>
    %42 = arith.addf %36, %41 : vector<288x64xf32>
    %c0_38 = arith.constant 0 : index
    %c37 = arith.constant 37 : index
    %c0_39 = arith.constant 0 : index
    %43 = vector.load %arg1[%c0_38, %c37, %c0_39] : memref<1x342x128xbf16, #tpu.memory_space<vmem>>, vector<1x288x128xbf16>
    %44 = vector.shape_cast %43 : vector<1x288x128xbf16> to vector<288x128xbf16>
    %c7 = arith.constant 7 : index
    %c0_40 = arith.constant 0 : index
    %c0_41 = arith.constant 0 : index
    %45 = vector.load %arg2[%c7, %c0_40, %c0_41] : memref<9x128x64xbf16, #tpu.memory_space<vmem>>, vector<1x128x64xbf16>
    %46 = vector.shape_cast %45 : vector<1x128x64xbf16> to vector<128x64xbf16>
    %cst_42 = arith.constant dense<0.000000e+00> : vector<288x64xf32>
    %47 = tpu.matmul %44, %46, %cst_42 {dimension_numbers = #tpu.dot_dimension_numbers<[1], [0], [0], [1], [0, 0, 1, 1], [], []>} : vector<288x128xbf16>, vector<128x64xbf16>, vector<288x64xf32> -> vector<288x64xf32>
    %48 = arith.addf %42, %47 : vector<288x64xf32>
    %c0_43 = arith.constant 0 : index
    %c38 = arith.constant 38 : index
    %c0_44 = arith.constant 0 : index
    %49 = vector.load %arg1[%c0_43, %c38, %c0_44] : memref<1x342x128xbf16, #tpu.memory_space<vmem>>, vector<1x288x128xbf16>
    %50 = vector.shape_cast %49 : vector<1x288x128xbf16> to vector<288x128xbf16>
    %c8 = arith.constant 8 : index
    %c0_45 = arith.constant 0 : index
    %c0_46 = arith.constant 0 : index
    %51 = vector.load %arg2[%c8, %c0_45, %c0_46] : memref<9x128x64xbf16, #tpu.memory_space<vmem>>, vector<1x128x64xbf16>
    %52 = vector.shape_cast %51 : vector<1x128x64xbf16> to vector<128x64xbf16>
    %cst_47 = arith.constant dense<0.000000e+00> : vector<288x64xf32>
    %53 = tpu.matmul %50, %52, %cst_47 {dimension_numbers = #tpu.dot_dimension_numbers<[1], [0], [0], [1], [0, 0, 1, 1], [], []>} : vector<288x128xbf16>, vector<128x64xbf16>, vector<288x64xf32> -> vector<288x64xf32>
    %54 = arith.addf %48, %53 : vector<288x64xf32>
    %c0_48 = arith.constant 0 : index
    %c0_49 = arith.constant 0 : index
    %55 = vector.load %arg3[%c0_48, %c0_49] : memref<1x64xf32, #tpu.memory_space<vmem>>, vector<1x64xf32>
    %56 = vector.broadcast %55 : vector<1x64xf32> to vector<288x64xf32>
    %57 = arith.addf %54, %56 : vector<288x64xf32>
    %cst_50 = arith.constant 0.000000e+00 : f32
    %58 = vector.broadcast %cst_50 : f32 to vector<288x64xf32>
    %59 = arith.maximumf %57, %58 : vector<288x64xf32>
    %60 = vector.shape_cast %59 : vector<288x64xf32> to vector<16x18x64xf32>
    %61 = vector.extract_strided_slice %60 {offsets = [0, 0, 0], sizes = [16, 16, 64], strides = [1, 1, 1]} : vector<16x18x64xf32> to vector<16x16x64xf32>
    %62 = vector.shape_cast %61 : vector<16x16x64xf32> to vector<1x256x64xf32>
    %63 = arith.truncf %62 : vector<1x256x64xf32> to vector<1x256x64xbf16>
    %c0_51 = arith.constant 0 : index
    %c0_52 = arith.constant 0 : index
    %c0_53 = arith.constant 0 : index
    %64 = vector.load %arg4[%c0_51, %c0_52, %c0_53] : memref<1x256x64xbf16, #tpu.memory_space<vmem>>, vector<1x256x64xbf16>
    tpu.vector_store %arg4[%c0_51, %c0_52, %c0_53], %63 {strides = array<i32>} : memref<1x256x64xbf16, #tpu.memory_space<vmem>>, vector<1x256x64xbf16>,
    return
  }
  func.func @transform_0(%arg0: i32) -> (i32, i32, i32) {
    %c0_i32 = arith.constant 0 : i32
    %c0_i32_0 = arith.constant 0 : i32
    %c0_i32_1 = arith.constant 0 : i32
    return %arg0, %c0_i32, %c0_i32_0 : i32, i32, i32
  }
  func.func @transform_1(%arg0: i32) -> (i32, i32, i32) {
    %c0_i32 = arith.constant 0 : i32
    %c0_i32_0 = arith.constant 0 : i32
    %c0_i32_1 = arith.constant 0 : i32
    %c0_i32_2 = arith.constant 0 : i32
    return %c0_i32, %c0_i32_0, %c0_i32_1 : i32, i32, i32
  }
  func.func @transform_2(%arg0: i32) -> (i32, i32) {
    %c0_i32 = arith.constant 0 : i32
    %c0_i32_0 = arith.constant 0 : i32
    %c0_i32_1 = arith.constant 0 : i32
    return %c0_i32, %c0_i32_0 : i32, i32
  }
  func.func @transform_3(%arg0: i32) -> (i32, i32, i32) {
    %c0_i32 = arith.constant 0 : i32
    %c0_i32_0 = arith.constant 0 : i32
    %c0_i32_1 = arith.constant 0 : i32
    return %arg0, %c0_i32, %c0_i32_0 : i32, i32, i32
  }
}

module attributes {stable_mosaic.version = 11 : i64} {
  func.func @_pam_cam_kernel(%arg0: i32, %arg1: memref<2xf32, #tpu.memory_space<smem>>, %arg2: memref<1x256x64xbf16, #tpu.memory_space<vmem>>, %arg3: memref<32x40xbf16, #tpu.memory_space<vmem>>, %arg4: memref<1x40xf32, #tpu.memory_space<vmem>>, %arg5: memref<1x256x64xbf16, #tpu.memory_space<vmem>>) attributes {dimension_semantics = [#tpu.dimension_semantics<parallel>], iteration_bounds = array<i64: 2>, scalar_prefetch = 0 : i64, scratch_operands = 0 : i64, tpu.core_type = #tpu.core_type<tc>, window_params = [{transform_indices = @transform_0, window_bounds = array<i64: 2>}, {transform_indices = @transform_1, window_bounds = array<i64: 1, 256, 64>}, {pipeline_mode = #tpu.pipeline_mode<synchronous>, transform_indices = @transform_2, window_bounds = array<i64: 32, 40>}, {pipeline_mode = #tpu.pipeline_mode<synchronous>, transform_indices = @transform_3, window_bounds = array<i64: 1, 40>}, {transform_indices = @transform_4, window_bounds = array<i64: 1, 256, 64>}]} {
    %c0 = arith.constant 0 : index
    %c0_0 = arith.constant 0 : index
    %c0_1 = arith.constant 0 : index
    %0 = vector.load %arg2[%c0, %c0_0, %c0_1] : memref<1x256x64xbf16, #tpu.memory_space<vmem>>, vector<1x256x64xbf16>
    %1 = vector.shape_cast %0 : vector<1x256x64xbf16> to vector<256x64xbf16>
    %2 = vector.extract_strided_slice %1 {offsets = [0, 0], sizes = [256, 32], strides = [1, 1]} : vector<256x64xbf16> to vector<256x32xbf16>
    %3 = vector.extract_strided_slice %1 {offsets = [0, 32], sizes = [256, 32], strides = [1, 1]} : vector<256x64xbf16> to vector<256x32xbf16>
    %c0_2 = arith.constant 0 : index
    %c0_3 = arith.constant 0 : index
    %4 = vector.load %arg3[%c0_2, %c0_3] : memref<32x40xbf16, #tpu.memory_space<vmem>>, vector<32x40xbf16>
    %cst = arith.constant dense<0.000000e+00> : vector<256x40xf32>
    %5 = tpu.matmul %2, %4, %cst {dimension_numbers = #tpu.dot_dimension_numbers<[1], [0], [0], [1], [0, 0, 1, 1], [], []>} : vector<256x32xbf16>, vector<32x40xbf16>, vector<256x40xf32> -> vector<256x40xf32>
    %c0_4 = arith.constant 0 : index
    %c0_5 = arith.constant 0 : index
    %6 = vector.load %arg4[%c0_4, %c0_5] : memref<1x40xf32, #tpu.memory_space<vmem>>, vector<1x40xf32>
    %7 = vector.broadcast %6 : vector<1x40xf32> to vector<256x40xf32>
    %8 = arith.addf %5, %7 : vector<256x40xf32>
    %9 = vector.extract_strided_slice %8 {offsets = [0, 0], sizes = [256, 4], strides = [1, 1]} : vector<256x40xf32> to vector<256x4xf32>
    %10 = vector.extract_strided_slice %8 {offsets = [0, 4], sizes = [256, 4], strides = [1, 1]} : vector<256x40xf32> to vector<256x4xf32>
    %11 = vector.extract_strided_slice %8 {offsets = [0, 8], sizes = [256, 32], strides = [1, 1]} : vector<256x40xf32> to vector<256x32xf32>
    %12 = arith.truncf %9 : vector<256x4xf32> to vector<256x4xbf16>
    %13 = arith.truncf %10 : vector<256x4xf32> to vector<256x4xbf16>
    %cst_6 = arith.constant dense<0.000000e+00> : vector<256x256xf32>
    %14 = tpu.matmul %12, %13, %cst_6 {dimension_numbers = #tpu.dot_dimension_numbers<[1], [1], [0], [0], [0, 0, 1, 0], [], []>} : vector<256x4xbf16>, vector<256x4xbf16>, vector<256x256xf32> -> vector<256x256xf32>
    %cst_7 = arith.constant dense<0xFF800000> : vector<256xf32>
    %15 = vector.multi_reduction <maximumf>, %14, %cst_7 [1] : vector<256x256xf32> to vector<256xf32>
    %16 = vector.shape_cast %15 : vector<256xf32> to vector<256x1xf32>
    %17 = vector.broadcast %16 : vector<256x1xf32> to vector<256x256xf32>
    %18 = arith.subf %14, %17 : vector<256x256xf32>
    %19 = math.exp %18 : vector<256x256xf32>
    %cst_8 = arith.constant dense<0.000000e+00> : vector<256xf32>
    %20 = vector.multi_reduction <add>, %19, %cst_8 [1] : vector<256x256xf32> to vector<256xf32>
    %21 = vector.shape_cast %20 : vector<256xf32> to vector<256x1xf32>
    %22 = tpu.reciprocal %21 {approx = true} : vector<256x1xf32> -> vector<256x1xf32>
    %23 = vector.broadcast %22 : vector<256x1xf32> to vector<256x256xf32>
    %24 = arith.mulf %19, %23 : vector<256x256xf32>
    %25 = arith.truncf %24 : vector<256x256xf32> to vector<256x256xbf16>
    %26 = arith.truncf %11 : vector<256x32xf32> to vector<256x32xbf16>
    %cst_9 = arith.constant dense<0.000000e+00> : vector<256x32xf32>
    %27 = tpu.matmul %25, %26, %cst_9 {dimension_numbers = #tpu.dot_dimension_numbers<[1], [0], [0], [1], [0, 0, 1, 1], [], []>} : vector<256x256xbf16>, vector<256x32xbf16>, vector<256x32xf32> -> vector<256x32xf32>
    %c0_10 = arith.constant 0 : index
    %28 = memref.load %arg1[%c0_10] : memref<2xf32, #tpu.memory_space<smem>>
    %29 = vector.broadcast %28 : f32 to vector<256x32xf32>
    %30 = arith.mulf %29, %27 : vector<256x32xf32>
    %31 = arith.extf %2 : vector<256x32xbf16> to vector<256x32xf32>
    %32 = arith.addf %30, %31 : vector<256x32xf32>
    %cst_11 = arith.constant dense<0.000000e+00> : vector<32x32xf32>
    %33 = tpu.matmul %3, %3, %cst_11 {dimension_numbers = #tpu.dot_dimension_numbers<[0], [0], [1], [1], [0, 1, 1, 1], [], []>} : vector<256x32xbf16>, vector<256x32xbf16>, vector<32x32xf32> -> vector<32x32xf32>
    %cst_12 = arith.constant dense<0xFF800000> : vector<32xf32>
    %34 = vector.multi_reduction <maximumf>, %33, %cst_12 [1] : vector<32x32xf32> to vector<32xf32>
    %35 = vector.shape_cast %34 : vector<32xf32> to vector<32x1xf32>
    %36 = vector.broadcast %35 : vector<32x1xf32> to vector<32x32xf32>
    %37 = arith.subf %36, %33 : vector<32x32xf32>
    %cst_13 = arith.constant dense<0xFF800000> : vector<32xf32>
    %38 = vector.multi_reduction <maximumf>, %37, %cst_13 [1] : vector<32x32xf32> to vector<32xf32>
    %39 = vector.shape_cast %38 : vector<32xf32> to vector<32x1xf32>
    %40 = vector.broadcast %39 : vector<32x1xf32> to vector<32x32xf32>
    %41 = arith.subf %37, %40 : vector<32x32xf32>
    %42 = math.exp %41 : vector<32x32xf32>
    %cst_14 = arith.constant dense<0.000000e+00> : vector<32xf32>
    %43 = vector.multi_reduction <add>, %42, %cst_14 [1] : vector<32x32xf32> to vector<32xf32>
    %44 = vector.shape_cast %43 : vector<32xf32> to vector<32x1xf32>
    %45 = tpu.reciprocal %44 {approx = true} : vector<32x1xf32> -> vector<32x1xf32>
    %46 = vector.broadcast %45 : vector<32x1xf32> to vector<32x32xf32>
    %47 = arith.mulf %42, %46 : vector<32x32xf32>
    %48 = arith.truncf %47 : vector<32x32xf32> to vector<32x32xbf16>
    %cst_15 = arith.constant dense<0.000000e+00> : vector<256x32xf32>
    %49 = tpu.matmul %3, %48, %cst_15 {dimension_numbers = #tpu.dot_dimension_numbers<[1], [1], [0], [0], [0, 0, 1, 0], [], []>} : vector<256x32xbf16>, vector<32x32xbf16>, vector<256x32xf32> -> vector<256x32xf32>
    %c1 = arith.constant 1 : index
    %50 = memref.load %arg1[%c1] : memref<2xf32, #tpu.memory_space<smem>>
    %51 = vector.broadcast %50 : f32 to vector<256x32xf32>
    %52 = arith.mulf %51, %49 : vector<256x32xf32>
    %53 = arith.extf %3 : vector<256x32xbf16> to vector<256x32xf32>
    %54 = arith.addf %52, %53 : vector<256x32xf32>
    %55 = tpu.concatenate %32, %54 in 1 : vector<256x32xf32>, vector<256x32xf32> -> vector<256x64xf32>
    %56 = vector.shape_cast %55 : vector<256x64xf32> to vector<1x256x64xf32>
    %57 = arith.truncf %56 : vector<1x256x64xf32> to vector<1x256x64xbf16>
    %c0_16 = arith.constant 0 : index
    %c0_17 = arith.constant 0 : index
    %c0_18 = arith.constant 0 : index
    %58 = vector.load %arg5[%c0_16, %c0_17, %c0_18] : memref<1x256x64xbf16, #tpu.memory_space<vmem>>, vector<1x256x64xbf16>
    tpu.vector_store %arg5[%c0_16, %c0_17, %c0_18], %57 {strides = array<i32>} : memref<1x256x64xbf16, #tpu.memory_space<vmem>>, vector<1x256x64xbf16>,
    return
  }
  func.func @transform_0(%arg0: i32) -> i32 {
    %c0_i32 = arith.constant 0 : i32
    %c0_i32_0 = arith.constant 0 : i32
    return %c0_i32 : i32
  }
  func.func @transform_1(%arg0: i32) -> (i32, i32, i32) {
    %c0_i32 = arith.constant 0 : i32
    %c0_i32_0 = arith.constant 0 : i32
    %c0_i32_1 = arith.constant 0 : i32
    return %arg0, %c0_i32, %c0_i32_0 : i32, i32, i32
  }
  func.func @transform_2(%arg0: i32) -> (i32, i32) {
    %c0_i32 = arith.constant 0 : i32
    %c0_i32_0 = arith.constant 0 : i32
    %c0_i32_1 = arith.constant 0 : i32
    return %c0_i32, %c0_i32_0 : i32, i32
  }
  func.func @transform_3(%arg0: i32) -> (i32, i32) {
    %c0_i32 = arith.constant 0 : i32
    %c0_i32_0 = arith.constant 0 : i32
    %c0_i32_1 = arith.constant 0 : i32
    return %c0_i32, %c0_i32_0 : i32, i32
  }
  func.func @transform_4(%arg0: i32) -> (i32, i32, i32) {
    %c0_i32 = arith.constant 0 : i32
    %c0_i32_0 = arith.constant 0 : i32
    %c0_i32_1 = arith.constant 0 : i32
    return %arg0, %c0_i32, %c0_i32_0 : i32, i32, i32
  }
}

module attributes {stable_mosaic.version = 11 : i64} {
  func.func @kernel(%arg0: i32, %arg1: memref<1x342x64xbf16, #tpu.memory_space<vmem>>, %arg2: memref<9x64x64xbf16, #tpu.memory_space<vmem>>, %arg3: memref<1x64xf32, #tpu.memory_space<vmem>>, %arg4: memref<64x128xbf16, #tpu.memory_space<vmem>>, %arg5: memref<1x128xf32, #tpu.memory_space<vmem>>, %arg6: memref<1x256x128xf32, #tpu.memory_space<vmem>>) attributes {dimension_semantics = [#tpu.dimension_semantics<parallel>], iteration_bounds = array<i64: 2>, scalar_prefetch = 0 : i64, scratch_operands = 0 : i64, tpu.core_type = #tpu.core_type<tc>, window_params = [{transform_indices = @transform_0, window_bounds = array<i64: 1, 342, 64>}, {pipeline_mode = #tpu.pipeline_mode<synchronous>, transform_indices = @transform_1, window_bounds = array<i64: 9, 64, 64>}, {pipeline_mode = #tpu.pipeline_mode<synchronous>, transform_indices = @transform_2, window_bounds = array<i64: 1, 64>}, {pipeline_mode = #tpu.pipeline_mode<synchronous>, transform_indices = @transform_3, window_bounds = array<i64: 64, 128>}, {pipeline_mode = #tpu.pipeline_mode<synchronous>, transform_indices = @transform_4, window_bounds = array<i64: 1, 128>}, {transform_indices = @transform_5, window_bounds = array<i64: 1, 256, 128>}]} {
    %cst = arith.constant 0.000000e+00 : f32
    %0 = vector.broadcast %cst : f32 to vector<288x64xf32>
    %c0 = arith.constant 0 : index
    %c0_0 = arith.constant 0 : index
    %c0_1 = arith.constant 0 : index
    %1 = vector.load %arg1[%c0, %c0_0, %c0_1] : memref<1x342x64xbf16, #tpu.memory_space<vmem>>, vector<1x288x64xbf16>
    %2 = vector.shape_cast %1 : vector<1x288x64xbf16> to vector<288x64xbf16>
    %c0_2 = arith.constant 0 : index
    %c0_3 = arith.constant 0 : index
    %c0_4 = arith.constant 0 : index
    %3 = vector.load %arg2[%c0_2, %c0_3, %c0_4] : memref<9x64x64xbf16, #tpu.memory_space<vmem>>, vector<1x64x64xbf16>
    %4 = vector.shape_cast %3 : vector<1x64x64xbf16> to vector<64x64xbf16>
    %cst_5 = arith.constant dense<0.000000e+00> : vector<288x64xf32>
    %5 = tpu.matmul %2, %4, %cst_5 {dimension_numbers = #tpu.dot_dimension_numbers<[1], [0], [0], [1], [0, 0, 1, 1], [], []>} : vector<288x64xbf16>, vector<64x64xbf16>, vector<288x64xf32> -> vector<288x64xf32>
    %6 = arith.addf %0, %5 : vector<288x64xf32>
    %c0_6 = arith.constant 0 : index
    %c1 = arith.constant 1 : index
    %c0_7 = arith.constant 0 : index
    %7 = vector.load %arg1[%c0_6, %c1, %c0_7] : memref<1x342x64xbf16, #tpu.memory_space<vmem>>, vector<1x288x64xbf16>
    %8 = vector.shape_cast %7 : vector<1x288x64xbf16> to vector<288x64xbf16>
    %c1_8 = arith.constant 1 : index
    %c0_9 = arith.constant 0 : index
    %c0_10 = arith.constant 0 : index
    %9 = vector.load %arg2[%c1_8, %c0_9, %c0_10] : memref<9x64x64xbf16, #tpu.memory_space<vmem>>, vector<1x64x64xbf16>
    %10 = vector.shape_cast %9 : vector<1x64x64xbf16> to vector<64x64xbf16>
    %cst_11 = arith.constant dense<0.000000e+00> : vector<288x64xf32>
    %11 = tpu.matmul %8, %10, %cst_11 {dimension_numbers = #tpu.dot_dimension_numbers<[1], [0], [0], [1], [0, 0, 1, 1], [], []>} : vector<288x64xbf16>, vector<64x64xbf16>, vector<288x64xf32> -> vector<288x64xf32>
    %12 = arith.addf %6, %11 : vector<288x64xf32>
    %c0_12 = arith.constant 0 : index
    %c2 = arith.constant 2 : index
    %c0_13 = arith.constant 0 : index
    %13 = vector.load %arg1[%c0_12, %c2, %c0_13] : memref<1x342x64xbf16, #tpu.memory_space<vmem>>, vector<1x288x64xbf16>
    %14 = vector.shape_cast %13 : vector<1x288x64xbf16> to vector<288x64xbf16>
    %c2_14 = arith.constant 2 : index
    %c0_15 = arith.constant 0 : index
    %c0_16 = arith.constant 0 : index
    %15 = vector.load %arg2[%c2_14, %c0_15, %c0_16] : memref<9x64x64xbf16, #tpu.memory_space<vmem>>, vector<1x64x64xbf16>
    %16 = vector.shape_cast %15 : vector<1x64x64xbf16> to vector<64x64xbf16>
    %cst_17 = arith.constant dense<0.000000e+00> : vector<288x64xf32>
    %17 = tpu.matmul %14, %16, %cst_17 {dimension_numbers = #tpu.dot_dimension_numbers<[1], [0], [0], [1], [0, 0, 1, 1], [], []>} : vector<288x64xbf16>, vector<64x64xbf16>, vector<288x64xf32> -> vector<288x64xf32>
    %18 = arith.addf %12, %17 : vector<288x64xf32>
    %c0_18 = arith.constant 0 : index
    %c18 = arith.constant 18 : index
    %c0_19 = arith.constant 0 : index
    %19 = vector.load %arg1[%c0_18, %c18, %c0_19] : memref<1x342x64xbf16, #tpu.memory_space<vmem>>, vector<1x288x64xbf16>
    %20 = vector.shape_cast %19 : vector<1x288x64xbf16> to vector<288x64xbf16>
    %c3 = arith.constant 3 : index
    %c0_20 = arith.constant 0 : index
    %c0_21 = arith.constant 0 : index
    %21 = vector.load %arg2[%c3, %c0_20, %c0_21] : memref<9x64x64xbf16, #tpu.memory_space<vmem>>, vector<1x64x64xbf16>
    %22 = vector.shape_cast %21 : vector<1x64x64xbf16> to vector<64x64xbf16>
    %cst_22 = arith.constant dense<0.000000e+00> : vector<288x64xf32>
    %23 = tpu.matmul %20, %22, %cst_22 {dimension_numbers = #tpu.dot_dimension_numbers<[1], [0], [0], [1], [0, 0, 1, 1], [], []>} : vector<288x64xbf16>, vector<64x64xbf16>, vector<288x64xf32> -> vector<288x64xf32>
    %24 = arith.addf %18, %23 : vector<288x64xf32>
    %c0_23 = arith.constant 0 : index
    %c19 = arith.constant 19 : index
    %c0_24 = arith.constant 0 : index
    %25 = vector.load %arg1[%c0_23, %c19, %c0_24] : memref<1x342x64xbf16, #tpu.memory_space<vmem>>, vector<1x288x64xbf16>
    %26 = vector.shape_cast %25 : vector<1x288x64xbf16> to vector<288x64xbf16>
    %c4 = arith.constant 4 : index
    %c0_25 = arith.constant 0 : index
    %c0_26 = arith.constant 0 : index
    %27 = vector.load %arg2[%c4, %c0_25, %c0_26] : memref<9x64x64xbf16, #tpu.memory_space<vmem>>, vector<1x64x64xbf16>
    %28 = vector.shape_cast %27 : vector<1x64x64xbf16> to vector<64x64xbf16>
    %cst_27 = arith.constant dense<0.000000e+00> : vector<288x64xf32>
    %29 = tpu.matmul %26, %28, %cst_27 {dimension_numbers = #tpu.dot_dimension_numbers<[1], [0], [0], [1], [0, 0, 1, 1], [], []>} : vector<288x64xbf16>, vector<64x64xbf16>, vector<288x64xf32> -> vector<288x64xf32>
    %30 = arith.addf %24, %29 : vector<288x64xf32>
    %c0_28 = arith.constant 0 : index
    %c20 = arith.constant 20 : index
    %c0_29 = arith.constant 0 : index
    %31 = vector.load %arg1[%c0_28, %c20, %c0_29] : memref<1x342x64xbf16, #tpu.memory_space<vmem>>, vector<1x288x64xbf16>
    %32 = vector.shape_cast %31 : vector<1x288x64xbf16> to vector<288x64xbf16>
    %c5 = arith.constant 5 : index
    %c0_30 = arith.constant 0 : index
    %c0_31 = arith.constant 0 : index
    %33 = vector.load %arg2[%c5, %c0_30, %c0_31] : memref<9x64x64xbf16, #tpu.memory_space<vmem>>, vector<1x64x64xbf16>
    %34 = vector.shape_cast %33 : vector<1x64x64xbf16> to vector<64x64xbf16>
    %cst_32 = arith.constant dense<0.000000e+00> : vector<288x64xf32>
    %35 = tpu.matmul %32, %34, %cst_32 {dimension_numbers = #tpu.dot_dimension_numbers<[1], [0], [0], [1], [0, 0, 1, 1], [], []>} : vector<288x64xbf16>, vector<64x64xbf16>, vector<288x64xf32> -> vector<288x64xf32>
    %36 = arith.addf %30, %35 : vector<288x64xf32>
    %c0_33 = arith.constant 0 : index
    %c36 = arith.constant 36 : index
    %c0_34 = arith.constant 0 : index
    %37 = vector.load %arg1[%c0_33, %c36, %c0_34] : memref<1x342x64xbf16, #tpu.memory_space<vmem>>, vector<1x288x64xbf16>
    %38 = vector.shape_cast %37 : vector<1x288x64xbf16> to vector<288x64xbf16>
    %c6 = arith.constant 6 : index
    %c0_35 = arith.constant 0 : index
    %c0_36 = arith.constant 0 : index
    %39 = vector.load %arg2[%c6, %c0_35, %c0_36] : memref<9x64x64xbf16, #tpu.memory_space<vmem>>, vector<1x64x64xbf16>
    %40 = vector.shape_cast %39 : vector<1x64x64xbf16> to vector<64x64xbf16>
    %cst_37 = arith.constant dense<0.000000e+00> : vector<288x64xf32>
    %41 = tpu.matmul %38, %40, %cst_37 {dimension_numbers = #tpu.dot_dimension_numbers<[1], [0], [0], [1], [0, 0, 1, 1], [], []>} : vector<288x64xbf16>, vector<64x64xbf16>, vector<288x64xf32> -> vector<288x64xf32>
    %42 = arith.addf %36, %41 : vector<288x64xf32>
    %c0_38 = arith.constant 0 : index
    %c37 = arith.constant 37 : index
    %c0_39 = arith.constant 0 : index
    %43 = vector.load %arg1[%c0_38, %c37, %c0_39] : memref<1x342x64xbf16, #tpu.memory_space<vmem>>, vector<1x288x64xbf16>
    %44 = vector.shape_cast %43 : vector<1x288x64xbf16> to vector<288x64xbf16>
    %c7 = arith.constant 7 : index
    %c0_40 = arith.constant 0 : index
    %c0_41 = arith.constant 0 : index
    %45 = vector.load %arg2[%c7, %c0_40, %c0_41] : memref<9x64x64xbf16, #tpu.memory_space<vmem>>, vector<1x64x64xbf16>
    %46 = vector.shape_cast %45 : vector<1x64x64xbf16> to vector<64x64xbf16>
    %cst_42 = arith.constant dense<0.000000e+00> : vector<288x64xf32>
    %47 = tpu.matmul %44, %46, %cst_42 {dimension_numbers = #tpu.dot_dimension_numbers<[1], [0], [0], [1], [0, 0, 1, 1], [], []>} : vector<288x64xbf16>, vector<64x64xbf16>, vector<288x64xf32> -> vector<288x64xf32>
    %48 = arith.addf %42, %47 : vector<288x64xf32>
    %c0_43 = arith.constant 0 : index
    %c38 = arith.constant 38 : index
    %c0_44 = arith.constant 0 : index
    %49 = vector.load %arg1[%c0_43, %c38, %c0_44] : memref<1x342x64xbf16, #tpu.memory_space<vmem>>, vector<1x288x64xbf16>
    %50 = vector.shape_cast %49 : vector<1x288x64xbf16> to vector<288x64xbf16>
    %c8 = arith.constant 8 : index
    %c0_45 = arith.constant 0 : index
    %c0_46 = arith.constant 0 : index
    %51 = vector.load %arg2[%c8, %c0_45, %c0_46] : memref<9x64x64xbf16, #tpu.memory_space<vmem>>, vector<1x64x64xbf16>
    %52 = vector.shape_cast %51 : vector<1x64x64xbf16> to vector<64x64xbf16>
    %cst_47 = arith.constant dense<0.000000e+00> : vector<288x64xf32>
    %53 = tpu.matmul %50, %52, %cst_47 {dimension_numbers = #tpu.dot_dimension_numbers<[1], [0], [0], [1], [0, 0, 1, 1], [], []>} : vector<288x64xbf16>, vector<64x64xbf16>, vector<288x64xf32> -> vector<288x64xf32>
    %54 = arith.addf %48, %53 : vector<288x64xf32>
    %c0_48 = arith.constant 0 : index
    %c0_49 = arith.constant 0 : index
    %55 = vector.load %arg3[%c0_48, %c0_49] : memref<1x64xf32, #tpu.memory_space<vmem>>, vector<1x64xf32>
    %56 = vector.broadcast %55 : vector<1x64xf32> to vector<288x64xf32>
    %57 = arith.addf %54, %56 : vector<288x64xf32>
    %cst_50 = arith.constant 0.000000e+00 : f32
    %58 = vector.broadcast %cst_50 : f32 to vector<288x64xf32>
    %59 = arith.maximumf %57, %58 : vector<288x64xf32>
    %60 = arith.truncf %59 : vector<288x64xf32> to vector<288x64xbf16>
    %c0_51 = arith.constant 0 : index
    %c0_52 = arith.constant 0 : index
    %61 = vector.load %arg4[%c0_51, %c0_52] : memref<64x128xbf16, #tpu.memory_space<vmem>>, vector<64x128xbf16>
    %cst_53 = arith.constant dense<0.000000e+00> : vector<288x128xf32>
    %62 = tpu.matmul %60, %61, %cst_53 {dimension_numbers = #tpu.dot_dimension_numbers<[1], [0], [0], [1], [0, 0, 1, 1], [], []>} : vector<288x64xbf16>, vector<64x128xbf16>, vector<288x128xf32> -> vector<288x128xf32>
    %c0_54 = arith.constant 0 : index
    %c0_55 = arith.constant 0 : index
    %63 = vector.load %arg5[%c0_54, %c0_55] : memref<1x128xf32, #tpu.memory_space<vmem>>, vector<1x128xf32>
    %64 = vector.broadcast %63 : vector<1x128xf32> to vector<288x128xf32>
    %65 = arith.addf %62, %64 : vector<288x128xf32>
    %66 = vector.shape_cast %65 : vector<288x128xf32> to vector<16x18x128xf32>
    %67 = vector.extract_strided_slice %66 {offsets = [0, 0, 0], sizes = [16, 16, 128], strides = [1, 1, 1]} : vector<16x18x128xf32> to vector<16x16x128xf32>
    %68 = vector.shape_cast %67 : vector<16x16x128xf32> to vector<1x256x128xf32>
    %c0_56 = arith.constant 0 : index
    %c0_57 = arith.constant 0 : index
    %c0_58 = arith.constant 0 : index
    %69 = vector.load %arg6[%c0_56, %c0_57, %c0_58] : memref<1x256x128xf32, #tpu.memory_space<vmem>>, vector<1x256x128xf32>
    tpu.vector_store %arg6[%c0_56, %c0_57, %c0_58], %68 {strides = array<i32>} : memref<1x256x128xf32, #tpu.memory_space<vmem>>, vector<1x256x128xf32>,
    return
  }
  func.func @transform_0(%arg0: i32) -> (i32, i32, i32) {
    %c0_i32 = arith.constant 0 : i32
    %c0_i32_0 = arith.constant 0 : i32
    %c0_i32_1 = arith.constant 0 : i32
    return %arg0, %c0_i32, %c0_i32_0 : i32, i32, i32
  }
  func.func @transform_1(%arg0: i32) -> (i32, i32, i32) {
    %c0_i32 = arith.constant 0 : i32
    %c0_i32_0 = arith.constant 0 : i32
    %c0_i32_1 = arith.constant 0 : i32
    %c0_i32_2 = arith.constant 0 : i32
    return %c0_i32, %c0_i32_0, %c0_i32_1 : i32, i32, i32
  }
  func.func @transform_2(%arg0: i32) -> (i32, i32) {
    %c0_i32 = arith.constant 0 : i32
    %c0_i32_0 = arith.constant 0 : i32
    %c0_i32_1 = arith.constant 0 : i32
    return %c0_i32, %c0_i32_0 : i32, i32
  }
  func.func @transform_3(%arg0: i32) -> (i32, i32) {
    %c0_i32 = arith.constant 0 : i32
    %c0_i32_0 = arith.constant 0 : i32
    %c0_i32_1 = arith.constant 0 : i32
    return %c0_i32, %c0_i32_0 : i32, i32
  }
  func.func @transform_4(%arg0: i32) -> (i32, i32) {
    %c0_i32 = arith.constant 0 : i32
    %c0_i32_0 = arith.constant 0 : i32
    %c0_i32_1 = arith.constant 0 : i32
    return %c0_i32, %c0_i32_0 : i32, i32
  }
  func.func @transform_5(%arg0: i32) -> (i32, i32, i32) {
    %c0_i32 = arith.constant 0 : i32
    %c0_i32_0 = arith.constant 0 : i32
    %c0_i32_1 = arith.constant 0 : i32
    return %arg0, %c0_i32, %c0_i32_0 : i32, i32, i32
  }
}

</mosaic_0001>

<bundles_post_ra>
// kernel: da_head_forward.4
= control target key start
LH: loop header
LB: loop body
LE: loop exit
PB: predicated region body
PF: predicated region fallthrough
CT: control target
= control target key end

     0   :  { %9 = vsyncpa [#allocation3], 0  ;;  %s3112_s15 = smov 0   ;;  %s4885_s0 = inlined_call_operand.vmem [shape: f32[2], index: 0, kind: input, shape index: {}]   ;;  %s4886_s1 = inlined_call_operand.vmem [shape: bf16[2,256,64], index: 1, kind: input, shape index: {}]   ;;  %s4887_s2 = inlined_call_operand.vmem [shape: bf16[32,40], index: 2, kind: input, shape index: {}]   ;;  %s4888_s3 = inlined_call_operand.vmem [shape: f32[1,40], index: 3, kind: input, shape index: {}]   ;;  %s4889_s4 = inlined_call_operand.vmem [shape: bf16[2,256,64], index: 4, kind: output, shape index: {}]  }
   0x1 LB: > { %s2467_s16 = sadd.s32 4294967295, %s3079_s15   ;;  %p2469_p0 = scmp.ge.s32.totalorder %s3079_s15, 1  ;;  %s3079_s15 = sphi %s3112_s15, %s15_s15  }
   0x2   : > { %p135_p1 = scmp.lt.s32.totalorder %s3079_s15, 3  ;;  %s147_s19 = sshll.u32 %s4885_s0, 4  ;;  %s148_s19 = int_to_ptr.vmem [resolvable:$true] %s147_s19 }
   0x3   : > { %p2670_p3 = scmp.eq.s32.totalorder %s2467_s16, 0  ;;  %s3081_s20 = smov [#allocation2]  }
   0x4   : > { %p136_p2 = pnand %p2469_p0, %p135_p1 }
   0x6   : > { %p2666_p4 = pneg %p136_p2  ;;  %174 = sbr.rel (%p136_p2) target bundleno = 1739 (0x6cb), region = 36 }
   0x8   : > { %p2667_p5 = pnand %p2670_p3, %p2666_p4 }
   0xa   : > { %2669 = dma.vmem_to_smem (!%p2667_p5), %s148_s19, 16, %s3081_s20, [#allocation3]  }
   0xb   : > { %3074 = dma.done.wait (%p2670_p3), [#allocation3], 16  }
   0xc   : > { %3076 = vsyncadd (%p2670_p3), [#allocation3], 4294967280 }
   0xd   : > { %181 = sfence }
   0xe   : > { %v2636_v0 = vld [vmem:[%s4887_s2 + $0x8] sm:$0xff]  ;;  %p202_p6 = scmp.lt.s32.totalorder %s2467_s16, 1  ;;  %v2635_v1 = vld [vmem:[%s4887_s2] sm:$0xff]  ;;  %vm345_vm0 = vcmask 261120   ;;  %s3082_s5 = smov 124   ;;  %vm547_vm1 = vcmask 31744  }
   0xf   : > { %400 = vmatpush.bf16.msra.mxu0 %v2636_v0  ;;  %2637 = vmatpush.bf16.msra.mxu1 %v2636_v0  ;;  %v3230_v32 = vld [vmem:[%s4888_s3] ss:$0 sm:$0xff]  ;;  %s3083_s6 = smov 96   ;;  %s3084_s7 = smov 120   ;;  %vm2367_vm2 = vcmask 519168  }
  0x10   : > { %s5124_s16 = smov (!%p202_p6, %s2467_s16), 1  ;;  %s1560_s8 = sld [smem:[#allocation2]] }
  0x11   : > { %s2617_s25 = sshll.u32 %s5124_s16, 7  ;;  %s2614_s9 = sld [smem:[#allocation2 + $0x1]] }
  0x12   : > { %s3137_s28 = scalar_lea.vmem %s4886_s1, %s2617_s25  ;;  %s3085_s10 = smov 32  }
  0x13   : > { %401 = vmatpush.bf16.msra.mxu0 %v2635_v1  ;;  %v3140_v2 = vld [vmem:[%s3137_s28] sm:$0xff]  ;;  %2638 = vmatpush.bf16.msra.mxu1 %v2635_v1  ;;  %v3143_v3 = vld [vmem:[%s3137_s28 + $0x58] sm:$0xff]  ;;  %v3150_v4 = vld [vmem:[%s3137_s28 + $0x8] sm:$0xff]  ;;  %s4668_s13 = scalar_lea.vmem %s4889_s4, %s2617_s25 }
  0x14   : > { %v3153_v5 = vld [vmem:[%s3137_s28 + $0x60] sm:$0xff]  ;;  %v3160_v6 = vld [vmem:[%s3137_s28 + $0x10] sm:$0xff]  ;;  %v3163_v7 = vld [vmem:[%s3137_s28 + $0x68] sm:$0xff] }
  0x15   : > { %v3170_v8 = vld [vmem:[%s3137_s28 + $0x18] sm:$0xff]  ;;  %v3173_v9 = vld [vmem:[%s3137_s28 + $0x70] sm:$0xff]  ;;  %v3180_v10 = vld [vmem:[%s3137_s28 + $0x20] sm:$0xff] }
  0x16   : > { %2550 = vmatmul.msk.bf16.vlgmr.msra.gmra.mxu0 %vm345_vm0, %v3140_v2  ;;  %2561 = vmatmul.msk.bf16.vlgmr.msra.gmra.mxu1 %vm345_vm0, %v3143_v3  ;;  %v3183_v11 = vld [vmem:[%s3137_s28 + $0x78] sm:$0xff]  ;;  %v3190_v12 = vld [vmem:[%s3137_s28 + $0x28] sm:$0xff]  ;;  %v3195_v13 = vld [vmem:[%s3137_s28 + $0x30] sm:$0xff] }
  0x17   : > { %v3200_v14 = vld [vmem:[%s3137_s28 + $0x38] sm:$0xff]  ;;  %v3205_v15 = vld [vmem:[%s3137_s28 + $0x40] sm:$0xff]  ;;  %v3214_v20 = vld [vmem:[%s3137_s28 + $0x48] sm:$0xff] }
  0x18   : > { %v3223_v25 = vld [vmem:[%s3137_s28 + $0x50] sm:$0xff] }
  0x26   : > { %2551 = vmatmul.msk.bf16.gmra.mxu0 %vm345_vm0, %v3150_v4  ;;  %2562 = vmatmul.msk.bf16.gmra.mxu1 %vm345_vm0, %v3153_v5 }
  0x36   : > { %2552 = vmatmul.msk.bf16.gmra.mxu0 %vm345_vm0, %v3160_v6  ;;  %2563 = vmatmul.msk.bf16.gmra.mxu1 %vm345_vm0, %v3163_v7 }
  0x46   : > { %2553 = vmatmul.msk.bf16.gmra.mxu0 %vm345_vm0, %v3170_v8  ;;  %2564 = vmatmul.msk.bf16.gmra.mxu1 %vm345_vm0, %v3173_v9 }
  0x56   : > { %2554 = vmatmul.msk.bf16.gmra.mxu0 %vm345_vm0, %v3180_v10  ;;  %2565 = vmatmul.msk.bf16.gmra.mxu1 %vm345_vm0, %v3183_v11 }
  0x66   : > { %2555 = vmatmul.msk.bf16.gmra.mxu0 %vm345_vm0, %v3190_v12 }
  0x76   : > { %2556 = vmatmul.msk.bf16.gmra.mxu0 %vm345_vm0, %v3195_v13 }
  0x86   : > { %2557 = vmatmul.msk.bf16.gmra.mxu0 %vm345_vm0, %v3200_v14 }
  0x93   : > { %v403_v16 = vpop.f32.mrf.mxu0  ;;  %v3207_v17 = vpop.f32.mrf.mxu1 }
  0x94   : > { %v404_v62 = vadd.f32 %v3230_v32, %v403_v16 }
  0x96   : > { %2558 = vmatmul.msk.bf16.gmra.mxu0 %vm345_vm0, %v3205_v15 }
  0x9b   : > { %v405_v18 = vpop.f32.mrf.mxu0  ;;  %v3211_v19 = vpop.f32.mrf.mxu1 }
  0x9c   : > { %v406_v60 = vadd.f32 %v3230_v32, %v405_v18 }
  0x9e   : > { %v3270_v63 = vpack.c.bf16 %v406_v60, %v404_v62 }
  0xa3   : > { %v3216_v21 = vpop.f32.mrf.mxu0  ;;  %v463_v22 = vpop.f32.mrf.mxu1 }
  0xa4   : > { %v464_v48 = vadd.f32 %v3230_v32, %v463_v22 }
  0xa6   : > { %2559 = vmatmul.msk.bf16.gmra.mxu0 %vm345_vm0, %v3214_v20 }
  0xab   : > { %v3220_v23 = vpop.f32.mrf.mxu0  ;;  %v465_v24 = vpop.f32.mrf.mxu1 }
  0xac   : > { %v466_v49 = vadd.f32 %v3230_v32, %v465_v24 }
  0xae   : > { %v3252_v51 = vpack.c.bf16 %v466_v49, %v464_v48 }
  0xb3   : > { %v413_v26 = vpop.f32.mrf.mxu0  ;;  %v468_v27 = vpop.f32.mrf.mxu1 }
  0xb4   : > { %v414_v41 = vadd.f32 %v3230_v32, %v413_v26  ;;  %v469_v0 = vadd.f32 %v3230_v32, %v468_v27 }
  0xb6   : > { %2560 = vmatmul.msk.bf16.gmra.mxu0 %vm345_vm0, %v3223_v25 }
  0xbb   : > { %v415_v28 = vpop.f32.mrf.mxu0  ;;  %v470_v29 = vpop.f32.mrf.mxu1 }
  0xbc   : > { %v416_v38 = vadd.f32 %v3230_v32, %v415_v28  ;;  %v471_v1 = vadd.f32 %v3230_v32, %v470_v29 }
  0xbe   : > { %v3240_v42 = vpack.c.bf16 %v416_v38, %v414_v41  ;;  %v3276_v24 = vpack.c.bf16 %v471_v1, %v469_v0  ;;  %v409_v38 = vadd.f32 %v3230_v32, %v3216_v21  ;;  %v461_v21 = vadd.f32 %v3230_v32, %v3211_v19 }
  0xc3   : > { %v418_v30 = vpop.f32.mrf.mxu0  ;;  %v473_v31 = vpop.f32.mrf.mxu1 }
  0xc4   : > { %v419_v35 = vadd.f32 %v3230_v32, %v418_v30 }
  0xcb   : > { %v420_v33 = vpop.f32.mrf.mxu0  ;;  %v475_v34 = vpop.f32.mrf.mxu1 }
  0xcc   : > { %v421_v36 = vadd.f32 %v3230_v32, %v420_v33  ;;  %v476_v41 = vadd.f32 %v3230_v32, %v475_v34 }
  0xce   : > { %v3234_v37 = vpack.c.bf16 %v421_v36, %v419_v35  ;;  %v411_v35 = vadd.f32 %v3230_v32, %v3220_v23  ;;  %v459_v23 = vadd.f32 %v3230_v32, %v3207_v17 }
  0xd0   : > { %521 = vrot.lane.b32.xlu2 %v3234_v37, %s3082_s5 }
  0xd3   : > { %v423_v39 = vpop.f32.mrf.mxu0  ;;  %v478_v40 = vpop.f32.mrf.mxu1 }
  0xd4   : > { %v479_v43 = vadd.f32 %v3230_v32, %v478_v40  ;;  %v424_v58 = vadd.f32 %v3230_v32, %v423_v39  ;;  %v3296_v39 = vpack.c.bf16 %v411_v35, %v409_v38  ;;  %v474_v40 = vadd.f32 %v3230_v32, %v473_v31 }
  0xd5   : > { %v3312_v31 = vpack.c.bf16 %v461_v21, %v459_v23 }
  0xd8   : > { %519 = vrot.lane.b32.xlu2 %v3240_v42, %s3082_s5 }
  0xdb   : > { %v425_v44 = vpop.f32.mrf.mxu0  ;;  %v480_v45 = vpop.f32.mrf.mxu1 }
  0xdc   : > { %v481_v46 = vadd.f32 %v3230_v32, %v480_v45  ;;  %v426_v56 = vadd.f32 %v3230_v32, %v425_v44  ;;  %v3302_v44 = vpack.c.bf16 %v476_v41, %v474_v40 }
  0xde   : > { %v3246_v47 = vpack.c.bf16 %v481_v46, %v479_v43  ;;  %v3264_v59 = vpack.c.bf16 %v426_v56, %v424_v58 }
  0xe0   : > { %545 = vrot.lane.b32.xlu2 %v3246_v47, %s3082_s5 }
  0xe3   : > { %v428_v50 = vpop.f32.mrf.mxu0 }
  0xe4   : > { %v429_v53 = vadd.f32 %v3230_v32, %v428_v50 }
  0xe8   : > { %539 = vrot.lane.b32.xlu2 %v3252_v51, %s3082_s5 }
  0xeb   : > { %v430_v52 = vpop.f32.mrf.mxu0 }
  0xec   : > { %v431_v54 = vadd.f32 %v3230_v32, %v430_v52 }
  0xee   : > { %v3258_v55 = vpack.c.bf16 %v431_v54, %v429_v53 }
  0xf0   : > { %525 = vrot.lane.b32.xlu1 %v3258_v55, %s3082_s5 }
  0xf3   : > { %v433_v57 = vpop.f32.mrf.mxu0 }
  0xf4   : > { %v434_v30 = vadd.f32 %v3230_v32, %v433_v57 }
  0xf8   : > { %523 = vrot.lane.b32.xlu1 %v3264_v59, %s3082_s5 }
  0xfb   : > { %v435_v61 = vpop.f32.mrf.mxu0 }
  0xfc   : > { %v436_v27 = vadd.f32 %v3230_v32, %v435_v61 }
  0xfe   : > { %v3288_v33 = vpack.c.bf16 %v436_v27, %v434_v30 }
 0x100   : > { %515 = vrot.lane.b32.xlu1 %v3270_v63, %s3082_s5 }
 0x103   : > { %v438_v22 = vpop.f32.mrf.mxu0 }
 0x104   : > { %v439_v18 = vadd.f32 %v3230_v32, %v438_v22 }
 0x108   : > { %541 = vrot.lane.b32.xlu1 %v3276_v24, %s3082_s5 }
 0x10b   : > { %v440_v26 = vpop.f32.mrf.mxu0 }
 0x10c   : > { %v441_v16 = vadd.f32 %v3230_v32, %v440_v26 }
 0x10e   : > { %v3282_v28 = vpack.c.bf16 %v441_v16, %v439_v18 }
 0x110   : > { %529 = vrot.lane.b32.xlu0 %v3282_v28, %s3082_s5 }
 0x113   : > { %v443_v29 = vpop.f32.mrf.mxu0 }
 0x114   : > { %v444_v19 = vadd.f32 %v3230_v32, %v443_v29 }
 0x118   : > { %527 = vrot.lane.b32.xlu0 %v3288_v33, %s3082_s5 }
 0x11b   : > { %v445_v36 = vpop.f32.mrf.mxu0 }
 0x11c   : > { %v446_v17 = vadd.f32 %v3230_v32, %v445_v36 }
 0x11e   : > { %v3322_v50 = vpack.c.bf16 %v446_v17, %v444_v19 }
 0x120   : > { %517 = vrot.lane.b32.xlu0 %v3296_v39, %s3082_s5  ;;  %4961 = vst [vmem:[#allocation6_spill] sm:$0xff] %v3322_v50 }
 0x123   : > { %v448_v43 = vpop.f32.mrf.mxu0 }
 0x124   : > { %v449_v46 = vadd.f32 %v3230_v32, %v448_v43 }
 0x128   : > { %543 = vrot.lane.b32.xlu0 %v3302_v44, %s3082_s5 }
 0x12b   : > { %v450_v45 = vpop.f32.mrf.mxu0 }
 0x12c   : > { %v451_v48 = vadd.f32 %v3230_v32, %v450_v45 }
 0x12e   : > { %v3314_v34 = vpack.c.bf16 %v451_v48, %v449_v46 }
 0x130   : > { %4960 = vst [vmem:[#allocation5_spill] sm:$0xff] %v3314_v34  ;;  %533 = vrot.lane.b32.xlu2 %v3314_v34, %s3082_s5  ;;  %537 = vrot.lane.b32.xlu0 %v3312_v31, %s3082_s5 }
 0x133   : > { %v453_v49 = vpop.f32.mrf.mxu0 }
 0x134   : > { %v454_v53 = vadd.f32 %v3230_v32, %v453_v49 }
 0x138   : > { %531 = vrot.lane.b32.xlu0 %v3322_v50, %s3082_s5  ;;  %1670 = vrot.lane.b32.xlu2 %v3195_v13, %s3083_s6 }
 0x13b   : > { %v455_v52 = vpop.f32.mrf.mxu0 }
 0x13c   : > { %v456_v54 = vadd.f32 %v3230_v32, %v455_v52 }
 0x13e   : > { %v3330_v56 = vpack.c.bf16 %v456_v54, %v454_v53 }
 0x140   : > { %4962 = vst [vmem:[#allocation7_spill] sm:$0xff] %v3330_v56  ;;  %1668 = vrot.lane.b32.xlu0 %v3190_v12, %s3083_s6  ;;  %535 = vrot.lane.b32.xlu1 %v3330_v56, %s3082_s5 }
 0x141   : > { %1664 = vrot.lane.b32.xlu2 %v3170_v8, %s3083_s6 }
 0x148   : > { %1662 = vrot.lane.b32.xlu0 %v3160_v6, %s3083_s6  ;;  %1672 = vrot.lane.b32.xlu1 %v3200_v14, %s3083_s6  ;;  %v522_v6 = vpop.permute.xlu2 %521 }
 0x149   : > { %1658 = vrot.lane.b32.xlu2 %v3140_v2, %s3083_s6  ;;  %v606_v58 = vsel %vm547_vm1, %v522_v6, 0 }
 0x150   : > { %1674 = vrot.lane.b32.xlu0 %v3205_v15, %s3083_s6  ;;  %1666 = vrot.lane.b32.xlu1 %v3180_v10, %s3083_s6  ;;  %v520_v2 = vpop.permute.xlu2 %519 }
 0x151   : > { %1678 = vrot.lane.b32.xlu2 %v3223_v25, %s3083_s6  ;;  %v603_v0 = vsel %vm547_vm1, %v520_v2, 0 }
 0x158   : > { %1680 = vrot.lane.b32.xlu0 %v3143_v3, %s3083_s6  ;;  %1660 = vrot.lane.b32.xlu1 %v3150_v4, %s3083_s6  ;;  %v546_v3 = vpop.permute.xlu2 %545 }
 0x159   : > { %1684 = vrot.lane.b32.xlu2 %v3163_v7, %s3083_s6  ;;  %v642_v4 = vsel %vm547_vm1, %v546_v3, 0 }
 0x15a   : > { %733 = vmatpush.bf16.xpose.msra.mxu2 %v642_v4 }
 0x160   : > { %1688 = vrot.lane.b32.xlu0 %v3183_v11, %s3083_s6  ;;  %1676 = vrot.lane.b32.xlu1 %v3214_v20, %s3083_s6  ;;  %v540_v61 = vpop.permute.xlu2 %539 }
 0x161   : > { %v633_v1 = vsel %vm547_vm1, %v540_v61, 0 }
 0x162   : > { %v526_v8 = vpop.permute.xlu1 %525 }
 0x163   : > { %v612_v13 = vsel %vm547_vm1, %v526_v8, 0 }
 0x168   : > { %1348 = vrot.lane.b32.xlu0 %v3282_v28, %s3084_s7  ;;  %1682 = vrot.lane.b32.xlu1 %v3153_v5, %s3083_s6 }
 0x16a   : > { %v524_v11 = vpop.permute.xlu1 %523 }
 0x16b   : > { %v609_v20 = vsel %vm547_vm1, %v524_v11, 0 }
 0x170   : > { %1344 = vrot.lane.b32.xlu0 %v3258_v55, %s3084_s7  ;;  %1686 = vrot.lane.b32.xlu1 %v3173_v9, %s3083_s6 }
 0x172   : > { %v516_v14 = vpop.permute.xlu1 %515 }
 0x173   : > { %v597_v35 = vsel %vm547_vm1, %v516_v14, 0 }
 0x178   : > { %1340 = vrot.lane.b32.xlu0 %v3234_v37, %s3084_s7  ;;  %1346 = vrot.lane.b32.xlu1 %v3288_v33, %s3084_s7 }
 0x17a   : > { %v542_v32 = vpop.permute.xlu1 %541 }
 0x17b   : > { %v636_v60 = vsel %vm547_vm1, %v542_v32, 0 }
 0x180   : > { %1338 = vrot.lane.b32.xlu0 %v3240_v42, %s3084_s7  ;;  %1342 = vrot.lane.b32.xlu1 %v3264_v59, %s3084_s7 }
 0x182   : > { %v530_v5 = vpop.permute.xlu0 %529 }
 0x183   : > { %v618_v7 = vsel %vm547_vm1, %v530_v5, 0 }
 0x184   : > { %644 = vmatpush.bf16.xpose.msra.mxu1 %v618_v7 }
 0x188   : > { %1334 = vrot.lane.b32.xlu0 %v3270_v63, %s3084_s7  ;;  %1336 = vrot.lane.b32.xlu1 %v3296_v39, %s3084_s7 }
 0x18a   : > { %v528_v9 = vpop.permute.xlu0 %527  ;;  %v534_v27 = vpop.permute.xlu2 %533 }
 0x18b   : > { %v615_v10 = vsel %vm547_vm1, %v528_v9, 0  ;;  %v624_v43 = vsel %vm547_vm1, %v534_v27, 0 }
 0x18c   : > { %645 = vmatpush.bf16.xpose.msra.mxu1 %v615_v10 }
 0x190   : > { %1364 = vrot.lane.b32.xlu1 %v3246_v47, %s3084_s7 }
 0x192   : > { %v518_v12 = vpop.permute.xlu0 %517  ;;  %v3403_v38 = vpop.permute.xlu2 %1670 }
 0x193   : > { %v600_v18 = vsel %vm547_vm1, %v518_v12, 0  ;;  %4966 = vst [vmem:[#allocation11_spill] sm:$0xff] %v3403_v38 }
 0x194   : > { %646 = vmatpush.bf16.xpose.msra.mxu1 %v612_v13 }
 0x19a   : > { %v544_v15 = vpop.permute.xlu0 %543 }
 0x19b   : > { %v639_v25 = vsel %vm547_vm1, %v544_v15, 0  ;;  %v3418_v23 = vpop.permute.xlu2 %1664 }
 0x19c   : > { %647 = vmatpush.bf16.xpose.msra.mxu1 %v609_v20  ;;  %734 = vmatpush.bf16.xpose.msra.mxu2 %v639_v25  ;;  %4969 = vst [vmem:[#allocation14_spill] sm:$0xff] %v3418_v23 }
 0x1a2   : > { %v538_v57 = vpop.permute.xlu0 %537 }
 0x1a3   : > { %v630_v16 = vsel %vm547_vm1, %v538_v57, 0  ;;  %v3440_v49 = vpop.permute.xlu2 %1658 }
 0x1a4   : > { %648 = vmatpush.bf16.xpose.msra.mxu1 %v606_v58  ;;  %735 = vmatpush.bf16.xpose.msra.mxu2 %v636_v60  ;;  %4974 = vst [vmem:[#allocation19_spill] sm:$0xff] %v3440_v49 }
 0x1aa   : > { %v532_v62 = vpop.permute.xlu0 %531 }
 0x1ab   : > { %v621_v46 = vsel %vm547_vm1, %v532_v62, 0 }
 0x1ac   : > { %649 = vmatpush.bf16.xpose.msra.mxu1 %v603_v0  ;;  %736 = vmatpush.bf16.xpose.msra.mxu2 %v633_v1 }
 0x1b2   : > { %v3392_v22 = vpop.permute.xlu0 %1668  ;;  %v536_v26 = vpop.permute.xlu1 %535 }
 0x1b3   : > { %4963 = vst [vmem:[#allocation8_spill] sm:$0xff] %v3392_v22  ;;  %v627_v36 = vsel %vm547_vm1, %v536_v26, 0 }
 0x1b4   : > { %650 = vmatpush.bf16.xpose.msra.mxu1 %v600_v18  ;;  %737 = vmatpush.bf16.xpose.msra.mxu2 %v630_v16 }
 0x1ba   : > { %v3396_v29 = vpop.permute.xlu0 %1662  ;;  %v3398_v30 = vpop.permute.xlu1 %1672 }
 0x1bb   : > { %4964 = vst [vmem:[#allocation9_spill] sm:$0xff] %v3396_v29 }
 0x1bc   : > { %4965 = vst [vmem:[#allocation10_spill] sm:$0xff] %v3398_v30  ;;  %2649 = vmatpush.lsf.bf16.msrb.mxu1 %v3398_v30  ;;  %738 = vmatpush.bf16.xpose.msra.mxu2 %v627_v36 }
 0x1c0   : > { %651 = vmatpush.bf16.xpose.msra.mxu1 %v597_v35 }
 0x1c2   : > { %v3406_v40 = vpop.permute.xlu0 %1674  ;;  %v3408_v41 = vpop.permute.xlu1 %1666 }
 0x1c3   : > { %4967 = vst [vmem:[#allocation12_spill] sm:$0xff] %v3406_v40  ;;  %1722 = vxpose.xlu2.c.b16.start [1/8] (narrow) %v3406_v40, 32 }
 0x1c4   : > { %4968 = vst [vmem:[#allocation13_spill] sm:$0xff] %v3408_v41  ;;  %739 = vmatpush.bf16.xpose.msra.mxu2 %v624_v43 }
 0x1c7   : > { %2566 = vmatmul.msk.bf16.vlgmr.msra.gmra.mxu1 %vm547_vm1, %v3270_v63 }
 0x1c8   : > { %2650 = vmatpush.lsf.bf16.msrb.mxu1 %v3403_v38 }
 0x1ca   : > { %v3420_v21 = vpop.permute.xlu0 %1680  ;;  %v3422_v45 = vpop.permute.xlu1 %1660 }
 0x1cb   : > { %4970 = vst [vmem:[#allocation15_spill] sm:$0xff] %v3420_v21 }
 0x1cc   : > { %2651 = vmatpush.lsf.bf16.msrb.mxu1 %v3392_v22  ;;  %4971 = vst [vmem:[#allocation16_spill] sm:$0xff] %v3422_v45  ;;  %740 = vmatpush.bf16.xpose.msra.mxu2 %v621_v46 }
 0x1d0   : > { %1738 = vmatpush.bf16.msra.mxu1 %v3398_v30 }
 0x1d2   : > { %v3429_v48 = vpop.permute.xlu0 %1688  ;;  %v3431_v17 = vpop.permute.xlu1 %1676 }
 0x1d3   : > { %4972 = vst [vmem:[#allocation17_spill] sm:$0xff] %v3429_v48  ;;  %2582 = vmatmul.msk.bf16.vlgmr.msra.gmra.mxu2 %vm547_vm1, %v3270_v63  ;;  %1723 = vxpose.xlu2.c.b16.cont [2/8] (narrow) %v3431_v17, 32  ;;  %v3448_v63 = vpop.permute.xlu2 %1678 }
 0x1d4   : > { %2652 = vmatpush.lsf.bf16.msrb.mxu1 %v3408_v41  ;;  %4973 = vst [vmem:[#allocation18_spill] sm:$0xff] %v3431_v17 }
 0x1d5   : > { %4976 = vst [vmem:[#allocation21_spill] sm:$0xff] %v3448_v63 }
 0x1d7   : > { %2567 = vmatmul.msk.bf16.gmra.mxu1 %vm547_vm1, %v3296_v39 }
 0x1d8   : > { %1739 = vmatpush.bf16.msra.mxu1 %v3403_v38 }
 0x1da   : > { %v1349_v19 = vpop.permute.xlu0 %1348  ;;  %v3444_v52 = vpop.permute.xlu1 %1682 }
 0x1db   : > { %4975 = vst [vmem:[#allocation20_spill] sm:$0xff] %v3444_v52  ;;  %1382 = vmatpush.bf16.msra.mxu3 %v1349_v19 }
 0x1dc   : > { %2653 = vmatpush.lsf.bf16.msrb.mxu1 %v3418_v23 }
 0x1e0   : > { %1740 = vmatpush.bf16.msra.mxu1 %v3392_v22 }
 0x1e2   : > { %v3450_v53 = vpop.permute.xlu1 %1686  ;;  %v1345_v54 = vpop.permute.xlu0 %1344 }
 0x1e3   : > { %4977 = vst [vmem:[#allocation22_spill] sm:$0xff] %v3450_v53  ;;  %2583 = vmatmul.msk.bf16.gmra.mxu2 %vm547_vm1, %v3296_v39  ;;  %1724 = vxpose.xlu2.c.b16.cont [3/8] (narrow) %v3448_v63, 32 }
 0x1e4   : > { %2654 = vmatpush.lsf.bf16.msrb.mxu1 %v3396_v29 }
 0x1e7   : > { %2568 = vmatmul.msk.bf16.gmra.mxu1 %vm547_vm1, %v3240_v42 }
 0x1e8   : > { %1741 = vmatpush.bf16.msra.mxu1 %v3408_v41 }
 0x1ea   : > { %v1347_v6 = vpop.permute.xlu1 %1346  ;;  %v1341_v2 = vpop.permute.xlu0 %1340 }
 0x1eb   : > { %1383 = vmatpush.bf16.msra.mxu3 %v1347_v6 }
 0x1ec   : > { %2655 = vmatpush.lsf.bf16.msrb.mxu1 %v3422_v45 }
 0x1ef   : > { %1384 = vmatpush.bf16.msra.mxu3 %v1345_v54 }
 0x1f0   : > { %1742 = vmatpush.bf16.msra.mxu1 %v3418_v23 }
 0x1f2   : > { %v1343_v3 = vpop.permute.xlu1 %1342  ;;  %v1339_v4 = vpop.permute.xlu0 %1338 }
 0x1f3   : > { %2584 = vmatmul.msk.bf16.gmra.mxu2 %vm547_vm1, %v3240_v42  ;;  %1725 = vxpose.xlu2.c.b16.cont [4/8] (narrow) %v3420_v21, 32  ;;  %v3467_v42 = vpop.permute.xlu2 %1684 }
 0x1f4   : > { %2656 = vmatpush.lsf.bf16.msrb.mxu1 %v3440_v49  ;;  %1385 = vmatpush.bf16.msra.mxu3 %v1343_v3  ;;  %4978 = vst [vmem:[#allocation23_spill] sm:$0xff] %v3467_v42 }
 0x1f6   : > { %2657 = vllmr.4.mxu1 }
 0x1f7   : > { %2569 = vmatmul.msk.bf16.gmra.mxu1 %vm547_vm1, %v3234_v37 }
 0x1f8   : > { %1743 = vmatpush.bf16.msra.mxu1 %v3396_v29  ;;  %1386 = vmatpush.bf16.msra.mxu3 %v1341_v2 }
 0x1fa   : > { %v1337_v39 = vpop.permute.xlu1 %1336  ;;  %v1335_v7 = vpop.permute.xlu0 %1334 }
 0x1fc   : > { %1744 = vmatpush.bf16.msra.mxu1 %v3422_v45  ;;  %1387 = vmatpush.bf16.msra.mxu3 %v1339_v4 }
 0x200   : > { %1745 = vmatpush.bf16.msra.mxu1 %v3440_v49  ;;  %1388 = vmatpush.bf16.msra.mxu3 %v1337_v39 }
 0x202   : > { %v1365_v5 = vpop.permute.xlu1 %1364 }
 0x203   : > { %2585 = vmatmul.msk.bf16.gmra.mxu2 %vm547_vm1, %v3234_v37  ;;  %1726 = vxpose.xlu2.c.b16.cont [5/8] (narrow) %v3444_v52, 32 }
 0x204   : > { %1389 = vmatpush.bf16.msra.mxu3 %v1335_v7  ;;  %1471 = vmatpush.bf16.msrb.mxu0 %v1365_v5 }
 0x207   : > { %2570 = vmatmul.msk.bf16.gmra.mxu1 %vm547_vm1, %v3264_v59 }
 0x213   : > { %2586 = vmatmul.msk.bf16.gmra.mxu2 %vm547_vm1, %v3264_v59  ;;  %1727 = vxpose.xlu2.c.b16.cont [6/8] (narrow) %v3467_v42, 32 }
 0x217   : > { %2571 = vmatmul.msk.bf16.gmra.mxu1 %vm547_vm1, %v3258_v55 }
 0x223   : > { %2587 = vmatmul.msk.bf16.gmra.mxu2 %vm547_vm1, %v3258_v55  ;;  %1728 = vxpose.xlu2.c.b16.cont [7/8] (narrow) %v3450_v53, 32 }
 0x227   : > { %2572 = vmatmul.msk.bf16.gmra.mxu1 %vm547_vm1, %v3288_v33 }
 0x233   : > { %2588 = vmatmul.msk.bf16.gmra.mxu2 %vm547_vm1, %v3288_v33  ;;  %1729 = vxpose.xlu2.c.b16.end [8/8] (narrow) %v3429_v48, 32 }
 0x237   : > { %2573 = vmatmul.msk.bf16.gmra.mxu1 %vm547_vm1, %v3282_v28 }
 0x243   : > { %2589 = vmatmul.msk.bf16.gmra.mxu2 %vm547_vm1, %v3282_v28 }
 0x244   : > { %v3484_v37 = vpop.f32.mrf.mxu1 }
 0x247   : > { %2574 = vmatmul.msk.bf16.gmra.mxu1 %vm547_vm1, %v3322_v50 }
 0x24c   : > { %v3490_v59 = vpop.f32.mrf.mxu1 }
 0x253   : > { %2590 = vmatmul.msk.bf16.gmra.mxu2 %vm547_vm1, %v3322_v50 }
 0x254   : > { %v3492_v55 = vpop.f32.mrf.mxu1 }
 0x256   : > { %v3498_v33 = vpop.f32.mrf.mxu2 }
 0x257   : > { %2575 = vmatmul.msk.bf16.gmra.mxu1 %vm547_vm1, %v3314_v34  ;;  %v822_v43 = vmax.f32 %v3484_v37, %v3498_v33 }
 0x25c   : > { %v3500_v8 = vpop.f32.mrf.mxu1 }
 0x25e   : > { %v3502_v9 = vpop.f32.mrf.mxu2 }
 0x25f   : > { %v825_v10 = vmax.f32 %v3490_v59, %v3502_v9 }
 0x261   : > { %826 = vmax.xlane.f32.xlu0 %v825_v10 }
 0x263   : > { %2591 = vmatmul.msk.bf16.gmra.mxu2 %vm547_vm1, %v3314_v34 }
 0x264   : > { %v3506_v28 = vpop.f32.mrf.mxu1  ;;  %v1730_v30 = vpop.trf.xlu2 }
 0x266   : > { %v3512_v11 = vpop.f32.mrf.mxu2 }
 0x267   : > { %2576 = vmatmul.msk.bf16.gmra.mxu1 %vm547_vm1, %v3330_v56  ;;  %v828_v12 = vmax.f32 %v3492_v55, %v3512_v11 }
 0x269   : > { %829 = vmax.xlane.f32.xlu1 %v828_v12 }
 0x26c   : > { %v3516_v13 = vpop.f32.mrf.mxu1 }
 0x26e   : > { %v3518_v14 = vpop.f32.mrf.mxu2 }
 0x26f   : > { %v831_v6 = vmax.f32 %v3500_v8, %v3518_v14 }
 0x273   : > { %2592 = vmatmul.msk.bf16.gmra.mxu2 %vm547_vm1, %v3330_v56 }
 0x274   : > { %v3520_v15 = vpop.f32.mrf.mxu1 }
 0x275   : > { %1360 = vrot.lane.b32.xlu0 %v3276_v24, %s3084_s7 }
 0x276   : > { %v3528_v20 = vpop.f32.mrf.mxu2 }
 0x277   : > { %2577 = vmatmul.msk.bf16.gmra.mxu1 %vm547_vm1, %v3312_v31  ;;  %v834_v16 = vmax.f32 %v3506_v28, %v3528_v20 }
 0x27c   : > { %v3530_v25 = vpop.f32.mrf.mxu1 }
 0x27e   : > { %v3532_v32 = vpop.f32.mrf.mxu2 }
 0x27f   : > { %v837_v57 = vmax.f32 %v3516_v13, %v3532_v32 }
 0x281   : > { %838 = vmax.xlane.f32.xlu1 %v837_v57 }
 0x283   : > { %2593 = vmatmul.msk.bf16.gmra.mxu2 %vm547_vm1, %v3312_v31 }
 0x284   : > { %v3536_v58 = vpop.f32.mrf.mxu1 }
 0x286   : > { %v3542_v60 = vpop.f32.mrf.mxu2 }
 0x287   : > { %2578 = vmatmul.msk.bf16.gmra.mxu1 %vm547_vm1, %v3252_v51  ;;  %v840_v46 = vmax.f32 %v3520_v15, %v3542_v60 }
 0x28c   : > { %v3544_v61 = vpop.f32.mrf.mxu1 }
 0x28e   : > { %v3546_v62 = vpop.f32.mrf.mxu2 }
 0x28f   : > { %v843_v0 = vmax.f32 %v3530_v25, %v3546_v62 }
 0x291   : > { %844 = vmax.xlane.f32.xlu1 %v843_v0 }
 0x293   : > { %2594 = vmatmul.msk.bf16.gmra.mxu2 %vm547_vm1, %v3252_v51 }
 0x294   : > { %v3550_v1 = vpop.f32.mrf.mxu1 }
 0x296   : > { %v3556_v26 = vpop.f32.mrf.mxu2 }
 0x297   : > { %2579 = vmatmul.msk.bf16.gmra.mxu1 %vm547_vm1, %v3276_v24  ;;  %v846_v2 = vmax.f32 %v3536_v58, %v3556_v26 }
 0x29c   : > { %v3558_v18 = vpop.f32.mrf.mxu1 }
 0x29e   : > { %v3562_v27 = vpop.f32.mrf.mxu2 }
 0x29f   : > { %835 = vmax.xlane.f32.xlu0 %v834_v16  ;;  %v849_v35 = vmax.f32 %v3544_v61, %v3562_v27 }
 0x2a1   : > { %850 = vmax.xlane.f32.xlu1 %v849_v35 }
 0x2a3   : > { %2595 = vmatmul.msk.bf16.gmra.mxu2 %vm547_vm1, %v3276_v24 }
 0x2a4   : > { %v3566_v36 = vpop.f32.mrf.mxu1  ;;  %823 = vmax.xlane.f32.xlu2 %v822_v43 }
 0x2a6   : > { %v3576_v19 = vpop.f32.mrf.mxu2 }
 0x2a7   : > { %2580 = vmatmul.msk.bf16.gmra.mxu1 %vm547_vm1, %v3302_v44  ;;  %841 = vmax.xlane.f32.xlu0 %v840_v46  ;;  %v852_v39 = vmax.f32 %v3550_v1, %v3576_v19 }
 0x2ac   : > { %v3578_v54 = vpop.f32.mrf.mxu1  ;;  %832 = vmax.xlane.f32.xlu2 %v831_v6 }
 0x2ae   : > { %v3584_v24 = vpop.f32.mrf.mxu2 }
 0x2af   : > { %847 = vmax.xlane.f32.xlu0 %v846_v2  ;;  %v855_v3 = vmax.f32 %v3558_v18, %v3584_v24 }
 0x2b1   : > { %856 = vmax.xlane.f32.xlu1 %v855_v3 }
 0x2b3   : > { %2596 = vmatmul.msk.bf16.gmra.mxu2 %vm547_vm1, %v3302_v44 }
 0x2b4   : > { %v3588_v4 = vpop.f32.mrf.mxu1 }
 0x2b6   : > { %v3596_v5 = vpop.f32.mrf.mxu2 }
 0x2b7   : > { %2581 = vmatmul.msk.bf16.gmra.mxu1 %vm547_vm1, %v3246_v47  ;;  %853 = vmax.xlane.f32.xlu0 %v852_v39  ;;  %v858_v10 = vmax.f32 %v3566_v36, %v3596_v5 }
 0x2bc   : > { %v3598_v7 = vpop.f32.mrf.mxu1 }
 0x2be   : > { %v3602_v12 = vpop.f32.mrf.mxu2 }
 0x2bf   : > { %859 = vmax.xlane.f32.xlu0 %v858_v10  ;;  %v861_v57 = vmax.f32 %v3578_v54, %v3602_v12 }
 0x2c1   : > { %862 = vmax.xlane.f32.xlu1 %v861_v57 }
 0x2c3   : > { %2597 = vmatmul.msk.bf16.gmra.mxu2 %vm547_vm1, %v3246_v47 }
 0x2c4   : > { %v3606_v0 = vpop.f32.mrf.mxu1  ;;  %1362 = vrot.lane.b32.xlu2 %v3302_v44, %s3084_s7 }
 0x2c6   : > { %v3613_v16 = vpop.f32.mrf.mxu2 }
 0x2c7   : > { %2658 = vmatmul.lmr.bf16.vlgmr.msra.gmra.4.mxu1  ;;  %v864_v35 = vmax.f32 %v3588_v4, %v3613_v16 }
 0x2c8   : > { %1757 = vmatpush.bf16.msra.mxu1 %v3429_v48 }
 0x2c9   : > { %865 = vmax.xlane.f32.xlu0 %v864_v35 }
 0x2cc   : > { %1758 = vmatpush.bf16.msra.mxu1 %v3450_v53  ;;  %v3618_v43 = vpop.f32.mrf.mxu1 }
 0x2ce   : > { %v3621_v47 = vpop.f32.mrf.mxu2 }
 0x2cf   : > { %2659 = vmatmul.lmr.bf16.gmra.4.mxu1  ;;  %4979 = vst [vmem:[#allocation24_spill] sm:$0xff] %v3621_v47  ;;  %v867_v46 = vmax.f32 %v3598_v7, %v3621_v47 }
 0x2d0   : > { %1759 = vmatpush.bf16.msra.mxu1 %v3467_v42 }
 0x2d1   : > { %868 = vmax.xlane.f32.xlu1 %v867_v46 }
 0x2d4   : > { %1760 = vmatpush.bf16.msra.mxu1 %v3444_v52  ;;  %v3626_v44 = vpop.f32.mrf.mxu1  ;;  %v827_v22 = vpop.xlane.xlu0 %826 }
 0x2d5   : > { %4980 = vst [vmem:[#allocation25_spill] sm:$0xff] %v3626_v44 }
 0x2d6   : > { %v3629_v6 = vpop.f32.mrf.mxu2 }
 0x2d7   : > { %2660 = vmatmul.lmr.bf16.gmra.4.mxu1  ;;  %v870_v2 = vmax.f32 %v3606_v0, %v3629_v6 }
 0x2d8   : > { %1761 = vmatpush.bf16.msra.mxu1 %v3420_v21 }
 0x2d9   : > { %871 = vmax.xlane.f32.xlu0 %v870_v2 }
 0x2dc   : > { %1762 = vmatpush.bf16.msra.mxu1 %v3448_v63  ;;  %v3634_v3 = vpop.f32.mrf.mxu1  ;;  %v830_v39 = vpop.xlane.xlu1 %829 }
 0x2dd   : > { %v922_v10 = vsub.f32 %v3492_v55, %v830_v39  ;;  %v923_v57 = vsub.f32 %v3512_v11, %v830_v39 }
 0x2de   : > { %v3639_v35 = vpop.f32.mrf.mxu2 }
 0x2df   : > { %2661 = vmatmul.lmr.bf16.gmra.4.mxu1  ;;  %v990_v46 = vmul.f32 1.442695, %v922_v10  ;;  %v992_v48 = vmul.f32 1.442695, %v923_v57 }
 0x2e0   : > { %1763 = vmatpush.bf16.msra.mxu1 %v3431_v17 }
 0x2e1   : > { %2846 = vpow2.f32 %v990_v46 }
 0x2e2   : > { %2848 = vpow2.f32 %v992_v48 }
 0x2e4   : > { %1764 = vmatpush.bf16.msra.mxu1 %v3406_v40  ;;  %v3642_v53 = vpop.f32.mrf.mxu1 }
 0x2e6   : > { %v3644_v2 = vpop.f32.mrf.mxu2 }
 0x2e7   : > { %1765 = vmatmul.bf16.vlgmr.msra.gmra.mxu1 %v1730_v30  ;;  %4981 = vst [vmem:[#allocation26_spill] sm:$0xff] %v3644_v2  ;;  %v876_v42 = vmax.f32 %v3626_v44, %v3644_v2  ;;  %v3648_v55 = vpop.eup %2846  ;;  %v1731_v30 = vpop.trf.xlu2 }
 0x2e8   : > { %4982 = vst [vmem:[#allocation27_spill] sm:$0xff] %v3648_v55  ;;  %v3652_v39 = vpop.eup %2848 }
 0x2e9   : > { %4983 = vst [vmem:[#allocation28_spill] sm:$0xff] %v3652_v39  ;;  %877 = vmax.xlane.f32.xlu0 %v876_v42  ;;  %v1116_v10 = vadd.f32 %v3652_v39, %v3648_v55 }
 0x2ec   : > { %v3650_v11 = vpop.f32.mrf.mxu1 }
 0x2ed   : > { %1117 = vadd.xlane.f32.xlu2 %v1116_v10 }
 0x2ee   : > { %v3656_v57 = vpop.f32.mrf.mxu2 }
 0x2f4   : > { %v3658_v48 = vpop.f32.mrf.mxu1 }
 0x2f6   : > { %v3660_v46 = vpop.f32.mrf.mxu2 }
 0x2f7   : > { %1770 = vmatmul.bf16.gmra.mxu1 %v1731_v30  ;;  %v1361_v30 = vpop.permute.xlu0 %1360 }
 0x2fc   : > { %v3662_v38 = vpop.f32.mrf.mxu1 }
 0x2fd   : > { %1356 = vrot.lane.b32.xlu0 %v3312_v31, %s3084_s7 }
 0x2fe   : > { %v3666_v52 = vpop.f32.mrf.mxu2 }
 0x304   : > { %v3668_v42 = vpop.f32.mrf.mxu1 }
 0x305   : > { %1358 = vrot.lane.b32.xlu2 %v3252_v51, %s3084_s7 }
 0x306   : > { %v3672_v10 = vpop.f32.mrf.mxu2 }
 0x30c   : > { %v3674_v21 = vpop.f32.mrf.mxu1 }
 0x30d   : > { %4984 = vst [vmem:[#allocation29_spill] sm:$0xff] %v3674_v21 }
 0x30e   : > { %v3676_v41 = vpop.f32.mrf.mxu2 }
 0x312   : > { %v836_v23 = vpop.xlane.xlu0 %835 }
 0x314   : > { %v3678_v63 = vpop.f32.mrf.mxu1 }
 0x315   : > { %4985 = vst [vmem:[#allocation30_spill] sm:$0xff] %v3678_v63 }
 0x316   : > { %v3680_v17 = vpop.f32.mrf.mxu2 }
 0x317   : > { %v824_v31 = vpop.xlane.xlu2 %823 }
 0x318   : > { %v918_v40 = vsub.f32 %v3484_v37, %v824_v31  ;;  %v919_v45 = vsub.f32 %v3498_v33, %v824_v31 }
 0x31a   : > { %v982_v51 = vmul.f32 1.442695, %v918_v40  ;;  %v984_v49 = vmul.f32 1.442695, %v919_v45  ;;  %v3686_v50 = vpop.xlane.xlu0 %841  ;;  %v920_v40 = vsub.f32 %v3490_v59, %v827_v22  ;;  %v921_v45 = vsub.f32 %v3502_v9, %v827_v22 }
 0x31b   : > { %v926_v22 = vsub.f32 %v3506_v28, %v836_v23  ;;  %v927_v9 = vsub.f32 %v3528_v20, %v836_v23 }
 0x31c   : > { %v3682_v29 = vpop.f32.mrf.mxu1  ;;  %2850 = vpow2.f32 %v982_v51 }
 0x31d   : > { %2852 = vpow2.f32 %v984_v49  ;;  %v1000_v28 = vmul.f32 1.442695, %v927_v9  ;;  %v839_v9 = vpop.xlane.xlu1 %838 }
 0x31e   : > { %v3688_v34 = vpop.f32.mrf.mxu2 }
 0x31f   : > { %4986 = vst [vmem:[#allocation31_spill] sm:$0xff] %v3688_v34  ;;  %v833_v55 = vpop.xlane.xlu2 %832 }
 0x320   : > { %v924_v2 = vsub.f32 %v3500_v8, %v833_v55  ;;  %v925_v44 = vsub.f32 %v3518_v14, %v833_v55  ;;  %v986_v14 = vmul.f32 1.442695, %v920_v40  ;;  %v873_v40 = vmax.f32 %v3618_v43, %v3639_v35 }
 0x322   : > { %v3694_v56 = vpop.eup %2850  ;;  %v994_v37 = vmul.f32 1.442695, %v924_v2  ;;  %v996_v47 = vmul.f32 1.442695, %v925_v44  ;;  %v3704_v8 = vpop.xlane.xlu0 %847  ;;  %v988_v44 = vmul.f32 1.442695, %v921_v45 }
 0x323   : > { %v3696_v33 = vpop.eup %2852  ;;  %v998_v45 = vmul.f32 1.442695, %v926_v22 }
 0x324   : > { %v3690_v39 = vpop.f32.mrf.mxu1  ;;  %2854 = vpow2.f32 %v994_v37  ;;  %v1110_v49 = vadd.f32 %v3696_v33, %v3694_v56  ;;  %v897_v37 = vmax.f32 %v3674_v21, %v3688_v34 }
 0x325   : > { %4987 = vst [vmem:[#allocation32_spill] sm:$0xff] %v3690_v39  ;;  %2856 = vpow2.f32 %v996_v47 }
 0x326   : > { %v3702_v31 = vpop.f32.mrf.mxu2  ;;  %1111 = vadd.xlane.f32.xlu1 %v1110_v49  ;;  %2858 = vpow2.f32 %v986_v14 }
 0x327   : > { %4988 = vst [vmem:[#allocation33_spill] sm:$0xff] %v3702_v31  ;;  %v1363_v55 = vpop.permute.xlu2 %1362  ;;  %2860 = vpow2.f32 %v988_v44  ;;  %v900_v44 = vmax.f32 %v3678_v63, %v3702_v31  ;;  %v930_v31 = vsub.f32 %v3520_v15, %v3686_v50  ;;  %v931_v63 = vsub.f32 %v3542_v60, %v3686_v50 }
 0x328   : > { %1472 = vmatpush.bf16.msrb.mxu0 %v1363_v55  ;;  %2862 = vpow2.f32 %v998_v45  ;;  %v882_v55 = vmax.f32 %v3642_v53, %v3660_v46  ;;  %v928_v45 = vsub.f32 %v3516_v13, %v839_v9  ;;  %v879_v13 = vmax.f32 %v3634_v3, %v3656_v57 }
 0x329   : > { %2864 = vpow2.f32 %v1000_v28  ;;  %v1008_v15 = vmul.f32 1.442695, %v931_v63  ;;  %v888_v63 = vmax.f32 %v3658_v48, %v3672_v10 }
 0x32a   : > { %v3708_v51 = vpop.eup %2854  ;;  %v3726_v20 = vpop.xlane.xlu0 %853  ;;  %v1002_v21 = vmul.f32 1.442695, %v928_v45 }
 0x32b   : > { %v3711_v59 = vpop.eup %2856 }
 0x32c   : > { %v3706_v2 = vpop.f32.mrf.mxu1  ;;  %1473 = vmatpush.bf16.msrb.mxu0 %v1361_v30  ;;  %v1119_v47 = vadd.f32 %v3711_v59, %v3708_v51  ;;  %v3724_v23 = vpop.eup %2858  ;;  %2866 = vpow2.f32 %v1002_v21 }
 0x32d   : > { %4989 = vst [vmem:[#allocation34_spill] sm:$0xff] %v3706_v2  ;;  %v3728_v30 = vpop.eup %2860 }
 0x32e   : > { %1120 = vadd.xlane.f32.xlu0 %v1119_v47  ;;  %898 = vmax.xlane.f32.xlu2 %v897_v37  ;;  %v3720_v49 = vpop.f32.mrf.mxu2  ;;  %v1113_v22 = vadd.f32 %v3728_v30, %v3724_v23  ;;  %v3738_v37 = vpop.eup %2862 }
 0x32f   : > { %874 = vmax.xlane.f32.xlu1 %v873_v40  ;;  %v3740_v40 = vpop.eup %2864 }
 0x332   : > { %v3749_v34 = vpop.xlane.xlu0 %859  ;;  %v3770_v21 = vpop.eup %2866 }
 0x334   : > { %v3722_v14 = vpop.f32.mrf.mxu1 }
 0x335   : > { %4990 = vst [vmem:[#allocation35_spill] sm:$0xff] %v3722_v14 }
 0x336   : > { %883 = vmax.xlane.f32.xlu0 %v882_v55  ;;  %901 = vmax.xlane.f32.xlu2 %v900_v44  ;;  %v3743_v28 = vpop.f32.mrf.mxu2  ;;  %v929_v55 = vsub.f32 %v3532_v32, %v839_v9  ;;  %v1122_v44 = vadd.f32 %v3740_v40, %v3738_v37  ;;  %v934_v32 = vsub.f32 %v3536_v58, %v3704_v8 }
 0x337   : > { %1114 = vadd.xlane.f32.xlu1 %v1113_v22  ;;  %4992 = vst [vmem:[#allocation37_spill] sm:$0xff] %v3743_v28  ;;  %v906_v22 = vmax.f32 %v3690_v39, %v3743_v28  ;;  %v935_v9 = vsub.f32 %v3556_v26, %v3704_v8 }
 0x338   : > { %v1004_v60 = vmul.f32 1.442695, %v929_v55  ;;  %v1014_v55 = vmul.f32 1.442695, %v934_v32  ;;  %v939_v32 = vsub.f32 %v3576_v19, %v3726_v20 }
 0x33c   : > { %v3736_v47 = vpop.f32.mrf.mxu1  ;;  %v3764_v45 = vpop.xlane.xlu0 %865 }
 0x33d   : > { %4991 = vst [vmem:[#allocation36_spill] sm:$0xff] %v3736_v47  ;;  %v1006_v47 = vmul.f32 1.442695, %v930_v31  ;;  %v845_v31 = vpop.xlane.xlu1 %844 }
 0x33e   : > { %1123 = vadd.xlane.f32.xlu0 %v1122_v44  ;;  %907 = vmax.xlane.f32.xlu2 %v906_v22  ;;  %v885_v44 = vmax.f32 %v3650_v11, %v3666_v52  ;;  %v932_v58 = vsub.f32 %v3530_v25, %v845_v31 }
 0x33f   : > { %880 = vmax.xlane.f32.xlu1 %v879_v13  ;;  %2868 = vpow2.f32 %v1006_v47  ;;  %v1016_v47 = vmul.f32 1.442695, %v935_v9  ;;  %v933_v9 = vsub.f32 %v3546_v62, %v845_v31 }
 0x340   : > { %2870 = vpow2.f32 %v1008_v15  ;;  %v938_v15 = vsub.f32 %v3550_v1, %v3726_v20 }
 0x341   : > { %2872 = vpow2.f32 %v1004_v60  ;;  %v1010_v60 = vmul.f32 1.442695, %v932_v58 }
 0x342   : > { %2874 = vpow2.f32 %v1014_v55  ;;  %v1022_v39 = vmul.f32 1.442695, %v938_v15 }
 0x343   : > { %2876 = vpow2.f32 %v1016_v47  ;;  %v1024_v47 = vmul.f32 1.442695, %v939_v32 }
 0x344   : > { %v3758_v50 = vpop.f32.mrf.mxu1  ;;  %2878 = vpow2.f32 %v1010_v60 }
 0x345   : > { %v3775_v26 = vpop.eup %2868  ;;  %v851_v60 = vpop.xlane.xlu1 %850 }
 0x346   : > { %889 = vmax.xlane.f32.xlu0 %v888_v63  ;;  %v3777_v8 = vpop.eup %2870 }
 0x347   : > { %886 = vmax.xlane.f32.xlu1 %v885_v44  ;;  %v3779_v13 = vpop.eup %2872  ;;  %v1128_v28 = vadd.f32 %v3777_v8, %v3775_v26 }
 0x348   : > { %v1125_v55 = vadd.f32 %v3779_v13, %v3770_v21  ;;  %v3794_v62 = vpop.eup %2874 }
 0x34c   : > { %v3773_v22 = vpop.f32.mrf.mxu1  ;;  %v872_v25 = vpop.xlane.xlu0 %871 }
 0x34d   : > { %v950_v63 = vsub.f32 %v3606_v0, %v872_v25  ;;  %v951_v44 = vsub.f32 %v3629_v6, %v872_v25  ;;  %v1012_v0 = vmul.f32 1.442695, %v933_v9  ;;  %v3796_v6 = vpop.eup %2876 }
 0x34e   : > { %1129 = vadd.xlane.f32.xlu0 %v1128_v28  ;;  %v1134_v20 = vadd.f32 %v3796_v6, %v3794_v62  ;;  %v3800_v31 = vpop.eup %2878  ;;  %v891_v28 = vmax.f32 %v3662_v38, %v3676_v41 }
 0x34f   : > { %v1046_v1 = vmul.f32 1.442695, %v950_v63  ;;  %v1048_v58 = vmul.f32 1.442695, %v951_v44  ;;  %1126 = vadd.xlane.f32.xlu1 %v1125_v55  ;;  %v936_v44 = vsub.f32 %v3544_v61, %v851_v60 }
 0x351   : > { %2880 = vpow2.f32 %v1046_v1  ;;  %v942_v1 = vsub.f32 %v3566_v36, %v3749_v34 }
 0x352   : > { %2882 = vpow2.f32 %v1048_v58  ;;  %v943_v58 = vsub.f32 %v3596_v5, %v3749_v34 }
 0x353   : > { %2884 = vpow2.f32 %v1022_v39  ;;  %v1030_v61 = vmul.f32 1.442695, %v942_v1 }
 0x354   : > { %v3792_v19 = vpop.f32.mrf.mxu1  ;;  %2886 = vpow2.f32 %v1024_v47  ;;  %v937_v47 = vsub.f32 %v3562_v27, %v851_v60 }
 0x355   : > { %2888 = vpow2.f32 %v1012_v0 }
 0x356   : > { %1135 = vadd.xlane.f32.xlu0 %v1134_v20  ;;  %v1018_v20 = vmul.f32 1.442695, %v936_v44  ;;  %v1020_v36 = vmul.f32 1.442695, %v937_v47  ;;  %v903_v44 = vmax.f32 %v3682_v29, %v3720_v49 }
 0x357   : > { %v3804_v15 = vpop.eup %2880  ;;  %892 = vmax.xlane.f32.xlu1 %v891_v28 }
 0x358   : > { %4993 = vst [vmem:[#allocation38_spill] sm:$0xff] %v3804_v15  ;;  %v3806_v32 = vpop.eup %2882  ;;  %2890 = vpow2.f32 %v1018_v20 }
 0x359   : > { %4994 = vst [vmem:[#allocation39_spill] sm:$0xff] %v3806_v32  ;;  %v3810_v39 = vpop.eup %2884  ;;  %v1158_v9 = vadd.f32 %v3806_v32, %v3804_v15  ;;  %v857_v15 = vpop.xlane.xlu1 %856  ;;  %v1032_v32 = vmul.f32 1.442695, %v943_v58  ;;  %2892 = vpow2.f32 %v1030_v61 }
 0x35a   : > { %v3814_v63 = vpop.eup %2886  ;;  %v940_v5 = vsub.f32 %v3558_v18, %v857_v15  ;;  %v941_v60 = vsub.f32 %v3584_v24, %v857_v15 }
 0x35b   : > { %v3817_v55 = vpop.eup %2888  ;;  %1159 = vadd.xlane.f32.xlu2 %v1158_v9  ;;  %v1140_v0 = vadd.f32 %v3814_v63, %v3810_v39  ;;  %2894 = vpow2.f32 %v1032_v32 }
 0x35c   : > { %v3808_v25 = vpop.f32.mrf.mxu1  ;;  %v1131_v28 = vadd.f32 %v3817_v55, %v3800_v31  ;;  %2896 = vpow2.f32 %v1020_v36  ;;  %v3841_v1 = vpop.xlane.xlu0 %877  ;;  %v1026_v47 = vmul.f32 1.442695, %v940_v5  ;;  %v946_v36 = vsub.f32 %v3588_v4, %v3764_v45 }
 0x35e   : > { %1141 = vadd.xlane.f32.xlu0 %v1140_v0  ;;  %v3843_v58 = vpop.eup %2890  ;;  %v1028_v0 = vmul.f32 1.442695, %v941_v60  ;;  %2898 = vpow2.f32 %v1026_v47 }
 0x35f   : > { %1132 = vadd.xlane.f32.xlu1 %v1131_v28  ;;  %v3845_v32 = vpop.eup %2892 }
 0x360   : > { %v3831_v34 = vpop.xlane.xlu2 %1117  ;;  %4995 = vst [vmem:[#allocation40_spill] sm:$0xff] %v3845_v32  ;;  %2900 = vpow2.f32 %v1028_v0 }
 0x361   : > { %v3850_v20 = vpop.eup %2894 }
 0x362   : > { %v3853_v61 = vpop.eup %2896 }
 0x364   : > { %v1766_v14 = vpop.f32.mrf.mxu1 }
 0x365   : > { %v3829_v9 = vadd.f32 %v1766_v14, %v3758_v50  ;;  %v894_v14 = vmax.f32 %v3668_v42, %v3680_v17  ;;  %v863_v50 = vpop.xlane.xlu1 %862 }
 0x366   : > { %904 = vmax.xlane.f32.xlu0 %v903_v44  ;;  %v944_v28 = vsub.f32 %v3578_v54, %v863_v50  ;;  %v945_v5 = vsub.f32 %v3602_v12, %v863_v50  ;;  %v1137_v54 = vadd.f32 %v3853_v61, %v3843_v58  ;;  %v1038_v44 = vmul.f32 1.442695, %v946_v36  ;;  %v3867_v12 = vpop.eup %2898  ;;  %v4997_v36 = vld [vmem:[#allocation24_spill] sm:$0xff] }
 0x367   : > { %v1776_v27 = vsel %vm345_vm0, %v3829_v9, -inf  ;;  %895 = vmax.xlane.f32.xlu1 %v894_v14  ;;  %v3871_v50 = vpop.eup %2900 }
 0x368   : > { %1777 = vmax.xlane.f32.xlu2 %v1776_v27  ;;  %v1359_v15 = vpop.permute.xlu2 %1358  ;;  %v947_v27 = vsub.f32 %v3613_v16, %v3764_v45  ;;  %v1034_v60 = vmul.f32 1.442695, %v944_v28  ;;  %v1036_v47 = vmul.f32 1.442695, %v945_v5  ;;  %v3869_v45 = vpop.f32.mrf.mxu2  ;;  %v1143_v5 = vadd.f32 %v3871_v50, %v3867_v12 }
 0x369   : > { %1474 = vmatpush.bf16.msrb.mxu0 %v1359_v15  ;;  %4996 = vst [vmem:[#allocation41_spill] sm:$0xff] %v3869_v45 }
 0x36a   : > { %2902 = vpow2.f32 %v1034_v60 }
 0x36b   : > { %2904 = vpow2.f32 %v1038_v44 }
 0x36c   : > { %v1768_v18 = vpop.f32.mrf.mxu1 }
 0x36d   : > { %v3848_v24 = vadd.f32 %v1768_v18, %v3773_v22  ;;  %v1146_v22 = vadd.f32 %v3850_v20, %v3845_v32  ;;  %v1040_v18 = vmul.f32 1.442695, %v947_v27  ;;  %v869_v15 = vpop.xlane.xlu1 %868 }
 0x36e   : > { %v948_v28 = vsub.f32 %v3598_v7, %v869_v15  ;;  %v949_v27 = vsub.f32 %v4997_v36, %v869_v15  ;;  %v5000_v36 = vld [vmem:[#allocation7_spill] sm:$0xff] }
 0x36f   : > { %1147 = vadd.xlane.f32.xlu0 %v1146_v22  ;;  %v1357_v14 = vpop.permute.xlu0 %1356  ;;  %1138 = vadd.xlane.f32.xlu1 %v1137_v54  ;;  %2906 = vpow2.f32 %v1040_v18 }
 0x370   : > { %1475 = vmatpush.bf16.msrb.mxu0 %v1357_v14  ;;  %2908 = vpow2.f32 %v1036_v47  ;;  %v3881_v22 = vpop.eup %2902  ;;  %v1042_v60 = vmul.f32 1.442695, %v948_v28  ;;  %v1044_v44 = vmul.f32 1.442695, %v949_v27 }
 0x371   : > { %v3883_v54 = vpop.eup %2904 }
 0x372   : > { %4998 = vst [vmem:[#allocation24_spill] sm:$0xff] %v3883_v54  ;;  %2910 = vpow2.f32 %v1042_v60 }
 0x373   : > { %2912 = vpow2.f32 %v1044_v44  ;;  %v5001_v44 = vld [vmem:[#allocation25_spill] sm:$0xff] }
 0x374   : > { %v1771_v4 = vpop.f32.mrf.mxu1  ;;  %2914 = vrcp.f32 %v3831_v34 }
 0x375   : > { %v3865_v16 = vadd.f32 %v1771_v4, %v3792_v19  ;;  %v909_v19 = vmax.f32 %v3706_v2, %v3869_v45  ;;  %v3885_v14 = vpop.eup %2906 }
 0x376   : > { %v3887_v7 = vpop.eup %2908  ;;  %v1152_v18 = vadd.f32 %v3885_v14, %v3883_v54 }
 0x377   : > { %v1782_v0 = vsel %vm345_vm0, %v3865_v16, -inf  ;;  %910 = vmax.xlane.f32.xlu0 %v909_v19  ;;  %1144 = vadd.xlane.f32.xlu1 %v1143_v5  ;;  %v1149_v4 = vadd.f32 %v3887_v7, %v3881_v22 }
 0x378   : > { %1783 = vmax.xlane.f32.xlu2 %v1782_v0  ;;  %v3893_v47 = vpop.eup %2910 }
 0x379   : > { %4999 = vst [vmem:[#allocation42_spill] sm:$0xff] %v3893_v47  ;;  %v3895_v15 = vpop.eup %2912 }
 0x37a   : > { %v1155_v0 = vadd.f32 %v3895_v15, %v3893_v47  ;;  %v2915_v2 = vpop.eup %2914 }
 0x37f   : > { %1153 = vadd.xlane.f32.xlu0 %v1152_v18  ;;  %1150 = vadd.xlane.f32.xlu1 %v1149_v4  ;;  %v954_v18 = vsub.f32 %v5001_v44, %v3841_v1 }
 0x387   : > { %1156 = vadd.xlane.f32.xlu1 %v1155_v0  ;;  %v5002_v0 = vld [vmem:[#allocation26_spill] sm:$0xff] }
 0x388   : > { %v955_v54 = vsub.f32 %v5002_v0, %v3841_v1 }
 0x399   : > { %v1112_v28 = vpop.xlane.xlu1 %1111 }
 0x3a0   : > { %1354 = vrot.lane.b32.xlu1 %v5000_v36, %s3084_s7  ;;  %v1054_v36 = vmul.f32 1.442695, %v954_v18 }
 0x3a1   : > { %v1121_v27 = vpop.xlane.xlu0 %1120 }
 0x3a2   : > { %v875_v19 = vpop.xlane.xlu1 %874  ;;  %2916 = vrcp.f32 %v1121_v27  ;;  %v5003_v27 = vld [vmem:[#allocation28_spill] sm:$0xff] }
 0x3a3   : > { %v952_v5 = vsub.f32 %v3618_v43, %v875_v19  ;;  %v953_v60 = vsub.f32 %v3639_v35, %v875_v19  ;;  %v3909_v32 = vmul.f32 %v2915_v2, %v5003_v27  ;;  %v1056_v35 = vmul.f32 1.442695, %v955_v54 }
 0x3a5   : > { %v1050_v4 = vmul.f32 1.442695, %v952_v5  ;;  %v1052_v45 = vmul.f32 1.442695, %v953_v60  ;;  %5004 = vst [vmem:[#allocation7_spill] sm:$0xff] %v3909_v32 }
 0x3a7   : > { %2918 = vpow2.f32 %v1050_v4 }
 0x3a8   : > { %v2917_v34 = vpop.eup %2916  ;;  %2920 = vpow2.f32 %v1052_v45 }
 0x3a9   : > { %2922 = vrcp.f32 %v1112_v28  ;;  %v884_v47 = vpop.xlane.xlu0 %883  ;;  %v3912_v43 = vmul.f32 %v2917_v34, %v3711_v59 }
 0x3aa   : > { %v1115_v19 = vpop.xlane.xlu1 %1114 }
 0x3ab   : > { %5005 = vst [vmem:[#allocation25_spill] sm:$0xff] %v3912_v43  ;;  %2924 = vrcp.f32 %v1115_v19  ;;  %v958_v19 = vsub.f32 %v3642_v53, %v884_v47 }
 0x3ac   : > { %2926 = vpow2.f32 %v1054_v36 }
 0x3ad   : > { %v3916_v60 = vpop.eup %2918  ;;  %2928 = vpow2.f32 %v1056_v35 }
 0x3ae   : > { %v3918_v1 = vpop.eup %2920 }
 0x3af   : > { %v2923_v45 = vpop.eup %2922  ;;  %v1161_v28 = vadd.f32 %v3918_v1, %v3916_v60 }
 0x3b0   : > { %v1238_v54 = vmul.f32 %v2923_v45, %v3694_v56  ;;  %v3927_v27 = vmul.f32 %v2923_v45, %v3696_v33 }
 0x3b1   : > { %v2925_v44 = vpop.eup %2924  ;;  %1162 = vadd.xlane.f32.xlu0 %v1161_v28  ;;  %v1124_v59 = vpop.xlane.xlu0 %1123  ;;  %v959_v28 = vsub.f32 %v3660_v46, %v884_v47  ;;  %v1779_v47 = vsel %vm345_vm0, %v3848_v24, -inf }
 0x3b2   : > { %v881_v18 = vpop.xlane.xlu1 %880  ;;  %v1240_v4 = vmul.f32 %v2925_v44, %v3724_v23  ;;  %v3924_v0 = vpop.eup %2926  ;;  %v3930_v36 = vmul.f32 %v2925_v44, %v3728_v30  ;;  %v1062_v30 = vmul.f32 1.442695, %v958_v19 }
 0x3b3   : > { %v3932_v35 = vpop.eup %2928  ;;  %v956_v23 = vsub.f32 %v3634_v3, %v881_v18  ;;  %v957_v32 = vsub.f32 %v3656_v57, %v881_v18  ;;  %v1064_v45 = vmul.f32 1.442695, %v959_v28  ;;  %v3942_v46 = vpop.xlane.xlu2 %898  ;;  %v5006_v28 = vld [vmem:[#allocation27_spill] sm:$0xff] }
 0x3b4   : > { %v1302_v5 = vpack.c.bf16 %v1240_v4, %v1238_v54  ;;  %v1164_v33 = vadd.f32 %v3932_v35, %v3924_v0  ;;  %2930 = vpow2.f32 %v1062_v30 }
 0x3b5   : > { %v1058_v43 = vmul.f32 1.442695, %v956_v23  ;;  %v1060_v54 = vmul.f32 1.442695, %v957_v32  ;;  %2932 = vpow2.f32 %v1064_v45  ;;  %v1242_v23 = vmul.f32 %v2915_v2, %v5006_v28 }
 0x3b6   : > { %1390 = vmatmul.bf16.vlgmr.msra.gmra.mxu3 %v1302_v5  ;;  %v1244_v5 = vmul.f32 %v2917_v34, %v3708_v51 }
 0x3b7   : > { %2934 = vpow2.f32 %v1058_v43 }
 0x3b8   : > { %2936 = vpow2.f32 %v1060_v54 }
 0x3b9   : > { %1165 = vadd.xlane.f32.xlu0 %v1164_v33  ;;  %v890_v44 = vpop.xlane.xlu0 %889  ;;  %2938 = vrcp.f32 %v1124_v59 }
 0x3ba   : > { %v887_v53 = vpop.xlane.xlu1 %886  ;;  %v3949_v4 = vpop.eup %2930  ;;  %v962_v51 = vsub.f32 %v3658_v48, %v890_v44  ;;  %v963_v34 = vsub.f32 %v3672_v10, %v890_v44 }
 0x3bb   : > { %v960_v3 = vsub.f32 %v3650_v11, %v887_v53  ;;  %v961_v57 = vsub.f32 %v3666_v52, %v887_v53  ;;  %v3952_v43 = vpop.eup %2932  ;;  %v1304_v52 = vpack.c.bf16 %v1244_v5, %v1242_v23  ;;  %v3960_v45 = vpop.xlane.xlu2 %901 }
 0x3bc   : > { %v1170_v2 = vadd.f32 %v3952_v43, %v3949_v4  ;;  %v1072_v48 = vmul.f32 1.442695, %v963_v34 }
 0x3bd   : > { %v1066_v32 = vmul.f32 1.442695, %v960_v3  ;;  %v1068_v11 = vmul.f32 1.442695, %v961_v57  ;;  %v3954_v33 = vpop.eup %2934  ;;  %v1773_v3 = vpop.f32.mrf.mxu1  ;;  %v1070_v57 = vmul.f32 1.442695, %v962_v51 }
 0x3be   : > { %v3956_v30 = vpop.eup %2936  ;;  %v3977_v23 = vadd.f32 %v1773_v3, %v3808_v25 }
 0x3bf   : > { %v2939_v59 = vpop.eup %2938  ;;  %v1167_v53 = vadd.f32 %v3956_v30, %v3954_v33 }
 0x3c0   : > { %v3967_v10 = vmul.f32 %v2939_v59, %v3740_v40 }
 0x3c1   : > { %1780 = vmax.xlane.f32.xlu0 %v1779_v47  ;;  %v1130_v18 = vpop.xlane.xlu0 %1129 }
 0x3c2   : > { %v1127_v19 = vpop.xlane.xlu1 %1126 }
 0x3c3   : > { %2940 = vrcp.f32 %v1127_v19  ;;  %v3988_v25 = vpop.xlane.xlu2 %907 }
 0x3c4   : > { %2942 = vpow2.f32 %v1066_v32 }
 0x3c5   : > { %2944 = vpow2.f32 %v1068_v11 }
 0x3c6   : > { %1395 = vmatmul.bf16.gmra.mxu3 %v1304_v52  ;;  %2946 = vpow2.f32 %v1070_v57 }
 0x3c7   : > { %2948 = vpow2.f32 %v1072_v48 }
 0x3c9   : > { %v2941_v54 = vpop.eup %2940  ;;  %1171 = vadd.xlane.f32.xlu0 %v1170_v2  ;;  %v1136_v47 = vpop.xlane.xlu0 %1135 }
 0x3ca   : > { %1168 = vadd.xlane.f32.xlu1 %v1167_v53  ;;  %v893_v5 = vpop.xlane.xlu1 %892  ;;  %v3970_v44 = vmul.f32 %v2941_v54, %v3779_v13  ;;  %v3974_v28 = vpop.eup %2942  ;;  %v1248_v13 = vmul.f32 %v2941_v54, %v3770_v21  ;;  %v1246_v53 = vmul.f32 %v2939_v59, %v3738_v37 }
 0x3cb   : > { %v964_v32 = vsub.f32 %v3662_v38, %v893_v5  ;;  %v965_v19 = vsub.f32 %v3676_v41, %v893_v5  ;;  %v3981_v52 = vpop.eup %2944  ;;  %v1785_v38 = vsel %vm345_vm0, %v3977_v23, -inf }
 0x3cc   : > { %v1173_v41 = vadd.f32 %v3981_v52, %v3974_v28  ;;  %v3991_v3 = vpop.eup %2946  ;;  %v1306_v48 = vpack.c.bf16 %v1248_v13, %v1246_v53 }
 0x3cd   : > { %v1074_v40 = vmul.f32 1.442695, %v964_v32  ;;  %v1076_v51 = vmul.f32 1.442695, %v965_v19  ;;  %v3993_v57 = vpop.eup %2948 }
 0x3ce   : > { %v1176_v54 = vadd.f32 %v3993_v57, %v3991_v3  ;;  %v4003_v37 = vpop.xlane.xlu2 %1159 }
 0x3cf   : > { %2950 = vpow2.f32 %v1074_v40 }
 0x3d0   : > { %2952 = vpow2.f32 %v1076_v51 }
 0x3d1   : > { %2954 = vrcp.f32 %v1130_v18  ;;  %1786 = vmax.xlane.f32.xlu0 %v1785_v38  ;;  %v1142_v34 = vpop.xlane.xlu0 %1141 }
 0x3d2   : > { %1174 = vadd.xlane.f32.xlu1 %v1173_v41  ;;  %v1133_v2 = vpop.xlane.xlu1 %1132 }
 0x3d3   : > { %2956 = vrcp.f32 %v1133_v2 }
 0x3d5   : > { %v3995_v5 = vpop.eup %2950 }
 0x3d6   : > { %v3997_v32 = vpop.eup %2952  ;;  %1400 = vmatmul.bf16.gmra.mxu3 %v1306_v48 }
 0x3d7   : > { %v2955_v21 = vpop.eup %2954  ;;  %v1179_v18 = vadd.f32 %v3997_v32, %v3995_v5 }
 0x3d8   : > { %v4008_v51 = vmul.f32 %v2955_v21, %v3777_v8 }
 0x3d9   : > { %v2957_v19 = vpop.eup %2956  ;;  %1180 = vadd.xlane.f32.xlu2 %v1179_v18  ;;  %v4005_v59 = vpop.xlane.xlu0 %904 }
 0x3da   : > { %v896_v40 = vpop.xlane.xlu1 %895  ;;  %1177 = vadd.xlane.f32.xlu1 %v1176_v54  ;;  %v4011_v38 = vmul.f32 %v2957_v19, %v3817_v55  ;;  %v1252_v18 = vmul.f32 %v2957_v19, %v3800_v31  ;;  %v1250_v55 = vmul.f32 %v2955_v21, %v3775_v26 }
 0x3db   : > { %v966_v41 = vsub.f32 %v3668_v42, %v896_v40  ;;  %v967_v13 = vsub.f32 %v3680_v17, %v896_v40  ;;  %v4018_v54 = vpop.xlane.xlu2 %1777  ;;  %v5007_v17 = vld [vmem:[#allocation5_spill] sm:$0xff] }
 0x3dc   : > { %v1309_v2 = vpack.c.bf16 %v4011_v38, %v4008_v51  ;;  %v1308_v42 = vpack.c.bf16 %v1252_v18, %v1250_v55 }
 0x3dd   : > { %v1078_v53 = vmul.f32 1.442695, %v966_v41  ;;  %v1080_v48 = vmul.f32 1.442695, %v967_v13 }
 0x3df   : > { %2958 = vpow2.f32 %v1078_v53 }
 0x3e0   : > { %2960 = vpow2.f32 %v1080_v48 }
 0x3e1   : > { %2962 = vrcp.f32 %v1136_v47 }
 0x3e2   : > { %v1139_v8 = vpop.xlane.xlu1 %1138  ;;  %v1148_v11 = vpop.xlane.xlu0 %1147 }
 0x3e3   : > { %2964 = vrcp.f32 %v1139_v8 }
 0x3e4   : > { %2966 = vrcp.f32 %v1142_v34 }
 0x3e5   : > { %v4021_v56 = vpop.eup %2958  ;;  %1352 = vrot.lane.b32.xlu0 %v5007_v17, %s3084_s7 }
 0x3e6   : > { %v4025_v40 = vpop.eup %2960  ;;  %1405 = vmatmul.bf16.gmra.mxu3 %v1308_v42 }
 0x3e7   : > { %v2963_v41 = vpop.eup %2962  ;;  %v1182_v31 = vadd.f32 %v4025_v40, %v4021_v56 }
 0x3e8   : > { %v4030_v26 = vmul.f32 %v2963_v41, %v3796_v6 }
 0x3e9   : > { %v2965_v47 = vpop.eup %2964  ;;  %1183 = vadd.xlane.f32.xlu1 %v1182_v31 }
 0x3ea   : > { %v1145_v13 = vpop.xlane.xlu1 %1144  ;;  %v4033_v21 = vmul.f32 %v2965_v47, %v3853_v61  ;;  %v4038_v48 = vpop.xlane.xlu0 %910  ;;  %v1256_v55 = vmul.f32 %v2965_v47, %v3843_v58  ;;  %v5008_v61 = vld [vmem:[#allocation6_spill] sm:$0xff] }
 0x3eb   : > { %v1784_v19 = vpop.xlane.xlu2 %1783  ;;  %2968 = vrcp.f32 %v1145_v13  ;;  %v2967_v8 = vpop.eup %2966 }
 0x3ec   : > { %v4036_v53 = vsub.f32 %v1784_v19, %v3865_v16  ;;  %v1311_v18 = vpack.c.bf16 %v4033_v21, %v4030_v26  ;;  %2970 = vrcp.f32 %v1148_v11  ;;  %v1254_v16 = vmul.f32 %v2963_v41, %v3794_v62 }
 0x3ed   : > { %v4049_v17 = vmul.f32 %v2967_v8, %v3814_v63 }
 0x3ee   : > { %v1798_v34 = vsel %vm345_vm0, %v4036_v53, -inf  ;;  %v1310_v19 = vpack.c.bf16 %v1256_v55, %v1254_v16 }
 0x3f1   : > { %v2969_v6 = vpop.eup %2968  ;;  %1350 = vrot.lane.b32.xlu2 %v5008_v61, %s3084_s7  ;;  %1799 = vmax.xlane.f32.xlu1 %v1798_v34 }
 0x3f2   : > { %v1151_v42 = vpop.xlane.xlu1 %1150  ;;  %v4052_v31 = vmul.f32 %v2969_v6, %v3871_v50  ;;  %v1154_v47 = vpop.xlane.xlu0 %1153  ;;  %v1260_v41 = vmul.f32 %v2969_v6, %v3867_v12  ;;  %v973_v12 = vsub.f32 %v3720_v49, %v4005_v59 }
 0x3f3   : > { %2972 = vrcp.f32 %v1151_v42  ;;  %v2971_v11 = vpop.eup %2970  ;;  %v1258_v42 = vmul.f32 %v2967_v8, %v3810_v39  ;;  %v5009_v39 = vld [vmem:[#allocation35_spill] sm:$0xff] }
 0x3f4   : > { %v1313_v58 = vpack.c.bf16 %v4052_v31, %v4049_v17  ;;  %2974 = vrcp.f32 %v1154_v47  ;;  %v4057_v61 = vmul.f32 %v2971_v11, %v3850_v20  ;;  %v4074_v47 = vpop.f32.mrf.mxu2 }
 0x3f5   : > { %v1312_v20 = vpack.c.bf16 %v1260_v41, %v1258_v42  ;;  %v4085_v41 = vsub.f32 %v4018_v54, %v3829_v9 }
 0x3f6   : > { %1410 = vmatmul.bf16.gmra.mxu3 %v1310_v19 }
 0x3f9   : > { %v2973_v13 = vpop.eup %2972 }
 0x3fa   : > { %v1157_v34 = vpop.xlane.xlu1 %1156  ;;  %v4060_v62 = vmul.f32 %v2973_v13, %v3887_v7  ;;  %v2975_v50 = vpop.eup %2974  ;;  %v1264_v6 = vmul.f32 %v2973_v13, %v3881_v22  ;;  %v5011_v22 = vld [vmem:[#allocation36_spill] sm:$0xff] }
 0x3fb   : > { %2976 = vrcp.f32 %v1157_v34  ;;  %v4067_v16 = vmul.f32 %v2975_v50, %v3885_v14  ;;  %v972_v34 = vsub.f32 %v3682_v29, %v4005_v59  ;;  %v912_v14 = vmax.f32 %v5009_v39, %v4074_v47 }
 0x3fc   : > { %v4088_v49 = vpop.f32.mrf.mxu2  ;;  %v1792_v59 = vsel %vm345_vm0, %v4085_v41, -inf }
 0x3fd   : > { %v1090_v8 = vmul.f32 1.442695, %v972_v34  ;;  %v915_v13 = vmax.f32 %v5011_v22, %v4088_v49 }
 0x3ff   : > { %2978 = vpow2.f32 %v1090_v8 }
 0x401   : > { %v2977_v55 = vpop.eup %2976 }
 0x402   : > { %v4070_v19 = vmul.f32 %v2977_v55, %v3895_v15  ;;  %v1092_v15 = vmul.f32 1.442695, %v973_v12  ;;  %v5013_v12 = vld [vmem:[#allocation24_spill] sm:$0xff] }
 0x404   : > { %2980 = vpow2.f32 %v1092_v15 }
 0x405   : > { %v4094_v34 = vpop.eup %2978  ;;  %2982 = vrcp.f32 %v4003_v37 }
 0x406   : > { %1415 = vmatmul.bf16.gmra.mxu3 %v1312_v20  ;;  %v5010_v20 = vld [vmem:[#allocation40_spill] sm:$0xff] }
 0x407   : > { %v1262_v7 = vmul.f32 %v2971_v11, %v5010_v20  ;;  %v5012_v11 = vld [vmem:[#allocation42_spill] sm:$0xff]  ;;  %v5014_v20 = vld [vmem:[#allocation32_spill] sm:$0xff] }
 0x409   : > { %v1314_v29 = vpack.c.bf16 %v1264_v6, %v1262_v7  ;;  %v1268_v7 = vmul.f32 %v2977_v55, %v5012_v11 }
 0x40a   : > { %v4096_v9 = vpop.eup %2980 }
 0x40b   : > { %v1191_v54 = vadd.f32 %v4096_v9, %v4094_v34  ;;  %v2983_v6 = vpop.eup %2982 }
 0x40f   : > { %913 = vmax.xlane.f32.xlu0 %v912_v14  ;;  %v1266_v14 = vmul.f32 %v2975_v50, %v5013_v12  ;;  %v5016_v50 = vld [vmem:[#allocation37_spill] sm:$0xff] }
 0x410   : > { %v975_v55 = vsub.f32 %v5016_v50, %v3988_v25 }
 0x411   : > { %v1316_v15 = vpack.c.bf16 %v1268_v7, %v1266_v14  ;;  %v5017_v14 = vld [vmem:[#allocation38_spill] sm:$0xff] }
 0x412   : > { %v1355_v42 = vpop.permute.xlu1 %1354  ;;  %v1096_v12 = vmul.f32 1.442695, %v975_v55 }
 0x413   : > { %1476 = vmatpush.bf16.msrb.mxu0 %v1355_v42 }
 0x416   : > { %1420 = vmatmul.bf16.gmra.mxu3 %v1314_v29  ;;  %v974_v29 = vsub.f32 %v5014_v20, %v3988_v25 }
 0x417   : > { %1793 = vmax.xlane.f32.xlu0 %v1792_v59 }
 0x418   : > { %v1094_v11 = vmul.f32 1.442695, %v974_v29  ;;  %v5018_v29 = vld [vmem:[#allocation29_spill] sm:$0xff] }
 0x41a   : > { %916 = vmax.xlane.f32.xlu2 %v915_v13  ;;  %v5015_v13 = vld [vmem:[#allocation39_spill] sm:$0xff] }
 0x41b   : > { %v4106_v63 = vmul.f32 %v2983_v6, %v5015_v13 }
 0x41f   : > { %1192 = vadd.xlane.f32.xlu0 %v1191_v54 }
 0x424   : > { %v1163_v8 = vpop.xlane.xlu0 %1162 }
 0x425   : > { %2984 = vrcp.f32 %v1163_v8  ;;  %v1270_v8 = vmul.f32 %v2983_v6, %v5017_v14  ;;  %v5019_v6 = vld [vmem:[#allocation31_spill] sm:$0xff] }
 0x426   : > { %1425 = vmatmul.bf16.gmra.mxu3 %v1316_v15  ;;  %2986 = vpow2.f32 %v1094_v11  ;;  %v969_v50 = vsub.f32 %v5019_v6, %v3942_v46 }
 0x427   : > { %2988 = vpow2.f32 %v1096_v12 }
 0x428   : > { %v1084_v12 = vmul.f32 1.442695, %v969_v50 }
 0x42b   : > { %v2985_v42 = vpop.eup %2984 }
 0x42c   : > { %v1166_v59 = vpop.xlane.xlu0 %1165  ;;  %v4109_v54 = vmul.f32 %v2985_v42, %v3918_v1  ;;  %v1272_v7 = vmul.f32 %v2985_v42, %v3916_v60  ;;  %v4122_v25 = vpop.eup %2986  ;;  %v968_v60 = vsub.f32 %v5018_v29, %v3942_v46 }
 0x42d   : > { %v4126_v42 = vpop.eup %2988  ;;  %2990 = vrcp.f32 %v1166_v59 }
 0x42e   : > { %v1319_v37 = vpack.c.bf16 %v4109_v54, %v4106_v63  ;;  %v1318_v20 = vpack.c.bf16 %v1272_v7, %v1270_v8  ;;  %v1194_v7 = vadd.f32 %v4126_v42, %v4122_v25  ;;  %v5020_v8 = vld [vmem:[#allocation30_spill] sm:$0xff] }
 0x433   : > { %v2991_v14 = vpop.eup %2990 }
 0x434   : > { %v1781_v15 = vpop.xlane.xlu0 %1780  ;;  %v1274_v29 = vmul.f32 %v2991_v14, %v3924_v0 }
 0x435   : > { %v4118_v13 = vsub.f32 %v1781_v15, %v3848_v24  ;;  %v1082_v24 = vmul.f32 1.442695, %v968_v60  ;;  %v970_v15 = vsub.f32 %v5020_v8, %v3960_v45 }
 0x436   : > { %1430 = vmatmul.bf16.gmra.mxu3 %v1318_v20 }
 0x437   : > { %v1795_v1 = vsel %vm345_vm0, %v4118_v13, -inf }
 0x438   : > { %1796 = vmax.xlane.f32.xlu2 %v1795_v1  ;;  %v5021_v1 = vld [vmem:[#allocation33_spill] sm:$0xff] }
 0x439   : > { %v971_v46 = vsub.f32 %v5021_v1, %v3960_v45 }
 0x43c   : > { %v1172_v55 = vpop.xlane.xlu0 %1171 }
 0x43d   : > { %v1169_v11 = vpop.xlane.xlu1 %1168 }
 0x43e   : > { %2992 = vrcp.f32 %v1169_v11  ;;  %v4142_v11 = vmul.f32 %v2991_v14, %v3932_v35  ;;  %v5022_v14 = vld [vmem:[#allocation34_spill] sm:$0xff] }
 0x43f   : > { %2994 = vpow2.f32 %v1082_v24  ;;  %v976_v8 = vsub.f32 %v5022_v14, %v4038_v48 }
 0x440   : > { %1195 = vadd.xlane.f32.xlu2 %v1194_v7  ;;  %2996 = vpow2.f32 %v1084_v12  ;;  %v1086_v7 = vmul.f32 1.442695, %v970_v15  ;;  %v1088_v12 = vmul.f32 1.442695, %v971_v46 }
 0x441   : > { %2998 = vrcp.f32 %v1172_v55 }
 0x444   : > { %v2993_v20 = vpop.eup %2992  ;;  %v1787_v59 = vpop.xlane.xlu0 %1786 }
 0x445   : > { %v4138_v60 = vsub.f32 %v1787_v59, %v3977_v23  ;;  %v1175_v6 = vpop.xlane.xlu1 %1174  ;;  %v1276_v50 = vmul.f32 %v2993_v20, %v3954_v33  ;;  %v4145_v24 = vmul.f32 %v2993_v20, %v3956_v30  ;;  %v4151_v23 = vpop.eup %2994  ;;  %v5023_v20 = vld [vmem:[#allocation41_spill] sm:$0xff] }
 0x446   : > { %3000 = vrcp.f32 %v1175_v6  ;;  %v4153_v33 = vpop.eup %2996  ;;  %v977_v1 = vsub.f32 %v5023_v20, %v4038_v48 }
 0x447   : > { %v1801_v45 = vsel %vm345_vm0, %v4138_v60, -inf  ;;  %v1320_v55 = vpack.c.bf16 %v1276_v50, %v1274_v29  ;;  %v1321_v0 = vpack.c.bf16 %v4145_v24, %v4142_v11  ;;  %v2999_v35 = vpop.eup %2998  ;;  %3002 = vpow2.f32 %v1086_v7 }
 0x448   : > { %1802 = vmax.xlane.f32.xlu1 %v1801_v45  ;;  %3004 = vpow2.f32 %v1088_v12  ;;  %v4160_v29 = vmul.f32 %v2999_v35, %v3952_v43  ;;  %v1185_v6 = vadd.f32 %v4153_v33, %v4151_v23  ;;  %v1098_v7 = vmul.f32 1.442695, %v976_v8 }
 0x449   : > { %1435 = vmatmul.bf16.gmra.mxu3 %v1320_v55  ;;  %v1100_v48 = vmul.f32 1.442695, %v977_v1  ;;  %v4323_v24 = vstv %s1560_s8 }
 0x44c   : > { %v3001_v30 = vpop.eup %3000  ;;  %v1181_v15 = vpop.xlane.xlu2 %1180 }
 0x44d   : > { %3006 = vrcp.f32 %v1181_v15  ;;  %v1178_v59 = vpop.xlane.xlu1 %1177  ;;  %v4163_v46 = vmul.f32 %v3001_v30, %v3981_v52  ;;  %v4169_v45 = vpop.eup %3002  ;;  %v1280_v43 = vmul.f32 %v3001_v30, %v3974_v28  ;;  %v1278_v52 = vmul.f32 %v2999_v35, %v3949_v4 }
 0x44e   : > { %3008 = vrcp.f32 %v1178_v59  ;;  %v4171_v55 = vpop.eup %3004  ;;  %v5024_v30 = vpack.c.bf16 %v3930_v36, %v3927_v27  ;;  %v5028_v36 = vpack.c.bf16 %v3970_v44, %v3967_v10 }
 0x44f   : > { %3010 = vpow2.f32 %v1098_v7  ;;  %v1188_v8 = vadd.f32 %v4171_v55, %v4169_v45  ;;  %v1322_v59 = vpack.c.bf16 %v1280_v43, %v1278_v52 }
 0x450   : > { %1186 = vadd.xlane.f32.xlu1 %v1185_v6  ;;  %3012 = vpow2.f32 %v1100_v48  ;;  %v5026_v6 = vld [vmem:[#allocation7_spill] sm:$0xff] }
 0x453   : > { %v3007_v12 = vpop.eup %3006 }
 0x454   : > { %v3009_v14 = vpop.eup %3008  ;;  %v4179_v20 = vmul.f32 %v3007_v12, %v3997_v32  ;;  %v1284_v52 = vmul.f32 %v3007_v12, %v3995_v5 }
 0x455   : > { %v4176_v15 = vmul.f32 %v3009_v14, %v3993_v57  ;;  %v4185_v28 = vpop.eup %3010  ;;  %v1351_v57 = vpop.permute.xlu2 %1350  ;;  %v1282_v7 = vmul.f32 %v3009_v14, %v3991_v3 }
 0x456   : > { %v4187_v4 = vpop.eup %3012 }
 0x457   : > { %v1353_v1 = vpop.permute.xlu0 %1352  ;;  %v1197_v32 = vadd.f32 %v4187_v4, %v4185_v28 }
 0x458   : > { %1477 = vmatpush.bf16.msrb.mxu0 %v1353_v1  ;;  %1189 = vadd.xlane.f32.xlu1 %v1188_v8  ;;  %v1324_v1 = vpack.c.bf16 %v1284_v52, %v1282_v7 }
 0x459   : > { %1440 = vmatmul.bf16.gmra.mxu3 %v1322_v59 }
 0x45c   : > { %v4189_v35 = vpop.xlane.xlu1 %1183  ;;  %1478 = vmatpush.bf16.msrb.mxu0 %v1351_v57  ;;  %v5025_v57 = vld [vmem:[#allocation25_spill] sm:$0xff] }
 0x45d   : > { %v5027_v50 = vpack.c.bf16 %v5025_v57, %v5026_v6 }
 0x45f   : > { %1479 = vmatmul.bf16.vlgmr.msrb.gmra.mxu0 %v5024_v30 }
 0x460   : > { %1198 = vadd.xlane.f32.xlu1 %v1197_v32 }
 0x464   : > { %v1800_v48 = vpop.xlane.xlu1 %1799 }
 0x465   : > { %v1806_v43 = vsub.f32 %v4036_v53, %v1800_v48 }
 0x467   : > { %v1812_v8 = vmul.f32 1.442695, %v1806_v43 }
 0x469   : > { %3014 = vpow2.f32 %v1812_v8  ;;  %1445 = vmatmul.bf16.gmra.mxu3 %v1324_v1 }
 0x46f   : > { %v4199_v59 = vpop.eup %3014  ;;  %1484 = vmatmul.bf16.gmra.mxu0 %v5027_v50 }
 0x470   : > { %v1822_v27 = vsel %vm345_vm0, %v4199_v59, 0.0 }
 0x471   : > { %1823 = vadd.xlane.f32.xlu1 %v1822_v27 }
 0x47f   : > { %1489 = vmatmul.bf16.gmra.mxu0 %v5028_v36 }
 0x482   : > { %v914_v3 = vpop.xlane.xlu0 %913 }
 0x483   : > { %v978_v5 = vsub.f32 %v5009_v39, %v914_v3  ;;  %v979_v53 = vsub.f32 %v4074_v47, %v914_v3  ;;  %v5029_v3 = vpack.c.bf16 %v4060_v62, %v4057_v61 }
 0x485   : > { %v1102_v12 = vmul.f32 1.442695, %v978_v5  ;;  %v1104_v14 = vmul.f32 1.442695, %v979_v53 }
 0x487   : > { %3016 = vpow2.f32 %v1102_v12 }
 0x488   : > { %3018 = vpow2.f32 %v1104_v14 }
 0x48a   : > { %v1794_v10 = vpop.xlane.xlu0 %1793 }
 0x48b   : > { %v1804_v48 = vsub.f32 %v4085_v41, %v1794_v10 }
 0x48d   : > { %v4211_v32 = vpop.eup %3016  ;;  %v917_v50 = vpop.xlane.xlu2 %916  ;;  %v1808_v43 = vmul.f32 1.442695, %v1804_v48 }
 0x48e   : > { %v4213_v6 = vpop.eup %3018  ;;  %v980_v30 = vsub.f32 %v5011_v22, %v917_v50  ;;  %v981_v7 = vsub.f32 %v4088_v49, %v917_v50 }
 0x48f   : > { %1494 = vmatmul.bf16.gmra.mxu0 %v1309_v2  ;;  %v1200_v44 = vadd.f32 %v4213_v6, %v4211_v32  ;;  %v4234_v2 = vpop.f32.mrf.mxu3 }
 0x490   : > { %v1106_v47 = vmul.f32 1.442695, %v980_v30  ;;  %v1108_v39 = vmul.f32 1.442695, %v981_v7 }
 0x491   : > { %1201 = vadd.xlane.f32.xlu0 %v1200_v44 }
 0x492   : > { %3020 = vpow2.f32 %v1106_v47  ;;  %v1193_v5 = vpop.xlane.xlu0 %1192  ;;  %v5030_v47 = vpack.c.bf16 %v4070_v19, %v4067_v16 }
 0x493   : > { %3022 = vpow2.f32 %v1108_v39 }
 0x494   : > { %3024 = vpow2.f32 %v1808_v43 }
 0x497   : > { %v4239_v1 = vpop.f32.mrf.mxu3 }
 0x498   : > { %v4223_v52 = vpop.eup %3020 }
 0x499   : > { %v4225_v22 = vpop.eup %3022 }
 0x49a   : > { %v1203_v51 = vadd.f32 %v4225_v22, %v4223_v52  ;;  %v4232_v38 = vpop.eup %3024 }
 0x49b   : > { %v1816_v41 = vsel %vm345_vm0, %v4232_v38, 0.0 }
 0x49c   : > { %1204 = vadd.xlane.f32.xlu2 %v1203_v51 }
 0x49f   : > { %1499 = vmatmul.bf16.gmra.mxu0 %v1311_v18  ;;  %v4246_v21 = vpop.f32.mrf.mxu3 }
 0x4a4   : > { %1817 = vadd.xlane.f32.xlu2 %v1816_v41 }
 0x4a7   : > { %v4254_v17 = vpop.f32.mrf.mxu3 }
 0x4ab   : > { %v1797_v49 = vpop.xlane.xlu2 %1796 }
 0x4ac   : > { %v1805_v8 = vsub.f32 %v4118_v13, %v1797_v49 }
 0x4ae   : > { %v1810_v57 = vmul.f32 1.442695, %v1805_v8 }
 0x4af   : > { %1504 = vmatmul.bf16.gmra.mxu0 %v1313_v58  ;;  %v4261_v14 = vpop.f32.mrf.mxu3 }
 0x4b0   : > { %3026 = vpow2.f32 %v1810_v57 }
 0x4b3   : > { %v1196_v44 = vpop.xlane.xlu2 %1195 }
 0x4b6   : > { %v4244_v26 = vpop.eup %3026 }
 0x4b7   : > { %v1819_v18 = vsel %vm345_vm0, %v4244_v26, 0.0  ;;  %v1403_v48 = vpop.f32.mrf.mxu3 }
 0x4b8   : > { %1820 = vadd.xlane.f32.xlu1 %v1819_v18 }
 0x4bb   : > { %v1803_v27 = vpop.xlane.xlu1 %1802 }
 0x4bc   : > { %v1807_v36 = vsub.f32 %v4138_v60, %v1803_v27 }
 0x4be   : > { %v1814_v13 = vmul.f32 1.442695, %v1807_v36 }
 0x4bf   : > { %1509 = vmatmul.bf16.gmra.mxu0 %v5029_v3  ;;  %v1406_v18 = vpop.f32.mrf.mxu3 }
 0x4c0   : > { %3028 = vpow2.f32 %v1814_v13 }
 0x4c1   : > { %3030 = vrcp.f32 %v4189_v35 }
 0x4c3   : > { %v1187_v31 = vpop.xlane.xlu1 %1186 }
 0x4c4   : > { %3032 = vrcp.f32 %v1187_v31 }
 0x4c5   : > { %3034 = vrcp.f32 %v1193_v5 }
 0x4c6   : > { %v4257_v58 = vpop.eup %3028 }
 0x4c7   : > { %v1825_v53 = vsel %vm345_vm0, %v4257_v58, 0.0  ;;  %v3031_v12 = vpop.eup %3030 }
 0x4c8   : > { %1826 = vadd.xlane.f32.xlu0 %v1825_v53  ;;  %v1286_v62 = vmul.f32 %v3031_v12, %v4021_v56  ;;  %v4266_v35 = vmul.f32 %v3031_v12, %v4025_v40  ;;  %v219_v12 = vld [vmem:[%s3137_s28 + $0x18] sm:$0xff]  }
 0x4ca   : > { %v3033_v60 = vpop.eup %3032 }
 0x4cb   : > { %v1190_v61 = vpop.xlane.xlu1 %1189  ;;  %v1288_v50 = vmul.f32 %v3033_v60, %v4151_v23  ;;  %v4269_v30 = vmul.f32 %v3033_v60, %v4153_v33  ;;  %v3035_v56 = vpop.eup %3034 }
 0x4cc   : > { %3036 = vrcp.f32 %v1190_v61  ;;  %v4280_v33 = vmul.f32 %v3035_v56, %v4096_v9  ;;  %v1292_v19 = vmul.f32 %v3035_v56, %v4094_v34 }
 0x4cd   : > { %v1326_v7 = vpack.c.bf16 %v1288_v50, %v1286_v62  ;;  %v1327_v10 = vpack.c.bf16 %v4269_v30, %v4266_v35  ;;  %3038 = vrcp.f32 %v1196_v44 }
 0x4cf   : > { %1450 = vmatmul.bf16.gmra.mxu3 %v1326_v7  ;;  %1514 = vmatmul.bf16.gmra.mxu0 %v5030_v47  ;;  %v5033_v7 = vpack.c.bf16 %v4179_v20, %v4176_v15 }
 0x4d2   : > { %v3037_v39 = vpop.eup %3036 }
 0x4d3   : > { %v1199_v23 = vpop.xlane.xlu1 %1198  ;;  %v4277_v40 = vmul.f32 %v3037_v39, %v4171_v55  ;;  %v3039_v51 = vpop.eup %3038  ;;  %v1290_v41 = vmul.f32 %v3037_v39, %v4169_v45 }
 0x4d4   : > { %3040 = vrcp.f32 %v1199_v23  ;;  %v4287_v49 = vmul.f32 %v3039_v51, %v4126_v42  ;;  %v1408_v42 = vpop.f32.mrf.mxu3 }
 0x4d5   : > { %v1329_v43 = vpack.c.bf16 %v4280_v33, %v4277_v40  ;;  %v1328_v9 = vpack.c.bf16 %v1292_v19, %v1290_v41 }
 0x4da   : > { %v3041_v16 = vpop.eup %3040 }
 0x4db   : > { %v4290_v55 = vmul.f32 %v3041_v16, %v4187_v4  ;;  %v1296_v45 = vmul.f32 %v3041_v16, %v4185_v28  ;;  %v1294_v4 = vmul.f32 %v3039_v51, %v4122_v25  ;;  %v5032_v25 = vpack.c.bf16 %v4163_v46, %v4160_v29  ;;  %v4320_v28 = vld [vmem:[%s3137_s28 + $0x10] sm:$0xff]  }
 0x4dc   : > { %v4292_v8 = vpop.f32.mrf.mxu0  ;;  %v4308_v13 = vpop.f32.mrf.mxu3  ;;  %v1599_v11 = vunpack.c.h.bf16 %v4320_v28  ;;  %v1600_v46 = vunpack.c.l.bf16 %v219_v12 }
 0x4dd   : > { %v1331_v57 = vpack.c.bf16 %v4290_v55, %v4287_v49  ;;  %v1330_v36 = vpack.c.bf16 %v1296_v45, %v1294_v4  ;;  %v4356_v4 = vld [vmem:[%s3137_s28] sm:$0xff]   ;;  %v4937_v49 = vunpack.c.l.bf16 %v4320_v28 }
 0x4df   : > { %1455 = vmatmul.bf16.gmra.mxu3 %v1328_v9  ;;  %1519 = vmatmul.bf16.gmra.mxu0 %v1319_v37 }
 0x4e4   : > { %v4299_v34 = vpop.f32.mrf.mxu0  ;;  %v4314_v37 = vpop.f32.mrf.mxu3 }
 0x4e5   : > { %5031 = vst [vmem:[#allocation26_spill] sm:$0xff] %v4314_v37 }
 0x4ec   : > { %v4303_v27 = vpop.f32.mrf.mxu0 }
 0x4ef   : > { %1460 = vmatmul.bf16.gmra.mxu3 %v1330_v36  ;;  %1524 = vmatmul.bf16.gmra.mxu0 %v1321_v0  ;;  %v1416_v0 = vpop.f32.mrf.mxu3 }
 0x4f4   : > { %v4310_v63 = vpop.f32.mrf.mxu0 }
 0x4f7   : > { %v1418_v44 = vpop.f32.mrf.mxu3 }
 0x4fc   : > { %v4312_v54 = vpop.f32.mrf.mxu0 }
 0x4ff   : > { %1529 = vmatmul.bf16.gmra.mxu0 %v5032_v25  ;;  %v1421_v9 = vpop.f32.mrf.mxu3  ;;  %v4946_v25 = vunpack.c.h.bf16 %v4356_v4 }
 0x504   : > { %v1492_v3 = vpop.f32.mrf.mxu0  ;;  %v1202_v60 = vpop.xlane.xlu0 %1201 }
 0x505   : > { %v1493_v31 = vadd.f32 %v1492_v3, %v1403_v48  ;;  %3042 = vrcp.f32 %v1202_v60  ;;  %v1601_v48 = vunpack.c.h.bf16 %v219_v12 }
 0x507   : > { %v1567_v5 = vmul.f32 %v4323_v24, %v1493_v31  ;;  %v1423_v45 = vpop.f32.mrf.mxu3 }
 0x509   : > { %v4328_v53 = vadd.f32 %v1599_v11, %v1567_v5 }
 0x50b   : > { %v4337_v56 = vpop.eup %3042 }
 0x50c   : > { %v1495_v61 = vpop.f32.mrf.mxu0  ;;  %v1298_v16 = vmul.f32 %v4337_v56, %v4211_v32  ;;  %v223_v32 = vld [vmem:[%s3137_s28 + $0x28] sm:$0xff]  }
 0x50d   : > { %v1496_v29 = vadd.f32 %v1495_v61, %v1406_v18  ;;  %v1604_v31 = vunpack.c.l.bf16 %v223_v32  ;;  %v1605_v61 = vunpack.c.h.bf16 %v223_v32  ;;  %v4389_v32 = vld [vmem:[%s3137_s28 + $0x40] sm:$0xff]  }
 0x50f   : > { %v1568_v62 = vmul.f32 %v4323_v24, %v1496_v29  ;;  %v1205_v50 = vpop.xlane.xlu2 %1204  ;;  %1534 = vmatmul.bf16.gmra.mxu0 %v5033_v7  ;;  %v4361_v5 = vpop.f32.mrf.mxu3 }
 0x510   : > { %3044 = vrcp.f32 %v1205_v50 }
 0x511   : > { %v4335_v47 = vadd.f32 %v1600_v46, %v1568_v62  ;;  %v2700_v62 = vpack.i.bf16 %v1601_v48, %v1600_v46  ;;  %v2710_v46 = vpack.i.bf16 %v1605_v61, %v1604_v31 }
 0x514   : > { %v1497_v39 = vpop.f32.mrf.mxu0 }
 0x515   : > { %v1498_v23 = vadd.f32 %v1497_v39, %v1408_v42 }
 0x516   : > { %v4339_v51 = vpop.eup %3044 }
 0x517   : > { %v1569_v41 = vmul.f32 %v4323_v24, %v1498_v23  ;;  %v1300_v15 = vmul.f32 %v4339_v51, %v4223_v52  ;;  %v4947_v52 = vunpack.c.l.bf16 %v4356_v4  ;;  %v4375_v50 = vpop.f32.mrf.mxu3  ;;  %v1818_v23 = vpop.xlane.xlu2 %1817 }
 0x519   : > { %v4346_v20 = vadd.f32 %v1601_v48, %v1569_v41  ;;  %v1332_v19 = vpack.c.bf16 %v1300_v15, %v1298_v16  ;;  %v2685_v35 = vpack.i.bf16 %v4946_v25, %v4947_v52 }
 0x51b   : > { %1465 = vmatmul.bf16.gmra.mxu3 %v1332_v19  ;;  %2686 = vrot.lane.b32.xlu0 %v2685_v35, %s3083_s6 }
 0x51c   : > { %v4348_v18 = vpop.f32.mrf.mxu0 }
 0x51d   : > { %5034 = vst [vmem:[#allocation28_spill] sm:$0xff] %v4348_v18 }
 0x51f   : > { %1539 = vmatmul.bf16.gmra.mxu0 %v1327_v10  ;;  %v1824_v10 = vpop.xlane.xlu1 %1823 }
 0x520   : > { %3046 = vrcp.f32 %v1824_v10  ;;  %v4941_v10 = vunpack.c.l.bf16 %v4389_v32 }
 0x523   : > { %2701 = vrot.lane.b32.xlu0 %v2700_v62, %s3083_s6 }
 0x524   : > { %v4353_v42 = vpop.f32.mrf.mxu0 }
 0x525   : > { %5035 = vst [vmem:[#allocation27_spill] sm:$0xff] %v4353_v42 }
 0x526   : > { %v3047_v48 = vpop.eup %3046 }
 0x52b   : > { %v1821_v33 = vpop.xlane.xlu1 %1820  ;;  %2711 = vrot.lane.b32.xlu0 %v2710_v46, %s3083_s6 }
 0x52c   : > { %v1505_v36 = vpop.f32.mrf.mxu0 }
 0x52d   : > { %v1506_v3 = vadd.f32 %v1505_v36, %v1416_v0 }
 0x52f   : > { %v1572_v12 = vmul.f32 %v4323_v24, %v1506_v3  ;;  %1544 = vmatmul.bf16.gmra.mxu0 %v1329_v43  ;;  %v225_v43 = vld [vmem:[%s3137_s28 + $0x30] sm:$0xff]   ;;  %v4391_v3 = vpop.f32.mrf.mxu3 }
 0x530   : > { %v1606_v41 = vunpack.c.l.bf16 %v225_v43 }
 0x531   : > { %v4371_v30 = vadd.f32 %v1604_v31, %v1572_v12 }
 0x533   : > { %5036 = vst [vmem:[#allocation5_spill] sm:$0xff] %v4371_v30 }
 0x534   : > { %v1507_v0 = vpop.f32.mrf.mxu0 }
 0x535   : > { %v1508_v60 = vadd.f32 %v1507_v0, %v1418_v44  ;;  %v4938_v0 = vunpack.c.h.bf16 %v4389_v32 }
 0x537   : > { %v1573_v29 = vmul.f32 %v4323_v24, %v1508_v60 }
 0x539   : > { %v4377_v40 = vadd.f32 %v1605_v61, %v1573_v29 }
 0x53b   : > { %5037 = vst [vmem:[#allocation6_spill] sm:$0xff] %v4377_v40  ;;  %v1827_v7 = vpop.xlane.xlu0 %1826 }
 0x53c   : > { %3048 = vrcp.f32 %v1827_v7  ;;  %v1510_v39 = vpop.f32.mrf.mxu0 }
 0x53d   : > { %3050 = vrcp.f32 %v1821_v33  ;;  %v1511_v44 = vadd.f32 %v1510_v39, %v1421_v9  ;;  %v1834_v9 = vmul.f32 %v3047_v48, %v4199_v59 }
 0x53e   : > { %3052 = vrcp.f32 %v1818_v23  ;;  %v4419_v23 = vpop.f32.mrf.mxu3 }
 0x53f   : > { %v1574_v16 = vmul.f32 %v4323_v24, %v1511_v44  ;;  %1549 = vmatmul.bf16.gmra.mxu0 %v1331_v57  ;;  %v1607_v57 = vunpack.c.h.bf16 %v225_v43  ;;  %v227_v43 = vld [vmem:[%s3137_s28 + $0x38] sm:$0xff]  }
 0x541   : > { %v4385_v15 = vadd.f32 %v1606_v41, %v1574_v16  ;;  %v1608_v16 = vunpack.c.l.bf16 %v227_v43 }
 0x542   : > { %v3049_v19 = vpop.eup %3048 }
 0x543   : > { %5038 = vst [vmem:[#allocation35_spill] sm:$0xff] %v4385_v15  ;;  %v3051_v36 = vpop.eup %3050  ;;  %v1835_v12 = vmul.f32 %v3049_v19, %v4257_v58  ;;  %v2695_v58 = vpack.i.bf16 %v1599_v11, %v4937_v49  ;;  %v1299_v11 = vmul.f32 %v4337_v56, %v4213_v6  ;;  %v4428_v6 = vld [vmem:[%s3137_s28 + $0x48] sm:$0xff]   ;;  %v5058_v49 = vld [vmem:[#allocation8_spill] sm:$0xff] }
 0x544   : > { %v1512_v55 = vpop.f32.mrf.mxu0  ;;  %v3053_v60 = vpop.eup %3052  ;;  %v1833_v61 = vmul.f32 %v3051_v36, %v4244_v26  ;;  %v1301_v26 = vmul.f32 %v4339_v51, %v4225_v22  ;;  %v2715_v51 = vpack.i.bf16 %v1607_v57, %v1606_v41  ;;  %v1609_v36 = vunpack.c.h.bf16 %v227_v43  ;;  %v5046_v43 = vld [vmem:[#allocation18_spill] sm:$0xff] }
 0x545   : > { %v1513_v31 = vadd.f32 %v1512_v55, %v1423_v45  ;;  %v1837_v35 = vpack.c.bf16 %v1835_v12, %v1834_v9  ;;  %v2725_v45 = vpack.i.bf16 %v4938_v0, %v4941_v10  ;;  %v1832_v33 = vmul.f32 %v3053_v60, %v4232_v38  ;;  %2696 = vrot.lane.b32.xlu1 %v2695_v58, %s3083_s6  ;;  %v5041_v55 = vld [vmem:[#allocation19_spill] sm:$0xff]  ;;  %v4450_v60 = vld [vmem:[%s3137_s28 + $0x8] sm:$0xff]  }
 0x546   : > { %v1333_v46 = vpack.c.bf16 %v1301_v26, %v1299_v11  ;;  %v4945_v9 = vunpack.c.l.bf16 %v4428_v6  ;;  %v4944_v41 = vunpack.c.h.bf16 %v4428_v6 }
 0x547   : > { %v1575_v29 = vmul.f32 %v4323_v24, %v1513_v31  ;;  %v1890_v59 = vsel %vm345_vm0, %v1837_v35, 0  ;;  %2726 = vrot.lane.b32.xlu0 %v2725_v45, %s3083_s6  ;;  %v1836_v7 = vpack.c.bf16 %v1833_v61, %v1832_v33  ;;  %v5045_v33 = vld [vmem:[#allocation9_spill] sm:$0xff] }
 0x548   : > { %1898 = vmatpush.bf16.xpose.msra.mxu1 %v1890_v59  ;;  %2639 = vmatpush.bf16.xpose.msrb.mxu2 %v1890_v59  ;;  %v2730_v31 = vpack.i.bf16 %v4944_v41, %v4945_v9  ;;  %v4565_v41 = vld [vmem:[%s3137_s28 + $0x68] sm:$0xff]  }
 0x549   : > { %v4409_v62 = vadd.f32 %v1607_v57, %v1575_v29  ;;  %2640 = vmatpush.bf16.xpose.msrb.mxu3 %v1890_v59  ;;  %v1887_v38 = vsel %vm345_vm0, %v1836_v7, 0  ;;  %v5042_v57 = vld [vmem:[#allocation16_spill] sm:$0xff]  ;;  %v4943_v29 = vunpack.c.l.bf16 %v4450_v60  ;;  %v4942_v59 = vunpack.c.h.bf16 %v4450_v60  ;;  %v4472_v7 = vld [vmem:[%s3137_s28 + $0x20] sm:$0xff]   ;;  %5064 = vst [vmem:[#allocation34_spill] sm:$0xff] %v4565_v41 }
 0x54a   : > { %5047 = vst [vmem:[#allocation24_spill] sm:$0xff] %v4472_v7  ;;  %v4953_v52 = vunpack.c.l.bf16 %v4565_v41 }
 0x54b   : > { %5039 = vst [vmem:[#allocation40_spill] sm:$0xff] %v4409_v62  ;;  %v2690_v45 = vpack.i.bf16 %v4942_v59, %v4943_v29  ;;  %v5062_v29 = vld [vmem:[#allocation11_spill] sm:$0xff] }
 0x54c   : > { %v1515_v39 = vpop.f32.mrf.mxu0 }
 0x54d   : > { %v1516_v44 = vadd.f32 %v1515_v39, %v4361_v5  ;;  %2716 = vrot.lane.b32.xlu1 %v2715_v51, %s3083_s6  ;;  %v4430_v5 = vpop.f32.mrf.mxu3  ;;  %2691 = vrot.lane.b32.xlu2 %v2690_v45, %s3083_s6  ;;  %v4503_v45 = vld [vmem:[%s3137_s28 + $0x50] sm:$0xff]  }
 0x54f   : > { %v1576_v22 = vmul.f32 %v4323_v24, %v1516_v44  ;;  %1554 = vmatmul.bf16.gmra.mxu0 %v1333_v46  ;;  %v4934_v44 = vunpack.c.l.bf16 %v4472_v7  ;;  %v4933_v46 = vunpack.c.h.bf16 %v4472_v7  ;;  %v4603_v7 = vstv %s2614_s9 }
 0x550   : > { %1899 = vmatpush.bf16.xpose.msra.mxu1 %v1887_v38  ;;  %2641 = vmatpush.bf16.xpose.msrb.mxu2 %v1887_v38 }
 0x551   : > { %v4424_v48 = vadd.f32 %v1608_v16, %v1576_v22  ;;  %2642 = vmatpush.bf16.xpose.msrb.mxu3 %v1887_v38  ;;  %v2705_v22 = vpack.i.bf16 %v4933_v46, %v4934_v44  ;;  %v4484_v38 = vld [vmem:[%s3137_s28 + $0x58] sm:$0xff]  }
 0x552   : > { %5048 = vst [vmem:[#allocation32_spill] sm:$0xff] %v4484_v38 }
 0x553   : > { %5040 = vst [vmem:[#allocation36_spill] sm:$0xff] %v4424_v48  ;;  %v4952_v48 = vunpack.c.h.bf16 %v4565_v41 }
 0x554   : > { %v1517_v56 = vpop.f32.mrf.mxu0 }
 0x555   : > { %v1518_v19 = vadd.f32 %v1517_v56, %v4375_v50  ;;  %v5043_v50 = vld [vmem:[#allocation12_spill] sm:$0xff]  ;;  %2731 = vrot.lane.b32.xlu1 %v2730_v31, %s3083_s6  ;;  %v4456_v58 = vpop.f32.mrf.mxu3  ;;  %2706 = vrot.lane.b32.xlu2 %v2705_v22, %s3083_s6 }
 0x557   : > { %v1577_v12 = vmul.f32 %v4323_v24, %v1518_v19  ;;  %2598 = vmatmul.msk.bf16.vlgmr.msra.gmra.mxu1 %vm345_vm0, %v5041_v55  ;;  %2599 = vmatmul.msk.bf16.vlgmr.msrb.gmra.mxu2 %vm345_vm0, %v5042_v57  ;;  %v4932_v19 = vunpack.c.l.bf16 %v4484_v38  ;;  %v5049_v55 = vld [vmem:[#allocation14_spill] sm:$0xff]  ;;  %v2720_v57 = vpack.i.bf16 %v1609_v36, %v1608_v16  ;;  %v4936_v16 = vunpack.c.l.bf16 %v4503_v45 }
 0x558   : > { %2606 = vmatmul.msk.bf16.vlgmr.msrb.gmra.mxu3 %vm345_vm0, %v5043_v50  ;;  %v5050_v50 = vld [vmem:[#allocation21_spill] sm:$0xff] }
 0x559   : > { %v4446_v35 = vadd.f32 %v1609_v36, %v1577_v12  ;;  %v4931_v12 = vunpack.c.h.bf16 %v4484_v38  ;;  %v4935_v36 = vunpack.c.h.bf16 %v4503_v45 }
 0x55b   : > { %5044 = vst [vmem:[#allocation42_spill] sm:$0xff] %v4446_v35  ;;  %v2740_v31 = vpack.i.bf16 %v4931_v12, %v4932_v19  ;;  %v2735_v22 = vpack.i.bf16 %v4935_v36, %v4936_v16  ;;  %v5054_v19 = vld [vmem:[#allocation13_spill] sm:$0xff] }
 0x55c   : > { %v4452_v61 = vpop.f32.mrf.mxu0 }
 0x55d   : > { %v4469_v11 = vpop.f32.mrf.mxu3  ;;  %2721 = vrot.lane.b32.xlu2 %v2720_v57, %s3083_s6  ;;  %2741 = vrot.lane.b32.xlu0 %v2740_v31, %s3083_s6 }
 0x564   : > { %v4463_v26 = vpop.f32.mrf.mxu0 }
 0x565   : > { %v4486_v51 = vpop.f32.mrf.mxu3  ;;  %2736 = vrot.lane.b32.xlu2 %v2735_v22, %s3083_s6  ;;  %v5055_v22 = vld [vmem:[#allocation15_spill] sm:$0xff] }
 0x567   : > { %2600 = vmatmul.msk.bf16.gmra.mxu2 %vm345_vm0, %v5045_v33 }
 0x568   : > { %2607 = vmatmul.msk.bf16.gmra.mxu3 %vm345_vm0, %v5046_v43 }
 0x56c   : > { %v4474_v39 = vpop.f32.mrf.mxu0 }
 0x56d   : > { %v4507_v43 = vpop.f32.mrf.mxu3 }
 0x56e   : > { %5051 = vst [vmem:[#allocation39_spill] sm:$0xff] %v4507_v43 }
 0x574   : > { %v4488_v56 = vpop.f32.mrf.mxu0 }
 0x575   : > { %v4523_v12 = vpop.f32.mrf.mxu3 }
 0x576   : > { %5053 = vst [vmem:[#allocation38_spill] sm:$0xff] %v4523_v12 }
 0x577   : > { %2601 = vmatmul.msk.bf16.gmra.mxu2 %vm345_vm0, %v5049_v55  ;;  %v4517_v55 = vld [vmem:[%s3137_s28 + $0x60] sm:$0xff]  }
 0x578   : > { %2608 = vmatmul.msk.bf16.gmra.mxu3 %vm345_vm0, %v5050_v50  ;;  %5052 = vst [vmem:[#allocation37_spill] sm:$0xff] %v4517_v55  ;;  %v4940_v31 = vunpack.c.l.bf16 %v4517_v55  ;;  %v4939_v50 = vunpack.c.h.bf16 %v4517_v55 }
 0x57a   : > { %v2745_v46 = vpack.i.bf16 %v4939_v50, %v4940_v31 }
 0x57c   : > { %v4505_v33 = vpop.f32.mrf.mxu0  ;;  %2746 = vrot.lane.b32.xlu1 %v2745_v46, %s3083_s6 }
 0x57d   : > { %v4536_v36 = vpop.f32.mrf.mxu3 }
 0x584   : > { %v4519_v57 = vpop.f32.mrf.mxu0 }
 0x585   : > { %v4544_v0 = vpop.f32.mrf.mxu3 }
 0x587   : > { %2602 = vmatmul.msk.bf16.gmra.mxu2 %vm345_vm0, %v5054_v19  ;;  %v5059_v19 = vld [vmem:[#allocation20_spill] sm:$0xff] }
 0x588   : > { %2609 = vmatmul.msk.bf16.gmra.mxu3 %vm345_vm0, %v5055_v22  ;;  %v4549_v22 = vld [vmem:[%s3137_s28 + $0x70] sm:$0xff]  }
 0x589   : > { %5060 = vst [vmem:[#allocation30_spill] sm:$0xff] %v4549_v22  ;;  %v4948_v10 = vunpack.c.l.bf16 %v4549_v22  ;;  %v1623_v59 = vunpack.c.h.bf16 %v4549_v22 }
 0x58c   : > { %v4534_v44 = vpop.f32.mrf.mxu0 }
 0x58d   : > { %5056 = vst [vmem:[#allocation29_spill] sm:$0xff] %v4534_v44  ;;  %v4551_v46 = vpop.f32.mrf.mxu3 }
 0x58e   : > { %5061 = vst [vmem:[#allocation33_spill] sm:$0xff] %v4551_v46  ;;  %v5070_v46 = vld [vmem:[#allocation22_spill] sm:$0xff] }
 0x594   : > { %v4538_v16 = vpop.f32.mrf.mxu0 }
 0x595   : > { %5057 = vst [vmem:[#allocation31_spill] sm:$0xff] %v4538_v16  ;;  %v4569_v25 = vpop.f32.mrf.mxu3 }
 0x596   : > { %5066 = vst [vmem:[#allocation25_spill] sm:$0xff] %v4569_v25 }
 0x597   : > { %2603 = vmatmul.msk.bf16.gmra.mxu2 %vm345_vm0, %v5058_v49  ;;  %v2755_v49 = vpack.i.bf16 %v1623_v59, %v4948_v10 }
 0x598   : > { %2610 = vmatmul.msk.bf16.gmra.mxu3 %vm345_vm0, %v5059_v19  ;;  %v5063_v19 = vld [vmem:[#allocation23_spill] sm:$0xff] }
 0x599   : > { %2756 = vrot.lane.b32.xlu0 %v2755_v49, %s3083_s6 }
 0x59c   : > { %v4546_v50 = vpop.f32.mrf.mxu0 }
 0x59d   : > { %v4581_v22 = vpop.f32.mrf.mxu3 }
 0x59e   : > { %5068 = vst [vmem:[#allocation19_spill] sm:$0xff] %v4581_v22 }
 0x5a4   : > { %v4553_v31 = vpop.f32.mrf.mxu0 }
 0x5a7   : > { %2604 = vmatmul.msk.bf16.gmra.mxu2 %vm345_vm0, %v5062_v29  ;;  %v2750_v29 = vpack.i.bf16 %v4952_v48, %v4953_v52  ;;  %v1463_v48 = vpop.f32.mrf.mxu3  ;;  %v2692_v55 = vpop.permute.xlu2 %2691 }
 0x5a8   : > { %2611 = vmatmul.msk.bf16.gmra.mxu3 %vm345_vm0, %v5063_v19  ;;  %v243_v19 = vld [vmem:[%s3137_s28 + $0x78] sm:$0xff]   ;;  %v2693_v44 = vunpack.i.l.bf16 %v2692_v55 }
 0x5a9   : > { %2751 = vrot.lane.b32.xlu2 %v2750_v29, %s3083_s6  ;;  %v1624_v49 = vunpack.c.l.bf16 %v243_v19  ;;  %v1625_v35 = vunpack.c.h.bf16 %v243_v19  ;;  %v2687_v29 = vpop.permute.xlu0 %2686  ;;  %v5072_v19 = vld [vmem:[#allocation17_spill] sm:$0xff] }
 0x5ab   : > { %v2760_v25 = vpack.i.bf16 %v1625_v35, %v1624_v49 }
 0x5ac   : > { %v4567_v9 = vpop.f32.mrf.mxu0 }
 0x5ad   : > { %5065 = vst [vmem:[#allocation41_spill] sm:$0xff] %v4567_v9  ;;  %v5069_v9 = vld [vmem:[#allocation10_spill] sm:$0xff]  ;;  %2761 = vrot.lane.b32.xlu1 %v2760_v25, %s3083_s6 }
 0x5af   : > { %v1466_v22 = vpop.f32.mrf.mxu3 }
 0x5b4   : > { %v4579_v10 = vpop.f32.mrf.mxu0 }
 0x5b5   : > { %5067 = vst [vmem:[#allocation7_spill] sm:$0xff] %v4579_v10 }
 0x5b7   : > { %2605 = vmatmul.msk.bf16.gmra.mxu2 %vm345_vm0, %v5069_v9  ;;  %v4595_v9 = vpop.permute.xlu0 %2701  ;;  %v1468_v62 = vpop.f32.mrf.mxu3 }
 0x5b8   : > { %2612 = vmatmul.msk.bf16.gmra.mxu3 %vm345_vm0, %v5070_v46 }
 0x5bc   : > { %v4588_v41 = vpop.f32.mrf.mxu0 }
 0x5bd   : > { %5071 = vst [vmem:[#allocation16_spill] sm:$0xff] %v4588_v41 }
 0x5c4   : > { %v1552_v52 = vpop.f32.mrf.mxu0 }
 0x5c5   : > { %v1553_v30 = vadd.f32 %v1552_v52, %v1463_v48  ;;  %v4600_v48 = vpop.permute.xlu0 %2711 }
 0x5c7   : > { %v1591_v10 = vmul.f32 %v4323_v24, %v1553_v30 }
 0x5c8   : > { %2613 = vmatmul.msk.bf16.gmra.mxu3 %vm345_vm0, %v5072_v19 }
 0x5c9   : > { %v4593_v40 = vadd.f32 %v1623_v59, %v1591_v10 }
 0x5cb   : > { %5073 = vst [vmem:[#allocation12_spill] sm:$0xff] %v4593_v40  ;;  %v2689_v40 = vunpack.i.h.bf16 %v2687_v29 }
 0x5cc   : > { %v1555_v15 = vpop.f32.mrf.mxu0 }
 0x5cd   : > { %v1556_v46 = vadd.f32 %v1555_v15, %v1466_v22  ;;  %v2688_v15 = vunpack.i.l.bf16 %v2687_v29  ;;  %v2727_v12 = vpop.permute.xlu0 %2726 }
 0x5ce   : > { %v2728_v29 = vunpack.i.l.bf16 %v2727_v12 }
 0x5cf   : > { %v1592_v25 = vmul.f32 %v4323_v24, %v1556_v46  ;;  %v2697_v46 = vpop.permute.xlu1 %2696 }
 0x5d0   : > { %v2699_v37 = vunpack.i.h.bf16 %v2697_v46 }
 0x5d1   : > { %v4598_v41 = vadd.f32 %v1624_v49, %v1592_v25 }
 0x5d3   : > { %5074 = vst [vmem:[#allocation9_spill] sm:$0xff] %v4598_v41 }
 0x5d4   : > { %v1557_v38 = vpop.f32.mrf.mxu0  ;;  %v1901_v52 = vpop.f32.mrf.mxu1 }
 0x5d5   : > { %v1558_v30 = vadd.f32 %v1557_v38, %v1468_v62  ;;  %v1983_v22 = vmul.f32 %v4603_v7, %v1901_v52 }
 0x5d7   : > { %v1593_v19 = vmul.f32 %v4323_v24, %v1558_v30  ;;  %v2143_v16 = vadd.f32 %v2688_v15, %v1983_v22  ;;  %v2694_v30 = vunpack.i.h.bf16 %v2692_v55 }
 0x5d9   : > { %v4605_v10 = vadd.f32 %v1625_v35, %v1593_v19 }
 0x5da   : > { %v1906_v59 = vpop.f32.mrf.mxu2 }
 0x5db   : > { %5075 = vst [vmem:[#allocation18_spill] sm:$0xff] %v4605_v10  ;;  %v1941_v49 = vpop.f32.mrf.mxu3  ;;  %v1985_v38 = vmul.f32 %v4603_v7, %v1906_v59  ;;  %v2729_v10 = vunpack.i.h.bf16 %v2727_v12 }
 0x5dc   : > { %v1903_v25 = vpop.f32.mrf.mxu1  ;;  %v1999_v19 = vmul.f32 %v4603_v7, %v1941_v49  ;;  %v2707_v49 = vpop.permute.xlu2 %2706 }
 0x5dd   : > { %v1984_v41 = vmul.f32 %v4603_v7, %v1903_v25  ;;  %v2145_v22 = vadd.f32 %v2693_v44, %v1985_v38 }
 0x5de   : > { %v2159_v59 = vadd.f32 %v2728_v29, %v1999_v19 }
 0x5df   : > { %v2144_v62 = vadd.f32 %v2689_v40, %v1984_v41  ;;  %v4614_v40 = vpop.permute.xlu1 %2716 }
 0x5e1   : > { %v2765_v35 = vpack.i.bf16 %v2144_v62, %v2143_v16 }
 0x5e2   : > { %v1908_v43 = vpop.f32.mrf.mxu2 }
 0x5e3   : > { %v1986_v52 = vmul.f32 %v4603_v7, %v1908_v43  ;;  %v1943_v42 = vpop.f32.mrf.mxu3  ;;  %2766 = vrot.lane.b32.xlu2 %v2765_v35, %s3085_s10  ;;  %v2698_v35 = vunpack.i.l.bf16 %v2697_v46 }
 0x5e4   : > { %v2000_v15 = vmul.f32 %v4603_v7, %v1943_v42 }
 0x5e5   : > { %v2146_v41 = vadd.f32 %v2694_v30, %v1986_v52 }
 0x5e6   : > { %v2160_v55 = vadd.f32 %v2729_v10, %v2000_v15 }
 0x5e7   : > { %v2770_v16 = vpack.i.bf16 %v2146_v41, %v2145_v22  ;;  %v2732_v62 = vpop.permute.xlu1 %2731  ;;  %v4622_v41 = vpop.permute.xlu2 %2721 }
 0x5e8   : > { %v2775_v25 = vpack.i.bf16 %v2160_v55, %v2159_v59  ;;  %v2734_v44 = vunpack.i.h.bf16 %v2732_v62  ;;  %v2733_v38 = vunpack.i.l.bf16 %v2732_v62  ;;  %v2704_v62 = vunpack.i.h.bf16 %v4595_v9 }
 0x5e9   : > { %2771 = vrot.lane.b32.xlu0 %v2770_v16, %s3085_s10 }
 0x5ea   : > { %2776 = vrot.lane.b32.xlu1 %v2775_v25, %s3085_s10  ;;  %v1911_v12 = vpop.f32.mrf.mxu2 }
 0x5eb   : > { %v1946_v43 = vpop.f32.mrf.mxu3  ;;  %v1987_v42 = vmul.f32 %v4603_v7, %v1911_v12 }
 0x5ec   : > { %v2001_v30 = vmul.f32 %v4603_v7, %v1946_v43 }
 0x5ed   : > { %v2147_v15 = vadd.f32 %v2698_v35, %v1987_v42 }
 0x5ee   : > { %v2161_v59 = vadd.f32 %v2733_v38, %v2001_v30 }
 0x5ef   : > { %v2737_v43 = vpop.permute.xlu2 %2736 }
 0x5f0   : > { %v2739_v42 = vunpack.i.h.bf16 %v2737_v43  ;;  %v2738_v38 = vunpack.i.l.bf16 %v2737_v43  ;;  %v2708_v43 = vunpack.i.l.bf16 %v2707_v49 }
 0x5f2   : > { %v1913_v19 = vpop.f32.mrf.mxu2 }
 0x5f3   : > { %v1988_v10 = vmul.f32 %v4603_v7, %v1913_v19  ;;  %v1948_v29 = vpop.f32.mrf.mxu3  ;;  %v2703_v19 = vunpack.i.l.bf16 %v4595_v9 }
 0x5f4   : > { %v2002_v52 = vmul.f32 %v4603_v7, %v1948_v29 }
 0x5f5   : > { %v2148_v22 = vadd.f32 %v2699_v37, %v1988_v10 }
 0x5f6   : > { %v2162_v55 = vadd.f32 %v2734_v44, %v2002_v52 }
 0x5f7   : > { %v2780_v16 = vpack.i.bf16 %v2148_v22, %v2147_v15 }
 0x5f8   : > { %v2785_v46 = vpack.i.bf16 %v2162_v55, %v2161_v59 }
 0x5f9   : > { %2781 = vrot.lane.b32.xlu1 %v2780_v16, %s3085_s10 }
 0x5fa   : > { %2786 = vrot.lane.b32.xlu2 %v2785_v46, %s3085_s10  ;;  %v1916_v25 = vpop.f32.mrf.mxu2 }
 0x5fb   : > { %v1951_v12 = vpop.f32.mrf.mxu3  ;;  %v1989_v35 = vmul.f32 %v4603_v7, %v1916_v25  ;;  %v2742_v25 = vpop.permute.xlu0 %2741 }
 0x5fc   : > { %v2003_v37 = vmul.f32 %v4603_v7, %v1951_v12  ;;  %v2709_v12 = vunpack.i.h.bf16 %v2707_v49 }
 0x5fd   : > { %v2149_v52 = vadd.f32 %v2703_v19, %v1989_v35  ;;  %v2743_v19 = vunpack.i.l.bf16 %v2742_v25 }
 0x5fe   : > { %v2163_v22 = vadd.f32 %v2738_v38, %v2003_v37 }
 0x602   : > { %v1918_v44 = vpop.f32.mrf.mxu2 }
 0x603   : > { %v1990_v30 = vmul.f32 %v4603_v7, %v1918_v44  ;;  %v1953_v10 = vpop.f32.mrf.mxu3 }
 0x604   : > { %v2004_v29 = vmul.f32 %v4603_v7, %v1953_v10  ;;  %v2744_v10 = vunpack.i.h.bf16 %v2742_v25 }
 0x605   : > { %v2150_v15 = vadd.f32 %v2704_v62, %v1990_v30 }
 0x606   : > { %v2164_v59 = vadd.f32 %v2739_v42, %v2004_v29 }
 0x607   : > { %v2790_v55 = vpack.i.bf16 %v2150_v15, %v2149_v52 }
 0x608   : > { %v2795_v16 = vpack.i.bf16 %v2164_v59, %v2163_v22 }
 0x609   : > { %2791 = vrot.lane.b32.xlu2 %v2790_v55, %s3085_s10  ;;  %v2747_v55 = vpop.permute.xlu1 %2746 }
 0x60a   : > { %2796 = vrot.lane.b32.xlu0 %v2795_v16, %s3085_s10  ;;  %v1921_v9 = vpop.f32.mrf.mxu2  ;;  %v2714_v16 = vunpack.i.h.bf16 %v4600_v48  ;;  %v2749_v25 = vunpack.i.h.bf16 %v2747_v55 }
 0x60b   : > { %v1956_v46 = vpop.f32.mrf.mxu3  ;;  %v1991_v44 = vmul.f32 %v4603_v7, %v1921_v9  ;;  %v2713_v9 = vunpack.i.l.bf16 %v4600_v48 }
 0x60c   : > { %v2005_v18 = vmul.f32 %v4603_v7, %v1956_v46 }
 0x60d   : > { %v2151_v38 = vadd.f32 %v2708_v43, %v1991_v44  ;;  %v2748_v43 = vunpack.i.l.bf16 %v2747_v55 }
 0x60e   : > { %v2165_v29 = vadd.f32 %v2743_v19, %v2005_v18 }
 0x612   : > { %v1923_v62 = vpop.f32.mrf.mxu2 }
 0x613   : > { %v1992_v35 = vmul.f32 %v4603_v7, %v1923_v62  ;;  %v1958_v37 = vpop.f32.mrf.mxu3 }
 0x614   : > { %v2006_v42 = vmul.f32 %v4603_v7, %v1958_v37 }
 0x615   : > { %v2152_v30 = vadd.f32 %v2709_v12, %v1992_v35 }
 0x616   : > { %v2166_v52 = vadd.f32 %v2744_v10, %v2006_v42 }
 0x617   : > { %v2800_v15 = vpack.i.bf16 %v2152_v30, %v2151_v38 }
 0x618   : > { %v2805_v22 = vpack.i.bf16 %v2166_v52, %v2165_v29  ;;  %v2719_v52 = vunpack.i.h.bf16 %v4614_v40 }
 0x619   : > { %2801 = vrot.lane.b32.xlu0 %v2800_v15, %s3085_s10  ;;  %v2718_v15 = vunpack.i.l.bf16 %v4614_v40 }
 0x61a   : > { %2806 = vrot.lane.b32.xlu1 %v2805_v22, %s3085_s10  ;;  %v1926_v49 = vpop.f32.mrf.mxu2 }
 0x61b   : > { %v1961_v59 = vpop.f32.mrf.mxu3  ;;  %v1993_v46 = vmul.f32 %v4603_v7, %v1926_v49 }
 0x61c   : > { %v2007_v18 = vmul.f32 %v4603_v7, %v1961_v59 }
 0x61d   : > { %v2153_v62 = vadd.f32 %v2713_v9, %v1993_v46  ;;  %v2752_v9 = vpop.permute.xlu2 %2751 }
 0x61e   : > { %v2167_v37 = vadd.f32 %v2748_v43, %v2007_v18  ;;  %v1483_v43 = vadd.f32 %v4299_v34, %v4239_v1 }
 0x622   : > { %v1928_v12 = vpop.f32.mrf.mxu2 }
 0x623   : > { %v1994_v44 = vmul.f32 %v4603_v7, %v1928_v12  ;;  %v1963_v10 = vpop.f32.mrf.mxu3  ;;  %v1563_v12 = vmul.f32 %v4323_v24, %v1483_v43 }
 0x624   : > { %v2008_v19 = vmul.f32 %v4603_v7, %v1963_v10 }
 0x625   : > { %v2154_v35 = vadd.f32 %v2714_v16, %v1994_v44 }
 0x626   : > { %v2168_v42 = vadd.f32 %v2749_v25, %v2008_v19  ;;  %v1481_v25 = vadd.f32 %v4292_v8, %v4234_v2 }
 0x627   : > { %v2810_v38 = vpack.i.bf16 %v2154_v35, %v2153_v62  ;;  %v5076_v62 = vunpack.c.l.bf16 %v4356_v4 }
 0x628   : > { %v2815_v30 = vpack.i.bf16 %v2168_v42, %v2167_v37  ;;  %v1562_v40 = vmul.f32 %v4323_v24, %v1481_v25  ;;  %v5077_v37 = vunpack.c.h.bf16 %v4356_v4 }
 0x629   : > { %2811 = vrot.lane.b32.xlu1 %v2810_v38, %s3085_s10  ;;  %v2757_v38 = vpop.permute.xlu0 %2756 }
 0x62a   : > { %2816 = vrot.lane.b32.xlu2 %v2815_v30, %s3085_s10  ;;  %v1931_v48 = vpop.f32.mrf.mxu2  ;;  %v1626_v35 = vadd.f32 %v5076_v62, %v1562_v40  ;;  %v1627_v42 = vadd.f32 %v5077_v37, %v1563_v12  ;;  %v2753_v37 = vunpack.i.l.bf16 %v2752_v9 }
 0x62b   : > { %v1966_v29 = vpop.f32.mrf.mxu3  ;;  %v1995_v22 = vmul.f32 %v4603_v7, %v1931_v48 }
 0x62d   : > { %v2155_v16 = vadd.f32 %v2718_v15, %v1995_v22  ;;  %v2759_v15 = vunpack.i.h.bf16 %v2757_v38  ;;  %v2758_v22 = vunpack.i.l.bf16 %v2757_v38  ;;  %v1528_v38 = vadd.f32 %v4488_v56, %v4456_v58 }
 0x62e   : > { %v1488_v58 = vadd.f32 %v4310_v63, %v4254_v17  ;;  %v1523_v56 = vadd.f32 %v4463_v26, %v4419_v23 }
 0x630   : > { %v1565_v26 = vmul.f32 %v4323_v24, %v1488_v58 }
 0x632   : > { %v1933_v49 = vpop.f32.mrf.mxu2 }
 0x633   : > { %v1996_v59 = vmul.f32 %v4603_v7, %v1933_v49  ;;  %v1968_v55 = vpop.f32.mrf.mxu3 }
 0x635   : > { %v2156_v46 = vadd.f32 %v2719_v52, %v1996_v59  ;;  %v2724_v59 = vunpack.i.h.bf16 %v4622_v41 }
 0x637   : > { %v2820_v18 = vpack.i.bf16 %v2156_v46, %v2155_v16  ;;  %v2723_v16 = vunpack.i.l.bf16 %v4622_v41  ;;  %v2009_v41 = vmul.f32 %v4603_v7, %v1966_v29  ;;  %v1581_v29 = vmul.f32 %v4323_v24, %v1528_v38 }
 0x639   : > { %2821 = vrot.lane.b32.xlu2 %v2820_v18, %s3085_s10 }
 0x63a   : > { %v1936_v44 = vpop.f32.mrf.mxu2 }
 0x63b   : > { %v1971_v10 = vpop.f32.mrf.mxu3  ;;  %v1997_v30 = vmul.f32 %v4603_v7, %v1936_v44 }
 0x63c   : > { %v2011_v52 = vmul.f32 %v4603_v7, %v1971_v10  ;;  %v2754_v10 = vunpack.i.h.bf16 %v2752_v9 }
 0x63d   : > { %v2767_v19 = vpop.permute.xlu2 %2766  ;;  %v2157_v18 = vadd.f32 %v2723_v16, %v1997_v30  ;;  %v5079_v16 = vunpack.c.h.bf16 %v4428_v6 }
 0x63e   : > { %v2769_v2 = vunpack.i.h.bf16 %v2767_v19  ;;  %v2768_v8 = vunpack.i.l.bf16 %v2767_v19  ;;  %v2171_v12 = vadd.f32 %v2758_v22, %v2011_v52  ;;  %v2010_v19 = vmul.f32 %v4603_v7, %v1968_v55  ;;  %v2762_v55 = vpop.permute.xlu1 %2761 }
 0x63f   : > { %v2764_v9 = vunpack.i.h.bf16 %v2762_v55  ;;  %v1486_v52 = vadd.f32 %v4303_v27, %v4246_v21  ;;  %v1645_v21 = vadd.f32 %v5079_v16, %v1581_v29 }
 0x640   : > { %v2304_v1 = vsel %vm345_vm0, %v1627_v42, %v2769_v2  ;;  %v2303_v34 = vsel %vm345_vm0, %v1626_v35, %v2768_v8  ;;  %v2170_v42 = vadd.f32 %v2754_v10, %v2010_v19  ;;  %v1526_v8 = vadd.f32 %v4474_v39, %v4430_v5 }
 0x641   : > { %v2336_v4 = vpack.c.bf16 %v2304_v1, %v2304_v1  ;;  %v2335_v48 = vpack.c.bf16 %v2303_v34, %v2303_v34  ;;  %v2169_v1 = vadd.f32 %v2753_v37, %v2009_v41  ;;  %v1521_v39 = vadd.f32 %v4452_v61, %v4391_v3 }
 0x642   : > { %v1938_v49 = vpop.f32.mrf.mxu2  ;;  %v1580_v30 = vmul.f32 %v4323_v24, %v1526_v8  ;;  %v1564_v3 = vmul.f32 %v4323_v24, %v1486_v52  ;;  %v5081_v10 = vunpack.c.h.bf16 %v4450_v60  ;;  %v5082_v37 = vunpack.c.l.bf16 %v4389_v32 }
 0x643   : > { %2369 = vst.msk [vmem:[%s4668_s13 + $0x4] sm:$0xf] %vm2367_vm2, %v2336_v4  ;;  %v1998_v46 = vmul.f32 %v4603_v7, %v1938_v49  ;;  %v1973_v25 = vpop.f32.mrf.mxu3  ;;  %v2830_v34 = vpack.i.bf16 %v2170_v42, %v2169_v1  ;;  %v2763_v4 = vunpack.i.l.bf16 %v2762_v55  ;;  %v5078_v49 = vunpack.c.l.bf16 %v4428_v6 }
 0x644   : > { %2368 = vst.msk [vmem:[%s4668_s13] sm:$0xf] %vm2367_vm2, %v2335_v48  ;;  %v2012_v43 = vmul.f32 %v4603_v7, %v1973_v25  ;;  %v1579_v6 = vmul.f32 %v4323_v24, %v1523_v56  ;;  %v1629_v19 = vadd.f32 %v5081_v10, %v1565_v26  ;;  %v1491_v52 = vadd.f32 %v4312_v54, %v4261_v14  ;;  %v5091_v10 = vld [vmem:[#allocation29_spill] sm:$0xff] }
 0x645   : > { %v2158_v40 = vadd.f32 %v2724_v59, %v1998_v46  ;;  %v1644_v59 = vadd.f32 %v5078_v49, %v1580_v30  ;;  %v5084_v54 = vunpack.c.l.bf16 %v4320_v28  ;;  %v1533_v28 = vadd.f32 %v4519_v57, %v4486_v51 }
 0x646   : > { %v2172_v44 = vadd.f32 %v2759_v15, %v2012_v43  ;;  %v1566_v49 = vmul.f32 %v4323_v24, %v1491_v52 }
 0x647   : > { %v2825_v62 = vpack.i.bf16 %v2158_v40, %v2157_v18  ;;  %v1578_v18 = vmul.f32 %v4323_v24, %v1521_v39 }
 0x648   : > { %v2835_v35 = vpack.i.bf16 %v2172_v44, %v2171_v12  ;;  %v5080_v12 = vunpack.c.l.bf16 %v4450_v60 }
 0x649   : > { %2826 = vrot.lane.b32.xlu0 %v2825_v62, %s3085_s10  ;;  %v1642_v42 = vadd.f32 %v5082_v37, %v1578_v18 }
 0x64a   : > { %2836 = vrot.lane.b32.xlu1 %v2835_v35, %s3085_s10  ;;  %v1628_v44 = vadd.f32 %v5080_v12, %v1564_v3  ;;  %v5085_v3 = vunpack.c.l.bf16 %v4503_v45 }
 0x64b   : > { %v1976_v2 = vpop.f32.mrf.mxu3 }
 0x64c   : > { %v2013_v48 = vmul.f32 %v4603_v7, %v1976_v2  ;;  %v5083_v2 = vunpack.c.h.bf16 %v4389_v32 }
 0x64e   : > { %v2173_v17 = vadd.f32 %v2763_v4, %v2013_v48  ;;  %v1643_v8 = vadd.f32 %v5083_v2, %v1579_v6 }
 0x651   : > { %2831 = vrot.lane.b32.xlu0 %v2830_v34, %s3085_s10 }
 0x653   : > { %v1978_v5 = vpop.f32.mrf.mxu3 }
 0x654   : > { %v2014_v15 = vmul.f32 %v4603_v7, %v1978_v5  ;;  %v2787_v22 = vpop.permute.xlu2 %2786 }
 0x655   : > { %v2789_v27 = vunpack.i.h.bf16 %v2787_v22  ;;  %v2788_v46 = vunpack.i.l.bf16 %v2787_v22 }
 0x656   : > { %v2174_v63 = vadd.f32 %v2764_v9, %v2014_v15 }
 0x657   : > { %v2322_v61 = vsel %vm345_vm0, %v1645_v21, %v2789_v27  ;;  %v2321_v23 = vsel %vm345_vm0, %v1644_v59, %v2788_v46  ;;  %v1630_v59 = vadd.f32 %v5084_v54, %v1566_v49  ;;  %v5100_v54 = vld [vmem:[#allocation32_spill] sm:$0xff] }
 0x658   : > { %v2354_v7 = vpack.c.bf16 %v2322_v61, %v2322_v61  ;;  %v2353_v25 = vpack.c.bf16 %v2321_v23, %v2321_v23  ;;  %v2840_v43 = vpack.i.bf16 %v2174_v63, %v2173_v17  ;;  %v1531_v17 = vadd.f32 %v4505_v33, %v4469_v11 }
 0x659   : > { %v5086_v23 = vunpack.c.h.bf16 %v4503_v45  ;;  %v1543_v11 = vadd.f32 %v4553_v31, %v4544_v0  ;;  %v5088_v0 = vld [vmem:[#allocation26_spill] sm:$0xff]  ;;  %v5089_v31 = vld [vmem:[#allocation27_spill] sm:$0xff] }
 0x65a   : > { %2387 = vst.msk [vmem:[%s4668_s13 + $0x4c] sm:$0xf] %vm2367_vm2, %v2354_v7  ;;  %2841 = vrot.lane.b32.xlu2 %v2840_v43, %s3085_s10  ;;  %v1582_v63 = vmul.f32 %v4323_v24, %v1531_v17  ;;  %v1503_v12 = vadd.f32 %v5089_v31, %v5088_v0  ;;  %v5106_v0 = vld [vmem:[#allocation5_spill] sm:$0xff] }
 0x65b   : > { %2386 = vst.msk [vmem:[%s4668_s13 + $0x48] sm:$0xf] %vm2367_vm2, %v2353_v25  ;;  %v2772_v40 = vpop.permute.xlu0 %2771  ;;  %v1541_v25 = vadd.f32 %v4546_v50, %v4536_v36  ;;  %v1587_v45 = vmul.f32 %v4323_v24, %v1543_v11  ;;  %v5087_v36 = vld [vmem:[#allocation28_spill] sm:$0xff] }
 0x65c   : > { %v2774_v62 = vunpack.i.h.bf16 %v2772_v40  ;;  %v2773_v35 = vunpack.i.l.bf16 %v2772_v40  ;;  %v2777_v41 = vpop.permute.xlu1 %2776  ;;  %v1646_v61 = vadd.f32 %v5085_v3, %v1582_v63  ;;  %v1501_v50 = vadd.f32 %v5087_v36, %v4308_v13  ;;  %v5103_v11 = vld [vmem:[#allocation40_spill] sm:$0xff]  ;;  %v5105_v36 = vld [vmem:[#allocation6_spill] sm:$0xff] }
 0x65d   : > { %v2779_v38 = vunpack.i.h.bf16 %v2777_v41  ;;  %v2778_v1 = vunpack.i.l.bf16 %v2777_v41  ;;  %v1586_v40 = vmul.f32 %v4323_v24, %v1541_v25 }
 0x65e   : > { %v2306_v34 = vsel %vm345_vm0, %v1629_v19, %v2774_v62  ;;  %v2305_v60 = vsel %vm345_vm0, %v1628_v44, %v2773_v35  ;;  %v5090_v44 = vld [vmem:[#allocation39_spill] sm:$0xff]  ;;  %v5092_v62 = vld [vmem:[#allocation38_spill] sm:$0xff] }
 0x65f   : > { %v2338_v55 = vpack.c.bf16 %v2306_v34, %v2306_v34  ;;  %v2337_v30 = vpack.c.bf16 %v2305_v60, %v2305_v60  ;;  %v2320_v29 = vsel %vm345_vm0, %v1643_v8, %v2779_v38  ;;  %v2319_v9 = vsel %vm345_vm0, %v1642_v42, %v2778_v1  ;;  %v5093_v35 = vld [vmem:[#allocation31_spill] sm:$0xff]  ;;  %v5094_v42 = vld [vmem:[#allocation37_spill] sm:$0xff] }
 0x660   : > { %v2352_v4 = vpack.c.bf16 %v2320_v29, %v2320_v29  ;;  %v2351_v48 = vpack.c.bf16 %v2319_v9, %v2319_v9  ;;  %v1536_v19 = vadd.f32 %v5091_v10, %v5090_v44  ;;  %v1538_v41 = vadd.f32 %v5093_v35, %v5092_v62  ;;  %v5108_v62 = vld [vmem:[#allocation16_spill] sm:$0xff] }
 0x661   : > { %2371 = vst.msk [vmem:[%s4668_s13 + $0xc] sm:$0xf] %vm2367_vm2, %v2338_v55  ;;  %v5095_v2 = vunpack.c.l.bf16 %v5094_v42  ;;  %v5096_v38 = vunpack.c.h.bf16 %v5094_v42  ;;  %v1571_v29 = vmul.f32 %v4323_v24, %v1503_v12  ;;  %v5109_v42 = vld [vmem:[#allocation18_spill] sm:$0xff] }
 0x662   : > { %2370 = vst.msk [vmem:[%s4668_s13 + $0x8] sm:$0xf] %vm2367_vm2, %v2337_v30  ;;  %v1570_v30 = vmul.f32 %v4323_v24, %v1501_v50 }
 0x663   : > { %2385 = vst.msk [vmem:[%s4668_s13 + $0x44] sm:$0xf] %vm2367_vm2, %v2352_v4  ;;  %v2792_v32 = vpop.permute.xlu2 %2791  ;;  %v1650_v8 = vadd.f32 %v5095_v2, %v1586_v40  ;;  %v1651_v1 = vadd.f32 %v5096_v38, %v1587_v45 }
 0x664   : > { %2384 = vst.msk [vmem:[%s4668_s13 + $0x40] sm:$0xf] %vm2367_vm2, %v2351_v48  ;;  %v2794_v5 = vunpack.i.h.bf16 %v2792_v32  ;;  %v2793_v58 = vunpack.i.l.bf16 %v2792_v32  ;;  %v1584_v48 = vmul.f32 %v4323_v24, %v1536_v19  ;;  %v1585_v32 = vmul.f32 %v4323_v24, %v1538_v41  ;;  %v5107_v19 = vld [vmem:[#allocation19_spill] sm:$0xff] }
 0x665   : > { %v1551_v35 = vadd.f32 %v5108_v62, %v5107_v19 }
 0x666   : > { %v2310_v39 = vsel %vm345_vm0, %v4346_v20, %v2794_v5  ;;  %v2309_v56 = vsel %vm345_vm0, %v4335_v47, %v2793_v58  ;;  %v5097_v5 = vld [vmem:[#allocation24_spill] sm:$0xff] }
 0x667   : > { %v2342_v15 = vpack.c.bf16 %v2310_v39, %v2310_v39  ;;  %v2341_v22 = vpack.c.bf16 %v2309_v56, %v2309_v56  ;;  %v5098_v58 = vunpack.c.l.bf16 %v5097_v5  ;;  %v5099_v56 = vunpack.c.h.bf16 %v5097_v5 }
 0x669   : > { %2375 = vst.msk [vmem:[%s4668_s13 + $0x1c] sm:$0xf] %vm2367_vm2, %v2342_v15  ;;  %v1634_v39 = vadd.f32 %v5098_v58, %v1570_v30  ;;  %v1635_v15 = vadd.f32 %v5099_v56, %v1571_v29  ;;  %v5112_v30 = vld [vmem:[#allocation41_spill] sm:$0xff]  ;;  %v5115_v58 = vld [vmem:[#allocation30_spill] sm:$0xff] }
 0x66a   : > { %2374 = vst.msk [vmem:[%s4668_s13 + $0x18] sm:$0xf] %vm2367_vm2, %v2341_v22 }
 0x66b   : > { %v2782_v14 = vpop.permute.xlu1 %2781 }
 0x66c   : > { %v2784_v16 = vunpack.i.h.bf16 %v2782_v14  ;;  %v2783_v21 = vunpack.i.l.bf16 %v2782_v14 }
 0x66e   : > { %v2308_v20 = vsel %vm345_vm0, %v4328_v53, %v2784_v16  ;;  %v2307_v27 = vsel %vm345_vm0, %v1630_v59, %v2783_v21  ;;  %v1583_v53 = vmul.f32 %v4323_v24, %v1533_v28  ;;  %v5101_v59 = vunpack.c.l.bf16 %v5100_v54 }
 0x66f   : > { %v2340_v47 = vpack.c.bf16 %v2308_v20, %v2308_v20  ;;  %v2339_v46 = vpack.c.bf16 %v2307_v27, %v2307_v27  ;;  %v5102_v21 = vunpack.c.h.bf16 %v5100_v54  ;;  %v5118_v54 = vld [vmem:[#allocation36_spill] sm:$0xff] }
 0x670   : > { %v1647_v26 = vadd.f32 %v5086_v23, %v1583_v53  ;;  %v1648_v16 = vadd.f32 %v5101_v59, %v1584_v48 }
 0x671   : > { %2373 = vst.msk [vmem:[%s4668_s13 + $0x14] sm:$0xf] %vm2367_vm2, %v2340_v47  ;;  %v1649_v20 = vadd.f32 %v5102_v21, %v1585_v32 }
 0x672   : > { %2372 = vst.msk [vmem:[%s4668_s13 + $0x10] sm:$0xf] %vm2367_vm2, %v2339_v46 }
 0x67c   : > { %v2797_v7 = vpop.permute.xlu0 %2796 }
 0x67d   : > { %v2799_v51 = vunpack.i.h.bf16 %v2797_v7  ;;  %v2798_v33 = vunpack.i.l.bf16 %v2797_v7 }
 0x67f   : > { %v2324_v57 = vsel %vm345_vm0, %v1647_v26, %v2799_v51  ;;  %v2323_v43 = vsel %vm345_vm0, %v1646_v61, %v2798_v33  ;;  %v5104_v33 = vld [vmem:[#allocation35_spill] sm:$0xff] }
 0x680   : > { %v2356_v18 = vpack.c.bf16 %v2324_v57, %v2324_v57  ;;  %v2355_v6 = vpack.c.bf16 %v2323_v43, %v2323_v43 }
 0x682   : > { %2389 = vst.msk [vmem:[%s4668_s13 + $0x54] sm:$0xf] %vm2367_vm2, %v2356_v18 }
 0x683   : > { %2388 = vst.msk [vmem:[%s4668_s13 + $0x50] sm:$0xf] %vm2367_vm2, %v2355_v6 }
 0x684   : > { %v2817_v37 = vpop.permute.xlu2 %2816 }
 0x685   : > { %v2819_v34 = vunpack.i.h.bf16 %v2817_v37  ;;  %v2818_v13 = vunpack.i.l.bf16 %v2817_v37 }
 0x687   : > { %v2328_v60 = vsel %vm345_vm0, %v1651_v1, %v2819_v34  ;;  %v2327_v55 = vsel %vm345_vm0, %v1650_v8, %v2818_v13  ;;  %v5110_v8 = vld [vmem:[#allocation9_spill] sm:$0xff]  ;;  %v1590_v13 = vmul.f32 %v4323_v24, %v1551_v35 }
 0x688   : > { %v2360_v9 = vpack.c.bf16 %v2328_v60, %v2328_v60  ;;  %v2359_v4 = vpack.c.bf16 %v2327_v55, %v2327_v55  ;;  %v5111_v55 = vld [vmem:[#allocation33_spill] sm:$0xff] }
 0x689   : > { %v1546_v29 = vadd.f32 %v5112_v30, %v5111_v55 }
 0x68a   : > { %2393 = vst.msk [vmem:[%s4668_s13 + $0x64] sm:$0xf] %vm2367_vm2, %v2360_v9  ;;  %v5113_v9 = vld [vmem:[#allocation25_spill] sm:$0xff] }
 0x68b   : > { %2392 = vst.msk [vmem:[%s4668_s13 + $0x60] sm:$0xf] %vm2367_vm2, %v2359_v4  ;;  %v2802_v52 = vpop.permute.xlu0 %2801  ;;  %v5114_v4 = vld [vmem:[#allocation7_spill] sm:$0xff] }
 0x68c   : > { %v2804_v22 = vunpack.i.h.bf16 %v2802_v52  ;;  %v2803_v49 = vunpack.i.l.bf16 %v2802_v52  ;;  %v2807_v14 = vpop.permute.xlu1 %2806  ;;  %v1548_v48 = vadd.f32 %v5114_v4, %v5113_v9 }
 0x68d   : > { %v2809_v27 = vunpack.i.h.bf16 %v2807_v14  ;;  %v2808_v47 = vunpack.i.l.bf16 %v2807_v14 }
 0x68e   : > { %v2312_v46 = vsel %vm345_vm0, %v1635_v15, %v2804_v22  ;;  %v2311_v17 = vsel %vm345_vm0, %v1634_v39, %v2803_v49  ;;  %v5116_v39 = vunpack.c.l.bf16 %v5115_v58  ;;  %v5117_v49 = vld [vmem:[#allocation42_spill] sm:$0xff] }
 0x68f   : > { %v2344_v28 = vpack.c.bf16 %v2312_v46, %v2312_v46  ;;  %v2343_v63 = vpack.c.bf16 %v2311_v17, %v2311_v17  ;;  %v2326_v53 = vsel %vm345_vm0, %v1649_v20, %v2809_v27  ;;  %v2325_v3 = vsel %vm345_vm0, %v1648_v16, %v2808_v47  ;;  %v5119_v20 = vld [vmem:[#allocation12_spill] sm:$0xff] }
 0x690   : > { %v2358_v61 = vpack.c.bf16 %v2326_v53, %v2326_v53  ;;  %v2357_v23 = vpack.c.bf16 %v2325_v3, %v2325_v3  ;;  %v1654_v56 = vadd.f32 %v5116_v39, %v1590_v13  ;;  %v1588_v46 = vmul.f32 %v4323_v24, %v1546_v29  ;;  %v5120_v3 = vld [vmem:[#allocation34_spill] sm:$0xff] }
 0x691   : > { %2377 = vst.msk [vmem:[%s4668_s13 + $0x24] sm:$0xf] %vm2367_vm2, %v2344_v28  ;;  %v1589_v17 = vmul.f32 %v4323_v24, %v1548_v48 }
 0x692   : > { %2376 = vst.msk [vmem:[%s4668_s13 + $0x20] sm:$0xf] %vm2367_vm2, %v2343_v63 }
 0x693   : > { %2391 = vst.msk [vmem:[%s4668_s13 + $0x5c] sm:$0xf] %vm2367_vm2, %v2358_v61  ;;  %v2822_v26 = vpop.permute.xlu2 %2821  ;;  %v5121_v61 = vunpack.c.l.bf16 %v5120_v3 }
 0x694   : > { %2390 = vst.msk [vmem:[%s4668_s13 + $0x58] sm:$0xf] %vm2367_vm2, %v2357_v23  ;;  %v2824_v7 = vunpack.i.h.bf16 %v2822_v26  ;;  %v2823_v25 = vunpack.i.l.bf16 %v2822_v26  ;;  %v5122_v26 = vunpack.c.h.bf16 %v5120_v3 }
 0x695   : > { %v1652_v23 = vadd.f32 %v5121_v61, %v1588_v46 }
 0x696   : > { %v2316_v51 = vsel %vm345_vm0, %v5103_v11, %v2824_v7  ;;  %v2315_v57 = vsel %vm345_vm0, %v5104_v33, %v2823_v25  ;;  %v1653_v7 = vadd.f32 %v5122_v26, %v1589_v17 }
 0x697   : > { %v2348_v43 = vpack.c.bf16 %v2316_v51, %v2316_v51  ;;  %v2347_v18 = vpack.c.bf16 %v2315_v57, %v2315_v57 }
 0x699   : > { %2381 = vst.msk [vmem:[%s4668_s13 + $0x34] sm:$0xf] %vm2367_vm2, %v2348_v43 }
 0x69a   : > { %2380 = vst.msk [vmem:[%s4668_s13 + $0x30] sm:$0xf] %vm2367_vm2, %v2347_v18 }
 0x69b   : > { %v2812_v6 = vpop.permute.xlu1 %2811 }
 0x69c   : > { %v2814_v40 = vunpack.i.h.bf16 %v2812_v6  ;;  %v2813_v45 = vunpack.i.l.bf16 %v2812_v6 }
 0x69e   : > { %v2314_v50 = vsel %vm345_vm0, %v5105_v36, %v2814_v40  ;;  %v2313_v31 = vsel %vm345_vm0, %v5106_v0, %v2813_v45 }
 0x69f   : > { %v2346_v12 = vpack.c.bf16 %v2314_v50, %v2314_v50  ;;  %v2345_v44 = vpack.c.bf16 %v2313_v31, %v2313_v31 }
 0x6a1   : > { %2379 = vst.msk [vmem:[%s4668_s13 + $0x2c] sm:$0xf] %vm2367_vm2, %v2346_v12 }
 0x6a2   : > { %2378 = vst.msk [vmem:[%s4668_s13 + $0x28] sm:$0xf] %vm2367_vm2, %v2345_v44 }
 0x6b4   : > { %v2842_v10 = vpop.permute.xlu2 %2841 }
 0x6b5   : > { %v2844_v41 = vunpack.i.h.bf16 %v2842_v10  ;;  %v2843_v37 = vunpack.i.l.bf16 %v2842_v10 }
 0x6b7   : > { %v2334_v2 = vsel %vm345_vm0, %v5109_v42, %v2844_v41  ;;  %v2333_v38 = vsel %vm345_vm0, %v5110_v8, %v2843_v37 }
 0x6b8   : > { %v2366_v1 = vpack.c.bf16 %v2334_v2, %v2334_v2  ;;  %v2365_v34 = vpack.c.bf16 %v2333_v38, %v2333_v38 }
 0x6ba   : > { %2399 = vst.msk [vmem:[%s4668_s13 + $0x7c] sm:$0xf] %vm2367_vm2, %v2366_v1 }
 0x6bb   : > { %2398 = vst.msk [vmem:[%s4668_s13 + $0x78] sm:$0xf] %vm2367_vm2, %v2365_v34  ;;  %v2827_v60 = vpop.permute.xlu0 %2826 }
 0x6bc   : > { %v2829_v32 = vunpack.i.h.bf16 %v2827_v60  ;;  %v2828_v52 = vunpack.i.l.bf16 %v2827_v60  ;;  %v2837_v5 = vpop.permute.xlu1 %2836 }
 0x6bd   : > { %v2839_v15 = vunpack.i.h.bf16 %v2837_v5  ;;  %v2838_v22 = vunpack.i.l.bf16 %v2837_v5 }
 0x6be   : > { %v2318_v14 = vsel %vm345_vm0, %v5117_v49, %v2829_v32  ;;  %v2317_v59 = vsel %vm345_vm0, %v5118_v54, %v2828_v52 }
 0x6bf   : > { %v2350_v16 = vpack.c.bf16 %v2318_v14, %v2318_v14  ;;  %v2349_v21 = vpack.c.bf16 %v2317_v59, %v2317_v59  ;;  %v2332_v27 = vsel %vm345_vm0, %v5119_v20, %v2839_v15  ;;  %v2331_v47 = vsel %vm345_vm0, %v1654_v56, %v2838_v22 }
 0x6c0   : > { %v2364_v28 = vpack.c.bf16 %v2332_v27, %v2332_v27  ;;  %v2363_v63 = vpack.c.bf16 %v2331_v47, %v2331_v47 }
 0x6c1   : > { %2383 = vst.msk [vmem:[%s4668_s13 + $0x3c] sm:$0xf] %vm2367_vm2, %v2350_v16 }
 0x6c2   : > { %2382 = vst.msk [vmem:[%s4668_s13 + $0x38] sm:$0xf] %vm2367_vm2, %v2349_v21 }
 0x6c3   : > { %2397 = vst.msk [vmem:[%s4668_s13 + $0x74] sm:$0xf] %vm2367_vm2, %v2364_v28  ;;  %v2832_v53 = vpop.permute.xlu0 %2831 }
 0x6c4   : > { %2396 = vst.msk [vmem:[%s4668_s13 + $0x70] sm:$0xf] %vm2367_vm2, %v2363_v63  ;;  %v2834_v24 = vunpack.i.h.bf16 %v2832_v53  ;;  %v2833_v25 = vunpack.i.l.bf16 %v2832_v53 }
 0x6c6   : > { %v2330_v11 = vsel %vm345_vm0, %v1653_v7, %v2834_v24  ;;  %v2329_v51 = vsel %vm345_vm0, %v1652_v23, %v2833_v25 }
 0x6c7   : > { %v2362_v33 = vpack.c.bf16 %v2330_v11, %v2330_v11  ;;  %v2361_v57 = vpack.c.bf16 %v2329_v51, %v2329_v51 }
 0x6c9   : > { %2395 = vst.msk [vmem:[%s4668_s13 + $0x6c] sm:$0xf] %vm2367_vm2, %v2362_v33 }
 0x6ca   : > { %2394 = vst.msk [vmem:[%s4668_s13 + $0x68] sm:$0xf] %vm2367_vm2, %v2361_v57 }
 0x6cb PF: > { %s15_s15 = sadd.s32 1, %s3079_s15  }
 0x6cc   : > { %p12_p7 = scmp.ge.s32.totalorder %s15_s15, 4  }
 0x6ce   :  { %14 = sbr.rel (!%p12_p7) target bundleno = 1 (0x1), region = 71 }
 0x6d3   :  { %2421 = vsyncpa [#allocation3], 1 }
 0x6d4   :  { %2423 = vsyncpa [#allocation3 + $0x1], 1 }

// kernel: da_head_forward.3
= control target key start
LH: loop header
LB: loop body
LE: loop exit
PB: predicated region body
PF: predicated region fallthrough
CT: control target
= control target key end

     0   :  { %s4523_s12 = smov 0   ;;  %s5903_s0 = inlined_call_operand.vmem [shape: bf16[2,342,128], index: 0, kind: input, shape index: {}]   ;;  %s5904_s1 = inlined_call_operand.vmem [shape: bf16[9,128,64], index: 1, kind: input, shape index: {}]   ;;  %s5905_s2 = inlined_call_operand.vmem [shape: f32[1,64], index: 2, kind: input, shape index: {}]   ;;  %s5906_s3 = inlined_call_operand.vmem [shape: bf16[2,256,64], index: 3, kind: output, shape index: {}]  }
   0x1 LB: > { %s3676_s13 = sadd.s32 4294967295, %s4501_s12   ;;  %p3680_p0 = scmp.ge.s32.totalorder %s4501_s12, 1  ;;  %s4501_s12 = sphi %s4523_s12, %s13_s12  }
   0x2   : > { %p137_p1 = scmp.lt.s32.totalorder %s4501_s12, 3 }
   0x4   : > { %p138_p2 = pnand %p3680_p0, %p137_p1 }
   0x6   : > { %141 = sbr.rel (%p138_p2) target bundleno = 847 (0x34f), region = 32 }
   0xb   : > { %v4339_v0 = vld [vmem:[%s5904_s1 + $0x78] sm:$0xff]  ;;  %p161_p3 = scmp.lt.s32.totalorder %s3676_s13, 1  ;;  %v4338_v1 = vld [vmem:[%s5904_s1 + $0x70] sm:$0xff]  ;;  %v4337_v2 = vld [vmem:[%s5904_s1 + $0x68] sm:$0xff]  ;;  %vm334_vm0 = vsmask.f32 7424 }
   0xc   : > { %4437 = vmatpush.bf16.msra.mxu1 %v4339_v0  ;;  %4438 = vmatpush.bf16.msra.mxu2 %v4339_v0  ;;  %v4336_v3 = vld [vmem:[%s5904_s1 + $0x60] sm:$0xff]  ;;  %v4335_v5 = vld [vmem:[%s5904_s1 + $0x58] sm:$0xff]  ;;  %v4334_v11 = vld [vmem:[%s5904_s1 + $0x50] sm:$0xff]  ;;  %vm834_vm1 = vcmask 1046528   ;;  %vm1479_vm2 = vsmask.f32 6400 }
   0xd   : > { %s5934_s13 = smov (!%p161_p3, %s3676_s13), 1  ;;  %549 = vmatpush.bf16.msra.mxu0 %v4339_v0  ;;  %4439 = vmatpush.bf16.msra.mxu3 %v4339_v0  ;;  %v4333_v20 = vld [vmem:[%s5904_s1 + $0x48] sm:$0xff]  ;;  %v4332_v31 = vld [vmem:[%s5904_s1 + $0x40] sm:$0xff]  ;;  %v4347_v36 = vld [vmem:[%s5904_s1 + $0xb8] sm:$0xff]  ;;  %vm2517_vm3 = vsmask.f32 5376 }
   0xe   : > { %s4461_s20 = smul.u32 172, %s5934_s13  ;;  %v4331_v39 = vld [vmem:[%s5904_s1 + $0x38] sm:$0xff]  ;;  %v4346_v46 = vld [vmem:[%s5904_s1 + $0xb0] sm:$0xff]  ;;  %v4345_v54 = vld [vmem:[%s5904_s1 + $0xa8] sm:$0xff]  ;;  %vm1872_vm4 = vcmask 1045504   ;;  %vm2910_vm5 = vcmask 1044480  }
   0xf   : > { %v4380_v40 = vld [vmem:[%s5904_s1 + $0x138] sm:$0xff]  ;;  %v4330_v47 = vld [vmem:[%s5904_s1 + $0x30] sm:$0xff]  ;;  %v4329_v55 = vld [vmem:[%s5904_s1 + $0x28] sm:$0xff]  ;;  %s4306_s19 = sshll.u32 %s5934_s13, 7  ;;  %vm3588_vm6 = vcmask 519168  }
  0x10   : > { %4440 = vmatpush.bf16.msra.mxu1 %v4338_v1  ;;  %4441 = vmatpush.bf16.msra.mxu2 %v4338_v1  ;;  %s4549_s25 = scalar_lea.vmem %s5903_s0, %s4461_s20  ;;  %v4379_v48 = vld [vmem:[%s5904_s1 + $0x130] sm:$0xff]  ;;  %v4372_v52 = vld [vmem:[%s5904_s1 + $0xf8] sm:$0xff]  ;;  %v4378_v56 = vld [vmem:[%s5904_s1 + $0x128] sm:$0xff]  ;;  %s5517_s21 = scalar_lea.vmem %s5906_s3, %s4306_s19 }
  0x11   : > { %550 = vmatpush.bf16.msra.mxu0 %v4338_v1  ;;  %4442 = vmatpush.bf16.msra.mxu3 %v4338_v1  ;;  %v4552_v4 = vld [vmem:[%s4549_s25 + $0x28] sm:$0xff]  ;;  %v4558_v6 = vld [vmem:[%s4549_s25 + $0x50] sm:$0xff]  ;;  %v4561_v7 = vld [vmem:[%s4549_s25] sm:$0xff]  }
  0x12   : > { %v4564_v8 = vld [vmem:[%s4549_s25 + $0x30] sm:$0xff]  ;;  %v375_v9 = vshll.u32 %v4552_v4, 16  ;;  %v4568_v10 = vld [vmem:[%s4549_s25 + $0x58] sm:$0xff]  ;;  %v415_v12 = vshll.u32 %v4558_v6, 16  ;;  %v4575_v13 = vld [vmem:[%s4549_s25 + $0x8] sm:$0xff]  ;;  %v338_v14 = vshll.u32 %v4561_v7, 16 }
  0x13   : > { %v4321_v15 = vld [vmem:[%s4549_s25 + $0x78] sm:$0xff]  ;;  %v379_v17 = vshrl.u32 %v4552_v4, 16  ;;  %v383_v18 = vshll.u32 %v4564_v8, 16  ;;  %v423_v19 = vshll.u32 %v4568_v10, 16  ;;  %v419_v22 = vshrl.u32 %v4558_v6, 16  ;;  %v4591_v23 = vld [vmem:[%s4549_s25 + $0x80] sm:$0xff] }
  0x14   : > { %4443 = vmatpush.bf16.msra.mxu1 %v4337_v2  ;;  %4444 = vmatpush.bf16.msra.mxu2 %v4337_v2  ;;  %v4579_v16 = vrot.slane %v375_v9, 1  ;;  %v4587_v21 = vrot.slane %v415_v12, 1  ;;  %v455_v24 = vshll.u32 %v4321_v15, 16  ;;  %v336_v25 = vshrl.u32 %v4561_v7, 16  ;;  %v4629_v49 = vld [vmem:[%s4549_s25 + $0x38] sm:$0xff]  ;;  %v4632_v50 = vld [vmem:[%s4549_s25 + $0x60] sm:$0xff] }
  0x15   : > { %551 = vmatpush.bf16.msra.mxu0 %v4337_v2  ;;  %4445 = vmatpush.bf16.msra.mxu3 %v4337_v2  ;;  %v340_v26 = vrot.slane %v338_v14, 1  ;;  %v343_v27 = vshll.u32 %v4575_v13, 16  ;;  %v385_v29 = vrot.slane %v383_v18, 1  ;;  %v4596_v30 = vrot.slane %v423_v19, 1  ;;  %v4639_v53 = vld [vmem:[%s4549_s25 + $0x10] sm:$0xff]  ;;  %v4658_v62 = vld [vmem:[%s4549_s25 + $0x88] sm:$0xff] }
  0x16   : > { %v381_v28 = vor.u32 %v379_v17, %v4579_v16  ;;  %v421_v32 = vor.u32 %v419_v22, %v4587_v21  ;;  %v4602_v33 = vrot.slane %v455_v24, 1  ;;  %v459_v34 = vshrl.u32 %v4321_v15, 16  ;;  %v4371_v61 = vld [vmem:[%s5904_s1 + $0xf0] sm:$0xff]  ;;  %v4344_v1 = vld [vmem:[%s5904_s1 + $0xa0] sm:$0xff]  ;;  %v4370_v17 = vld [vmem:[%s5904_s1 + $0xe8] sm:$0xff] }
  0x17   : > { %v463_v35 = vshll.u32 %v4591_v23, 16  ;;  %v341_v37 = vor.u32 %v340_v26, %v336_v25  ;;  %v345_v38 = vrot.slane %v343_v27, 1  ;;  %v387_v57 = vshrl.u32 %v4564_v8, 16  ;;  %v4328_v2 = vld [vmem:[%s5904_s1 + $0x20] sm:$0xff]  ;;  %v4678_v18 = vld [vmem:[%s4549_s25 + $0x48] sm:$0xff]  ;;  %v4343_v22 = vld [vmem:[%s5904_s1 + $0x98] sm:$0xff] }
  0x18   : > { %4446 = vmatpush.bf16.msra.mxu1 %v4336_v3  ;;  %4447 = vmatpush.bf16.msra.mxu2 %v4336_v3  ;;  %v386_v41 = vsel %vm334_vm0, %v381_v28, %v385_v29  ;;  %v426_v42 = vsel %vm334_vm0, %v421_v32, %v4596_v30  ;;  %v461_v43 = vor.u32 %v459_v34, %v4602_v33  ;;  %v391_v58 = vshll.u32 %v4629_v49, 16  ;;  %v223_v32 = vld [vmem:[%s4549_s25 + $0x90] sm:$0x1] }
  0x19   : > { %552 = vmatpush.bf16.msra.mxu0 %v4336_v3  ;;  %4448 = vmatpush.bf16.msra.mxu3 %v4336_v3  ;;  %v465_v44 = vrot.slane %v463_v35, 1  ;;  %v346_v45 = vsel %vm334_vm0, %v341_v37, %v345_v38  ;;  %v427_v59 = vshrl.u32 %v4568_v10, 16  ;;  %v431_v60 = vshll.u32 %v4632_v50, 16  ;;  %v4377_v3 = vld [vmem:[%s5904_s1 + $0x120] sm:$0xff]  ;;  %v4376_v37 = vld [vmem:[%s5904_s1 + $0x118] sm:$0xff] }
  0x1a   : > { %v347_v63 = vshrl.u32 %v4575_v13, 16  ;;  %v351_v0 = vshll.u32 %v4639_v53, 16  ;;  %v393_v9 = vrot.slane %v391_v58, 1  ;;  %v467_v14 = vshrl.u32 %v4591_v23, 16  ;;  %v4327_v23 = vld [vmem:[%s5904_s1 + $0x18] sm:$0xff] }
  0x1b   : > { %v466_v51 = vsel %vm334_vm0, %v461_v43, %v465_v44  ;;  %v433_v12 = vrot.slane %v431_v60, 1  ;;  %v471_v15 = vshll.u32 %v4658_v62, 16  ;;  %v407_v28 = vshll.u32 %v4678_v18, 16  ;;  %v4341_v43 = vld [vmem:[%s5904_s1 + $0x88] sm:$0xff] }
  0x1c   : > { %4449 = vmatpush.bf16.msra.mxu1 %v4335_v5  ;;  %4450 = vmatpush.bf16.msra.mxu2 %v4335_v5  ;;  %v349_v19 = vor.u32 %v347_v63, %v345_v38  ;;  %v469_v26 = vor.u32 %v467_v14, %v465_v44  ;;  %v4369_v38 = vld [vmem:[%s5904_s1 + $0xe0] sm:$0xff]  ;;  %v4375_v44 = vld [vmem:[%s5904_s1 + $0x110] sm:$0xff] }
  0x1d   : > { %553 = vmatpush.bf16.msra.mxu0 %v4335_v5  ;;  %4451 = vmatpush.bf16.msra.mxu3 %v4335_v5  ;;  %v389_v5 = vor.u32 %v387_v57, %v385_v29  ;;  %v473_v27 = vrot.slane %v471_v15, 1  ;;  %v4698_v35 = vrot.slane %v407_v28, 1  ;;  %v355_v57 = vshrl.u32 %v4639_v53, 16  ;;  %v4324_v28 = vld [vmem:[%s5904_s1] sm:$0xff] }
  0x1f   : > { %v394_v24 = vsel %vm334_vm0, %v389_v5, %v393_v9  ;;  %v474_v34 = vsel %vm334_vm0, %v469_v26, %v473_v27  ;;  %v4340_v26 = vld [vmem:[%s5904_s1 + $0x80] sm:$0xff] }
  0x20   : > { %4452 = vmatpush.bf16.msra.mxu1 %v4334_v11  ;;  %4453 = vmatpush.bf16.msra.mxu2 %v4334_v11 }
  0x21   : > { %554 = vmatpush.bf16.msra.mxu0 %v4334_v11  ;;  %4454 = vmatpush.bf16.msra.mxu3 %v4334_v11  ;;  %v429_v11 = vor.u32 %v427_v59, %v4596_v30  ;;  %v4691_v30 = vld [vmem:[%s4549_s25 + $0x40] sm:$0xff] }
  0x23   : > { %v434_v25 = vsel %vm334_vm0, %v429_v11, %v433_v12 }
  0x24   : > { %4455 = vmatpush.bf16.msra.mxu1 %v4333_v20  ;;  %4456 = vmatpush.bf16.msra.mxu2 %v4333_v20 }
  0x25   : > { %555 = vmatpush.bf16.msra.mxu0 %v4333_v20  ;;  %4457 = vmatpush.bf16.msra.mxu3 %v4333_v20  ;;  %v353_v20 = vrot.slane %v351_v0, 1 }
  0x27   : > { %v354_v29 = vsel %vm334_vm0, %v349_v19, %v353_v20 }
  0x28   : > { %4458 = vmatpush.bf16.msra.mxu1 %v4332_v31  ;;  %4459 = vmatpush.bf16.msra.mxu2 %v4332_v31 }
  0x29   : > { %556 = vmatpush.bf16.msra.mxu0 %v4332_v31  ;;  %4460 = vmatpush.bf16.msra.mxu3 %v4332_v31  ;;  %v4694_v31 = vld [vmem:[%s4549_s25 + $0x68] sm:$0xff] }
  0x2b   : > { %582 = vmatmul.bf16.vlgmr.msra.gmra.mxu1 %v386_v41  ;;  %607 = vmatmul.bf16.vlgmr.msra.gmra.mxu2 %v426_v42  ;;  %v4711_v41 = vld [vmem:[%s4549_s25 + $0x18] sm:$0xff]  ;;  %v4326_v42 = vld [vmem:[%s5904_s1 + $0x10] sm:$0xff] }
  0x2c   : > { %938 = vmatpush.bf16.msrb.mxu2 %v4347_v36  ;;  %714 = vmatpush.bf16.msrb.mxu1 %v4331_v39  ;;  %v4342_v36 = vld [vmem:[%s5904_s1 + $0x90] sm:$0xff]  ;;  %v314_v39 = vunpack.c.l.b16 %v223_v32  ;;  %v359_v58 = vshll.u32 %v4711_v41, 16  ;;  %v4777_v32 = vld [vmem:[%s4549_s25 + $0xc] sm:$0xf] }
  0x2d   : > { %1716 = vmatpush.bf16.msrb.mxu0 %v4380_v40  ;;  %632 = vmatmul.bf16.vlgmr.msra.gmra.mxu3 %v466_v51  ;;  %v411_v40 = vshrl.u32 %v4678_v18, 16  ;;  %v439_v51 = vshll.u32 %v4694_v31, 16 }
  0x2e   : > { %557 = vmatmul.bf16.vlgmr.msra.gmra.mxu0 %v346_v45  ;;  %1323 = vmatpush.bf16.msrb.mxu3 %v4372_v52  ;;  %v4728_v52 = vld [vmem:[%s4549_s25 + $0x20] sm:$0xff]  ;;  %v361_v5 = vrot.slane %v359_v58, 1 }
  0x2f   : > { %v413_v45 = vor.u32 %v411_v40, %v4698_v35  ;;  %v441_v63 = vrot.slane %v439_v51, 1  ;;  %v367_v0 = vshll.u32 %v4728_v52, 16  ;;  %v5907_v40 = vunpack.c.l.b16 %v4777_v32 }
  0x30   : > { %939 = vmatpush.bf16.msrb.mxu2 %v4346_v46  ;;  %715 = vmatpush.bf16.msrb.mxu1 %v4330_v47  ;;  %v395_v46 = vshrl.u32 %v4629_v49, 16  ;;  %v399_v47 = vshll.u32 %v4691_v30, 16 }
  0x31   : > { %1717 = vmatpush.bf16.msrb.mxu0 %v4379_v48  ;;  %v435_v48 = vshrl.u32 %v4632_v50, 16 }
  0x32   : > { %1324 = vmatpush.bf16.msrb.mxu3 %v4371_v61  ;;  %v397_v59 = vor.u32 %v395_v46, %v393_v9  ;;  %v401_v60 = vrot.slane %v399_v47, 1  ;;  %v4348_v46 = vld [vmem:[%s4549_s25 + $0x10] sm:$0xff] }
  0x33   : > { %v437_v61 = vor.u32 %v435_v48, %v433_v12  ;;  %v369_v12 = vrot.slane %v367_v0, 1  ;;  %v1221_v58 = vrot.slane %v4348_v46, 1  ;;  %v4429_v0 = vld [vmem:[%s5904_s1 + $0x238] sm:$0xff] }
  0x34   : > { %940 = vmatpush.bf16.msrb.mxu2 %v4345_v54  ;;  %716 = vmatpush.bf16.msrb.mxu1 %v4329_v55  ;;  %v4730_v54 = vpack.c.b16 %v314_v39, %v314_v39  ;;  %v4368_v55 = vld [vmem:[%s5904_s1 + $0xd8] sm:$0xff]  ;;  %v402_v11 = vsel %vm334_vm0, %v397_v59, %v401_v60 }
  0x35   : > { %1718 = vmatpush.bf16.msrb.mxu0 %v4378_v56  ;;  %v4737_v56 = vsel %vm334_vm0, %v413_v45, %v4587_v21  ;;  %v4367_v21 = vld [vmem:[%s5904_s1 + $0xd0] sm:$0xff]  ;;  %v442_v9 = vsel %vm334_vm0, %v437_v61, %v441_v63 }
  0x36   : > { %1325 = vmatpush.bf16.msrb.mxu3 %v4370_v17 }
  0x38   : > { %941 = vmatpush.bf16.msrb.mxu2 %v4344_v1  ;;  %717 = vmatpush.bf16.msrb.mxu1 %v4328_v2  ;;  %v475_v1 = vshrl.u32 %v4658_v62, 16  ;;  %v479_v2 = vshll.u32 %v4730_v54, 16  ;;  %v371_v62 = vshrl.u32 %v4728_v52, 16 }
  0x39   : > { %1719 = vmatpush.bf16.msrb.mxu0 %v4377_v3  ;;  %v357_v3 = vor.u32 %v355_v57, %v353_v20  ;;  %v4325_v20 = vld [vmem:[%s5904_s1 + $0x8] sm:$0xff] }
  0x3a   : > { %1326 = vmatpush.bf16.msrb.mxu3 %v4369_v38  ;;  %v477_v14 = vor.u32 %v475_v1, %v473_v27  ;;  %v481_v15 = vrot.slane %v479_v2, 1  ;;  %v373_v19 = vor.u32 %v371_v62, %v369_v12  ;;  %v4374_v27 = vld [vmem:[%s5904_s1 + $0x108] sm:$0xff]  ;;  %v1489_v62 = vshrl.u32 %v4348_v46, 16 }
  0x3b   : > { %587 = vmatmul.bf16.gmra.mxu1 %v394_v24  ;;  %612 = vmatmul.bf16.gmra.mxu2 %v434_v25  ;;  %v362_v17 = vsel %vm334_vm0, %v357_v3, %v361_v5  ;;  %v4366_v25 = vld [vmem:[%s5904_s1 + $0xc8] sm:$0xff] }
  0x3c   : > { %942 = vmatpush.bf16.msrb.mxu2 %v4343_v22  ;;  %718 = vmatpush.bf16.msrb.mxu1 %v4327_v23  ;;  %v4752_v22 = vld [vmem:[%s4549_s25 + $0x70] sm:$0xff]  ;;  %v482_v23 = vsel %vm334_vm0, %v477_v14, %v481_v15  ;;  %v378_v24 = vsel %vm334_vm0, %v373_v19, %v4579_v16  ;;  %v4365_v16 = vld [vmem:[%s5904_s1 + $0xc0] sm:$0xff] }
  0x3d   : > { %1720 = vmatpush.bf16.msrb.mxu0 %v4376_v37  ;;  %637 = vmatmul.bf16.gmra.mxu3 %v474_v34  ;;  %v403_v34 = vshrl.u32 %v4691_v30, 16  ;;  %v443_v37 = vshrl.u32 %v4694_v31, 16  ;;  %v447_v38 = vshll.u32 %v4752_v22, 16  ;;  %v451_v1 = vshrl.u32 %v4752_v22, 16 }
  0x3e   : > { %562 = vmatmul.bf16.gmra.mxu0 %v354_v29  ;;  %1327 = vmatpush.bf16.msrb.mxu3 %v4368_v55  ;;  %v1073_v29 = vld [vmem:[%s4549_s25 + $0x8] sm:$0xe] }
  0x3f   : > { %v1164_v39 = vunpack.c.l.b16 %v1073_v29  ;;  %v449_v45 = vrot.slane %v447_v38, 1  ;;  %v4420_v38 = vld [vmem:[%s5904_s1 + $0x1f0] sm:$0xff] }
  0x40   : > { %943 = vmatpush.bf16.msrb.mxu2 %v4342_v36  ;;  %719 = vmatpush.bf16.msrb.mxu1 %v4326_v42  ;;  %v4373_v36 = vld [vmem:[%s5904_s1 + $0x100] sm:$0xff]  ;;  %v363_v42 = vshrl.u32 %v4711_v41, 16 }
  0x41   : > { %1721 = vmatpush.bf16.msrb.mxu0 %v4375_v44  ;;  %v445_v44 = vor.u32 %v443_v37, %v441_v63  ;;  %v1201_v47 = vpack.c.b16 %v5907_v40, %v1164_v39  ;;  %v4388_v63 = vld [vmem:[%s5904_s1 + $0x178] sm:$0xff]  ;;  %v453_v2 = vor.u32 %v451_v1, %v449_v45  ;;  %v4412_v37 = vld [vmem:[%s5904_s1 + $0x1b0] sm:$0xff] }
  0x42   : > { %1328 = vmatpush.bf16.msrb.mxu3 %v4367_v21  ;;  %v365_v48 = vor.u32 %v363_v42, %v361_v5  ;;  %v4349_v21 = vld [vmem:[%s4549_s25 + $0x18] sm:$0xff]  ;;  %v4387_v39 = vld [vmem:[%s5904_s1 + $0x170] sm:$0xff] }
  0x43   : > { %v450_v55 = vsel %vm334_vm0, %v445_v44, %v449_v45  ;;  %v1220_v57 = vrot.slane %v1201_v47, 1  ;;  %v458_v3 = vsel %vm334_vm0, %v453_v2, %v4602_v33  ;;  %v1223_v5 = vrot.slane %v4349_v21, 1 }
  0x44   : > { %944 = vmatpush.bf16.msrb.mxu2 %v4341_v43  ;;  %720 = vmatpush.bf16.msrb.mxu1 %v4325_v20  ;;  %v405_v43 = vor.u32 %v403_v34, %v401_v60  ;;  %v370_v59 = vsel %vm334_vm0, %v365_v48, %v369_v12  ;;  %v4413_v60 = vld [vmem:[%s5904_s1 + $0x1b8] sm:$0xff]  ;;  %v4435_v12 = vld [vmem:[%s4549_s25] sm:$0xe]  ;;  %v1481_v14 = vshrl.u32 %v1201_v47, 16  ;;  %v1484_v15 = vshll.u32 %v1201_v47, 16 }
  0x45   : > { %1722 = vmatpush.bf16.msrb.mxu0 %v4374_v27  ;;  %v1222_v61 = vsel %vm834_vm1, %v1220_v57, %v1221_v58  ;;  %v4350_v27 = vld [vmem:[%s4549_s25 + $0x20] sm:$0xff]  ;;  %v1498_v42 = vshrl.u32 %v4349_v21, 16  ;;  %v838_v45 = vrot.slane %v4639_v53, 1 }
  0x46   : > { %1329 = vmatpush.bf16.msrb.mxu3 %v4366_v25  ;;  %v410_v51 = vsel %vm334_vm0, %v405_v43, %v4698_v35  ;;  %v4421_v35 = vld [vmem:[%s5904_s1 + $0x1f8] sm:$0xff]  ;;  %v1483_v20 = vrot.slane %v1481_v14, 1  ;;  %v1491_v25 = vrot.slane %v1489_v62, 1  ;;  %v1501_v43 = vshll.u32 %v4349_v21, 16  ;;  %v4411_v14 = vld [vmem:[%s5904_s1 + $0x1a8] sm:$0xff] }
  0x47   : > { %v4353_v62 = vld [vmem:[%s4549_s25 + $0x38] sm:$0xff] }
  0x48   : > { %945 = vmatpush.bf16.msrb.mxu2 %v4340_v26  ;;  %721 = vmatpush.bf16.msrb.mxu1 %v4324_v28  ;;  %v1503_v44 = vrot.slane %v1501_v43, 2 }
  0x49   : > { %1723 = vmatpush.bf16.msrb.mxu0 %v4373_v36 }
  0x4a   : > { %1330 = vmatpush.bf16.msrb.mxu3 %v4365_v16  ;;  %v1225_v16 = vrot.slane %v4350_v27, 1 }
  0x4b   : > { %592 = vmatmul.bf16.gmra.mxu1 %v402_v11  ;;  %617 = vmatmul.bf16.gmra.mxu2 %v442_v9  ;;  %v4434_v11 = vld [vmem:[%s4549_s25] sm:$0xf0]  ;;  %v1224_v9 = vsel %vm834_vm1, %v1221_v58, %v1223_v5 }
  0x4c   : > { %2361 = vmatpush.bf16.msra.mxu2 %v4413_v60  ;;  %1976 = vmatpush.bf16.msra.mxu1 %v4388_v63  ;;  %v4436_v19 = vor.u32 %v4435_v12, %v4434_v11  ;;  %v1226_v36 = vsel %vm834_vm1, %v1223_v5, %v1225_v16  ;;  %v1510_v60 = vshll.u32 %v4350_v27, 16  ;;  %v840_v63 = vrot.slane %v4711_v41, 1 }
  0x4d   : > { %642 = vmatmul.bf16.gmra.mxu3 %v482_v23  ;;  %3014 = vmatpush.bf16.msra.mxu0 %v4429_v0  ;;  %v1486_v23 = vrot.slane %v1484_v15, 2  ;;  %v4352_v0 = vld [vmem:[%s4549_s25 + $0x30] sm:$0xff]  ;;  %v4419_v15 = vld [vmem:[%s5904_s1 + $0x1e8] sm:$0xff] }
  0x4e   : > { %567 = vmatmul.bf16.gmra.mxu0 %v362_v17  ;;  %2754 = vmatpush.bf16.msra.mxu3 %v4421_v35  ;;  %v1492_v17 = vshll.u32 %v4348_v46, 16  ;;  %v835_v26 = vrot.slane %v4436_v19, 1  ;;  %v4351_v46 = vld [vmem:[%s4549_s25 + $0x28] sm:$0xff]  ;;  %v1512_v35 = vrot.slane %v1510_v60, 2  ;;  %v841_v2 = vsel %vm834_vm1, %v838_v45, %v840_v63 }
  0x4f   : > { %v1229_v21 = vrot.slane %v4352_v0, 1  ;;  %v1516_v5 = vshrl.u32 %v4351_v46, 16  ;;  %v1519_v11 = vshll.u32 %v4351_v46, 16  ;;  %v4386_v19 = vld [vmem:[%s5904_s1 + $0x168] sm:$0xff] }
  0x50   : > { %v1494_v33 = vrot.slane %v1492_v17, 2  ;;  %2362 = vmatpush.bf16.msra.mxu2 %v4412_v37  ;;  %1977 = vmatpush.bf16.msra.mxu1 %v4387_v39  ;;  %v4354_v39 = vld [vmem:[%s4549_s25 + $0x40] sm:$0xff] }
  0x51   : > { %v1521_v12 = vrot.slane %v1519_v11, 2  ;;  %v4418_v11 = vld [vmem:[%s5904_s1 + $0x1e0] sm:$0xff] }
  0x52   : > { %v1495_v28 = vor.u32 %v1494_v33, %v1491_v25  ;;  %2755 = vmatpush.bf16.msra.mxu3 %v4420_v38  ;;  %v1231_v25 = vrot.slane %v4353_v62, 1  ;;  %v844_v38 = vrot.slane %v4552_v4, 1 }
  0x54   : > { %2363 = vmatpush.bf16.msra.mxu2 %v4411_v14  ;;  %1978 = vmatpush.bf16.msra.mxu1 %v4386_v19 }
  0x56   : > { %2756 = vmatpush.bf16.msra.mxu3 %v4419_v15  ;;  %v4385_v15 = vld [vmem:[%s5904_s1 + $0x160] sm:$0xff] }
  0x58   : > { %1979 = vmatpush.bf16.msra.mxu1 %v4385_v15 }
  0x5a   : > { %2757 = vmatpush.bf16.msra.mxu3 %v4418_v11  ;;  %v850_v11 = vrot.slane %v4691_v30, 1 }
  0x5b   : > { %597 = vmatmul.bf16.gmra.mxu1 %v410_v51  ;;  %622 = vmatmul.bf16.gmra.mxu2 %v450_v55  ;;  %v1227_v51 = vrot.slane %v4351_v46, 1  ;;  %v4428_v55 = vld [vmem:[%s5904_s1 + $0x230] sm:$0xff] }
  0x5c   : > { %3015 = vmatpush.bf16.msra.mxu0 %v4428_v55  ;;  %v1534_v55 = vshrl.u32 %v4353_v62, 16 }
  0x5d   : > { %1331 = vmatmul.bf16.vlgmr.msrb.gmra.mxu3 %v1222_v61  ;;  %v1228_v58 = vsel %vm834_vm1, %v1225_v16, %v1227_v51 }
  0x5e   : > { %572 = vmatmul.bf16.gmra.mxu0 %v370_v59  ;;  %v1507_v59 = vshrl.u32 %v4350_v27, 16  ;;  %v4427_v27 = vld [vmem:[%s5904_s1 + $0x228] sm:$0xff] }
  0x60   : > { %v1509_v61 = vrot.slane %v1507_v59, 1  ;;  %3016 = vmatpush.bf16.msra.mxu0 %v4427_v27 }
  0x62   : > { %v1513_v1 = vor.u32 %v1512_v35, %v1509_v61  ;;  %v1536_v61 = vrot.slane %v1534_v55, 1 }
  0x6b   : > { %602 = vmatmul.bf16.gmra.mxu1 %v4737_v56  ;;  %627 = vmatmul.bf16.gmra.mxu2 %v458_v3  ;;  %v836_v56 = vrot.slane %v4575_v13, 1 }
  0x6d   : > { %1336 = vmatmul.bf16.gmra.mxu3 %v1224_v9  ;;  %v837_v29 = vsel %vm834_vm1, %v835_v26, %v836_v56  ;;  %v839_v48 = vsel %vm834_vm1, %v836_v56, %v838_v45  ;;  %v1518_v9 = vrot.slane %v1516_v5, 1  ;;  %v1232_v56 = vsel %vm834_vm1, %v1229_v21, %v1231_v25 }
  0x6e   : > { %577 = vmatmul.bf16.gmra.mxu0 %v378_v24  ;;  %v1487_v24 = vor.u32 %v1486_v23, %v1483_v20  ;;  %v1233_v45 = vrot.slane %v4354_v39, 1 }
  0x6f   : > { %v1522_v17 = vor.u32 %v1521_v12, %v1518_v9 }
  0x70   : > { %v1496_v34 = vsel %vm1479_vm2, %v1487_v24, %v1495_v28  ;;  %v1525_v24 = vshrl.u32 %v4352_v0, 16 }
  0x71   : > { %v1523_v26 = vsel %vm1479_vm2, %v1513_v1, %v1522_v17 }
  0x7b   : > { %722 = vmatmul.bf16.vlgmr.msrb.gmra.mxu1 %v4561_v7  ;;  %946 = vmatmul.bf16.vlgmr.msrb.gmra.mxu2 %v837_v29  ;;  %v1500_v7 = vrot.slane %v1498_v42, 1 }
  0x7d   : > { %1341 = vmatmul.bf16.gmra.mxu3 %v1226_v36  ;;  %v1504_v47 = vor.u32 %v1503_v44, %v1500_v7 }
  0x7e   : > { %1724 = vmatmul.bf16.vlgmr.msrb.gmra.mxu0 %v1496_v34 }
  0x7f   : > { %v1505_v57 = vsel %vm1479_vm2, %v1495_v28, %v1504_v47  ;;  %v1514_v3 = vsel %vm1479_vm2, %v1504_v47, %v1513_v1  ;;  %v1528_v28 = vshll.u32 %v4352_v0, 16  ;;  %v846_v0 = vrot.slane %v4564_v8, 1 }
  0x81   : > { %v1530_v36 = vrot.slane %v1528_v28, 2  ;;  %v4356_v28 = vld [vmem:[%s4549_s25 + $0x50] sm:$0xff] }
  0x8b   : > { %727 = vmatmul.bf16.gmra.mxu1 %v4575_v13  ;;  %951 = vmatmul.bf16.gmra.mxu2 %v839_v48  ;;  %v1230_v13 = vsel %vm834_vm1, %v1227_v51, %v1229_v21  ;;  %v1234_v51 = vsel %vm834_vm1, %v1231_v25, %v1233_v45  ;;  %v4410_v21 = vld [vmem:[%s5904_s1 + $0x1a0] sm:$0xff] }
  0x8c   : > { %2364 = vmatpush.bf16.msra.mxu2 %v4410_v21 }
  0x8d   : > { %1346 = vmatmul.bf16.gmra.mxu3 %v1228_v58 }
  0x8e   : > { %1729 = vmatmul.bf16.gmra.mxu0 %v1505_v57  ;;  %v1537_v57 = vshll.u32 %v4353_v62, 16  ;;  %v1543_v62 = vshrl.u32 %v4354_v39, 16 }
  0x90   : > { %v1539_v35 = vrot.slane %v1537_v57, 2 }
  0x92   : > { %v1540_v1 = vor.u32 %v1539_v35, %v1536_v61 }
  0x9b   : > { %732 = vmatmul.bf16.gmra.mxu1 %v4639_v53  ;;  %956 = vmatmul.bf16.gmra.mxu2 %v841_v2  ;;  %v842_v53 = vrot.slane %v4728_v52, 1 }
  0x9d   : > { %1351 = vmatmul.bf16.gmra.mxu3 %v1230_v13  ;;  %v843_v23 = vsel %vm834_vm1, %v840_v63, %v842_v53  ;;  %v845_v44 = vsel %vm834_vm1, %v842_v53, %v844_v38  ;;  %v847_v13 = vsel %vm834_vm1, %v844_v38, %v846_v0 }
  0x9e   : > { %1734 = vmatmul.bf16.gmra.mxu0 %v1514_v3 }
  0xa8   : > { %v4856_v20 = vpop.f32.mrf.mxu1 }
  0xab   : > { %v4859_v33 = vpop.f32.mrf.mxu0  ;;  %737 = vmatmul.bf16.gmra.mxu1 %v4711_v41  ;;  %961 = vmatmul.bf16.gmra.mxu2 %v843_v23  ;;  %v1527_v41 = vrot.slane %v1525_v24, 1  ;;  %v848_v24 = vrot.slane %v4629_v49, 1 }
  0xad   : > { %1356 = vmatmul.bf16.gmra.mxu3 %v1232_v56  ;;  %v1531_v42 = vor.u32 %v1530_v36, %v1527_v41 }
  0xae   : > { %1739 = vmatmul.bf16.gmra.mxu0 %v1523_v26  ;;  %v4867_v29 = vpop.f32.mrf.mxu2  ;;  %v1545_v26 = vrot.slane %v1543_v62, 1 }
  0xaf   : > { %v1532_v47 = vsel %vm1479_vm2, %v1522_v17, %v1531_v42  ;;  %v1541_v12 = vsel %vm1479_vm2, %v1531_v42, %v1540_v1  ;;  %v1546_v17 = vshll.u32 %v4354_v39, 16  ;;  %v849_v39 = vsel %vm834_vm1, %v846_v0, %v848_v24 }
  0xb0   : > { %v4869_v16 = vpop.f32.mrf.mxu1  ;;  %v4873_v37 = vpop.f32.mrf.mxu3  ;;  %v1237_v42 = vrot.slane %v4356_v28, 1 }
  0xb1   : > { %5909 = vst [vmem:[#allocation2_spill] sm:$0xff] %v4873_v37  ;;  %v1548_v56 = vrot.slane %v1546_v17, 2 }
  0xb3   : > { %v4871_v34 = vpop.f32.mrf.mxu0  ;;  %v1549_v41 = vor.u32 %v1548_v56, %v1545_v26  ;;  %v4409_v26 = vld [vmem:[%s5904_s1 + $0x198] sm:$0xff] }
  0xb4   : > { %2365 = vmatpush.bf16.msra.mxu2 %v4409_v26 }
  0xb6   : > { %v4877_v43 = vpop.f32.mrf.mxu2 }
  0xb8   : > { %v4879_v7 = vpop.f32.mrf.mxu1  ;;  %v4885_v48 = vpop.f32.mrf.mxu3 }
  0xb9   : > { %5910 = vst [vmem:[#allocation3_spill] sm:$0xff] %v4885_v48 }
  0xbb   : > { %v4882_v46 = vpop.f32.mrf.mxu0  ;;  %742 = vmatmul.bf16.gmra.mxu1 %v4728_v52  ;;  %966 = vmatmul.bf16.gmra.mxu2 %v845_v44  ;;  %v4355_v52 = vld [vmem:[%s4549_s25 + $0x48] sm:$0xff] }
  0xbc   : > { %v1235_v5 = vrot.slane %v4355_v52, 1  ;;  %v1552_v55 = vshrl.u32 %v4355_v52, 16  ;;  %v1555_v57 = vshll.u32 %v4355_v52, 16  ;;  %v851_v52 = vsel %vm834_vm1, %v848_v24, %v850_v11  ;;  %v4417_v24 = vld [vmem:[%s5904_s1 + $0x1d8] sm:$0xff] }
  0xbd   : > { %1361 = vmatmul.bf16.gmra.mxu3 %v1234_v51 }
  0xbe   : > { %1744 = vmatmul.bf16.gmra.mxu0 %v1532_v47  ;;  %v4889_v58 = vpop.f32.mrf.mxu2  ;;  %v1236_v53 = vsel %vm834_vm1, %v1233_v45, %v1235_v5  ;;  %v1550_v45 = vsel %vm1479_vm2, %v1540_v1, %v1549_v41  ;;  %v1238_v51 = vsel %vm834_vm1, %v1235_v5, %v1237_v42  ;;  %v1554_v21 = vrot.slane %v1552_v55, 1  ;;  %2758 = vmatpush.bf16.msra.mxu3 %v4417_v24 }
  0xbf   : > { %v1557_v1 = vrot.slane %v1555_v57, 2 }
  0xc0   : > { %v4891_v59 = vpop.f32.mrf.mxu1  ;;  %v4895_v63 = vpop.f32.mrf.mxu3 }
  0xc1   : > { %5911 = vst [vmem:[#allocation4_spill] sm:$0xff] %v4895_v63 }
  0xc3   : > { %v4893_v60 = vpop.f32.mrf.mxu0 }
  0xc6   : > { %v4899_v2 = vpop.f32.mrf.mxu2 }
  0xc8   : > { %v4904_v3 = vpop.f32.mrf.mxu1  ;;  %v4913_v14 = vpop.f32.mrf.mxu3 }
  0xc9   : > { %5912 = vst [vmem:[#allocation5_spill] sm:$0xff] %v4913_v14 }
  0xcb   : > { %v4910_v9 = vpop.f32.mrf.mxu0  ;;  %747 = vmatmul.bf16.gmra.mxu1 %v4552_v4  ;;  %971 = vmatmul.bf16.gmra.mxu2 %v847_v13  ;;  %v4426_v4 = vld [vmem:[%s5904_s1 + $0x220] sm:$0xff] }
  0xcc   : > { %3017 = vmatpush.bf16.msra.mxu0 %v4426_v4 }
  0xcd   : > { %1366 = vmatmul.bf16.gmra.mxu3 %v1236_v53 }
  0xce   : > { %1749 = vmatmul.bf16.gmra.mxu0 %v1541_v12  ;;  %v4920_v19 = vpop.f32.mrf.mxu2  ;;  %v4357_v12 = vld [vmem:[%s4549_s25 + $0x58] sm:$0xff] }
  0xcf   : > { %v1239_v5 = vrot.slane %v4357_v12, 1 }
  0xd0   : > { %v4922_v23 = vpop.f32.mrf.mxu1  ;;  %v4929_v27 = vpop.f32.mrf.mxu3 }
  0xd1   : > { %5913 = vst [vmem:[#allocation6_spill] sm:$0xff] %v4929_v27  ;;  %v1240_v56 = vsel %vm834_vm1, %v1237_v42, %v1239_v5  ;;  %v4384_v42 = vld [vmem:[%s5904_s1 + $0x158] sm:$0xff] }
  0xd2   : > { %1980 = vmatpush.bf16.msra.mxu1 %v4384_v42 }
  0xd3   : > { %v4927_v25 = vpop.f32.mrf.mxu0 }
  0xd6   : > { %v4933_v36 = vpop.f32.mrf.mxu2 }
  0xd8   : > { %v4935_v38 = vpop.f32.mrf.mxu1  ;;  %v4941_v47 = vpop.f32.mrf.mxu3 }
  0xd9   : > { %5914 = vst [vmem:[#allocation7_spill] sm:$0xff] %v4941_v47 }
  0xdb   : > { %v4938_v44 = vpop.f32.mrf.mxu0  ;;  %752 = vmatmul.bf16.gmra.mxu1 %v4564_v8  ;;  %976 = vmatmul.bf16.gmra.mxu2 %v849_v39  ;;  %v1558_v8 = vor.u32 %v1557_v1, %v1554_v21  ;;  %v1561_v39 = vshrl.u32 %v4356_v28, 16  ;;  %v4425_v21 = vld [vmem:[%s5904_s1 + $0x218] sm:$0xff]  ;;  %v852_v1 = vrot.slane %v4678_v18, 1 }
  0xdc   : > { %3018 = vmatpush.bf16.msra.mxu0 %v4425_v21  ;;  %v1573_v21 = vshll.u32 %v4357_v12, 16 }
  0xdd   : > { %1371 = vmatmul.bf16.gmra.mxu3 %v1238_v51  ;;  %v1559_v17 = vsel %vm1479_vm2, %v1549_v41, %v1558_v8  ;;  %v1563_v55 = vrot.slane %v1561_v39, 1  ;;  %v853_v24 = vsel %vm834_vm1, %v850_v11, %v852_v1 }
  0xde   : > { %1754 = vmatmul.bf16.gmra.mxu0 %v1550_v45  ;;  %v4945_v61 = vpop.f32.mrf.mxu2  ;;  %v1564_v45 = vshll.u32 %v4356_v28, 16  ;;  %v1575_v37 = vrot.slane %v1573_v21, 2 }
  0xe0   : > { %v4947_v35 = vpop.f32.mrf.mxu1  ;;  %v1332_v13 = vpop.f32.mrf.mxu3  ;;  %v1566_v57 = vrot.slane %v1564_v45, 2 }
  0xe3   : > { %v4949_v0 = vpop.f32.mrf.mxu0 }
  0xe6   : > { %v4953_v15 = vpop.f32.mrf.mxu2 }
  0xe8   : > { %v4955_v53 = vpop.f32.mrf.mxu1  ;;  %v1334_v4 = vpop.f32.mrf.mxu3 }
  0xeb   : > { %v4958_v62 = vpop.f32.mrf.mxu0  ;;  %757 = vmatmul.bf16.gmra.mxu1 %v4629_v49  ;;  %981 = vmatmul.bf16.gmra.mxu2 %v851_v52  ;;  %v4358_v52 = vld [vmem:[%s4549_s25 + $0x60] sm:$0xff] }
  0xec   : > { %v1241_v39 = vrot.slane %v4358_v52, 1 }
  0xed   : > { %1376 = vmatmul.bf16.gmra.mxu3 %v1240_v56 }
  0xee   : > { %1759 = vmatmul.bf16.gmra.mxu0 %v1559_v17  ;;  %v4969_v41 = vpop.f32.mrf.mxu2  ;;  %v1567_v17 = vor.u32 %v1566_v57, %v1563_v55  ;;  %v1242_v42 = vsel %vm834_vm1, %v1239_v5, %v1241_v39  ;;  %v1570_v57 = vshrl.u32 %v4357_v12, 16 }
  0xf0   : > { %v4971_v49 = vpop.f32.mrf.mxu1  ;;  %v1337_v28 = vpop.f32.mrf.mxu3  ;;  %v1568_v40 = vsel %vm1479_vm2, %v1558_v8, %v1567_v17  ;;  %v1572_v8 = vrot.slane %v1570_v57, 1 }
  0xf2   : > { %v1576_v5 = vor.u32 %v1575_v37, %v1572_v8 }
  0xf3   : > { %v4973_v51 = vpop.f32.mrf.mxu0 }
  0xf4   : > { %v1577_v57 = vsel %vm1479_vm2, %v1567_v17, %v1576_v5 }
  0xf6   : > { %v4983_v26 = vpop.f32.mrf.mxu2 }
  0xf7   : > { %5915 = vst [vmem:[#allocation8_spill] sm:$0xff] %v4983_v26 }
  0xf8   : > { %v723_v56 = vpop.f32.mrf.mxu1  ;;  %v4987_v47 = vpop.f32.mrf.mxu3 }
  0xf9   : > { %v724_v55 = vadd.f32 %v723_v56, %v4859_v33 }
  0xfb   : > { %v1725_v45 = vpop.f32.mrf.mxu0  ;;  %762 = vmatmul.bf16.gmra.mxu1 %v4691_v30  ;;  %986 = vmatmul.bf16.gmra.mxu2 %v853_v24  ;;  %v4998_v24 = vld [vmem:[%s4549_s25 + $0x68] sm:$0xff] }
  0xfd   : > { %1381 = vmatmul.bf16.gmra.mxu3 %v1242_v42 }
  0xfe   : > { %1764 = vmatmul.bf16.gmra.mxu0 %v1568_v40  ;;  %v947_v27 = vpop.f32.mrf.mxu2  ;;  %v854_v40 = vrot.slane %v4558_v6, 1 }
  0xff   : > { %v1037_v14 = vadd.f32 %v947_v27, %v724_v55 }
 0x100   : > { %v725_v11 = vpop.f32.mrf.mxu1  ;;  %v4992_v26 = vpop.f32.mrf.mxu3  ;;  %v855_v42 = vsel %vm834_vm1, %v852_v1, %v854_v40  ;;  %v1582_v1 = vshll.u32 %v4358_v52, 16 }
 0x101   : > { %v1422_v63 = vadd.f32 %v1332_v13, %v1037_v14  ;;  %v726_v33 = vadd.f32 %v725_v11, %v4871_v34  ;;  %v1243_v14 = vrot.slane %v4998_v24, 1 }
 0x103   : > { %v1727_v48 = vpop.f32.mrf.mxu0  ;;  %v4994_v30 = vadd.f32 %v1725_v45, %v1422_v63  ;;  %v1244_v34 = vsel %vm834_vm1, %v1241_v39, %v1243_v14  ;;  %v1579_v45 = vshrl.u32 %v4358_v52, 16  ;;  %v856_v39 = vrot.slane %v4568_v10, 1  ;;  %v4424_v10 = vld [vmem:[%s5904_s1 + $0x210] sm:$0xff] }
 0x104   : > { %3019 = vmatpush.bf16.msra.mxu0 %v4424_v10 }
 0x106   : > { %v949_v12 = vpop.f32.mrf.mxu2 }
 0x107   : > { %v1038_v56 = vadd.f32 %v949_v12, %v726_v33  ;;  %v1581_v33 = vrot.slane %v1579_v45, 1  ;;  %v1584_v12 = vrot.slane %v1582_v1, 2 }
 0x108   : > { %v728_v27 = vpop.f32.mrf.mxu1  ;;  %v5004_v63 = vpop.f32.mrf.mxu3 }
 0x109   : > { %v1423_v13 = vadd.f32 %v1334_v4, %v1038_v56  ;;  %v729_v37 = vadd.f32 %v728_v27, %v4882_v46  ;;  %v4383_v46 = vld [vmem:[%s5904_s1 + $0x150] sm:$0xff] }
 0x10a   : > { %1981 = vmatpush.bf16.msra.mxu1 %v4383_v46  ;;  %v4360_v56 = vld [vmem:[%s4549_s25 + $0x70] sm:$0xff] }
 0x10b   : > { %v1730_v55 = vpop.f32.mrf.mxu0  ;;  %767 = vmatmul.bf16.gmra.mxu1 %v4678_v18  ;;  %991 = vmatmul.bf16.gmra.mxu2 %v855_v42  ;;  %v5007_v6 = vadd.f32 %v1727_v48, %v1423_v13  ;;  %v4408_v18 = vld [vmem:[%s5904_s1 + $0x190] sm:$0xff]  ;;  %v1585_v42 = vor.u32 %v1584_v12, %v1581_v33  ;;  %v1245_v45 = vrot.slane %v4360_v56, 1 }
 0x10c   : > { %v4416_v48 = vld [vmem:[%s5904_s1 + $0x1d0] sm:$0xff]  ;;  %2366 = vmatpush.bf16.msra.mxu2 %v4408_v18 }
 0x10d   : > { %1386 = vmatmul.bf16.gmra.mxu3 %v1244_v34 }
 0x10e   : > { %1769 = vmatmul.bf16.gmra.mxu0 %v1577_v57  ;;  %v952_v21 = vpop.f32.mrf.mxu2  ;;  %2759 = vmatpush.bf16.msra.mxu3 %v4416_v48 }
 0x10f   : > { %v1039_v11 = vadd.f32 %v952_v21, %v729_v37  ;;  %v857_v37 = vsel %vm834_vm1, %v854_v40, %v856_v39  ;;  %v1246_v40 = vsel %vm834_vm1, %v1243_v14, %v1245_v45 }
 0x110   : > { %v730_v4 = vpop.f32.mrf.mxu1  ;;  %v5020_v52 = vpop.f32.mrf.mxu3 }
 0x111   : > { %v1424_v17 = vadd.f32 %v1337_v28, %v1039_v11  ;;  %v731_v27 = vadd.f32 %v730_v4, %v4893_v60  ;;  %v1588_v4 = vshrl.u32 %v4998_v24, 16 }
 0x113   : > { %v1732_v8 = vpop.f32.mrf.mxu0  ;;  %v5022_v28 = vadd.f32 %v1730_v55, %v1424_v17  ;;  %v1586_v55 = vsel %vm1479_vm2, %v1576_v5, %v1585_v42  ;;  %v4471_v17 = vld [vmem:[%s4549_s25 + $0x50] sm:$0xff]  ;;  %v1591_v5 = vshll.u32 %v4998_v24, 16 }
 0x116   : > { %v954_v13 = vpop.f32.mrf.mxu2 }
 0x117   : > { %v1040_v57 = vadd.f32 %v954_v13, %v731_v27  ;;  %v1593_v27 = vrot.slane %v1591_v5, 2 }
 0x118   : > { %v733_v34 = vpop.f32.mrf.mxu1  ;;  %v5033_v11 = vpop.f32.mrf.mxu3 }
 0x119   : > { %v1425_v1 = vadd.f32 %v4987_v47, %v1040_v57  ;;  %v734_v47 = vadd.f32 %v733_v34, %v4910_v9  ;;  %v858_v9 = vrot.slane %v4632_v50, 1  ;;  %v5049_v57 = vld [vmem:[%s4549_s25 + $0x78] sm:$0xff] }
 0x11a   : > { %v1247_v10 = vrot.slane %v5049_v57, 1  ;;  %v4472_v50 = vld [vmem:[%s4549_s25 + $0x58] sm:$0xff] }
 0x11b   : > { %v1735_v21 = vpop.f32.mrf.mxu0  ;;  %772 = vmatmul.bf16.gmra.mxu1 %v4471_v17  ;;  %996 = vmatmul.bf16.gmra.mxu2 %v857_v37  ;;  %v5036_v60 = vadd.f32 %v1732_v8, %v1425_v1  ;;  %v1590_v8 = vrot.slane %v1588_v4, 1 }
 0x11d   : > { %1391 = vmatmul.bf16.gmra.mxu3 %v1246_v40  ;;  %v1594_v34 = vor.u32 %v1593_v27, %v1590_v8 }
 0x11e   : > { %1774 = vmatmul.bf16.gmra.mxu0 %v1586_v55  ;;  %v957_v33 = vpop.f32.mrf.mxu2 }
 0x11f   : > { %v1041_v12 = vadd.f32 %v957_v33, %v734_v47  ;;  %v1600_v33 = vshll.u32 %v4360_v56, 16 }
 0x120   : > { %v735_v18 = vpop.f32.mrf.mxu1  ;;  %v5043_v13 = vpop.f32.mrf.mxu3 }
 0x121   : > { %v1426_v48 = vadd.f32 %v4992_v26, %v1041_v12  ;;  %v736_v24 = vadd.f32 %v735_v18, %v4927_v25  ;;  %v859_v26 = vsel %vm834_vm1, %v856_v39, %v858_v9  ;;  %v1248_v25 = vsel %vm834_vm1, %v1245_v45, %v1247_v10 }
 0x122   : > { %v1597_v39 = vshrl.u32 %v4360_v56, 16  ;;  %v1602_v27 = vrot.slane %v1600_v33, 2 }
 0x123   : > { %v1737_v46 = vpop.f32.mrf.mxu0  ;;  %v5045_v14 = vadd.f32 %v1735_v21, %v1426_v48  ;;  %v1595_v21 = vsel %vm1479_vm2, %v1585_v42, %v1594_v34 }
 0x124   : > { %v1599_v8 = vrot.slane %v1597_v39, 1  ;;  %v4382_v39 = vld [vmem:[%s5904_s1 + $0x148] sm:$0xff] }
 0x125   : > { %1982 = vmatpush.bf16.msra.mxu1 %v4382_v39 }
 0x126   : > { %v959_v37 = vpop.f32.mrf.mxu2 }
 0x127   : > { %v1042_v1 = vadd.f32 %v959_v37, %v736_v24  ;;  %v5076_v24 = vld [vmem:[%s4549_s25 + $0x80] sm:$0xff] }
 0x128   : > { %v738_v55 = vpop.f32.mrf.mxu1  ;;  %v5056_v47 = vpop.f32.mrf.mxu3 }
 0x129   : > { %v1427_v17 = vadd.f32 %v5004_v63, %v1042_v1  ;;  %v739_v5 = vadd.f32 %v738_v55, %v4938_v44  ;;  %v4415_v44 = vld [vmem:[%s5904_s1 + $0x1c8] sm:$0xff]  ;;  %v1603_v1 = vor.u32 %v1602_v27, %v1599_v8 }
 0x12a   : > { %2760 = vmatpush.bf16.msra.mxu3 %v4415_v44 }
 0x12b   : > { %v1740_v40 = vpop.f32.mrf.mxu0  ;;  %777 = vmatmul.bf16.gmra.mxu1 %v4472_v50  ;;  %1001 = vmatmul.bf16.gmra.mxu2 %v859_v26  ;;  %v5059_v4 = vadd.f32 %v1737_v46, %v1427_v17  ;;  %v4407_v46 = vld [vmem:[%s5904_s1 + $0x188] sm:$0xff]  ;;  %v1249_v50 = vrot.slane %v5076_v24, 1 }
 0x12c   : > { %2367 = vmatpush.bf16.msra.mxu2 %v4407_v46 }
 0x12d   : > { %1396 = vmatmul.bf16.gmra.mxu3 %v1248_v25 }
 0x12e   : > { %1779 = vmatmul.bf16.gmra.mxu0 %v1595_v21  ;;  %v962_v12 = vpop.f32.mrf.mxu2 }
 0x12f   : > { %v1043_v63 = vadd.f32 %v962_v12, %v739_v5 }
 0x130   : > { %v740_v18 = vpop.f32.mrf.mxu1  ;;  %v5070_v45 = vpop.f32.mrf.mxu3 }
 0x131   : > { %v1428_v42 = vadd.f32 %v5020_v52, %v1043_v63  ;;  %v860_v52 = vrot.slane %v4694_v31, 1  ;;  %v741_v37 = vadd.f32 %v740_v18, %v4949_v0  ;;  %v4473_v0 = vld [vmem:[%s4549_s25 + $0x60] sm:$0xff]  ;;  %v1606_v63 = vshrl.u32 %v5049_v57, 16 }
 0x132   : > { %v1609_v18 = vshll.u32 %v5049_v57, 16 }
 0x133   : > { %v1742_v48 = vpop.f32.mrf.mxu0  ;;  %v5072_v56 = vadd.f32 %v1740_v40, %v1428_v42  ;;  %v861_v21 = vsel %vm834_vm1, %v858_v9, %v860_v52  ;;  %v1604_v40 = vsel %vm1479_vm2, %v1594_v34, %v1603_v1  ;;  %v1250_v9 = vsel %vm834_vm1, %v1247_v10, %v1249_v50 }
 0x134   : > { %v1608_v46 = vrot.slane %v1606_v63, 1  ;;  %v1611_v44 = vrot.slane %v1609_v18, 2  ;;  %v1615_v63 = vshrl.u32 %v5076_v24, 16 }
 0x136   : > { %v964_v55 = vpop.f32.mrf.mxu2 }
 0x137   : > { %v1044_v26 = vadd.f32 %v964_v55, %v741_v37 }
 0x138   : > { %v743_v17 = vpop.f32.mrf.mxu1  ;;  %v5086_v33 = vpop.f32.mrf.mxu3 }
 0x139   : > { %v1429_v25 = vadd.f32 %v5033_v11, %v1044_v26  ;;  %v4423_v11 = vld [vmem:[%s5904_s1 + $0x208] sm:$0xff]  ;;  %v744_v34 = vadd.f32 %v743_v17, %v4958_v62  ;;  %v862_v62 = vrot.slane %v4752_v22, 1  ;;  %v1612_v17 = vor.u32 %v1611_v44, %v1608_v46 }
 0x13a   : > { %3020 = vmatpush.bf16.msra.mxu0 %v4423_v11  ;;  %v5105_v26 = vld [vmem:[%s4549_s25 + $0x88] sm:$0xff] }
 0x13b   : > { %v1745_v5 = vpop.f32.mrf.mxu0  ;;  %782 = vmatmul.bf16.gmra.mxu1 %v4473_v0  ;;  %1006 = vmatmul.bf16.gmra.mxu2 %v861_v21  ;;  %v5089_v12 = vadd.f32 %v1742_v48, %v1429_v25  ;;  %v863_v39 = vsel %vm834_vm1, %v860_v52, %v862_v62 }
 0x13d   : > { %1401 = vmatmul.bf16.gmra.mxu3 %v1250_v9 }
 0x13e   : > { %1784 = vmatmul.bf16.gmra.mxu0 %v1604_v40  ;;  %v967_v42 = vpop.f32.mrf.mxu2 }
 0x13f   : > { %v1045_v8 = vadd.f32 %v967_v42, %v744_v34 }
 0x140   : > { %v745_v48 = vpop.f32.mrf.mxu1  ;;  %v5099_v37 = vpop.f32.mrf.mxu3 }
 0x141   : > { %v1430_v27 = vadd.f32 %v5043_v13, %v1045_v8  ;;  %v746_v57 = vadd.f32 %v745_v48, %v4973_v51  ;;  %v1251_v13 = vrot.slane %v5105_v26, 1  ;;  %v1617_v48 = vrot.slane %v1615_v63, 1 }
 0x143   : > { %v1747_v10 = vpop.f32.mrf.mxu0  ;;  %v5101_v55 = vadd.f32 %v1745_v5, %v1430_v27  ;;  %v1613_v5 = vsel %vm1479_vm2, %v1603_v1, %v1612_v17  ;;  %v1252_v51 = vsel %vm834_vm1, %v1249_v50, %v1251_v13  ;;  %v4474_v50 = vld [vmem:[%s4549_s25 + $0x78] sm:$0xff] }
 0x144   : > { %v864_v44 = vrot.slane %v4474_v50, 1 }
 0x146   : > { %v969_v21 = vpop.f32.mrf.mxu2 }
 0x147   : > { %v1046_v25 = vadd.f32 %v969_v21, %v746_v57 }
 0x148   : > { %v748_v40 = vpop.f32.mrf.mxu1  ;;  %v5112_v11 = vpop.f32.mrf.mxu3 }
 0x149   : > { %v1431_v0 = vadd.f32 %v5056_v47, %v1046_v25  ;;  %v749_v52 = vadd.f32 %v748_v40, %v4856_v20  ;;  %v1618_v47 = vshll.u32 %v5076_v24, 16  ;;  %v5128_v20 = vld [vmem:[%s4549_s25 + $0x90] sm:$0xff] }
 0x14b   : > { %v1750_v9 = vpop.f32.mrf.mxu0  ;;  %787 = vmatmul.bf16.gmra.mxu1 %v4694_v31  ;;  %1011 = vmatmul.bf16.gmra.mxu2 %v863_v39  ;;  %v5115_v34 = vadd.f32 %v1747_v10, %v1431_v0  ;;  %v1620_v27 = vrot.slane %v1618_v47, 2  ;;  %v865_v39 = vsel %vm834_vm1, %v862_v62, %v864_v44  ;;  %v1624_v47 = vshrl.u32 %v5105_v26, 16 }
 0x14d   : > { %1406 = vmatmul.bf16.gmra.mxu3 %v1252_v51  ;;  %v1621_v24 = vor.u32 %v1620_v27, %v1617_v48  ;;  %v4406_v51 = vld [vmem:[%s5904_s1 + $0x180] sm:$0xff] }
 0x14e   : > { %1789 = vmatmul.bf16.gmra.mxu0 %v1613_v5  ;;  %v972_v18 = vpop.f32.mrf.mxu2  ;;  %2368 = vmatpush.bf16.msra.mxu2 %v4406_v51 }
 0x14f   : > { %v1047_v1 = vadd.f32 %v972_v18, %v749_v52  ;;  %v1627_v18 = vshll.u32 %v5105_v26, 16 }
 0x150   : > { %v750_v42 = vpop.f32.mrf.mxu1  ;;  %v5122_v10 = vpop.f32.mrf.mxu3 }
 0x151   : > { %v1432_v31 = vadd.f32 %v5070_v45, %v1047_v1  ;;  %v751_v57 = vadd.f32 %v750_v42, %v4869_v16  ;;  %v1253_v45 = vrot.slane %v5128_v20, 1  ;;  %v4414_v16 = vld [vmem:[%s5904_s1 + $0x1c0] sm:$0xff] }
 0x152   : > { %2761 = vmatpush.bf16.msra.mxu3 %v4414_v16 }
 0x153   : > { %v1752_v8 = vpop.f32.mrf.mxu0  ;;  %v5124_v46 = vadd.f32 %v1750_v9, %v1432_v31  ;;  %v1622_v9 = vsel %vm1479_vm2, %v1612_v17, %v1621_v24  ;;  %v1254_v17 = vsel %vm834_vm1, %v1251_v13, %v1253_v45  ;;  %v1626_v13 = vrot.slane %v1624_v47, 1 }
 0x155   : > { %5916 = vst [vmem:[#allocation9_spill] sm:$0xff] %v5124_v46 }
 0x156   : > { %v974_v21 = vpop.f32.mrf.mxu2 }
 0x157   : > { %v1048_v25 = vadd.f32 %v974_v21, %v751_v57  ;;  %v1629_v57 = vrot.slane %v1627_v18, 2  ;;  %v2111_v18 = vld [vmem:[%s4549_s25 + $0x10] sm:$0xc] }
 0x158   : > { %v753_v40 = vpop.f32.mrf.mxu1  ;;  %v5141_v52 = vpop.f32.mrf.mxu3 }
 0x159   : > { %v1433_v0 = vadd.f32 %v5086_v33, %v1048_v25  ;;  %v4381_v33 = vld [vmem:[%s5904_s1 + $0x140] sm:$0xff]  ;;  %v754_v63 = vadd.f32 %v753_v40, %v4879_v7 }
 0x15a   : > { %1983 = vmatpush.bf16.msra.mxu1 %v4381_v33  ;;  %v4422_v7 = vld [vmem:[%s5904_s1 + $0x200] sm:$0xff] }
 0x15b   : > { %v1755_v5 = vpop.f32.mrf.mxu0  ;;  %792 = vmatmul.bf16.gmra.mxu1 %v4752_v22  ;;  %1016 = vmatmul.bf16.gmra.mxu2 %v865_v39  ;;  %v5147_v62 = vadd.f32 %v1752_v8, %v1433_v0  ;;  %v1109_v22 = vld [vmem:[%s4549_s25 + $0x98] sm:$0x1]  ;;  %v5163_v25 = vld [vmem:[%s4549_s25 + $0x80] sm:$0xff]  ;;  %v1630_v0 = vor.u32 %v1629_v57, %v1626_v13 }
 0x15c   : > { %v1200_v8 = vunpack.c.l.b16 %v1109_v22  ;;  %3021 = vmatpush.bf16.msra.mxu0 %v4422_v7  ;;  %v866_v40 = vrot.slane %v5163_v25, 1  ;;  %v5172_v22 = vld [vmem:[%s4549_s25 + $0x14] sm:$0xf] }
 0x15d   : > { %5917 = vst [vmem:[#allocation10_spill] sm:$0xff] %v5147_v62  ;;  %1411 = vmatmul.bf16.gmra.mxu3 %v1254_v17 }
 0x15e   : > { %1794 = vmatmul.bf16.gmra.mxu0 %v1622_v9  ;;  %v977_v1 = vpop.f32.mrf.mxu2  ;;  %v1219_v39 = vpack.c.b16 %v1200_v8, %v1200_v8  ;;  %v867_v33 = vsel %vm834_vm1, %v864_v44, %v866_v40  ;;  %v5181_v8 = vld [vmem:[%s4549_s25 + $0x18] sm:$0xff] }
 0x15f   : > { %v1049_v42 = vadd.f32 %v977_v1, %v754_v63 }
 0x160   : > { %v755_v31 = vpop.f32.mrf.mxu1  ;;  %v5158_v21 = vpop.f32.mrf.mxu3  ;;  %v1255_v17 = vrot.slane %v1219_v39, 1  ;;  %v2527_v39 = vshrl.u32 %v5181_v8, 16 }
 0x161   : > { %v1434_v48 = vadd.f32 %v5099_v37, %v1049_v42  ;;  %v756_v37 = vadd.f32 %v755_v31, %v4891_v59  ;;  %v2202_v42 = vunpack.c.l.b16 %v2111_v18  ;;  %v5908_v59 = vunpack.c.l.b16 %v5172_v22 }
 0x162   : > { %v1256_v44 = vsel %vm834_vm1, %v1253_v45, %v1255_v17  ;;  %v4476_v17 = vld [vmem:[%s4549_s25 + $0x88] sm:$0xff] }
 0x163   : > { %v1757_v27 = vpop.f32.mrf.mxu0  ;;  %v5160_v26 = vadd.f32 %v1755_v5, %v1434_v48  ;;  %v1631_v5 = vsel %vm1479_vm2, %v1621_v24, %v1630_v0  ;;  %v1633_v48 = vshrl.u32 %v5128_v20, 16 }
 0x165   : > { %5918 = vst [vmem:[#allocation11_spill] sm:$0xff] %v5160_v26 }
 0x166   : > { %v979_v9 = vpop.f32.mrf.mxu2 }
 0x167   : > { %v1050_v51 = vadd.f32 %v979_v9, %v756_v37  ;;  %v2530_v37 = vshll.u32 %v5181_v8, 16 }
 0x168   : > { %v758_v16 = vpop.f32.mrf.mxu1  ;;  %v5174_v1 = vpop.f32.mrf.mxu3 }
 0x169   : > { %v1435_v63 = vadd.f32 %v5112_v11, %v1050_v51  ;;  %v5185_v11 = vpack.c.b16 %v5908_v59, %v2202_v42  ;;  %v759_v24 = vadd.f32 %v758_v16, %v4904_v3  ;;  %v1635_v51 = vrot.slane %v1633_v48, 1 }
 0x16b   : > { %v1760_v47 = vpop.f32.mrf.mxu0  ;;  %797 = vmatmul.bf16.gmra.mxu1 %v4474_v50  ;;  %1021 = vmatmul.bf16.gmra.mxu2 %v867_v33  ;;  %v5177_v31 = vadd.f32 %v1757_v27, %v1435_v63  ;;  %v1636_v50 = vshll.u32 %v5128_v20, 16  ;;  %v2519_v45 = vshrl.u32 %v5185_v11, 16  ;;  %v2522_v7 = vshll.u32 %v5185_v11, 16  ;;  %v1458_v20 = vld [vmem:[%s4549_s25 + $0x98] sm:$0x3] }
 0x16c   : > { %v868_v63 = vrot.slane %v4476_v17, 1 }
 0x16d   : > { %5919 = vst [vmem:[#allocation12_spill] sm:$0xff] %v5177_v31  ;;  %1416 = vmatmul.bf16.gmra.mxu3 %v1256_v44  ;;  %v1638_v16 = vrot.slane %v1636_v50, 2  ;;  %v2521_v18 = vrot.slane %v2519_v45, 2  ;;  %v2524_v42 = vrot.slane %v2522_v7, 3  ;;  %v2529_v44 = vrot.slane %v2527_v39, 2 }
 0x16e   : > { %1799 = vmatmul.bf16.gmra.mxu0 %v1631_v5  ;;  %v982_v13 = vpop.f32.mrf.mxu2  ;;  %v1477_v31 = vunpack.c.l.b16 %v1458_v20  ;;  %v869_v50 = vsel %vm834_vm1, %v866_v40, %v868_v63  ;;  %v5214_v40 = vld [vmem:[%s4549_s25 + $0x20] sm:$0xff] }
 0x16f   : > { %v1051_v27 = vadd.f32 %v982_v13, %v759_v24  ;;  %v2532_v24 = vrot.slane %v2530_v37, 3  ;;  %v1639_v59 = vor.u32 %v1638_v16, %v1635_v51 }
 0x170   : > { %v760_v57 = vpop.f32.mrf.mxu1  ;;  %v5195_v33 = vpop.f32.mrf.mxu3  ;;  %v5205_v7 = vpack.c.b16 %v1477_v31, %v1477_v31 }
 0x171   : > { %v1436_v3 = vadd.f32 %v5122_v10, %v1051_v27  ;;  %v761_v13 = vadd.f32 %v760_v57, %v4922_v23  ;;  %v2525_v27 = vor.u32 %v2524_v42, %v2521_v18  ;;  %v2533_v62 = vor.u32 %v2532_v24, %v2529_v44 }
 0x172   : > { %v1640_v45 = vsel %vm1479_vm2, %v1630_v0, %v1639_v59  ;;  %v1642_v57 = vshrl.u32 %v5205_v7, 16  ;;  %v1645_v0 = vshll.u32 %v5205_v7, 16  ;;  %v870_v42 = vrot.slane %v4730_v54, 1 }
 0x173   : > { %v1762_v9 = vpop.f32.mrf.mxu0  ;;  %v5199_v5 = vadd.f32 %v1760_v47, %v1436_v3 }
 0x174   : > { %v1644_v16 = vrot.slane %v1642_v57, 1  ;;  %v1647_v20 = vrot.slane %v1645_v0, 2  ;;  %v2889_v0 = vld [vmem:[%s4549_s25 + $0x10] sm:$0x8] }
 0x176   : > { %v984_v26 = vpop.f32.mrf.mxu2 }
 0x177   : > { %v1052_v10 = vadd.f32 %v984_v26, %v761_v13  ;;  %v2534_v26 = vsel %vm2517_vm3, %v2525_v27, %v2533_v62 }
 0x178   : > { %v763_v48 = vpop.f32.mrf.mxu1  ;;  %v5207_v39 = vpop.f32.mrf.mxu3 }
 0x179   : > { %v1437_v46 = vadd.f32 %v5141_v52, %v1052_v10  ;;  %v764_v52 = vadd.f32 %v763_v48, %v4935_v38  ;;  %v1648_v10 = vor.u32 %v1647_v20, %v1644_v16 }
 0x17b   : > { %v1765_v47 = vpop.f32.mrf.mxu0  ;;  %802 = vmatmul.bf16.gmra.mxu1 %v5163_v25  ;;  %1026 = vmatmul.bf16.gmra.mxu2 %v869_v50  ;;  %v5210_v23 = vadd.f32 %v1762_v9, %v1437_v46  ;;  %v2536_v25 = vshrl.u32 %v5214_v40, 16  ;;  %v2539_v46 = vshll.u32 %v5214_v40, 16 }
 0x17d   : > { %2762 = vmatmul.bf16.vlgmr.msra.gmra.mxu3 %v2534_v26  ;;  %v2538_v44 = vrot.slane %v2536_v25, 2  ;;  %v2541_v24 = vrot.slane %v2539_v46, 3 }
 0x17e   : > { %1804 = vmatmul.bf16.gmra.mxu0 %v1640_v45  ;;  %v987_v31 = vpop.f32.mrf.mxu2  ;;  %v1851_v45 = vld [vmem:[%s4549_s25 + $0x8] sm:$0xc] }
 0x17f   : > { %v1053_v37 = vadd.f32 %v987_v31, %v764_v52  ;;  %v2542_v26 = vor.u32 %v2541_v24, %v2538_v44 }
 0x180   : > { %v765_v3 = vpop.f32.mrf.mxu1  ;;  %v5222_v18 = vpop.f32.mrf.mxu3 }
 0x181   : > { %v1438_v9 = vadd.f32 %v5158_v21, %v1053_v37  ;;  %v766_v13 = vadd.f32 %v765_v3, %v4947_v35  ;;  %v871_v21 = vsel %vm834_vm1, %v868_v63, %v870_v42  ;;  %v1870_v35 = vunpack.c.l.b16 %v1851_v45  ;;  %v5239_v63 = vld [vmem:[%s4549_s25 + $0x28] sm:$0xff] }
 0x182   : > { %v2543_v37 = vsel %vm2517_vm3, %v2533_v62, %v2542_v26  ;;  %v2545_v16 = vshrl.u32 %v5239_v63, 16  ;;  %v5921_v42 = vunpack.c.l.b16 %v5172_v22  ;;  %v2912_v22 = vrot.slane %v5181_v8, 3 }
 0x183   : > { %v1767_v51 = vpop.f32.mrf.mxu0  ;;  %v5224_v38 = vadd.f32 %v1765_v47, %v1438_v9  ;;  %v1649_v47 = vsel %vm1479_vm2, %v1639_v59, %v1648_v10  ;;  %v5920_v59 = vunpack.c.l.b16 %v4777_v32  ;;  %v2258_v32 = vrot.slane %v5185_v11, 2 }
 0x185   : > { %v1871_v9 = vpack.c.b16 %v5920_v59, %v1870_v35 }
 0x186   : > { %v989_v48 = vpop.f32.mrf.mxu2 }
 0x187   : > { %v1054_v50 = vadd.f32 %v989_v48, %v766_v13  ;;  %v4477_v13 = vld [vmem:[%s4549_s25 + $0x10] sm:$0xff] }
 0x188   : > { %v768_v27 = vpop.f32.mrf.mxu1  ;;  %v5233_v54 = vpop.f32.mrf.mxu3  ;;  %v1874_v10 = vrot.slane %v4477_v13, 2  ;;  %v2261_v13 = vrot.slane %v5214_v40, 2 }
 0x189   : > { %v1439_v52 = vadd.f32 %v5174_v1, %v1054_v50  ;;  %v769_v3 = vadd.f32 %v768_v27, %v4955_v53  ;;  %v2908_v1 = vunpack.c.l.b16 %v2889_v0  ;;  %v1873_v53 = vrot.slane %v1871_v9, 2 }
 0x18a   : > { %v2259_v50 = vrot.slane %v5181_v8, 2  ;;  %v2547_v27 = vrot.slane %v2545_v16, 2 }
 0x18b   : > { %v1770_v57 = vpop.f32.mrf.mxu0  ;;  %807 = vmatmul.bf16.gmra.mxu1 %v4476_v17  ;;  %1031 = vmatmul.bf16.gmra.mxu2 %v871_v21  ;;  %v5235_v31 = vadd.f32 %v1767_v51, %v1439_v52  ;;  %v2548_v51 = vshll.u32 %v5239_v63, 16  ;;  %v2909_v44 = vpack.c.b16 %v5921_v42, %v2908_v1 }
 0x18c   : > { %v2260_v35 = vsel %vm1872_vm4, %v2258_v32, %v2259_v50 }
 0x18d   : > { %2767 = vmatmul.bf16.gmra.mxu3 %v2543_v37  ;;  %v2550_v21 = vrot.slane %v2548_v51, 3 }
 0x18e   : > { %1809 = vmatmul.bf16.gmra.mxu0 %v1649_v47  ;;  %v992_v25 = vpop.f32.mrf.mxu2 }
 0x18f   : > { %v1055_v46 = vadd.f32 %v992_v25, %v769_v3  ;;  %v2551_v11 = vor.u32 %v2550_v21, %v2547_v27  ;;  %v2914_v21 = vrot.slane %v5214_v40, 3 }
 0x190   : > { %v770_v17 = vpop.f32.mrf.mxu1  ;;  %v5249_v24 = vpop.f32.mrf.mxu3 }
 0x191   : > { %v1440_v20 = vadd.f32 %v5195_v33, %v1055_v46  ;;  %v771_v45 = vadd.f32 %v770_v17, %v4971_v49  ;;  %v2911_v33 = vrot.slane %v2909_v44, 3  ;;  %v2552_v25 = vsel %vm2517_vm3, %v2542_v26, %v2551_v11  ;;  %v5268_v46 = vld [vmem:[%s4549_s25 + $0x30] sm:$0xff]  ;;  %v4478_v26 = vld [vmem:[%s4549_s25 + $0x18] sm:$0xff] }
 0x192   : > { %v2554_v16 = vshrl.u32 %v5268_v46, 16  ;;  %v2557_v51 = vshll.u32 %v5268_v46, 16 }
 0x193   : > { %v1772_v62 = vpop.f32.mrf.mxu0  ;;  %v5252_v48 = vadd.f32 %v1770_v57, %v1440_v20  ;;  %v1875_v57 = vsel %vm1872_vm4, %v1873_v53, %v1874_v10  ;;  %v2913_v1 = vsel %vm2910_vm5, %v2911_v33, %v2912_v22  ;;  %v1876_v53 = vrot.slane %v4478_v26, 2 }
 0x194   : > { %v2559_v32 = vrot.slane %v2557_v51, 3 }
 0x196   : > { %v994_v52 = vpop.f32.mrf.mxu2 }
 0x197   : > { %v1056_v47 = vadd.f32 %v994_v52, %v771_v45 }
 0x198   : > { %v773_v0 = vpop.f32.mrf.mxu1  ;;  %v5262_v49 = vpop.f32.mrf.mxu3 }
 0x199   : > { %v1441_v37 = vadd.f32 %v5207_v39, %v1056_v47  ;;  %v774_v59 = vadd.f32 %v773_v0, %v4867_v29  ;;  %v2556_v29 = vrot.slane %v2554_v16, 2  ;;  %v2262_v47 = vsel %vm1872_vm4, %v2259_v50, %v2261_v13 }
 0x19b   : > { %v1775_v3 = vpop.f32.mrf.mxu0  ;;  %1984 = vmatmul.bf16.vlgmr.msra.gmra.mxu1 %v1875_v57  ;;  %2369 = vmatmul.bf16.vlgmr.msra.gmra.mxu2 %v2260_v35  ;;  %v5264_v8 = vadd.f32 %v1772_v62, %v1441_v37  ;;  %v2560_v0 = vor.u32 %v2559_v32, %v2556_v29  ;;  %v2915_v37 = vsel %vm2910_vm5, %v2912_v22, %v2914_v21  ;;  %v2916_v29 = vrot.slane %v5239_v63, 3 }
 0x19d   : > { %2772 = vmatmul.bf16.gmra.mxu3 %v2552_v25  ;;  %v2561_v40 = vsel %vm2517_vm3, %v2551_v11, %v2560_v0  ;;  %v4479_v11 = vld [vmem:[%s4549_s25 + $0x20] sm:$0xff] }
 0x19e   : > { %3022 = vmatmul.bf16.vlgmr.msra.gmra.mxu0 %v2913_v1  ;;  %v997_v9 = vpop.f32.mrf.mxu2  ;;  %v5292_v1 = vld [vmem:[%s4549_s25 + $0x38] sm:$0xff]  ;;  %v1878_v51 = vrot.slane %v4479_v11, 2 }
 0x19f   : > { %v1057_v17 = vadd.f32 %v997_v9, %v774_v59  ;;  %v2563_v22 = vshrl.u32 %v5292_v1, 16  ;;  %v2566_v59 = vshll.u32 %v5292_v1, 16 }
 0x1a0   : > { %v775_v39 = vpop.f32.mrf.mxu1  ;;  %v5274_v62 = vpop.f32.mrf.mxu3 }
 0x1a1   : > { %v1442_v20 = vadd.f32 %v5222_v18, %v1057_v17  ;;  %v776_v27 = vadd.f32 %v775_v39, %v4877_v43  ;;  %v1877_v18 = vsel %vm1872_vm4, %v1874_v10, %v1876_v53 }
 0x1a3   : > { %v1777_v42 = vpop.f32.mrf.mxu0  ;;  %v5276_v44 = vadd.f32 %v1775_v3, %v1442_v20  ;;  %v2263_v20 = vrot.slane %v5239_v63, 2 }
 0x1a6   : > { %v999_v45 = vpop.f32.mrf.mxu2 }
 0x1a7   : > { %v1058_v33 = vadd.f32 %v999_v45, %v776_v27 }
 0x1a8   : > { %v778_v52 = vpop.f32.mrf.mxu1  ;;  %v5286_v3 = vpop.f32.mrf.mxu3 }
 0x1a9   : > { %v1443_v57 = vadd.f32 %v5233_v54, %v1058_v33  ;;  %v779_v10 = vadd.f32 %v778_v52, %v4889_v58  ;;  %v2565_v58 = vrot.slane %v2563_v22, 2  ;;  %v2264_v33 = vsel %vm1872_vm4, %v2261_v13, %v2263_v20 }
 0x1ab   : > { %v1780_v35 = vpop.f32.mrf.mxu0  ;;  %1989 = vmatmul.bf16.gmra.mxu1 %v1877_v18  ;;  %2374 = vmatmul.bf16.gmra.mxu2 %v2262_v47  ;;  %v5288_v43 = vadd.f32 %v1777_v42, %v1443_v57  ;;  %v2568_v42 = vrot.slane %v2566_v59, 3  ;;  %v2917_v57 = vsel %vm2910_vm5, %v2914_v21, %v2916_v29 }
 0x1ad   : > { %2777 = vmatmul.bf16.gmra.mxu3 %v2561_v40  ;;  %v2569_v52 = vor.u32 %v2568_v42, %v2565_v58  ;;  %v2918_v58 = vrot.slane %v5268_v46, 3 }
 0x1ae   : > { %3027 = vmatmul.bf16.gmra.mxu0 %v2915_v37  ;;  %v1002_v50 = vpop.f32.mrf.mxu2  ;;  %v5316_v37 = vld [vmem:[%s4549_s25 + $0x40] sm:$0xff] }
 0x1af   : > { %v1059_v25 = vadd.f32 %v1002_v50, %v779_v10  ;;  %v2570_v63 = vsel %vm2517_vm3, %v2560_v0, %v2569_v52  ;;  %v2572_v21 = vshrl.u32 %v5316_v37, 16  ;;  %v2575_v10 = vshll.u32 %v5316_v37, 16  ;;  %v4480_v0 = vld [vmem:[%s4549_s25 + $0x28] sm:$0xff] }
 0x1b0   : > { %v780_v54 = vpop.f32.mrf.mxu1  ;;  %v5298_v39 = vpop.f32.mrf.mxu3  ;;  %v1880_v59 = vrot.slane %v4480_v0, 2 }
 0x1b1   : > { %v1444_v9 = vadd.f32 %v5249_v24, %v1059_v25  ;;  %v781_v26 = vadd.f32 %v780_v54, %v4899_v2  ;;  %v1879_v24 = vsel %vm1872_vm4, %v1876_v53, %v1878_v51 }
 0x1b3   : > { %v1782_v17 = vpop.f32.mrf.mxu0  ;;  %v5300_v16 = vadd.f32 %v1780_v35, %v1444_v9  ;;  %v2265_v9 = vrot.slane %v5268_v46, 2 }
 0x1b6   : > { %v1004_v32 = vpop.f32.mrf.mxu2 }
 0x1b7   : > { %v1060_v27 = vadd.f32 %v1004_v32, %v781_v26 }
 0x1b8   : > { %v783_v45 = vpop.f32.mrf.mxu1  ;;  %v5310_v35 = vpop.f32.mrf.mxu3 }
 0x1b9   : > { %v1445_v18 = vadd.f32 %v5262_v49, %v1060_v27  ;;  %v784_v53 = vadd.f32 %v783_v45, %v4920_v19  ;;  %v2574_v19 = vrot.slane %v2572_v21, 2  ;;  %v2266_v27 = vsel %vm1872_vm4, %v2263_v20, %v2265_v9 }
 0x1bb   : > { %v1785_v47 = vpop.f32.mrf.mxu0  ;;  %1994 = vmatmul.bf16.gmra.mxu1 %v1879_v24  ;;  %2379 = vmatmul.bf16.gmra.mxu2 %v2264_v33  ;;  %v5312_v2 = vadd.f32 %v1782_v17, %v1445_v18  ;;  %v2577_v17 = vrot.slane %v2575_v10, 3  ;;  %v2919_v18 = vsel %vm2910_vm5, %v2916_v29, %v2918_v58 }
 0x1bd   : > { %2782 = vmatmul.bf16.gmra.mxu3 %v2570_v63  ;;  %v2578_v45 = vor.u32 %v2577_v17, %v2574_v19  ;;  %v2920_v19 = vrot.slane %v5292_v1, 3 }
 0x1be   : > { %3032 = vmatmul.bf16.gmra.mxu0 %v2917_v57  ;;  %v1007_v13 = vpop.f32.mrf.mxu2  ;;  %v5340_v57 = vld [vmem:[%s4549_s25 + $0x48] sm:$0xff] }
 0x1bf   : > { %v1061_v40 = vadd.f32 %v1007_v13, %v784_v53  ;;  %v2579_v46 = vsel %vm2517_vm3, %v2569_v52, %v2578_v45  ;;  %v2581_v29 = vshrl.u32 %v5340_v57, 16  ;;  %v2584_v53 = vshll.u32 %v5340_v57, 16  ;;  %v4481_v52 = vld [vmem:[%s4549_s25 + $0x30] sm:$0xff] }
 0x1c0   : > { %v785_v49 = vpop.f32.mrf.mxu1  ;;  %v5322_v54 = vpop.f32.mrf.mxu3  ;;  %v1882_v10 = vrot.slane %v4481_v52, 2  ;;  %v5922_v52 = vld [vmem:[#allocation8_spill] sm:$0xff] }
 0x1c1   : > { %v1446_v50 = vadd.f32 %v5274_v62, %v1061_v40  ;;  %v786_v11 = vadd.f32 %v785_v49, %v4933_v36  ;;  %v1881_v62 = vsel %vm1872_vm4, %v1878_v51, %v1880_v59 }
 0x1c3   : > { %v1787_v25 = vpop.f32.mrf.mxu0  ;;  %v5324_v22 = vadd.f32 %v1785_v47, %v1446_v50  ;;  %v2267_v50 = vrot.slane %v5292_v1, 2 }
 0x1c6   : > { %v1009_v42 = vpop.f32.mrf.mxu2 }
 0x1c7   : > { %v1062_v26 = vadd.f32 %v1009_v42, %v786_v11 }
 0x1c8   : > { %v788_v32 = vpop.f32.mrf.mxu1  ;;  %v5334_v47 = vpop.f32.mrf.mxu3 }
 0x1c9   : > { %v1447_v24 = vadd.f32 %v5286_v3, %v1062_v26  ;;  %v789_v51 = vadd.f32 %v788_v32, %v4945_v61  ;;  %v2583_v61 = vrot.slane %v2581_v29, 2  ;;  %v2268_v26 = vsel %vm1872_vm4, %v2265_v9, %v2267_v50 }
 0x1cb   : > { %v1790_v33 = vpop.f32.mrf.mxu0  ;;  %1999 = vmatmul.bf16.gmra.mxu1 %v1881_v62  ;;  %2384 = vmatmul.bf16.gmra.mxu2 %v2266_v27  ;;  %v5336_v36 = vadd.f32 %v1787_v25, %v1447_v24  ;;  %v2586_v25 = vrot.slane %v2584_v53, 3  ;;  %v2921_v24 = vsel %vm2910_vm5, %v2918_v58, %v2920_v19 }
 0x1cd   : > { %2787 = vmatmul.bf16.gmra.mxu3 %v2579_v46  ;;  %v2587_v32 = vor.u32 %v2586_v25, %v2583_v61  ;;  %v2922_v25 = vrot.slane %v5316_v37, 3 }
 0x1ce   : > { %3037 = vmatmul.bf16.gmra.mxu0 %v2919_v18  ;;  %v1012_v20 = vpop.f32.mrf.mxu2  ;;  %v5364_v18 = vld [vmem:[%s4549_s25 + $0x50] sm:$0xff] }
 0x1cf   : > { %v1063_v63 = vadd.f32 %v1012_v20, %v789_v51  ;;  %v2588_v1 = vsel %vm2517_vm3, %v2578_v45, %v2587_v32  ;;  %v2590_v58 = vshrl.u32 %v5364_v18, 16  ;;  %v2593_v51 = vshll.u32 %v5364_v18, 16  ;;  %v4482_v45 = vld [vmem:[%s4549_s25 + $0x38] sm:$0xff] }
 0x1d0   : > { %v790_v3 = vpop.f32.mrf.mxu1  ;;  %v5346_v49 = vpop.f32.mrf.mxu3  ;;  %v1884_v53 = vrot.slane %v4482_v45, 2 }
 0x1d1   : > { %v1448_v13 = vadd.f32 %v5298_v39, %v1063_v63  ;;  %v791_v0 = vadd.f32 %v790_v3, %v4953_v15  ;;  %v1883_v39 = vsel %vm1872_vm4, %v1880_v59, %v1882_v10 }
 0x1d3   : > { %v1792_v40 = vpop.f32.mrf.mxu0  ;;  %v5348_v21 = vadd.f32 %v1790_v33, %v1448_v13  ;;  %v2269_v13 = vrot.slane %v5316_v37, 2 }
 0x1d6   : > { %v1014_v17 = vpop.f32.mrf.mxu2 }
 0x1d7   : > { %v1064_v11 = vadd.f32 %v1014_v17, %v791_v0 }
 0x1d8   : > { %v793_v42 = vpop.f32.mrf.mxu1  ;;  %v5358_v33 = vpop.f32.mrf.mxu3 }
 0x1d9   : > { %v1449_v62 = vadd.f32 %v5310_v35, %v1064_v11  ;;  %v794_v59 = vadd.f32 %v793_v42, %v4969_v41  ;;  %v2592_v41 = vrot.slane %v2590_v58, 2  ;;  %v2270_v42 = vsel %vm1872_vm4, %v2267_v50, %v2269_v13 }
 0x1db   : > { %v1795_v27 = vpop.f32.mrf.mxu0  ;;  %2004 = vmatmul.bf16.gmra.mxu1 %v1883_v39  ;;  %2389 = vmatmul.bf16.gmra.mxu2 %v2268_v26  ;;  %v5360_v15 = vadd.f32 %v1792_v40, %v1449_v62  ;;  %v2595_v40 = vrot.slane %v2593_v51, 3 }
 0x1dd   : > { %2792 = vmatmul.bf16.gmra.mxu3 %v2588_v1  ;;  %v2596_v39 = vor.u32 %v2595_v40, %v2592_v41  ;;  %v2271_v41 = vrot.slane %v5340_v57, 2 }
 0x1de   : > { %3042 = vmatmul.bf16.gmra.mxu0 %v2921_v24  ;;  %v1017_v9 = vpop.f32.mrf.mxu2 }
 0x1df   : > { %v1065_v46 = vadd.f32 %v1017_v9, %v794_v59  ;;  %v2597_v1 = vsel %vm2517_vm3, %v2587_v32, %v2596_v39  ;;  %v5388_v59 = vld [vmem:[%s4549_s25 + $0x58] sm:$0xff]  ;;  %v4483_v32 = vld [vmem:[%s4549_s25 + $0x40] sm:$0xff] }
 0x1e0   : > { %v795_v35 = vpop.f32.mrf.mxu1  ;;  %v5370_v3 = vpop.f32.mrf.mxu3  ;;  %v1886_v45 = vrot.slane %v4483_v32, 2 }
 0x1e1   : > { %v1450_v20 = vadd.f32 %v5322_v54, %v1065_v46  ;;  %v796_v61 = vadd.f32 %v795_v35, %v5922_v52  ;;  %v1885_v54 = vsel %vm1872_vm4, %v1882_v10, %v1884_v53  ;;  %v5923_v10 = vld [vmem:[#allocation2_spill] sm:$0xff]  ;;  %v2602_v35 = vshll.u32 %v5388_v59, 16 }
 0x1e3   : > { %v1797_v63 = vpop.f32.mrf.mxu0  ;;  %v5372_v29 = vadd.f32 %v1795_v27, %v1450_v20  ;;  %v2923_v27 = vsel %vm2910_vm5, %v2920_v19, %v2922_v25  ;;  %v2599_v19 = vshrl.u32 %v5388_v59, 16  ;;  %v2604_v52 = vrot.slane %v2602_v35, 3 }
 0x1e5   : > { %v2601_v40 = vrot.slane %v2599_v19, 2 }
 0x1e6   : > { %v1019_v0 = vpop.f32.mrf.mxu2 }
 0x1e7   : > { %v1066_v17 = vadd.f32 %v1019_v0, %v796_v61  ;;  %v5924_v61 = vld [vmem:[#allocation3_spill] sm:$0xff] }
 0x1e8   : > { %v798_v11 = vpop.f32.mrf.mxu1  ;;  %v5382_v24 = vpop.f32.mrf.mxu3 }
 0x1e9   : > { %v1451_v26 = vadd.f32 %v5334_v47, %v1066_v17  ;;  %v799_v50 = vadd.f32 %v798_v11, %v5923_v10  ;;  %v2924_v17 = vrot.slane %v5340_v57, 3 }
 0x1eb   : > { %v1800_v62 = vpop.f32.mrf.mxu0  ;;  %2009 = vmatmul.bf16.gmra.mxu1 %v1885_v54  ;;  %2394 = vmatmul.bf16.gmra.mxu2 %v2270_v42  ;;  %v5384_v37 = vadd.f32 %v1797_v63, %v1451_v26  ;;  %v2272_v26 = vsel %vm1872_vm4, %v2269_v13, %v2271_v41  ;;  %v2925_v10 = vsel %vm2910_vm5, %v2922_v25, %v2924_v17  ;;  %v5413_v13 = vld [vmem:[%s4549_s25 + $0x60] sm:$0xff] }
 0x1ec   : > { %v2608_v25 = vshrl.u32 %v5413_v13, 16  ;;  %v2611_v35 = vshll.u32 %v5413_v13, 16 }
 0x1ed   : > { %2797 = vmatmul.bf16.gmra.mxu3 %v2597_v1 }
 0x1ee   : > { %3047 = vmatmul.bf16.gmra.mxu0 %v2923_v27  ;;  %v1022_v9 = vpop.f32.mrf.mxu2 }
 0x1ef   : > { %v1067_v46 = vadd.f32 %v1022_v9, %v799_v50 }
 0x1f0   : > { %v800_v47 = vpop.f32.mrf.mxu1  ;;  %v5394_v20 = vpop.f32.mrf.mxu3 }
 0x1f1   : > { %v1452_v58 = vadd.f32 %v5346_v49, %v1067_v46  ;;  %v801_v0 = vadd.f32 %v800_v47, %v5924_v61  ;;  %v1887_v49 = vsel %vm1872_vm4, %v1884_v53, %v1886_v45  ;;  %v5925_v46 = vld [vmem:[#allocation4_spill] sm:$0xff]  ;;  %v2273_v61 = vrot.slane %v5364_v18, 2 }
 0x1f3   : > { %v1802_v51 = vpop.f32.mrf.mxu0  ;;  %v5396_v63 = vadd.f32 %v1800_v62, %v1452_v58  ;;  %v2605_v62 = vor.u32 %v2604_v52, %v2601_v40 }
 0x1f5   : > { %v2606_v9 = vsel %vm2517_vm3, %v2596_v39, %v2605_v62  ;;  %v4484_v39 = vld [vmem:[%s4549_s25 + $0x48] sm:$0xff] }
 0x1f6   : > { %v1024_v11 = vpop.f32.mrf.mxu2  ;;  %v1888_v52 = vrot.slane %v4484_v39, 2 }
 0x1f7   : > { %v1068_v54 = vadd.f32 %v1024_v11, %v801_v0  ;;  %v2610_v0 = vrot.slane %v2608_v25, 2  ;;  %v2613_v11 = vrot.slane %v2611_v35, 3  ;;  %v5927_v25 = vld [vmem:[#allocation6_spill] sm:$0xff] }
 0x1f8   : > { %v803_v42 = vpop.f32.mrf.mxu1  ;;  %v5406_v50 = vpop.f32.mrf.mxu3 }
 0x1f9   : > { %v1453_v27 = vadd.f32 %v5358_v33, %v1068_v54  ;;  %v804_v53 = vadd.f32 %v803_v42, %v5925_v46  ;;  %v5926_v54 = vld [vmem:[#allocation5_spill] sm:$0xff] }
 0x1fb   : > { %v1805_v1 = vpop.f32.mrf.mxu0  ;;  %2014 = vmatmul.bf16.gmra.mxu1 %v1887_v49  ;;  %2399 = vmatmul.bf16.gmra.mxu2 %v2272_v26  ;;  %v5408_v57 = vadd.f32 %v1802_v51, %v1453_v27  ;;  %v2926_v49 = vrot.slane %v5364_v18, 3 }
 0x1fd   : > { %2802 = vmatmul.bf16.gmra.mxu3 %v2606_v9  ;;  %v2274_v9 = vsel %vm1872_vm4, %v2271_v41, %v2273_v61  ;;  %v5437_v41 = vld [vmem:[%s4549_s25 + $0x68] sm:$0xff] }
 0x1fe   : > { %3052 = vmatmul.bf16.gmra.mxu0 %v2925_v10  ;;  %v1027_v47 = vpop.f32.mrf.mxu2  ;;  %v2620_v39 = vshll.u32 %v5437_v41, 16 }
 0x1ff   : > { %v1069_v19 = vadd.f32 %v1027_v47, %v804_v53  ;;  %v2927_v47 = vsel %vm2910_vm5, %v2924_v17, %v2926_v49  ;;  %v2617_v17 = vshrl.u32 %v5437_v41, 16 }
 0x200   : > { %v805_v33 = vpop.f32.mrf.mxu1  ;;  %v5418_v51 = vpop.f32.mrf.mxu3 }
 0x201   : > { %v1454_v58 = vadd.f32 %v5370_v3, %v1069_v19  ;;  %v806_v42 = vadd.f32 %v805_v33, %v5926_v54  ;;  %v1889_v3 = vsel %vm1872_vm4, %v1886_v45, %v1888_v52 }
 0x203   : > { %v1807_v32 = vpop.f32.mrf.mxu0  ;;  %v5420_v40 = vadd.f32 %v1805_v1, %v1454_v58  ;;  %v2614_v1 = vor.u32 %v2613_v11, %v2610_v0 }
 0x205   : > { %v2615_v33 = vsel %vm2517_vm3, %v2605_v62, %v2614_v1  ;;  %v4485_v62 = vld [vmem:[%s4549_s25 + $0x50] sm:$0xff] }
 0x206   : > { %v1029_v26 = vpop.f32.mrf.mxu2 }
 0x207   : > { %v1070_v27 = vadd.f32 %v1029_v26, %v806_v42  ;;  %v1890_v42 = vrot.slane %v4485_v62, 2  ;;  %v2275_v26 = vrot.slane %v5388_v59, 2 }
 0x208   : > { %v808_v10 = vpop.f32.mrf.mxu1  ;;  %v5430_v19 = vpop.f32.mrf.mxu3 }
 0x209   : > { %v1455_v46 = vadd.f32 %v5382_v24, %v1070_v27  ;;  %v809_v45 = vadd.f32 %v808_v10, %v5927_v25  ;;  %v2619_v27 = vrot.slane %v2617_v17, 2  ;;  %v2622_v10 = vrot.slane %v2620_v39, 3 }
 0x20b   : > { %v1810_v53 = vpop.f32.mrf.mxu0  ;;  %2019 = vmatmul.bf16.gmra.mxu1 %v1889_v3  ;;  %2404 = vmatmul.bf16.gmra.mxu2 %v2274_v9  ;;  %v5432_v18 = vadd.f32 %v1807_v32, %v1455_v46  ;;  %v5928_v3 = vld [vmem:[#allocation7_spill] sm:$0xff]  ;;  %v2928_v46 = vrot.slane %v5388_v59, 3 }
 0x20d   : > { %2807 = vmatmul.bf16.gmra.mxu3 %v2615_v33 }
 0x20e   : > { %3057 = vmatmul.bf16.gmra.mxu0 %v2927_v47  ;;  %v1032_v35 = vpop.f32.mrf.mxu2 }
 0x20f   : > { %v1071_v58 = vadd.f32 %v1032_v35, %v809_v45  ;;  %v2276_v45 = vsel %vm1872_vm4, %v2273_v61, %v2275_v26  ;;  %v5461_v61 = vld [vmem:[%s4549_s25 + $0x70] sm:$0xff] }
 0x210   : > { %v810_v24 = vpop.f32.mrf.mxu1  ;;  %v5442_v32 = vpop.f32.mrf.mxu3 }
 0x211   : > { %v1456_v0 = vadd.f32 %v5394_v20, %v1071_v58  ;;  %v811_v9 = vadd.f32 %v810_v24, %v5928_v3  ;;  %v1891_v20 = vsel %vm1872_vm4, %v1888_v52, %v1890_v42 }
 0x213   : > { %v1812_v11 = vpop.f32.mrf.mxu0  ;;  %v5444_v54 = vadd.f32 %v1810_v53, %v1456_v0  ;;  %v2623_v53 = vor.u32 %v2622_v10, %v2619_v27  ;;  %v2929_v0 = vsel %vm2910_vm5, %v2926_v49, %v2928_v46  ;;  %v2626_v49 = vshrl.u32 %v5461_v61, 16 }
 0x214   : > { %v2629_v27 = vshll.u32 %v5461_v61, 16 }
 0x215   : > { %v2624_v59 = vsel %vm2517_vm3, %v2614_v1, %v2623_v53 }
 0x216   : > { %v1034_v47 = vpop.f32.mrf.mxu2 }
 0x217   : > { %v1072_v33 = vadd.f32 %v1034_v47, %v811_v9  ;;  %v5474_v9 = vld [vmem:[%s4549_s25 + $0x58] sm:$0xff] }
 0x218   : > { %v1985_v25 = vpop.f32.mrf.mxu1  ;;  %v5454_v17 = vpop.f32.mrf.mxu3  ;;  %v1892_v47 = vrot.slane %v5474_v9, 2 }
 0x219   : > { %v1457_v35 = vadd.f32 %v5406_v50, %v1072_v33  ;;  %v2075_v52 = vadd.f32 %v1985_v25, %v4994_v30  ;;  %v2277_v33 = vrot.slane %v5413_v13, 2  ;;  %v2930_v25 = vrot.slane %v5413_v13, 3 }
 0x21b   : > { %v3023_v58 = vpop.f32.mrf.mxu0  ;;  %2024 = vmatmul.bf16.gmra.mxu1 %v1891_v20  ;;  %2409 = vmatmul.bf16.gmra.mxu2 %v2276_v45  ;;  %v5456_v24 = vadd.f32 %v1812_v11, %v1457_v35  ;;  %v5469_v11 = vld [vmem:[%s5905_s2] ss:$0 sm:$0xff]  ;;  %v2628_v20 = vrot.slane %v2626_v49, 2  ;;  %v2631_v45 = vrot.slane %v2629_v27, 3  ;;  %v2931_v49 = vsel %vm2910_vm5, %v2928_v46, %v2930_v25 }
 0x21d   : > { %2812 = vmatmul.bf16.gmra.mxu3 %v2624_v59  ;;  %v5490_v27 = vor.u32 %v2631_v45, %v2628_v20  ;;  %v5500_v45 = vld [vmem:[%s4549_s25 + $0x78] sm:$0xff] }
 0x21e   : > { %3062 = vmatmul.bf16.gmra.mxu0 %v2929_v0  ;;  %v2370_v39 = vpop.f32.mrf.mxu2 }
 0x21f   : > { %v2460_v62 = vadd.f32 %v2370_v39, %v2075_v52 }
 0x220   : > { %v1987_v50 = vpop.f32.mrf.mxu1  ;;  %v5471_v3 = vpop.f32.mrf.mxu3 }
 0x221   : > { %v2853_v10 = vadd.f32 %v5418_v51, %v2460_v62  ;;  %v2076_v35 = vadd.f32 %v1987_v50, %v5007_v6  ;;  %v2278_v62 = vsel %vm1872_vm4, %v2275_v26, %v2277_v33  ;;  %v2633_v26 = vsel %vm2517_vm3, %v2623_v53, %v5490_v27 }
 0x223   : > { %v3025_v1 = vpop.f32.mrf.mxu0  ;;  %v3113_v30 = vadd.f32 %v3023_v58, %v2853_v10  ;;  %v1893_v58 = vsel %vm1872_vm4, %v1890_v42, %v1892_v47 }
 0x225   : > { %v3153_v51 = vadd.f32 %v5469_v11, %v3113_v30 }
 0x226   : > { %v2372_v0 = vpop.f32.mrf.mxu2 }
 0x227   : > { %v3189_v59 = vmax.f32 %v3153_v51, 0.0  ;;  %v2461_v52 = vadd.f32 %v2372_v0, %v2076_v35 }
 0x228   : > { %v1990_v39 = vpop.f32.mrf.mxu1  ;;  %v5493_v35 = vpop.f32.mrf.mxu3 }
 0x229   : > { %v3261_v10 = vrot.slane %v3189_v59, 2  ;;  %v3262_v6 = vrot.slane %v3189_v59, 4  ;;  %v3263_v50 = vrot.slane %v3189_v59, 6  ;;  %3357 = vst [vmem:[#allocation1] ss:$4 sm:$0xff] %v3189_v59  ;;  %v2854_v30 = vadd.f32 %v5430_v19, %v2461_v52 }
 0x22a   : > { %v2077_v20 = vadd.f32 %v1990_v39, %v5022_v28  ;;  %v2635_v52 = vshrl.u32 %v5500_v45, 16 }
 0x22b   : > { %v3028_v51 = vpop.f32.mrf.mxu0  ;;  %3359 = vst [vmem:[#allocation1 + $0x1] ss:$4 sm:$0xff] %v3261_v10  ;;  %v3114_v42 = vadd.f32 %v3025_v1, %v2854_v30  ;;  %2029 = vmatmul.bf16.gmra.mxu1 %v1893_v58  ;;  %2414 = vmatmul.bf16.gmra.mxu2 %v2278_v62  ;;  %v2638_v58 = vshll.u32 %v5500_v45, 16 }
 0x22c   : > { %3361 = vst [vmem:[#allocation1 + $0x2] ss:$4 sm:$0xff] %v3262_v6  ;;  %v5507_v6 = vld [vmem:[%s4549_s25 + $0x60] sm:$0xff] }
 0x22d   : > { %3363 = vst [vmem:[#allocation1 + $0x3] ss:$4 sm:$0xff] %v3263_v50  ;;  %v3154_v46 = vadd.f32 %v5469_v11, %v3114_v42  ;;  %2817 = vmatmul.bf16.gmra.mxu3 %v2633_v26  ;;  %v1894_v28 = vrot.slane %v5507_v6, 2  ;;  %v2279_v42 = vrot.slane %v5437_v41, 2  ;;  %v2932_v26 = vrot.slane %v5437_v41, 3 }
 0x22e   : > { %3067 = vmatmul.bf16.gmra.mxu0 %v2931_v49  ;;  %v2375_v19 = vpop.f32.mrf.mxu2 }
 0x22f   : > { %v3190_v0 = vmax.f32 %v3154_v46, 0.0  ;;  %v2462_v59 = vadd.f32 %v2375_v19, %v2077_v20  ;;  %v2637_v46 = vrot.slane %v2635_v52, 2 }
 0x230   : > { %v1992_v1 = vpop.f32.mrf.mxu1  ;;  %v5510_v50 = vpop.f32.mrf.mxu3 }
 0x231   : > { %v3264_v62 = vrot.slane %v3190_v0, 2  ;;  %v3265_v53 = vrot.slane %v3190_v0, 4  ;;  %3365 = vst [vmem:[#allocation1 + $0x20] ss:$4 sm:$0xff] %v3190_v0  ;;  %v2855_v49 = vadd.f32 %v5442_v32, %v2462_v59  ;;  %v3266_v39 = vrot.slane %v3190_v0, 6 }
 0x232   : > { %v2640_v32 = vrot.slane %v2638_v58, 3  ;;  %v2078_v0 = vadd.f32 %v1992_v1, %v5036_v60  ;;  %v1895_v58 = vsel %vm1872_vm4, %v1892_v47, %v1894_v28  ;;  %v2280_v60 = vsel %vm1872_vm4, %v2277_v33, %v2279_v42 }
 0x233   : > { %v3030_v10 = vpop.f32.mrf.mxu0  ;;  %3367 = vst [vmem:[#allocation1 + $0x21] ss:$4 sm:$0xff] %v3264_v62  ;;  %v3115_v30 = vadd.f32 %v3028_v51, %v2855_v49  ;;  %v2933_v1 = vsel %vm2910_vm5, %v2930_v25, %v2932_v26 }
 0x234   : > { %v3372_v20 = vld.sshfl [vmem:[#allocation1] sm:$0xff pattern:$0x73625140]  ;;  %3369 = vst [vmem:[#allocation1 + $0x22] ss:$4 sm:$0xff] %v3265_v53  ;;  %v5538_v53 = vor.u32 %v2640_v32, %v2637_v46 }
 0x235   : > { %v3155_v19 = vadd.f32 %v5469_v11, %v3115_v30  ;;  %3371 = vst [vmem:[#allocation1 + $0x23] ss:$4 sm:$0xff] %v3266_v39  ;;  %v3556_v51 = vpack.c.bf16 %v3372_v20, %v3372_v20 }
 0x236   : > { %v2377_v59 = vpop.f32.mrf.mxu2  ;;  %v2642_v33 = vsel %vm2517_vm3, %v5490_v27, %v5538_v53 }
 0x237   : > { %v3191_v62 = vmax.f32 %v3155_v19, 0.0  ;;  %v2463_v49 = vadd.f32 %v2377_v59, %v2078_v0  ;;  %3589 = vst.msk [vmem:[%s5517_s21] sm:$0xf] %vm3588_vm6, %v3556_v51  ;;  %v5549_v51 = vld [vmem:[%s4549_s25 + $0x80] sm:$0xff] }
 0x238   : > { %v1995_v52 = vpop.f32.mrf.mxu1  ;;  %v5541_v19 = vpop.f32.mrf.mxu3  ;;  %v2647_v27 = vshll.u32 %v5549_v51, 16 }
 0x239   : > { %v3267_v39 = vrot.slane %v3191_v62, 2  ;;  %v3268_v30 = vrot.slane %v3191_v62, 4  ;;  %v3269_v20 = vrot.slane %v3191_v62, 6  ;;  %v2856_v9 = vadd.f32 %v5454_v17, %v2463_v49 }
 0x23a   : > { %v2079_v17 = vadd.f32 %v1995_v52, %v5045_v14  ;;  %v2644_v49 = vshrl.u32 %v5549_v51, 16 }
 0x23b   : > { %v3033_v47 = vpop.f32.mrf.mxu0  ;;  %3374 = vst [vmem:[#allocation1] ss:$4 sm:$0xff] %v3267_v39  ;;  %v3116_v0 = vadd.f32 %v3030_v10, %v2856_v9  ;;  %2034 = vmatmul.bf16.gmra.mxu1 %v1895_v58  ;;  %2419 = vmatmul.bf16.gmra.mxu2 %v2280_v60 }
 0x23c   : > { %3375 = vst [vmem:[#allocation1 + $0x1] ss:$4 sm:$0xff] %v3268_v30  ;;  %v3373_v13 = vld.sshfl [vmem:[#allocation1 + $0x20] sm:$0xff pattern:$0x73625140] }
 0x23d   : > { %3376 = vst [vmem:[#allocation1 + $0x2] ss:$4 sm:$0xff] %v3269_v20  ;;  %v3156_v25 = vadd.f32 %v5469_v11, %v3116_v0  ;;  %v3557_v46 = vpack.c.bf16 %v3373_v13, %v3373_v13  ;;  %2822 = vmatmul.bf16.gmra.mxu3 %v2642_v33  ;;  %v5559_v20 = vld [vmem:[%s4549_s25 + $0x68] sm:$0xff]  ;;  %v2281_v0 = vrot.slane %v5461_v61, 2  ;;  %v2934_v13 = vrot.slane %v5461_v61, 3 }
 0x23e   : > { %3072 = vmatmul.bf16.gmra.mxu0 %v2933_v1  ;;  %v2380_v32 = vpop.f32.mrf.mxu2  ;;  %v1896_v9 = vrot.slane %v5559_v20, 2  ;;  %v2646_v33 = vrot.slane %v2644_v49, 2 }
 0x23f   : > { %v3192_v10 = vmax.f32 %v3156_v25, 0.0  ;;  %v2464_v59 = vadd.f32 %v2380_v32, %v2079_v17  ;;  %3590 = vst.msk [vmem:[%s5517_s21 + $0x4] sm:$0xf] %vm3588_vm6, %v3557_v46  ;;  %v2649_v25 = vrot.slane %v2647_v27, 3  ;;  %v2282_v49 = vsel %vm1872_vm4, %v2279_v42, %v2281_v0 }
 0x240   : > { %v1997_v62 = vpop.f32.mrf.mxu1  ;;  %v5556_v39 = vpop.f32.mrf.mxu3 }
 0x241   : > { %v3270_v58 = vrot.slane %v3192_v10, 2  ;;  %v3271_v60 = vrot.slane %v3192_v10, 4  ;;  %v3272_v1 = vrot.slane %v3192_v10, 6  ;;  %3377 = vst [vmem:[#allocation1 + $0x3] ss:$4 sm:$0xff] %v3192_v10  ;;  %v2857_v14 = vadd.f32 %v5471_v3, %v2464_v59 }
 0x242   : > { %v2080_v3 = vadd.f32 %v1997_v62, %v5059_v4  ;;  %v2935_v4 = vsel %vm2910_vm5, %v2932_v26, %v2934_v13  ;;  %v5581_v62 = vor.u32 %v2649_v25, %v2646_v33  ;;  %v5594_v33 = vld [vmem:[%s4549_s25 + $0x88] sm:$0xff] }
 0x243   : > { %v3035_v52 = vpop.f32.mrf.mxu0  ;;  %v3117_v30 = vadd.f32 %v3033_v47, %v2857_v14  ;;  %3378 = vst [vmem:[#allocation1 + $0x20] ss:$4 sm:$0xff] %v3270_v58  ;;  %v1897_v58 = vsel %vm1872_vm4, %v1894_v28, %v1896_v9 }
 0x244   : > { %3379 = vst [vmem:[#allocation1 + $0x21] ss:$4 sm:$0xff] %v3271_v60  ;;  %v2651_v41 = vsel %vm2517_vm3, %v5538_v53, %v5581_v62 }
 0x245   : > { %v3157_v17 = vadd.f32 %v5469_v11, %v3117_v30  ;;  %3380 = vst [vmem:[#allocation1 + $0x22] ss:$4 sm:$0xff] %v3272_v1 }
 0x246   : > { %v2382_v46 = vpop.f32.mrf.mxu2 }
 0x247   : > { %v3193_v32 = vmax.f32 %v3157_v17, 0.0  ;;  %v2465_v47 = vadd.f32 %v2382_v46, %v2080_v3  ;;  %v2653_v46 = vshrl.u32 %v5594_v33, 16 }
 0x248   : > { %v3382_v10 = vld.sshfl [vmem:[#allocation1] sm:$0xff pattern:$0x73625140]  ;;  %v2000_v59 = vpop.f32.mrf.mxu1  ;;  %v5584_v14 = vpop.f32.mrf.mxu3 }
 0x249   : > { %v3558_v27 = vpack.c.bf16 %v3382_v10, %v3382_v10  ;;  %v3273_v60 = vrot.slane %v3193_v32, 4  ;;  %v3274_v6 = vrot.slane %v3193_v32, 6  ;;  %3381 = vst [vmem:[#allocation1 + $0x23] ss:$4 sm:$0xff] %v3193_v32  ;;  %v2858_v28 = vadd.f32 %v5493_v35, %v2465_v47 }
 0x24a   : > { %v2081_v30 = vadd.f32 %v2000_v59, %v5072_v56  ;;  %v2656_v32 = vshll.u32 %v5594_v33, 16 }
 0x24b   : > { %v3038_v1 = vpop.f32.mrf.mxu0  ;;  %3384 = vst [vmem:[#allocation1] ss:$4 sm:$0xff] %v3273_v60  ;;  %v3118_v42 = vadd.f32 %v3035_v52, %v2858_v28  ;;  %2039 = vmatmul.bf16.gmra.mxu1 %v1897_v58  ;;  %2424 = vmatmul.bf16.gmra.mxu2 %v2282_v49  ;;  %v2655_v28 = vrot.slane %v2653_v46, 2 }
 0x24c   : > { %3385 = vst [vmem:[#allocation1 + $0x1] ss:$4 sm:$0xff] %v3274_v6  ;;  %v2283_v6 = vrot.slane %v5500_v45, 2 }
 0x24d   : > { %v3158_v26 = vadd.f32 %v5469_v11, %v3118_v42  ;;  %3591 = vst.msk [vmem:[%s5517_s21 + $0x8] sm:$0xf] %vm3588_vm6, %v3558_v27  ;;  %2827 = vmatmul.bf16.gmra.mxu3 %v2651_v41  ;;  %v5602_v27 = vld [vmem:[%s4549_s25 + $0x70] sm:$0xff]  ;;  %v2658_v42 = vrot.slane %v2656_v32, 3 }
 0x24e   : > { %3077 = vmatmul.bf16.gmra.mxu0 %v2935_v4  ;;  %v2385_v35 = vpop.f32.mrf.mxu2  ;;  %v1898_v60 = vrot.slane %v5602_v27, 2 }
 0x24f   : > { %v3194_v25 = vmax.f32 %v3158_v26, 0.0  ;;  %v2466_v17 = vadd.f32 %v2385_v35, %v2081_v30  ;;  %v2936_v26 = vrot.slane %v5500_v45, 3 }
 0x250   : > { %v3383_v52 = vld.sshfl [vmem:[#allocation1 + $0x20] sm:$0xff pattern:$0x73625140]  ;;  %v2002_v3 = vpop.f32.mrf.mxu1  ;;  %v5599_v49 = vpop.f32.mrf.mxu3 }
 0x251   : > { %v3275_v53 = vrot.slane %v3194_v25, 2  ;;  %v3276_v47 = vrot.slane %v3194_v25, 4  ;;  %v3277_v10 = vrot.slane %v3194_v25, 6  ;;  %3386 = vst [vmem:[#allocation1 + $0x2] ss:$4 sm:$0xff] %v3194_v25  ;;  %v2859_v56 = vadd.f32 %v5510_v50, %v2466_v17 }
 0x252   : > { %v3559_v58 = vpack.c.bf16 %v3383_v52, %v3383_v52  ;;  %v2082_v50 = vadd.f32 %v2002_v3, %v5089_v12  ;;  %v1899_v17 = vsel %vm1872_vm4, %v1896_v9, %v1898_v60  ;;  %v2284_v12 = vsel %vm1872_vm4, %v2281_v0, %v2283_v6 }
 0x253   : > { %v3040_v59 = vpop.f32.mrf.mxu0  ;;  %3387 = vst [vmem:[#allocation1 + $0x3] ss:$4 sm:$0xff] %v3275_v53  ;;  %v3119_v4 = vadd.f32 %v3038_v1, %v2859_v56  ;;  %v5621_v52 = vor.u32 %v2658_v42, %v2655_v28  ;;  %v2937_v20 = vsel %vm2910_vm5, %v2934_v13, %v2936_v26 }
 0x254   : > { %3388 = vst [vmem:[#allocation1 + $0x20] ss:$4 sm:$0xff] %v3276_v47 }
 0x255   : > { %v3159_v41 = vadd.f32 %v5469_v11, %v3119_v4  ;;  %3389 = vst [vmem:[#allocation1 + $0x21] ss:$4 sm:$0xff] %v3277_v10 }
 0x256   : > { %v2387_v30 = vpop.f32.mrf.mxu2  ;;  %3592 = vst.msk [vmem:[%s5517_s21 + $0xc] sm:$0xf] %vm3588_vm6, %v3559_v58  ;;  %v5639_v58 = vld [vmem:[%s4549_s25 + $0x90] sm:$0xff] }
 0x257   : > { %v3195_v1 = vmax.f32 %v3159_v41, 0.0  ;;  %v2467_v35 = vadd.f32 %v2387_v30, %v2082_v50  ;;  %v2662_v42 = vshrl.u32 %v5639_v58, 16  ;;  %v2665_v41 = vshll.u32 %v5639_v58, 16 }
 0x258   : > { %v2005_v25 = vpop.f32.mrf.mxu1  ;;  %v5629_v47 = vpop.f32.mrf.mxu3 }
 0x259   : > { %v3278_v3 = vrot.slane %v3195_v1, 2  ;;  %v3279_v46 = vrot.slane %v3195_v1, 6  ;;  %3390 = vst [vmem:[#allocation1 + $0x22] ss:$4 sm:$0xff] %v3195_v1  ;;  %v2860_v32 = vadd.f32 %v5541_v19, %v2467_v35  ;;  %v2660_v19 = vsel %vm2517_vm3, %v5581_v62, %v5621_v52 }
 0x25a   : > { %v3392_v9 = vld.sshfl [vmem:[#allocation1] sm:$0xff pattern:$0x73625140]  ;;  %v2083_v61 = vadd.f32 %v2005_v25, %v5101_v55 }
 0x25b   : > { %v3043_v53 = vpop.f32.mrf.mxu0  ;;  %v3560_v0 = vpack.c.bf16 %v3392_v9, %v3392_v9  ;;  %3391 = vst [vmem:[#allocation1 + $0x23] ss:$4 sm:$0xff] %v3278_v3  ;;  %v3120_v10 = vadd.f32 %v3040_v59, %v2860_v32  ;;  %2044 = vmatmul.bf16.gmra.mxu1 %v1899_v17  ;;  %2429 = vmatmul.bf16.gmra.mxu2 %v2284_v12  ;;  %v5647_v3 = vld [vmem:[%s4549_s25 + $0x78] sm:$0xff]  ;;  %v2285_v32 = vrot.slane %v5549_v51, 2  ;;  %v2667_v9 = vrot.slane %v2665_v41, 3 }
 0x25c   : > { %3394 = vst [vmem:[#allocation1] ss:$4 sm:$0xff] %v3279_v46  ;;  %v1900_v46 = vrot.slane %v5647_v3, 2 }
 0x25d   : > { %v3160_v56 = vadd.f32 %v5469_v11, %v3120_v10  ;;  %3593 = vst.msk [vmem:[%s5517_s21 + $0x10] sm:$0xf] %vm3588_vm6, %v3560_v0  ;;  %2832 = vmatmul.bf16.gmra.mxu3 %v2660_v19  ;;  %v2938_v10 = vrot.slane %v5549_v51, 3 }
 0x25e   : > { %3082 = vmatmul.bf16.gmra.mxu0 %v2937_v20  ;;  %v2390_v13 = vpop.f32.mrf.mxu2  ;;  %v2664_v20 = vrot.slane %v2662_v42, 2 }
 0x25f   : > { %v3196_v4 = vmax.f32 %v3160_v56, 0.0  ;;  %v2468_v28 = vadd.f32 %v2390_v13, %v2083_v61  ;;  %v1901_v13 = vsel %vm1872_vm4, %v1898_v60, %v1900_v46  ;;  %v2939_v27 = vsel %vm2910_vm5, %v2936_v26, %v2938_v10 }
 0x260   : > { %v2007_v59 = vpop.f32.mrf.mxu1  ;;  %v5644_v25 = vpop.f32.mrf.mxu3 }
 0x261   : > { %v3280_v50 = vrot.slane %v3196_v4, 2  ;;  %v3281_v62 = vrot.slane %v3196_v4, 4  ;;  %v3282_v30 = vrot.slane %v3196_v4, 6  ;;  %3395 = vst [vmem:[#allocation1 + $0x1] ss:$4 sm:$0xff] %v3196_v4  ;;  %v2861_v55 = vadd.f32 %v5556_v39, %v2468_v28 }
 0x262   : > { %v3393_v35 = vld.sshfl [vmem:[#allocation1 + $0x20] sm:$0xff pattern:$0x73625140]  ;;  %v2084_v39 = vadd.f32 %v2007_v59, %v5115_v34  ;;  %v2286_v34 = vsel %vm1872_vm4, %v2283_v6, %v2285_v32  ;;  %v5666_v4 = vor.u32 %v2667_v9, %v2664_v20 }
 0x263   : > { %v3045_v1 = vpop.f32.mrf.mxu0  ;;  %3396 = vst [vmem:[#allocation1 + $0x2] ss:$4 sm:$0xff] %v3280_v50  ;;  %v3121_v17 = vadd.f32 %v3043_v53, %v2861_v55  ;;  %v3561_v12 = vpack.c.bf16 %v3393_v35, %v3393_v35 }
 0x264   : > { %3397 = vst [vmem:[#allocation1 + $0x3] ss:$4 sm:$0xff] %v3281_v62 }
 0x265   : > { %v3161_v0 = vadd.f32 %v5469_v11, %v3121_v17  ;;  %3398 = vst [vmem:[#allocation1 + $0x20] ss:$4 sm:$0xff] %v3282_v30  ;;  %v5929_v30 = vld [vmem:[#allocation9_spill] sm:$0xff] }
 0x266   : > { %v2392_v19 = vpop.f32.mrf.mxu2  ;;  %3594 = vst.msk [vmem:[%s5517_s21 + $0x14] sm:$0xf] %vm3588_vm6, %v3561_v12 }
 0x267   : > { %v3197_v53 = vmax.f32 %v3161_v0, 0.0  ;;  %v2469_v56 = vadd.f32 %v2392_v19, %v2084_v39  ;;  %v5688_v19 = vld [vmem:[%s4549_s25 + $0x80] sm:$0xff] }
 0x268   : > { %v2010_v61 = vpop.f32.mrf.mxu1  ;;  %v5674_v60 = vpop.f32.mrf.mxu3 }
 0x269   : > { %v3283_v28 = vrot.slane %v3197_v53, 2  ;;  %v3284_v59 = vrot.slane %v3197_v53, 4  ;;  %3399 = vst [vmem:[#allocation1 + $0x21] ss:$4 sm:$0xff] %v3197_v53  ;;  %v2862_v42 = vadd.f32 %v5584_v14, %v2469_v56  ;;  %v2669_v14 = vsel %vm2517_vm3, %v5621_v52, %v5666_v4 }
 0x26a   : > { %v2085_v26 = vadd.f32 %v2010_v61, %v5929_v30  ;;  %v1902_v53 = vrot.slane %v5688_v19, 2 }
 0x26b   : > { %v3048_v41 = vpop.f32.mrf.mxu0  ;;  %v3402_v50 = vld.sshfl [vmem:[#allocation1] sm:$0xff pattern:$0x73625140]  ;;  %3400 = vst [vmem:[#allocation1 + $0x22] ss:$4 sm:$0xff] %v3283_v28  ;;  %v3122_v6 = vadd.f32 %v3045_v1, %v2862_v42  ;;  %2049 = vmatmul.bf16.gmra.mxu1 %v1901_v13  ;;  %2434 = vmatmul.bf16.gmra.mxu2 %v2286_v34  ;;  %v5684_v1 = vld [vmem:[%s4549_s25 + $0x98] sm:$0xff] }
 0x26c   : > { %v3562_v62 = vpack.c.bf16 %v3402_v50, %v3402_v50  ;;  %3401 = vst [vmem:[#allocation1 + $0x23] ss:$4 sm:$0xff] %v3284_v59  ;;  %v2671_v61 = vshrl.u32 %v5684_v1, 16  ;;  %v2674_v13 = vshll.u32 %v5684_v1, 16  ;;  %v2287_v59 = vrot.slane %v5594_v33, 2 }
 0x26d   : > { %v3162_v45 = vadd.f32 %v5469_v11, %v3122_v6  ;;  %2837 = vmatmul.bf16.gmra.mxu3 %v2669_v14 }
 0x26e   : > { %3087 = vmatmul.bf16.gmra.mxu0 %v2939_v27  ;;  %v2395_v55 = vpop.f32.mrf.mxu2  ;;  %3595 = vst.msk [vmem:[%s5517_s21 + $0x18] sm:$0xf] %vm3588_vm6, %v3562_v62  ;;  %v2673_v27 = vrot.slane %v2671_v61, 2  ;;  %v2676_v50 = vrot.slane %v2674_v13, 3  ;;  %v5930_v62 = vld [vmem:[#allocation10_spill] sm:$0xff] }
 0x26f   : > { %v3198_v35 = vmax.f32 %v3162_v45, 0.0  ;;  %v2470_v17 = vadd.f32 %v2395_v55, %v2085_v26  ;;  %v1903_v55 = vsel %vm1872_vm4, %v1900_v46, %v1902_v53 }
 0x270   : > { %v2012_v12 = vpop.f32.mrf.mxu1  ;;  %v5691_v56 = vpop.f32.mrf.mxu3 }
 0x271   : > { %v3285_v20 = vrot.slane %v3198_v35, 2  ;;  %v3286_v9 = vrot.slane %v3198_v35, 4  ;;  %v3287_v0 = vrot.slane %v3198_v35, 6  ;;  %3404 = vst [vmem:[#allocation1] ss:$4 sm:$0xff] %v3198_v35  ;;  %v2863_v52 = vadd.f32 %v5599_v49, %v2470_v17 }
 0x272   : > { %v2940_v49 = vrot.slane %v5594_v33, 3  ;;  %v2086_v14 = vadd.f32 %v2012_v12, %v5930_v62  ;;  %v2288_v35 = vsel %vm1872_vm4, %v2285_v32, %v2287_v59  ;;  %v5716_v12 = vor.u32 %v2676_v50, %v2673_v27 }
 0x273   : > { %v3050_v39 = vpop.f32.mrf.mxu0  ;;  %3405 = vst [vmem:[#allocation1 + $0x1] ss:$4 sm:$0xff] %v3285_v20  ;;  %v3123_v34 = vadd.f32 %v3048_v41, %v2863_v52  ;;  %v3403_v28 = vld.sshfl [vmem:[#allocation1 + $0x20] sm:$0xff pattern:$0x73625140] }
 0x274   : > { %3406 = vst [vmem:[#allocation1 + $0x2] ss:$4 sm:$0xff] %v3286_v9  ;;  %v3563_v42 = vpack.c.bf16 %v3403_v28, %v3403_v28  ;;  %v2941_v17 = vsel %vm2910_vm5, %v2938_v10, %v2940_v49  ;;  %v2678_v10 = vsel %vm2517_vm3, %v5666_v4, %v5716_v12  ;;  %v2496_v28 = vld [vmem:[%s4549_s25 + $0xa0] sm:$0x7] }
 0x275   : > { %3407 = vst [vmem:[#allocation1 + $0x3] ss:$4 sm:$0xff] %v3287_v0  ;;  %v3163_v6 = vadd.f32 %v5469_v11, %v3123_v34  ;;  %v2515_v27 = vunpack.c.l.b16 %v2496_v28 }
 0x276   : > { %v2397_v45 = vpop.f32.mrf.mxu2  ;;  %3596 = vst.msk [vmem:[%s5517_s21 + $0x1c] sm:$0xf] %vm3588_vm6, %v3563_v42 }
 0x277   : > { %v3199_v30 = vmax.f32 %v3163_v6, 0.0  ;;  %v2471_v26 = vadd.f32 %v2397_v45, %v2086_v14  ;;  %v5729_v62 = vpack.c.b16 %v2515_v27, %v2515_v27 }
 0x278   : > { %v2015_v41 = vpop.f32.mrf.mxu1  ;;  %v5719_v52 = vpop.f32.mrf.mxu3 }
 0x279   : > { %v3288_v20 = vrot.slane %v3199_v30, 2  ;;  %v3289_v9 = vrot.slane %v3199_v30, 4  ;;  %v3290_v0 = vrot.slane %v3199_v30, 6  ;;  %3408 = vst [vmem:[#allocation1 + $0x20] ss:$4 sm:$0xff] %v3199_v30  ;;  %v2864_v3 = vadd.f32 %v5629_v47, %v2471_v26  ;;  %v5931_v47 = vld [vmem:[#allocation11_spill] sm:$0xff] }
 0x27a   : > { %v2087_v34 = vadd.f32 %v2015_v41, %v5931_v47  ;;  %v2680_v41 = vshrl.u32 %v5729_v62, 16 }
 0x27b   : > { %v3053_v46 = vpop.f32.mrf.mxu0  ;;  %3409 = vst [vmem:[#allocation1 + $0x21] ss:$4 sm:$0xff] %v3288_v20  ;;  %v3124_v32 = vadd.f32 %v3050_v39, %v2864_v3  ;;  %2054 = vmatmul.bf16.gmra.mxu1 %v1903_v55  ;;  %2439 = vmatmul.bf16.gmra.mxu2 %v2288_v35  ;;  %v2683_v35 = vshll.u32 %v5729_v62, 16  ;;  %v5737_v20 = vld [vmem:[%s4549_s25 + $0x88] sm:$0xff]  ;;  %v2942_v3 = vrot.slane %v5639_v58, 3 }
 0x27c   : > { %v3412_v51 = vld.sshfl [vmem:[#allocation1] sm:$0xff pattern:$0x73625140]  ;;  %3410 = vst [vmem:[#allocation1 + $0x22] ss:$4 sm:$0xff] %v3289_v9  ;;  %v1904_v9 = vrot.slane %v5737_v20, 2 }
 0x27d   : > { %v3564_v61 = vpack.c.bf16 %v3412_v51, %v3412_v51  ;;  %3411 = vst [vmem:[#allocation1 + $0x23] ss:$4 sm:$0xff] %v3290_v0  ;;  %v3164_v13 = vadd.f32 %v5469_v11, %v3124_v32  ;;  %2842 = vmatmul.bf16.gmra.mxu3 %v2678_v10  ;;  %v2289_v0 = vrot.slane %v5639_v58, 2  ;;  %v2685_v47 = vrot.slane %v2683_v35, 3 }
 0x27e   : > { %3092 = vmatmul.bf16.gmra.mxu0 %v2941_v17  ;;  %v2400_v42 = vpop.f32.mrf.mxu2  ;;  %v1905_v27 = vsel %vm1872_vm4, %v1902_v53, %v1904_v9 }
 0x27f   : > { %v3200_v39 = vmax.f32 %v3164_v13, 0.0  ;;  %v2472_v50 = vadd.f32 %v2400_v42, %v2087_v34  ;;  %3597 = vst.msk [vmem:[%s5517_s21 + $0x20] sm:$0xf] %vm3588_vm6, %v3564_v61  ;;  %v5932_v61 = vld [vmem:[#allocation12_spill] sm:$0xff] }
 0x280   : > { %v2017_v6 = vpop.f32.mrf.mxu1  ;;  %v5732_v55 = vpop.f32.mrf.mxu3 }
 0x281   : > { %v3291_v14 = vrot.slane %v3200_v39, 2  ;;  %v3292_v4 = vrot.slane %v3200_v39, 4  ;;  %v3293_v45 = vrot.slane %v3200_v39, 6  ;;  %v2865_v30 = vadd.f32 %v5644_v25, %v2472_v50 }
 0x282   : > { %v2682_v25 = vrot.slane %v2680_v41, 2  ;;  %v2088_v13 = vadd.f32 %v2017_v6, %v5932_v61  ;;  %v2290_v39 = vsel %vm1872_vm4, %v2287_v59, %v2289_v0  ;;  %v2943_v50 = vsel %vm2910_vm5, %v2940_v49, %v2942_v3 }
 0x283   : > { %v3055_v26 = vpop.f32.mrf.mxu0  ;;  %3414 = vst [vmem:[#allocation1] ss:$4 sm:$0xff] %v3291_v14  ;;  %v3125_v17 = vadd.f32 %v3053_v46, %v2865_v30 }
 0x284   : > { %v3413_v32 = vld.sshfl [vmem:[#allocation1 + $0x20] sm:$0xff pattern:$0x73625140]  ;;  %3415 = vst [vmem:[#allocation1 + $0x1] ss:$4 sm:$0xff] %v3292_v4  ;;  %v2686_v6 = vor.u32 %v2685_v47, %v2682_v25 }
 0x285   : > { %v3565_v51 = vpack.c.bf16 %v3413_v32, %v3413_v32  ;;  %3416 = vst [vmem:[#allocation1 + $0x2] ss:$4 sm:$0xff] %v3293_v45  ;;  %v3165_v10 = vadd.f32 %v5469_v11, %v3125_v17 }
 0x286   : > { %v2402_v46 = vpop.f32.mrf.mxu2  ;;  %v2687_v33 = vsel %vm2517_vm3, %v5716_v12, %v2686_v6 }
 0x287   : > { %v3201_v34 = vmax.f32 %v3165_v10, 0.0  ;;  %v2473_v28 = vadd.f32 %v2402_v46, %v2088_v13  ;;  %3598 = vst.msk [vmem:[%s5517_s21 + $0x24] sm:$0xf] %vm3588_vm6, %v3565_v51 }
 0x288   : > { %v2020_v42 = vpop.f32.mrf.mxu1  ;;  %v5762_v30 = vpop.f32.mrf.mxu3 }
 0x289   : > { %v3294_v14 = vrot.slane %v3201_v34, 2  ;;  %v3295_v4 = vrot.slane %v3201_v34, 4  ;;  %v3296_v45 = vrot.slane %v3201_v34, 6  ;;  %3417 = vst [vmem:[#allocation1 + $0x3] ss:$4 sm:$0xff] %v3201_v34  ;;  %v2866_v19 = vadd.f32 %v5674_v60, %v2473_v28 }
 0x28a   : > { %v2089_v49 = vadd.f32 %v2020_v42, %v5199_v5  ;;  %v5772_v5 = vld [vmem:[%s4549_s25 + $0x90] sm:$0xff]  ;;  %v2291_v34 = vrot.slane %v5684_v1, 2 }
 0x28b   : > { %v3058_v53 = vpop.f32.mrf.mxu0  ;;  %3418 = vst [vmem:[#allocation1 + $0x20] ss:$4 sm:$0xff] %v3294_v14  ;;  %v3126_v41 = vadd.f32 %v3055_v26, %v2866_v19  ;;  %2059 = vmatmul.bf16.gmra.mxu1 %v1905_v27  ;;  %2444 = vmatmul.bf16.gmra.mxu2 %v2290_v39  ;;  %v1906_v46 = vrot.slane %v5772_v5, 2  ;;  %v2147_v19 = vld [vmem:[%s4549_s25 + $0xa0] sm:$0x3]  ;;  %v1908_v5 = vrot.slane %v5205_v7, 2 }
 0x28c   : > { %3419 = vst [vmem:[#allocation1 + $0x21] ss:$4 sm:$0xff] %v3295_v4 }
 0x28d   : > { %3420 = vst [vmem:[#allocation1 + $0x22] ss:$4 sm:$0xff] %v3296_v45  ;;  %v3166_v59 = vadd.f32 %v5469_v11, %v3126_v41  ;;  %2847 = vmatmul.bf16.gmra.mxu3 %v2687_v33  ;;  %v1907_v4 = vsel %vm1872_vm4, %v1904_v9, %v1906_v46  ;;  %v2292_v45 = vsel %vm1872_vm4, %v2289_v0, %v2291_v34  ;;  %v2238_v0 = vunpack.c.l.b16 %v2147_v19 }
 0x28e   : > { %3097 = vmatmul.bf16.gmra.mxu0 %v2943_v50  ;;  %v2405_v35 = vpop.f32.mrf.mxu2 }
 0x28f   : > { %v3202_v60 = vmax.f32 %v3166_v59, 0.0  ;;  %v2474_v17 = vadd.f32 %v2405_v35, %v2089_v49 }
 0x290   : > { %v3422_v32 = vld.sshfl [vmem:[#allocation1] sm:$0xff pattern:$0x73625140]  ;;  %v2022_v26 = vpop.f32.mrf.mxu1  ;;  %v5769_v13 = vpop.f32.mrf.mxu3 }
 0x291   : > { %v3566_v25 = vpack.c.bf16 %v3422_v32, %v3422_v32  ;;  %v3297_v51 = vrot.slane %v3202_v60, 4  ;;  %v3298_v10 = vrot.slane %v3202_v60, 6  ;;  %3421 = vst [vmem:[#allocation1 + $0x23] ss:$4 sm:$0xff] %v3202_v60  ;;  %v2867_v61 = vadd.f32 %v5691_v56, %v2474_v17 }
 0x292   : > { %v2090_v42 = vadd.f32 %v2022_v26, %v5210_v23  ;;  %v2944_v56 = vrot.slane %v5684_v1, 3  ;;  %v2257_v32 = vpack.c.b16 %v2238_v0, %v2238_v0 }
 0x293   : > { %v3060_v12 = vpop.f32.mrf.mxu0  ;;  %3424 = vst [vmem:[#allocation1] ss:$4 sm:$0xff] %v3297_v51  ;;  %v3127_v47 = vadd.f32 %v3058_v53, %v2867_v61 }
 0x294   : > { %3425 = vst [vmem:[#allocation1 + $0x1] ss:$4 sm:$0xff] %v3298_v10  ;;  %v2945_v1 = vsel %vm2910_vm5, %v2942_v3, %v2944_v56 }
 0x295   : > { %v3167_v28 = vadd.f32 %v5469_v11, %v3127_v47  ;;  %3599 = vst.msk [vmem:[%s5517_s21 + $0x28] sm:$0xf] %vm3588_vm6, %v3566_v25 }
 0x296   : > { %v2407_v27 = vpop.f32.mrf.mxu2 }
 0x297   : > { %v3203_v39 = vmax.f32 %v3167_v28, 0.0  ;;  %v2475_v50 = vadd.f32 %v2407_v27, %v2090_v42  ;;  %v2293_v28 = vrot.slane %v2257_v32, 2  ;;  %v2946_v42 = vrot.slane %v5729_v62, 3 }
 0x298   : > { %v3423_v6 = vld.sshfl [vmem:[#allocation1 + $0x20] sm:$0xff pattern:$0x73625140]  ;;  %v2025_v14 = vpop.f32.mrf.mxu1  ;;  %v5792_v49 = vpop.f32.mrf.mxu3 }
 0x299   : > { %v3299_v53 = vrot.slane %v3203_v39, 2  ;;  %v3300_v41 = vrot.slane %v3203_v39, 4  ;;  %v3301_v33 = vrot.slane %v3203_v39, 6  ;;  %3426 = vst [vmem:[#allocation1 + $0x2] ss:$4 sm:$0xff] %v3203_v39  ;;  %v3567_v59 = vpack.c.bf16 %v3423_v6, %v3423_v6 }
 0x29a   : > { %v2868_v20 = vadd.f32 %v5719_v52, %v2475_v50  ;;  %v2091_v35 = vadd.f32 %v2025_v14, %v5224_v38  ;;  %v2947_v7 = vsel %vm2910_vm5, %v2944_v56, %v2946_v42 }
 0x29b   : > { %v3063_v23 = vpop.f32.mrf.mxu0  ;;  %3427 = vst [vmem:[#allocation1 + $0x3] ss:$4 sm:$0xff] %v3299_v53  ;;  %2064 = vmatmul.bf16.gmra.mxu1 %v1907_v4  ;;  %2449 = vmatmul.bf16.gmra.mxu2 %v2292_v45  ;;  %v1909_v4 = vsel %vm1872_vm4, %v1906_v46, %v1908_v5  ;;  %v2294_v45 = vsel %vm1872_vm4, %v2291_v34, %v2293_v28 }
 0x29c   : > { %3428 = vst [vmem:[#allocation1 + $0x20] ss:$4 sm:$0xff] %v3300_v41  ;;  %v3128_v9 = vadd.f32 %v3060_v12, %v2868_v20 }
 0x29d   : > { %3429 = vst [vmem:[#allocation1 + $0x21] ss:$4 sm:$0xff] %v3301_v33 }
 0x29e   : > { %3102 = vmatmul.bf16.gmra.mxu0 %v2945_v1  ;;  %3600 = vst.msk [vmem:[%s5517_s21 + $0x2c] sm:$0xf] %vm3588_vm6, %v3567_v59  ;;  %v3168_v58 = vadd.f32 %v5469_v11, %v3128_v9  ;;  %v2410_v3 = vpop.f32.mrf.mxu2 }
 0x29f   : > { %v2476_v60 = vadd.f32 %v2410_v3, %v2091_v35 }
 0x2a0   : > { %v3204_v17 = vmax.f32 %v3168_v58, 0.0  ;;  %v2027_v52 = vpop.f32.mrf.mxu1  ;;  %v5799_v12 = vpop.f32.mrf.mxu3 }
 0x2a1   : > { %v2869_v26 = vadd.f32 %v5732_v55, %v2476_v60  ;;  %v2092_v55 = vadd.f32 %v2027_v52, %v5235_v31 }
 0x2a2   : > { %v3432_v51 = vld.sshfl [vmem:[#allocation1] sm:$0xff pattern:$0x73625140]  ;;  %v3302_v10 = vrot.slane %v3204_v17, 2  ;;  %v3303_v61 = vrot.slane %v3204_v17, 6 }
 0x2a3   : > { %v3065_v25 = vpop.f32.mrf.mxu0  ;;  %v3568_v47 = vpack.c.bf16 %v3432_v51, %v3432_v51  ;;  %3430 = vst [vmem:[#allocation1 + $0x22] ss:$4 sm:$0xff] %v3204_v17  ;;  %v3129_v38 = vadd.f32 %v3063_v23, %v2869_v26 }
 0x2a4   : > { %3431 = vst [vmem:[#allocation1 + $0x23] ss:$4 sm:$0xff] %v3302_v10 }
 0x2a5   : > { %3601 = vst.msk [vmem:[%s5517_s21 + $0x30] sm:$0xf] %vm3588_vm6, %v3568_v47  ;;  %v3169_v27 = vadd.f32 %v5469_v11, %v3129_v38 }
 0x2a6   : > { %3434 = vst [vmem:[#allocation1] ss:$4 sm:$0xff] %v3303_v61  ;;  %v2412_v39 = vpop.f32.mrf.mxu2 }
 0x2a7   : > { %v3205_v50 = vmax.f32 %v3169_v27, 0.0  ;;  %v2477_v6 = vadd.f32 %v2412_v39, %v2092_v55 }
 0x2a8   : > { %v2030_v14 = vpop.f32.mrf.mxu1  ;;  %v5811_v46 = vpop.f32.mrf.mxu3 }
 0x2a9   : > { %v3304_v19 = vrot.slane %v3205_v50, 2  ;;  %v3305_v53 = vrot.slane %v3205_v50, 4  ;;  %v3306_v62 = vrot.slane %v3205_v50, 6  ;;  %3435 = vst [vmem:[#allocation1 + $0x1] ss:$4 sm:$0xff] %v3205_v50  ;;  %v2870_v41 = vadd.f32 %v5762_v30, %v2477_v6 }
 0x2aa   : > { %v2093_v56 = vadd.f32 %v2030_v14, %v5252_v48 }
 0x2ab   : > { %v3068_v33 = vpop.f32.mrf.mxu0  ;;  %v3433_v31 = vld.sshfl [vmem:[#allocation1 + $0x20] sm:$0xff pattern:$0x73625140]  ;;  %3436 = vst [vmem:[#allocation1 + $0x2] ss:$4 sm:$0xff] %v3304_v19  ;;  %v3130_v23 = vadd.f32 %v3065_v25, %v2870_v41  ;;  %2069 = vmatmul.bf16.gmra.mxu1 %v1909_v4  ;;  %2454 = vmatmul.bf16.gmra.mxu2 %v2294_v45 }
 0x2ac   : > { %v3569_v1 = vpack.c.bf16 %v3433_v31, %v3433_v31  ;;  %3437 = vst [vmem:[#allocation1 + $0x3] ss:$4 sm:$0xff] %v3305_v53 }
 0x2ad   : > { %3438 = vst [vmem:[#allocation1 + $0x20] ss:$4 sm:$0xff] %v3306_v62  ;;  %v3170_v34 = vadd.f32 %v5469_v11, %v3130_v23 }
 0x2ae   : > { %3107 = vmatmul.bf16.gmra.mxu0 %v2947_v7  ;;  %3602 = vst.msk [vmem:[%s5517_s21 + $0x34] sm:$0xf] %vm3588_vm6, %v3569_v1  ;;  %v2415_v59 = vpop.f32.mrf.mxu2 }
 0x2af   : > { %v3206_v30 = vmax.f32 %v3170_v34, 0.0  ;;  %v2478_v20 = vadd.f32 %v2415_v59, %v2093_v56 }
 0x2b0   : > { %v2032_v9 = vpop.f32.mrf.mxu1  ;;  %v5822_v25 = vpop.f32.mrf.mxu3 }
 0x2b1   : > { %v3307_v0 = vrot.slane %v3206_v30, 2  ;;  %v3308_v35 = vrot.slane %v3206_v30, 4  ;;  %3439 = vst [vmem:[#allocation1 + $0x21] ss:$4 sm:$0xff] %v3206_v30  ;;  %v2871_v58 = vadd.f32 %v5769_v13, %v2478_v20  ;;  %v2094_v32 = vadd.f32 %v2032_v9, %v5264_v8 }
 0x2b3   : > { %v3070_v3 = vpop.f32.mrf.mxu0  ;;  %v3442_v60 = vld.sshfl [vmem:[#allocation1] sm:$0xff pattern:$0x73625140]  ;;  %3440 = vst [vmem:[#allocation1 + $0x22] ss:$4 sm:$0xff] %v3307_v0  ;;  %v3131_v17 = vadd.f32 %v3068_v33, %v2871_v58 }
 0x2b4   : > { %v3570_v52 = vpack.c.bf16 %v3442_v60, %v3442_v60  ;;  %3441 = vst [vmem:[#allocation1 + $0x23] ss:$4 sm:$0xff] %v3308_v35  ;;  %v5833_v33 = vld [vmem:[%s5905_s2] ss:$0 sm:$0xff] }
 0x2b5   : > { %v3171_v48 = vadd.f32 %v5469_v11, %v3131_v17 }
 0x2b6   : > { %3603 = vst.msk [vmem:[%s5517_s21 + $0x38] sm:$0xf] %vm3588_vm6, %v3570_v52  ;;  %v2417_v26 = vpop.f32.mrf.mxu2 }
 0x2b7   : > { %v3207_v51 = vmax.f32 %v3171_v48, 0.0  ;;  %v2479_v10 = vadd.f32 %v2417_v26, %v2094_v32 }
 0x2b8   : > { %v2035_v61 = vpop.f32.mrf.mxu1  ;;  %v2820_v45 = vpop.f32.mrf.mxu3 }
 0x2b9   : > { %v3309_v13 = vrot.slane %v3207_v51, 2  ;;  %v3310_v47 = vrot.slane %v3207_v51, 4  ;;  %v3311_v38 = vrot.slane %v3207_v51, 6  ;;  %3444 = vst [vmem:[#allocation1] ss:$4 sm:$0xff] %v3207_v51  ;;  %v2872_v5 = vadd.f32 %v5792_v49, %v2479_v10 }
 0x2ba   : > { %v2095_v39 = vadd.f32 %v2035_v61, %v5276_v44 }
 0x2bb   : > { %v3073_v28 = vpop.f32.mrf.mxu0  ;;  %v3443_v42 = vld.sshfl [vmem:[#allocation1 + $0x20] sm:$0xff pattern:$0x73625140]  ;;  %3445 = vst [vmem:[#allocation1 + $0x1] ss:$4 sm:$0xff] %v3309_v13  ;;  %v3132_v27 = vadd.f32 %v3070_v3, %v2872_v5 }
 0x2bc   : > { %v3571_v8 = vpack.c.bf16 %v3443_v42, %v3443_v42  ;;  %3446 = vst [vmem:[#allocation1 + $0x2] ss:$4 sm:$0xff] %v3310_v47 }
 0x2bd   : > { %3447 = vst [vmem:[#allocation1 + $0x3] ss:$4 sm:$0xff] %v3311_v38  ;;  %v3172_v55 = vadd.f32 %v5469_v11, %v3132_v27 }
 0x2be   : > { %3604 = vst.msk [vmem:[%s5517_s21 + $0x3c] sm:$0xf] %vm3588_vm6, %v3571_v8  ;;  %v2420_v50 = vpop.f32.mrf.mxu2 }
 0x2bf   : > { %v3208_v6 = vmax.f32 %v3172_v55, 0.0  ;;  %v2480_v14 = vadd.f32 %v2420_v50, %v2095_v39 }
 0x2c0   : > { %v2037_v4 = vpop.f32.mrf.mxu1  ;;  %v2823_v35 = vpop.f32.mrf.mxu3 }
 0x2c1   : > { %v3312_v7 = vrot.slane %v3208_v6, 2  ;;  %v3313_v49 = vrot.slane %v3208_v6, 4  ;;  %v3314_v19 = vrot.slane %v3208_v6, 6  ;;  %3448 = vst [vmem:[#allocation1 + $0x20] ss:$4 sm:$0xff] %v3208_v6  ;;  %v2873_v53 = vadd.f32 %v5799_v12, %v2480_v14 }
 0x2c2   : > { %v2096_v23 = vadd.f32 %v2037_v4, %v5288_v43 }
 0x2c3   : > { %v3075_v62 = vpop.f32.mrf.mxu0  ;;  %3449 = vst [vmem:[#allocation1 + $0x21] ss:$4 sm:$0xff] %v3312_v7  ;;  %v3133_v41 = vadd.f32 %v3073_v28, %v2873_v53 }
 0x2c4   : > { %v3452_v11 = vld.sshfl [vmem:[#allocation1] sm:$0xff pattern:$0x73625140]  ;;  %3450 = vst [vmem:[#allocation1 + $0x22] ss:$4 sm:$0xff] %v3313_v49 }
 0x2c5   : > { %v3572_v44 = vpack.c.bf16 %v3452_v11, %v3452_v11  ;;  %3451 = vst [vmem:[#allocation1 + $0x23] ss:$4 sm:$0xff] %v3314_v19  ;;  %v3173_v31 = vadd.f32 %v5833_v33, %v3133_v41 }
 0x2c6   : > { %v2422_v1 = vpop.f32.mrf.mxu2 }
 0x2c7   : > { %3605 = vst.msk [vmem:[%s5517_s21 + $0x40] sm:$0xf] %vm3588_vm6, %v3572_v44  ;;  %v3209_v12 = vmax.f32 %v3173_v31, 0.0  ;;  %v2481_v34 = vadd.f32 %v2422_v1, %v2096_v23 }
 0x2c8   : > { %v2040_v56 = vpop.f32.mrf.mxu1  ;;  %v2825_v38 = vpop.f32.mrf.mxu3 }
 0x2c9   : > { %v3315_v59 = vrot.slane %v3209_v12, 2  ;;  %v3316_v30 = vrot.slane %v3209_v12, 4  ;;  %v3317_v20 = vrot.slane %v3209_v12, 6  ;;  %v2874_v9 = vadd.f32 %v5811_v46, %v2481_v34 }
 0x2ca   : > { %v2097_v17 = vadd.f32 %v2040_v56, %v5300_v16 }
 0x2cb   : > { %v3078_v0 = vpop.f32.mrf.mxu0  ;;  %3454 = vst [vmem:[#allocation1] ss:$4 sm:$0xff] %v3315_v59  ;;  %v3134_v58 = vadd.f32 %v3075_v62, %v2874_v9 }
 0x2cc   : > { %v3453_v3 = vld.sshfl [vmem:[#allocation1 + $0x20] sm:$0xff pattern:$0x73625140]  ;;  %3455 = vst [vmem:[#allocation1 + $0x1] ss:$4 sm:$0xff] %v3316_v30 }
 0x2cd   : > { %v3573_v60 = vpack.c.bf16 %v3453_v3, %v3453_v3  ;;  %3456 = vst [vmem:[#allocation1 + $0x2] ss:$4 sm:$0xff] %v3317_v20  ;;  %v3174_v43 = vadd.f32 %v5833_v33, %v3134_v58 }
 0x2ce   : > { %v2425_v52 = vpop.f32.mrf.mxu2 }
 0x2cf   : > { %3606 = vst.msk [vmem:[%s5517_s21 + $0x44] sm:$0xf] %vm3588_vm6, %v3573_v60  ;;  %v3210_v48 = vmax.f32 %v3174_v43, 0.0  ;;  %v2482_v32 = vadd.f32 %v2425_v52, %v2097_v17 }
 0x2d0   : > { %v2042_v26 = vpop.f32.mrf.mxu1  ;;  %v2828_v19 = vpop.f32.mrf.mxu3 }
 0x2d1   : > { %v3318_v51 = vrot.slane %v3210_v48, 2  ;;  %v3319_v46 = vrot.slane %v3210_v48, 4  ;;  %v3320_v10 = vrot.slane %v3210_v48, 6  ;;  %3457 = vst [vmem:[#allocation1 + $0x3] ss:$4 sm:$0xff] %v3210_v48  ;;  %v2875_v61 = vadd.f32 %v5822_v25, %v2482_v32 }
 0x2d2   : > { %v2098_v5 = vadd.f32 %v2042_v26, %v5312_v2 }
 0x2d3   : > { %v3080_v13 = vpop.f32.mrf.mxu0  ;;  %3458 = vst [vmem:[#allocation1 + $0x20] ss:$4 sm:$0xff] %v3318_v51  ;;  %v3135_v47 = vadd.f32 %v3078_v0, %v2875_v61 }
 0x2d4   : > { %3459 = vst [vmem:[#allocation1 + $0x21] ss:$4 sm:$0xff] %v3319_v46 }
 0x2d5   : > { %3460 = vst [vmem:[#allocation1 + $0x22] ss:$4 sm:$0xff] %v3320_v10  ;;  %v3175_v16 = vadd.f32 %v5833_v33, %v3135_v47 }
 0x2d6   : > { %v2427_v28 = vpop.f32.mrf.mxu2 }
 0x2d7   : > { %v3211_v42 = vmax.f32 %v3175_v16, 0.0  ;;  %v2483_v27 = vadd.f32 %v2427_v28, %v2098_v5 }
 0x2d8   : > { %v3462_v8 = vld.sshfl [vmem:[#allocation1] sm:$0xff pattern:$0x73625140]  ;;  %v2045_v55 = vpop.f32.mrf.mxu1  ;;  %v2830_v0 = vpop.f32.mrf.mxu3 }
 0x2d9   : > { %v3574_v39 = vpack.c.bf16 %v3462_v8, %v3462_v8  ;;  %v3321_v50 = vrot.slane %v3211_v42, 4  ;;  %v3322_v6 = vrot.slane %v3211_v42, 6  ;;  %3461 = vst [vmem:[#allocation1 + $0x23] ss:$4 sm:$0xff] %v3211_v42  ;;  %v2876_v25 = vadd.f32 %v2820_v45, %v2483_v27 }
 0x2da   : > { %v2099_v2 = vadd.f32 %v2045_v55, %v5324_v22 }
 0x2db   : > { %v3083_v14 = vpop.f32.mrf.mxu0  ;;  %3607 = vst.msk [vmem:[%s5517_s21 + $0x48] sm:$0xf] %vm3588_vm6, %v3574_v39  ;;  %v3136_v4 = vadd.f32 %v3080_v13, %v2876_v25 }
 0x2dc   : > { %3464 = vst [vmem:[#allocation1] ss:$4 sm:$0xff] %v3321_v50 }
 0x2dd   : > { %3465 = vst [vmem:[#allocation1 + $0x1] ss:$4 sm:$0xff] %v3322_v6  ;;  %v3176_v7 = vadd.f32 %v5833_v33, %v3136_v4 }
 0x2de   : > { %v2430_v49 = vpop.f32.mrf.mxu2 }
 0x2df   : > { %v3212_v53 = vmax.f32 %v3176_v7, 0.0  ;;  %v2484_v62 = vadd.f32 %v2430_v49, %v2099_v2 }
 0x2e0   : > { %v3463_v41 = vld.sshfl [vmem:[#allocation1 + $0x20] sm:$0xff pattern:$0x73625140]  ;;  %v2047_v11 = vpop.f32.mrf.mxu1  ;;  %v2833_v16 = vpop.f32.mrf.mxu3 }
 0x2e1   : > { %v3575_v44 = vpack.c.bf16 %v3463_v41, %v3463_v41  ;;  %v3323_v31 = vrot.slane %v3212_v53, 2  ;;  %v3324_v45 = vrot.slane %v3212_v53, 4  ;;  %3466 = vst [vmem:[#allocation1 + $0x2] ss:$4 sm:$0xff] %v3212_v53  ;;  %v3325_v1 = vrot.slane %v3212_v53, 6 }
 0x2e2   : > { %v2877_v12 = vadd.f32 %v2823_v35, %v2484_v62  ;;  %v2100_v22 = vadd.f32 %v2047_v11, %v5336_v36 }
 0x2e3   : > { %v3085_v23 = vpop.f32.mrf.mxu0  ;;  %3608 = vst.msk [vmem:[%s5517_s21 + $0x4c] sm:$0xf] %vm3588_vm6, %v3575_v44 }
 0x2e4   : > { %3467 = vst [vmem:[#allocation1 + $0x3] ss:$4 sm:$0xff] %v3323_v31  ;;  %v3137_v34 = vadd.f32 %v3083_v14, %v2877_v12 }
 0x2e5   : > { %3468 = vst [vmem:[#allocation1 + $0x20] ss:$4 sm:$0xff] %v3324_v45 }
 0x2e6   : > { %3469 = vst [vmem:[#allocation1 + $0x21] ss:$4 sm:$0xff] %v3325_v1  ;;  %v3177_v56 = vadd.f32 %v5833_v33, %v3137_v34  ;;  %v2432_v59 = vpop.f32.mrf.mxu2 }
 0x2e7   : > { %v2485_v30 = vadd.f32 %v2432_v59, %v2100_v22 }
 0x2e8   : > { %v3213_v20 = vmax.f32 %v3177_v56, 0.0  ;;  %v2050_v9 = vpop.f32.mrf.mxu1 }
 0x2e9   : > { %v2878_v58 = vadd.f32 %v2825_v38, %v2485_v30  ;;  %v2101_v48 = vadd.f32 %v2050_v9, %v5348_v21 }
 0x2ea   : > { %v3326_v60 = vrot.slane %v3213_v20, 2  ;;  %v3327_v35 = vrot.slane %v3213_v20, 6  ;;  %3470 = vst [vmem:[#allocation1 + $0x22] ss:$4 sm:$0xff] %v3213_v20 }
 0x2eb   : > { %v3088_v3 = vpop.f32.mrf.mxu0  ;;  %v3472_v43 = vld.sshfl [vmem:[#allocation1] sm:$0xff pattern:$0x73625140]  ;;  %v3138_v17 = vadd.f32 %v3085_v23, %v2878_v58 }
 0x2ec   : > { %v3576_v52 = vpack.c.bf16 %v3472_v43, %v3472_v43  ;;  %3471 = vst [vmem:[#allocation1 + $0x23] ss:$4 sm:$0xff] %v3326_v60 }
 0x2ed   : > { %3474 = vst [vmem:[#allocation1] ss:$4 sm:$0xff] %v3327_v35  ;;  %v3178_v36 = vadd.f32 %v5833_v33, %v3138_v17 }
 0x2ee   : > { %3609 = vst.msk [vmem:[%s5517_s21 + $0x50] sm:$0xf] %vm3588_vm6, %v3576_v52  ;;  %v2435_v32 = vpop.f32.mrf.mxu2 }
 0x2ef   : > { %v3214_v26 = vmax.f32 %v3178_v36, 0.0  ;;  %v2486_v51 = vadd.f32 %v2435_v32, %v2101_v48 }
 0x2f0   : > { %v2052_v46 = vpop.f32.mrf.mxu1 }
 0x2f1   : > { %v3328_v10 = vrot.slane %v3214_v26, 2  ;;  %v3329_v61 = vrot.slane %v3214_v26, 4  ;;  %v3330_v13 = vrot.slane %v3214_v26, 6  ;;  %3475 = vst [vmem:[#allocation1 + $0x1] ss:$4 sm:$0xff] %v3214_v26  ;;  %v2879_v47 = vadd.f32 %v2828_v19, %v2486_v51  ;;  %v2835_v19 = vpop.f32.mrf.mxu3 }
 0x2f2   : > { %v2102_v27 = vadd.f32 %v2052_v46, %v5360_v15 }
 0x2f3   : > { %v3090_v38 = vpop.f32.mrf.mxu0  ;;  %v3473_v5 = vld.sshfl [vmem:[#allocation1 + $0x20] sm:$0xff pattern:$0x73625140]  ;;  %3476 = vst [vmem:[#allocation1 + $0x2] ss:$4 sm:$0xff] %v3328_v10  ;;  %v3139_v28 = vadd.f32 %v3088_v3, %v2879_v47 }
 0x2f4   : > { %v3577_v42 = vpack.c.bf16 %v3473_v5, %v3473_v5  ;;  %3477 = vst [vmem:[#allocation1 + $0x3] ss:$4 sm:$0xff] %v3329_v61 }
 0x2f5   : > { %3478 = vst [vmem:[#allocation1 + $0x20] ss:$4 sm:$0xff] %v3330_v13  ;;  %v3179_v21 = vadd.f32 %v5833_v33, %v3139_v28 }
 0x2f6   : > { %3610 = vst.msk [vmem:[%s5517_s21 + $0x54] sm:$0xf] %vm3588_vm6, %v3577_v42  ;;  %v2437_v8 = vpop.f32.mrf.mxu2 }
 0x2f7   : > { %v3215_v55 = vmax.f32 %v3179_v21, 0.0  ;;  %v2487_v39 = vadd.f32 %v2437_v8, %v2102_v27 }
 0x2f8   : > { %v2055_v50 = vpop.f32.mrf.mxu1 }
 0x2f9   : > { %v3331_v6 = vrot.slane %v3215_v55, 2  ;;  %v3332_v25 = vrot.slane %v3215_v55, 4  ;;  %3479 = vst [vmem:[#allocation1 + $0x21] ss:$4 sm:$0xff] %v3215_v55  ;;  %v2880_v14 = vadd.f32 %v2830_v0, %v2487_v39  ;;  %v2103_v53 = vadd.f32 %v2055_v50, %v5372_v29  ;;  %v2838_v20 = vpop.f32.mrf.mxu3 }
 0x2fb   : > { %v3093_v4 = vpop.f32.mrf.mxu0  ;;  %v3482_v7 = vld.sshfl [vmem:[#allocation1] sm:$0xff pattern:$0x73625140]  ;;  %3480 = vst [vmem:[#allocation1 + $0x22] ss:$4 sm:$0xff] %v3331_v6  ;;  %v3140_v2 = vadd.f32 %v3090_v38, %v2880_v14 }
 0x2fc   : > { %v3578_v49 = vpack.c.bf16 %v3482_v7, %v3482_v7  ;;  %3481 = vst [vmem:[#allocation1 + $0x23] ss:$4 sm:$0xff] %v3332_v25 }
 0x2fd   : > { %v3180_v15 = vadd.f32 %v5833_v33, %v3140_v2 }
 0x2fe   : > { %3611 = vst.msk [vmem:[%s5517_s21 + $0x58] sm:$0xf] %vm3588_vm6, %v3578_v49  ;;  %v2440_v62 = vpop.f32.mrf.mxu2 }
 0x2ff   : > { %v3216_v41 = vmax.f32 %v3180_v15, 0.0  ;;  %v2488_v11 = vadd.f32 %v2440_v62, %v2103_v53 }
 0x300   : > { %v2057_v44 = vpop.f32.mrf.mxu1 }
 0x301   : > { %v3333_v31 = vrot.slane %v3216_v41, 2  ;;  %v3334_v45 = vrot.slane %v3216_v41, 4  ;;  %v3335_v23 = vrot.slane %v3216_v41, 6  ;;  %3484 = vst [vmem:[#allocation1] ss:$4 sm:$0xff] %v3216_v41  ;;  %v2881_v1 = vadd.f32 %v2833_v16, %v2488_v11  ;;  %v2840_v61 = vpop.f32.mrf.mxu3 }
 0x302   : > { %v2104_v59 = vadd.f32 %v2057_v44, %v5384_v37 }
 0x303   : > { %v3095_v12 = vpop.f32.mrf.mxu0  ;;  %v3483_v34 = vld.sshfl [vmem:[#allocation1 + $0x20] sm:$0xff pattern:$0x73625140]  ;;  %3485 = vst [vmem:[#allocation1 + $0x1] ss:$4 sm:$0xff] %v3333_v31  ;;  %v3141_v22 = vadd.f32 %v3093_v4, %v2881_v1 }
 0x304   : > { %v3579_v56 = vpack.c.bf16 %v3483_v34, %v3483_v34  ;;  %3486 = vst [vmem:[#allocation1 + $0x2] ss:$4 sm:$0xff] %v3334_v45 }
 0x305   : > { %3487 = vst [vmem:[#allocation1 + $0x3] ss:$4 sm:$0xff] %v3335_v23  ;;  %v3181_v29 = vadd.f32 %v5833_v33, %v3141_v22 }
 0x306   : > { %3612 = vst.msk [vmem:[%s5517_s21 + $0x5c] sm:$0xf] %vm3588_vm6, %v3579_v56  ;;  %v2442_v30 = vpop.f32.mrf.mxu2 }
 0x307   : > { %v3217_v9 = vmax.f32 %v3181_v29, 0.0  ;;  %v2489_v0 = vadd.f32 %v2442_v30, %v2104_v59 }
 0x308   : > { %v2060_v58 = vpop.f32.mrf.mxu1 }
 0x309   : > { %v3336_v3 = vrot.slane %v3217_v9, 2  ;;  %v3337_v60 = vrot.slane %v3217_v9, 4  ;;  %v3338_v35 = vrot.slane %v3217_v9, 6  ;;  %3488 = vst [vmem:[#allocation1 + $0x20] ss:$4 sm:$0xff] %v3217_v9  ;;  %v2882_v43 = vadd.f32 %v2835_v19, %v2489_v0  ;;  %v2843_v7 = vpop.f32.mrf.mxu3 }
 0x30a   : > { %v2105_v32 = vadd.f32 %v2060_v58, %v5396_v63 }
 0x30b   : > { %v3098_v17 = vpop.f32.mrf.mxu0  ;;  %3489 = vst [vmem:[#allocation1 + $0x21] ss:$4 sm:$0xff] %v3336_v3  ;;  %v3142_v52 = vadd.f32 %v3095_v12, %v2882_v43 }
 0x30c   : > { %v3492_v36 = vld.sshfl [vmem:[#allocation1] sm:$0xff pattern:$0x73625140]  ;;  %3490 = vst [vmem:[#allocation1 + $0x22] ss:$4 sm:$0xff] %v3337_v60 }
 0x30d   : > { %v3580_v48 = vpack.c.bf16 %v3492_v36, %v3492_v36  ;;  %3491 = vst [vmem:[#allocation1 + $0x23] ss:$4 sm:$0xff] %v3338_v35  ;;  %v3182_v37 = vadd.f32 %v5833_v33, %v3142_v52 }
 0x30e   : > { %v2445_v26 = vpop.f32.mrf.mxu2 }
 0x30f   : > { %3613 = vst.msk [vmem:[%s5517_s21 + $0x60] sm:$0xf] %vm3588_vm6, %v3580_v48  ;;  %v3218_v51 = vmax.f32 %v3182_v37, 0.0  ;;  %v2490_v46 = vadd.f32 %v2445_v26, %v2105_v32 }
 0x310   : > { %v2062_v10 = vpop.f32.mrf.mxu1 }
 0x311   : > { %v3339_v13 = vrot.slane %v3218_v51, 2  ;;  %v3340_v47 = vrot.slane %v3218_v51, 4  ;;  %v3341_v38 = vrot.slane %v3218_v51, 6  ;;  %v2883_v16 = vadd.f32 %v2838_v20, %v2490_v46  ;;  %v2845_v12 = vpop.f32.mrf.mxu3 }
 0x312   : > { %v2106_v27 = vadd.f32 %v2062_v10, %v5408_v57 }
 0x313   : > { %v3100_v5 = vpop.f32.mrf.mxu0  ;;  %3494 = vst [vmem:[#allocation1] ss:$4 sm:$0xff] %v3339_v13  ;;  %v3143_v28 = vadd.f32 %v3098_v17, %v2883_v16 }
 0x314   : > { %v3493_v42 = vld.sshfl [vmem:[#allocation1 + $0x20] sm:$0xff pattern:$0x73625140]  ;;  %3495 = vst [vmem:[#allocation1 + $0x1] ss:$4 sm:$0xff] %v3340_v47 }
 0x315   : > { %v3581_v21 = vpack.c.bf16 %v3493_v42, %v3493_v42  ;;  %3496 = vst [vmem:[#allocation1 + $0x2] ss:$4 sm:$0xff] %v3341_v38  ;;  %v3183_v63 = vadd.f32 %v5833_v33, %v3143_v28 }
 0x316   : > { %v2447_v8 = vpop.f32.mrf.mxu2 }
 0x317   : > { %3614 = vst.msk [vmem:[%s5517_s21 + $0x64] sm:$0xf] %vm3588_vm6, %v3581_v21  ;;  %v3219_v55 = vmax.f32 %v3183_v63, 0.0  ;;  %v2491_v39 = vadd.f32 %v2447_v8, %v2106_v27 }
 0x318   : > { %v2065_v50 = vpop.f32.mrf.mxu1 }
 0x319   : > { %v3342_v6 = vrot.slane %v3219_v55, 2  ;;  %v3343_v25 = vrot.slane %v3219_v55, 4  ;;  %v3344_v14 = vrot.slane %v3219_v55, 6  ;;  %3497 = vst [vmem:[#allocation1 + $0x3] ss:$4 sm:$0xff] %v3219_v55  ;;  %v2884_v4 = vadd.f32 %v2840_v61, %v2491_v39  ;;  %v2848_v17 = vpop.f32.mrf.mxu3 }
 0x31a   : > { %v2107_v19 = vadd.f32 %v2065_v50, %v5420_v40 }
 0x31b   : > { %3498 = vst [vmem:[#allocation1 + $0x20] ss:$4 sm:$0xff] %v3342_v6  ;;  %v3144_v2 = vadd.f32 %v3100_v5, %v2884_v4  ;;  %v3103_v49 = vpop.f32.mrf.mxu0 }
 0x31c   : > { %3499 = vst [vmem:[#allocation1 + $0x21] ss:$4 sm:$0xff] %v3343_v25 }
 0x31d   : > { %3500 = vst [vmem:[#allocation1 + $0x22] ss:$4 sm:$0xff] %v3344_v14  ;;  %v3184_v57 = vadd.f32 %v5833_v33, %v3144_v2 }
 0x31e   : > { %v2450_v15 = vpop.f32.mrf.mxu2 }
 0x31f   : > { %v3220_v53 = vmax.f32 %v3184_v57, 0.0  ;;  %v2492_v62 = vadd.f32 %v2450_v15, %v2107_v19 }
 0x320   : > { %v3502_v41 = vld.sshfl [vmem:[#allocation1] sm:$0xff pattern:$0x73625140]  ;;  %v2067_v11 = vpop.f32.mrf.mxu1 }
 0x321   : > { %v3582_v44 = vpack.c.bf16 %v3502_v41, %v3502_v41  ;;  %v3345_v31 = vrot.slane %v3220_v53, 4  ;;  %v3346_v45 = vrot.slane %v3220_v53, 6  ;;  %3501 = vst [vmem:[#allocation1 + $0x23] ss:$4 sm:$0xff] %v3220_v53  ;;  %v2885_v23 = vadd.f32 %v2843_v7, %v2492_v62  ;;  %v2850_v28 = vpop.f32.mrf.mxu3 }
 0x322   : > { %v2108_v40 = vadd.f32 %v2067_v11, %v5432_v18 }
 0x323   : > { %3615 = vst.msk [vmem:[%s5517_s21 + $0x68] sm:$0xf] %vm3588_vm6, %v3582_v44  ;;  %v3145_v1 = vadd.f32 %v3103_v49, %v2885_v23  ;;  %v3105_v22 = vpop.f32.mrf.mxu0 }
 0x324   : > { %3504 = vst [vmem:[#allocation1] ss:$4 sm:$0xff] %v3345_v31 }
 0x325   : > { %3505 = vst [vmem:[#allocation1 + $0x1] ss:$4 sm:$0xff] %v3346_v45  ;;  %v3185_v34 = vadd.f32 %v5833_v33, %v3145_v1 }
 0x326   : > { %v2452_v56 = vpop.f32.mrf.mxu2 }
 0x327   : > { %v3221_v29 = vmax.f32 %v3185_v34, 0.0  ;;  %v2493_v59 = vadd.f32 %v2452_v56, %v2108_v40 }
 0x328   : > { %v3503_v30 = vld.sshfl [vmem:[#allocation1 + $0x20] sm:$0xff pattern:$0x73625140]  ;;  %v2070_v20 = vpop.f32.mrf.mxu1 }
 0x329   : > { %v3583_v9 = vpack.c.bf16 %v3503_v30, %v3503_v30  ;;  %v3347_v0 = vrot.slane %v3221_v29, 2  ;;  %v3348_v58 = vrot.slane %v3221_v29, 4  ;;  %3506 = vst [vmem:[#allocation1 + $0x2] ss:$4 sm:$0xff] %v3221_v29  ;;  %v3349_v3 = vrot.slane %v3221_v29, 6 }
 0x32a   : > { %v2886_v60 = vadd.f32 %v2845_v12, %v2493_v59  ;;  %v2109_v43 = vadd.f32 %v2070_v20, %v5444_v54 }
 0x32b   : > { %3616 = vst.msk [vmem:[%s5517_s21 + $0x6c] sm:$0xf] %vm3588_vm6, %v3583_v9  ;;  %v3108_v37 = vpop.f32.mrf.mxu0 }
 0x32c   : > { %3507 = vst [vmem:[#allocation1 + $0x3] ss:$4 sm:$0xff] %v3347_v0  ;;  %v3146_v35 = vadd.f32 %v3105_v22, %v2886_v60 }
 0x32d   : > { %3508 = vst [vmem:[#allocation1 + $0x20] ss:$4 sm:$0xff] %v3348_v58 }
 0x32e   : > { %3509 = vst [vmem:[#allocation1 + $0x21] ss:$4 sm:$0xff] %v3349_v3  ;;  %v3186_v18 = vadd.f32 %v5833_v33, %v3146_v35  ;;  %v2455_v52 = vpop.f32.mrf.mxu2 }
 0x32f   : > { %v2494_v36 = vadd.f32 %v2455_v52, %v2109_v43 }
 0x330   : > { %v3222_v48 = vmax.f32 %v3186_v18, 0.0  ;;  %v2072_v46 = vpop.f32.mrf.mxu1 }
 0x331   : > { %v2887_v32 = vadd.f32 %v2848_v17, %v2494_v36  ;;  %v2110_v47 = vadd.f32 %v2072_v46, %v5456_v24 }
 0x332   : > { %v3350_v26 = vrot.slane %v3222_v48, 2  ;;  %v3351_v51 = vrot.slane %v3222_v48, 6  ;;  %3510 = vst [vmem:[#allocation1 + $0x22] ss:$4 sm:$0xff] %v3222_v48 }
 0x333   : > { %v3512_v10 = vld.sshfl [vmem:[#allocation1] sm:$0xff pattern:$0x73625140]  ;;  %v3147_v61 = vadd.f32 %v3108_v37, %v2887_v32  ;;  %v3110_v8 = vpop.f32.mrf.mxu0 }
 0x334   : > { %v3584_v13 = vpack.c.bf16 %v3512_v10, %v3512_v10  ;;  %3511 = vst [vmem:[#allocation1 + $0x23] ss:$4 sm:$0xff] %v3350_v26 }
 0x335   : > { %3514 = vst [vmem:[#allocation1] ss:$4 sm:$0xff] %v3351_v51  ;;  %v3187_v54 = vadd.f32 %v5833_v33, %v3147_v61 }
 0x336   : > { %3617 = vst.msk [vmem:[%s5517_s21 + $0x70] sm:$0xf] %vm3588_vm6, %v3584_v13  ;;  %v2457_v38 = vpop.f32.mrf.mxu2 }
 0x337   : > { %v3223_v16 = vmax.f32 %v3187_v54, 0.0  ;;  %v2495_v5 = vadd.f32 %v2457_v38, %v2110_v47 }
 0x339   : > { %v3352_v42 = vrot.slane %v3223_v16, 2  ;;  %v3353_v21 = vrot.slane %v3223_v16, 4  ;;  %v3354_v63 = vrot.slane %v3223_v16, 6  ;;  %3515 = vst [vmem:[#allocation1 + $0x1] ss:$4 sm:$0xff] %v3223_v16  ;;  %v2888_v27 = vadd.f32 %v2850_v28, %v2495_v5 }
 0x33b   : > { %v3513_v55 = vld.sshfl [vmem:[#allocation1 + $0x20] sm:$0xff pattern:$0x73625140]  ;;  %3516 = vst [vmem:[#allocation1 + $0x2] ss:$4 sm:$0xff] %v3352_v42  ;;  %v3148_v39 = vadd.f32 %v3110_v8, %v2888_v27 }
 0x33c   : > { %v3585_v50 = vpack.c.bf16 %v3513_v55, %v3513_v55  ;;  %3517 = vst [vmem:[#allocation1 + $0x3] ss:$4 sm:$0xff] %v3353_v21 }
 0x33d   : > { %3518 = vst [vmem:[#allocation1 + $0x20] ss:$4 sm:$0xff] %v3354_v63  ;;  %v3188_v24 = vadd.f32 %v5833_v33, %v3148_v39 }
 0x33e   : > { %3618 = vst.msk [vmem:[%s5517_s21 + $0x74] sm:$0xf] %vm3588_vm6, %v3585_v50 }
 0x33f   : > { %v3224_v6 = vmax.f32 %v3188_v24, 0.0 }
 0x341   : > { %v3355_v25 = vrot.slane %v3224_v6, 2  ;;  %v3356_v14 = vrot.slane %v3224_v6, 4  ;;  %3519 = vst [vmem:[#allocation1 + $0x21] ss:$4 sm:$0xff] %v3224_v6 }
 0x343   : > { %v3522_v4 = vld.sshfl [vmem:[#allocation1] sm:$0xff pattern:$0x73625140]  ;;  %3520 = vst [vmem:[#allocation1 + $0x22] ss:$4 sm:$0xff] %v3355_v25 }
 0x344   : > { %v3586_v7 = vpack.c.bf16 %v3522_v4, %v3522_v4  ;;  %3521 = vst [vmem:[#allocation1 + $0x23] ss:$4 sm:$0xff] %v3356_v14 }
 0x346   : > { %3619 = vst.msk [vmem:[%s5517_s21 + $0x78] sm:$0xf] %vm3588_vm6, %v3586_v7 }
 0x34b   : > { %v3523_v2 = vld.sshfl [vmem:[#allocation1 + $0x20] sm:$0xff pattern:$0x73625140] }
 0x34c   : > { %v3587_v49 = vpack.c.bf16 %v3523_v2, %v3523_v2 }
 0x34e   : > { %3620 = vst.msk [vmem:[%s5517_s21 + $0x7c] sm:$0xf] %vm3588_vm6, %v3587_v49 }
 0x34f PF: > { %s13_s12 = sadd.s32 1, %s4501_s12  }
 0x350   : > { %p10_p4 = scmp.ge.s32.totalorder %s13_s12, 4  }
 0x352   :  { %12 = sbr.rel (!%p10_p4) target bundleno = 1 (0x1), region = 77 }

// kernel: da_head_forward.5
= control target key start
LH: loop header
LB: loop body
LE: loop exit
PB: predicated region body
PF: predicated region fallthrough
CT: control target
= control target key end

     0   :  { %s4706_s18 = smov 0   ;;  %s5860_s0 = inlined_call_operand.vmem [shape: bf16[2,342,64], index: 0, kind: input, shape index: {}]   ;;  %s5861_s1 = inlined_call_operand.vmem [shape: bf16[9,64,64], index: 1, kind: input, shape index: {}]   ;;  %s5862_s2 = inlined_call_operand.vmem [shape: f32[1,64], index: 2, kind: input, shape index: {}]   ;;  %s5863_s3 = inlined_call_operand.vmem [shape: bf16[64,128], index: 3, kind: input, shape index: {}]   ;;  %s5864_s4 = inlined_call_operand.vmem [shape: f32[1,128], index: 4, kind: input, shape index: {}]   ;;  %s5865_s5 = inlined_call_operand.vmem [shape: f32[2,256,128], index: 5, kind: output, shape index: {}]  }
   0x1 LB: > { %s3924_s19 = sadd.s32 4294967295, %s4674_s18   ;;  %p3928_p0 = scmp.ge.s32.totalorder %s4674_s18, 1  ;;  %s4674_s18 = sphi %s4706_s18, %s15_s18  }
   0x2   : > { %p187_p1 = scmp.lt.s32.totalorder %s4674_s18, 3 }
   0x4   : > { %p188_p2 = pnand %p3928_p0, %p187_p1 }
   0x6   : > { %191 = sbr.rel (%p188_p2) target bundleno = 1031 (0x407), region = 40 }
   0xb   : > { %v4567_v0 = vld [vmem:[%s5861_s1 + $0x38] sm:$0xff]  ;;  %p215_p3 = scmp.lt.s32.totalorder %s3924_s19, 1  ;;  %v4566_v2 = vld [vmem:[%s5861_s1 + $0x30] sm:$0xff]  ;;  %v4565_v4 = vld [vmem:[%s5861_s1 + $0x28] sm:$0xff]  ;;  %vm373_vm0 = vsmask.f32 7424 }
   0xc   : > { %v4563_v1 = vld [vmem:[%s5861_s1 + $0x18] sm:$0xff]  ;;  %4641 = vmatpush.bf16.msra.mxu2 %v4567_v0  ;;  %v4562_v3 = vld [vmem:[%s5861_s1 + $0x10] sm:$0xff]  ;;  %605 = vmatpush.bf16.msra.mxu0 %v4567_v0  ;;  %v4561_v5 = vld [vmem:[%s5861_s1 + $0x8] sm:$0xff]  ;;  %vm546_vm1 = vcmask 523264   ;;  %vm872_vm2 = vcmask 1046528   ;;  %vm1922_vm4 = vcmask 1045504  }
   0xd   : > { %4645 = vmatpush.bf16.msra.mxu3 %v4563_v1  ;;  %s5881_s19 = smov (!%p215_p3, %s3924_s19), 1  ;;  %764 = vmatpush.bf16.msra.mxu1 %v4563_v1  ;;  %v4564_v15 = vld [vmem:[%s5861_s1 + $0x20] sm:$0xff]  ;;  %v4571_v21 = vld [vmem:[%s5861_s1 + $0x58] sm:$0xff]  ;;  %v4570_v30 = vld [vmem:[%s5861_s1 + $0x50] sm:$0xff]  ;;  %vm1525_vm3 = vsmask.f32 6400 }
   0xe   : > { %s4649_s28 = smul.u32 172, %s5881_s19  ;;  %v4560_v16 = vld [vmem:[%s5861_s1] sm:$0xff]  ;;  %v4592_v24 = vld [vmem:[%s5861_s1 + $0x78] sm:$0xff]  ;;  %v4591_v31 = vld [vmem:[%s5861_s1 + $0x70] sm:$0xff]  ;;  %vm2575_vm5 = vsmask.f32 5376 }
   0xf   : > { %v4596_v28 = vld [vmem:[%s5861_s1 + $0x98] sm:$0xff]  ;;  %v4595_v33 = vld [vmem:[%s5861_s1 + $0x90] sm:$0xff]  ;;  %v4569_v57 = vld [vmem:[%s5861_s1 + $0x48] sm:$0xff]  ;;  %vm2972_vm6 = vcmask 1044480   ;;  %s4542_s16 = sshll.u32 %s5881_s19, 8 }
  0x10   : > { %4642 = vmatpush.bf16.msra.mxu2 %v4566_v2  ;;  %s4738_s10 = scalar_lea.vmem %s5860_s0, %s4649_s28  ;;  %606 = vmatpush.bf16.msra.mxu0 %v4566_v2  ;;  %v4590_v58 = vld [vmem:[%s5861_s1 + $0x68] sm:$0xff]  ;;  %s5734_s21 = scalar_lea.vmem %s5865_s5, %s4542_s16 }
  0x11   : > { %4646 = vmatpush.bf16.msra.mxu3 %v4562_v3  ;;  %765 = vmatpush.bf16.msra.mxu1 %v4562_v3  ;;  %v4741_v6 = vld [vmem:[%s4738_s10 + $0x48] sm:$0xff]  ;;  %v4744_v7 = vld [vmem:[%s4738_s10 + $0x50] sm:$0xff]  ;;  %v4635_v8 = vld [vmem:[%s4738_s10] sm:$0xff]  }
  0x12   : > { %v4748_v9 = vld [vmem:[%s4738_s10 + $0x8] sm:$0xff]  ;;  %v375_v10 = vshrl.u32 %v4635_v8, 16  ;;  %v377_v11 = vshll.u32 %v4635_v8, 16  ;;  %v446_v12 = vshll.u32 %v4741_v6, 16  ;;  %v450_v13 = vshrl.u32 %v4741_v6, 16  ;;  %v4780_v29 = vld [vmem:[%s4738_s10 + $0x58] sm:$0xff] }
  0x13   : > { %v454_v14 = vshll.u32 %v4744_v7, 16  ;;  %v382_v18 = vshll.u32 %v4748_v9, 16  ;;  %v4789_v32 = vld [vmem:[%s4738_s10 + $0x10] sm:$0xff]  ;;  %v458_v34 = vshrl.u32 %v4744_v7, 16  ;;  %v462_v35 = vshll.u32 %v4780_v29, 16  ;;  %v4554_v44 = vld [vmem:[%s4738_s10 + $0x60] sm:$0xff] }
  0x14   : > { %4643 = vmatpush.bf16.msra.mxu2 %v4565_v4  ;;  %v379_v17 = vrot.slane %v377_v11, 1  ;;  %607 = vmatpush.bf16.msra.mxu0 %v4565_v4  ;;  %v4760_v19 = vrot.slane %v446_v12, 1  ;;  %v386_v36 = vshrl.u32 %v4748_v9, 16  ;;  %v390_v37 = vshll.u32 %v4789_v32, 16  ;;  %v4808_v45 = vld [vmem:[%s4738_s10 + $0x18] sm:$0xff]  ;;  %v4555_v56 = vld [vmem:[%s4738_s10 + $0x68] sm:$0xff] }
  0x15   : > { %4647 = vmatpush.bf16.msra.mxu3 %v4561_v5  ;;  %766 = vmatpush.bf16.msra.mxu1 %v4561_v5  ;;  %v456_v20 = vrot.slane %v454_v14, 1  ;;  %v384_v23 = vrot.slane %v382_v18, 1  ;;  %v464_v39 = vrot.slane %v462_v35, 1  ;;  %v466_v46 = vshrl.u32 %v4780_v29, 16  ;;  %v4829_v59 = vld [vmem:[%s4738_s10 + $0x20] sm:$0xff]  ;;  %v4845_v11 = vld [vmem:[%s4738_s10 + $0x28] sm:$0xff] }
  0x16   : > { %v380_v22 = vor.u32 %v379_v17, %v375_v10  ;;  %v452_v25 = vor.u32 %v450_v13, %v4760_v19  ;;  %v392_v41 = vrot.slane %v390_v37, 1  ;;  %v470_v47 = vshll.u32 %v4554_v44, 16  ;;  %v4594_v10 = vld [vmem:[%s5861_s1 + $0x88] sm:$0xff] }
  0x17   : > { %v460_v38 = vor.u32 %v458_v34, %v456_v20  ;;  %v388_v40 = vor.u32 %v386_v36, %v384_v23  ;;  %v394_v48 = vshrl.u32 %v4789_v32, 16  ;;  %v398_v49 = vshll.u32 %v4808_v45, 16 }
  0x18   : > { %4644 = vmatpush.bf16.msra.mxu2 %v4564_v15  ;;  %608 = vmatpush.bf16.msra.mxu0 %v4564_v15  ;;  %v457_v26 = vsel %vm373_vm0, %v452_v25, %v456_v20  ;;  %v385_v27 = vsel %vm373_vm0, %v380_v22, %v384_v23  ;;  %v468_v50 = vor.u32 %v466_v46, %v464_v39  ;;  %v472_v51 = vrot.slane %v470_v47, 1  ;;  %v4557_v23 = vld [vmem:[%s4738_s10 + $0x78] sm:$0xff]  ;;  %v4589_v25 = vld [vmem:[%s5861_s1 + $0x60] sm:$0xff] }
  0x19   : > { %4648 = vmatpush.bf16.msra.mxu3 %v4560_v16  ;;  %767 = vmatpush.bf16.msra.mxu1 %v4560_v16  ;;  %v465_v42 = vsel %vm373_vm0, %v460_v38, %v464_v39  ;;  %v393_v43 = vsel %vm373_vm0, %v388_v40, %v392_v41  ;;  %v396_v52 = vor.u32 %v394_v48, %v392_v41  ;;  %v400_v53 = vrot.slane %v398_v49, 1  ;;  %v4558_v39 = vld [vmem:[%s4738_s10 + $0x80] sm:$0xff]  ;;  %v4880_v41 = vld [vmem:[%s4738_s10 + $0x38] sm:$0xff] }
  0x1a   : > { %v473_v54 = vsel %vm373_vm0, %v468_v50, %v472_v51  ;;  %v474_v60 = vshrl.u32 %v4554_v44, 16  ;;  %v478_v61 = vshll.u32 %v4555_v56, 16  ;;  %v402_v62 = vshrl.u32 %v4808_v45, 16  ;;  %v4593_v40 = vld [vmem:[%s5861_s1 + $0x80] sm:$0xff] }
  0x1b   : > { %4033 = vmatmul.msk.bf16.vlgmr.msra.gmra.mxu2 %vm546_vm1, %v457_v26  ;;  %4024 = vmatmul.msk.bf16.vlgmr.msra.gmra.mxu0 %vm546_vm1, %v385_v27  ;;  %v401_v55 = vsel %vm373_vm0, %v396_v52, %v400_v53  ;;  %v406_v63 = vshll.u32 %v4829_v59, 16  ;;  %v482_v12 = vshrl.u32 %v4555_v56, 16  ;;  %v410_v14 = vshrl.u32 %v4829_v59, 16  ;;  %v4864_v26 = vld [vmem:[%s4738_s10 + $0x30] sm:$0xff] }
  0x1c   : > { %992 = vmatpush.bf16.msrb.mxu2 %v4571_v21  ;;  %4067 = vmatmul.msk.bf16.vlgmr.msra.gmra.mxu3 %vm546_vm1, %v4741_v6  ;;  %v476_v0 = vor.u32 %v474_v60, %v472_v51  ;;  %v480_v1 = vrot.slane %v478_v61, 1  ;;  %v404_v2 = vor.u32 %v402_v62, %v400_v53  ;;  %v414_v15 = vshll.u32 %v4845_v11, 16  ;;  %v4559_v53 = vld [vmem:[%s4738_s10 + $0x88] sm:$0xff] }
  0x1d   : > { %1381 = vmatpush.bf16.msrb.mxu3 %v4592_v24  ;;  %4058 = vmatmul.msk.bf16.vlgmr.msra.gmra.mxu1 %vm546_vm1, %v4635_v8  ;;  %v408_v3 = vrot.slane %v406_v63, 1  ;;  %v4556_v8 = vld [vmem:[%s4738_s10 + $0x70] sm:$0xff]  ;;  %v4568_v24 = vld [vmem:[%s5861_s1 + $0x40] sm:$0xff]  ;;  %v430_v46 = vshll.u32 %v4880_v41, 16 }
  0x1e   : > { %1778 = vmatpush.bf16.msrb.mxu0 %v4596_v28  ;;  %v481_v4 = vsel %vm373_vm0, %v476_v0, %v480_v1  ;;  %v486_v13 = vshll.u32 %v4556_v8, 16  ;;  %v484_v16 = vor.u32 %v482_v12, %v480_v1  ;;  %v416_v20 = vrot.slane %v414_v15, 1  ;;  %v270_v0 = vld [vmem:[%s4738_s10 + $0x90] sm:$0x1]  ;;  %v4600_v1 = vld [vmem:[%s5861_s1 + $0xb8] sm:$0xff] }
  0x1f   : > { %v409_v5 = vsel %vm373_vm0, %v404_v2, %v408_v3  ;;  %v412_v18 = vor.u32 %v410_v14, %v408_v3  ;;  %v490_v27 = vshrl.u32 %v4556_v8, 16  ;;  %v494_v28 = vshll.u32 %v4557_v23, 16  ;;  %2042 = vmatpush.bf16.msrb.mxu1 %v4600_v1  ;;  %v4625_v12 = vld [vmem:[%s5861_s1 + $0xf8] sm:$0xff] }
  0x20   : > { %993 = vmatpush.bf16.msrb.mxu2 %v4570_v30  ;;  %v488_v17 = vrot.slane %v486_v13, 1  ;;  %v418_v30 = vshrl.u32 %v4845_v11, 16  ;;  %v432_v50 = vrot.slane %v430_v46, 1  ;;  %v353_v3 = vunpack.c.l.b16 %v270_v0  ;;  %v4598_v13 = vld [vmem:[%s5861_s1 + $0xa8] sm:$0xff] }
  0x21   : > { %1382 = vmatpush.bf16.msrb.mxu3 %v4591_v31  ;;  %v417_v22 = vsel %vm373_vm0, %v412_v18, %v416_v20  ;;  %v422_v31 = vshll.u32 %v4864_v26, 16  ;;  %v496_v34 = vrot.slane %v494_v28, 1  ;;  %v514_v14 = vshrl.u32 %v4559_v53, 16  ;;  %v1124_v18 = vld [vmem:[%s4738_s10 + $0xc] sm:$0xf] }
  0x22   : > { %1779 = vmatpush.bf16.msrb.mxu0 %v4595_v33  ;;  %v489_v21 = vsel %vm373_vm0, %v484_v16, %v488_v17  ;;  %v492_v33 = vor.u32 %v490_v27, %v488_v17  ;;  %v420_v35 = vor.u32 %v418_v30, %v416_v20  ;;  %v1123_v17 = vld [vmem:[%s4738_s10 + $0x8] sm:$0xe]  ;;  %v4597_v20 = vld [vmem:[%s5861_s1 + $0xa0] sm:$0xff] }
  0x23   : > { %v424_v36 = vrot.slane %v422_v31, 1 }
  0x24   : > { %994 = vmatpush.bf16.msrb.mxu2 %v4569_v57  ;;  %v497_v37 = vsel %vm373_vm0, %v492_v33, %v496_v34  ;;  %v434_v57 = vshrl.u32 %v4880_v41, 16 }
  0x25   : > { %1383 = vmatpush.bf16.msrb.mxu3 %v4590_v58  ;;  %v425_v38 = vsel %vm373_vm0, %v420_v35, %v424_v36  ;;  %v4936_v35 = vld [vmem:[%s4738_s10 + $0x10] sm:$0xff] }
  0x26   : > { %1780 = vmatpush.bf16.msrb.mxu0 %v4594_v10  ;;  %v436_v62 = vor.u32 %v434_v57, %v432_v50  ;;  %v4914_v10 = vpack.c.b16 %v353_v3, %v353_v3  ;;  %v1924_v3 = vrot.slane %v4936_v35, 2 }
  0x28   : > { %995 = vmatpush.bf16.msrb.mxu2 %v4568_v24  ;;  %v518_v15 = vshll.u32 %v4914_v10, 16  ;;  %v1206_v24 = vunpack.c.l.b16 %v1123_v17  ;;  %v4573_v17 = vld [vmem:[%s4738_s10 + $0x18] sm:$0xff] }
  0x29   : > { %1384 = vmatpush.bf16.msrb.mxu3 %v4589_v25  ;;  %v1207_v25 = vunpack.c.l.b16 %v1124_v18 }
  0x2a   : > { %1781 = vmatpush.bf16.msrb.mxu0 %v4593_v40 }
  0x2b   : > { %4034 = vmatmul.msk.bf16.gmra.mxu2 %vm546_vm1, %v465_v42  ;;  %4025 = vmatmul.msk.bf16.gmra.mxu0 %vm546_vm1, %v393_v43  ;;  %v498_v42 = vshrl.u32 %v4557_v23, 16  ;;  %v502_v43 = vshll.u32 %v4558_v39, 16  ;;  %v1243_v30 = vpack.c.b16 %v1207_v25, %v1206_v24 }
  0x2c   : > { %4068 = vmatmul.msk.bf16.gmra.mxu3 %vm546_vm1, %v4744_v7 }
  0x2d   : > { %4059 = vmatmul.msk.bf16.gmra.mxu1 %vm546_vm1, %v4748_v9  ;;  %v500_v47 = vor.u32 %v498_v42, %v496_v34  ;;  %v504_v48 = vrot.slane %v502_v43, 1  ;;  %2828 = vmatpush.bf16.msra.mxu3 %v4625_v12  ;;  %v1527_v40 = vshrl.u32 %v1243_v30, 16  ;;  %v1530_v42 = vshll.u32 %v1243_v30, 16 }
  0x2e   : > { %v1538_v43 = vshll.u32 %v4936_v35, 16 }
  0x2f   : > { %v505_v51 = vsel %vm373_vm0, %v500_v47, %v504_v48 }
  0x3b   : > { %4035 = vmatmul.msk.bf16.gmra.mxu2 %vm546_vm1, %v473_v54  ;;  %4026 = vmatmul.msk.bf16.gmra.mxu0 %vm546_vm1, %v401_v55  ;;  %v4893_v54 = vld [vmem:[%s4738_s10 + $0x40] sm:$0xff]  ;;  %v506_v55 = vshrl.u32 %v4558_v39, 16 }
  0x3c   : > { %4069 = vmatmul.msk.bf16.gmra.mxu3 %vm546_vm1, %v4780_v29  ;;  %v438_v58 = vshll.u32 %v4893_v54, 16  ;;  %v442_v16 = vshrl.u32 %v4893_v54, 16 }
  0x3d   : > { %4060 = vmatmul.msk.bf16.gmra.mxu1 %vm546_vm1, %v4789_v32  ;;  %v508_v60 = vor.u32 %v506_v55, %v504_v48 }
  0x3e   : > { %v440_v63 = vrot.slane %v438_v58, 1 }
  0x40   : > { %v444_v27 = vor.u32 %v442_v16, %v440_v63 }
  0x42   : > { %v449_v34 = vsel %vm373_vm0, %v444_v27, %v4760_v19  ;;  %v1535_v19 = vshrl.u32 %v4936_v35, 16 }
  0x44   : > { %v1537_v55 = vrot.slane %v1535_v19, 1 }
  0x4b   : > { %4036 = vmatmul.msk.bf16.gmra.mxu2 %vm546_vm1, %v481_v4  ;;  %4027 = vmatmul.msk.bf16.gmra.mxu0 %vm546_vm1, %v409_v5  ;;  %v441_v4 = vsel %vm373_vm0, %v436_v62, %v440_v63  ;;  %v4599_v5 = vld [vmem:[%s5861_s1 + $0xb0] sm:$0xff]  ;;  %v1262_v62 = vrot.slane %v1243_v30, 1  ;;  %v1263_v63 = vrot.slane %v4936_v35, 1 }
  0x4c   : > { %4070 = vmatmul.msk.bf16.gmra.mxu3 %vm546_vm1, %v4554_v44  ;;  %v426_v44 = vshrl.u32 %v4864_v26, 16  ;;  %2043 = vmatpush.bf16.msrb.mxu1 %v4599_v5 }
  0x4d   : > { %4061 = vmatmul.msk.bf16.gmra.mxu1 %vm546_vm1, %v4808_v45 }
  0x4e   : > { %v428_v49 = vor.u32 %v426_v44, %v424_v36 }
  0x50   : > { %v433_v52 = vsel %vm373_vm0, %v428_v49, %v432_v50  ;;  %2044 = vmatpush.bf16.msrb.mxu1 %v4598_v13  ;;  %v1529_v50 = vrot.slane %v1527_v40, 1  ;;  %v1264_v13 = vsel %vm872_vm2, %v1262_v62, %v1263_v63 }
  0x54   : > { %2045 = vmatpush.bf16.msrb.mxu1 %v4597_v20  ;;  %v1544_v20 = vshrl.u32 %v4573_v17, 16 }
  0x5b   : > { %4037 = vmatmul.msk.bf16.gmra.mxu2 %vm546_vm1, %v489_v21  ;;  %4028 = vmatmul.msk.bf16.gmra.mxu0 %vm546_vm1, %v417_v22  ;;  %v4629_v21 = vld [vmem:[%s5861_s1 + $0x118] sm:$0xff] }
  0x5c   : > { %4071 = vmatmul.msk.bf16.gmra.mxu3 %vm546_vm1, %v4555_v56  ;;  %v510_v56 = vshll.u32 %v4559_v53, 16  ;;  %3092 = vmatpush.bf16.msra.mxu0 %v4629_v21  ;;  %v1547_v21 = vshll.u32 %v4573_v17, 16 }
  0x5d   : > { %4062 = vmatmul.msk.bf16.gmra.mxu1 %vm546_vm1, %v4829_v59 }
  0x5e   : > { %v512_v61 = vrot.slane %v510_v56, 1  ;;  %v1540_v56 = vrot.slane %v1538_v43, 2  ;;  %v1549_v30 = vrot.slane %v1547_v21, 2 }
  0x60   : > { %v513_v2 = vsel %vm373_vm0, %v508_v60, %v512_v61  ;;  %v516_v22 = vor.u32 %v514_v14, %v512_v61  ;;  %v874_v61 = vrot.slane %v4748_v9, 1  ;;  %v1541_v1 = vor.u32 %v1540_v56, %v1537_v55 }
  0x6b   : > { %4038 = vmatmul.msk.bf16.gmra.mxu2 %vm546_vm1, %v497_v37  ;;  %4029 = vmatmul.msk.bf16.gmra.mxu0 %vm546_vm1, %v425_v38  ;;  %v1909_v37 = vld [vmem:[%s4738_s10 + $0x8] sm:$0xc]  ;;  %v4638_v38 = vld [vmem:[%s4738_s10] sm:$0xf0] }
  0x6c   : > { %4072 = vmatmul.msk.bf16.gmra.mxu3 %vm546_vm1, %v4556_v8  ;;  %v4621_v8 = vld [vmem:[%s5861_s1 + $0xd8] sm:$0xff]  ;;  %v1920_v44 = vunpack.c.l.b16 %v1909_v37  ;;  %v1926_v37 = vrot.slane %v4573_v17, 2 }
  0x6d   : > { %4063 = vmatmul.msk.bf16.gmra.mxu1 %vm546_vm1, %v4845_v11  ;;  %2431 = vmatpush.bf16.msra.mxu2 %v4621_v8 }
  0x6e   : > { %v1921_v57 = vpack.c.b16 %v1207_v25, %v1920_v44 }
  0x7b   : > { %4039 = vmatmul.msk.bf16.gmra.mxu2 %vm546_vm1, %v505_v51  ;;  %4030 = vmatmul.msk.bf16.gmra.mxu0 %vm546_vm1, %v433_v52 }
  0x7c   : > { %4073 = vmatmul.msk.bf16.gmra.mxu3 %vm546_vm1, %v4557_v23  ;;  %v520_v23 = vrot.slane %v518_v15, 1 }
  0x7d   : > { %4064 = vmatmul.msk.bf16.gmra.mxu1 %vm546_vm1, %v4864_v26 }
  0x7e   : > { %v521_v28 = vsel %vm373_vm0, %v516_v22, %v520_v23 }
  0x8b   : > { %4040 = vmatmul.msk.bf16.gmra.mxu2 %vm546_vm1, %v513_v2  ;;  %4031 = vmatmul.msk.bf16.gmra.mxu0 %vm546_vm1, %v441_v4  ;;  %v1923_v2 = vrot.slane %v1921_v57, 2 }
  0x8c   : > { %4074 = vmatmul.msk.bf16.gmra.mxu3 %vm546_vm1, %v4558_v39  ;;  %v4639_v39 = vld [vmem:[%s4738_s10] sm:$0xe] }
  0x8d   : > { %4065 = vmatmul.msk.bf16.gmra.mxu1 %vm546_vm1, %v4880_v41  ;;  %v4640_v49 = vor.u32 %v4639_v39, %v4638_v38  ;;  %v1925_v16 = vsel %vm1922_vm4, %v1923_v2, %v1924_v3 }
  0x8f   : > { %v873_v60 = vrot.slane %v4640_v49, 1  ;;  %v4982_v49 = vld [vmem:[%s4738_s10 + $0x20] sm:$0xff] }
  0x90   : > { %v1928_v2 = vrot.slane %v4982_v49, 2 }
  0x91   : > { %v875_v12 = vsel %vm872_vm2, %v873_v60, %v874_v61 }
  0x98   : > { %v610_v31 = vpop.f32.mrf.mxu0 }
  0x9a   : > { %v769_v33 = vpop.f32.mrf.mxu1 }
  0x9b   : > { %v4938_v36 = vadd.f32 %v769_v33, %v610_v31  ;;  %4041 = vmatmul.msk.bf16.gmra.mxu2 %vm546_vm1, %v521_v28  ;;  %4032 = vmatmul.msk.bf16.gmra.mxu0 %vm546_vm1, %v449_v34  ;;  %v1546_v28 = vrot.slane %v1544_v20, 1  ;;  %v876_v33 = vrot.slane %v4789_v32, 1  ;;  %v1265_v34 = vrot.slane %v4573_v17, 1 }
  0x9c   : > { %4075 = vmatmul.msk.bf16.gmra.mxu3 %vm546_vm1, %v4559_v53  ;;  %v1532_v53 = vrot.slane %v1530_v42, 2 }
  0x9d   : > { %4066 = vmatmul.msk.bf16.gmra.mxu1 %vm546_vm1, %v4893_v54  ;;  %v1550_v35 = vor.u32 %v1549_v30, %v1546_v28  ;;  %v877_v42 = vsel %vm872_vm2, %v874_v61, %v876_v33  ;;  %v1266_v19 = vsel %vm872_vm2, %v1263_v63, %v1265_v34  ;;  %v878_v63 = vrot.slane %v4808_v45, 1  ;;  %v5006_v45 = vld [vmem:[%s4738_s10 + $0x28] sm:$0xff] }
  0x9e   : > { %v655_v46 = vpop.f32.mrf.mxu2  ;;  %v1533_v0 = vor.u32 %v1532_v53, %v1529_v50  ;;  %v1553_v50 = vshrl.u32 %v4982_v49, 16  ;;  %v1562_v20 = vshrl.u32 %v5006_v45, 16  ;;  %v1565_v21 = vshll.u32 %v5006_v45, 16 }
  0x9f   : > { %v814_v47 = vpop.f32.mrf.mxu3 }
  0xa0   : > { %v4950_v48 = vadd.f32 %v814_v47, %v655_v46  ;;  %v612_v51 = vpop.f32.mrf.mxu0  ;;  %v1542_v15 = vsel %vm1525_vm3, %v1533_v0, %v1541_v1  ;;  %v1551_v46 = vsel %vm1525_vm3, %v1541_v1, %v1550_v35  ;;  %v1927_v47 = vsel %vm1922_vm4, %v1924_v3, %v1926_v37 }
  0xa1   : > { %v1555_v60 = vrot.slane %v1553_v50, 1  ;;  %v1267_v0 = vrot.slane %v4982_v49, 1  ;;  %v1564_v30 = vrot.slane %v1562_v20, 1 }
  0xa2   : > { %v771_v52 = vpop.f32.mrf.mxu1 }
  0xa3   : > { %v4952_v58 = vadd.f32 %v771_v52, %v612_v51  ;;  %v1556_v51 = vshll.u32 %v4982_v49, 16 }
  0xa5   : > { %v1558_v61 = vrot.slane %v1556_v51, 2 }
  0xa6   : > { %v657_v4 = vpop.f32.mrf.mxu2 }
  0xa7   : > { %v816_v5 = vpop.f32.mrf.mxu3  ;;  %v1559_v1 = vor.u32 %v1558_v61, %v1555_v60 }
  0xa8   : > { %v4957_v8 = vadd.f32 %v816_v5, %v657_v4  ;;  %v615_v9 = vpop.f32.mrf.mxu0 }
  0xaa   : > { %v774_v14 = vpop.f32.mrf.mxu1 }
  0xab   : > { %v4964_v18 = vadd.f32 %v774_v14, %v615_v9  ;;  %4100 = vmatmul.msk.bf16.vlgmr.msrb.gmra.mxu2 %vm546_vm1, %v875_v12  ;;  %4252 = vmatmul.msk.bf16.vlgmr.msrb.gmra.mxu0 %vm546_vm1, %v1542_v15  ;;  %v879_v12 = vsel %vm872_vm2, %v876_v33, %v878_v63  ;;  %v1560_v15 = vsel %vm1525_vm3, %v1550_v35, %v1559_v1  ;;  %v1567_v33 = vrot.slane %v1565_v21, 2  ;;  %v4620_v35 = vld [vmem:[%s5861_s1 + $0xd0] sm:$0xff] }
  0xac   : > { %4210 = vmatmul.msk.bf16.vlgmr.msrb.gmra.mxu3 %vm546_vm1, %v1264_v13  ;;  %v1268_v13 = vsel %vm872_vm2, %v1265_v34, %v1267_v0  ;;  %2432 = vmatpush.bf16.msra.mxu2 %v4620_v35  ;;  %v4577_v35 = vld [vmem:[%s4738_s10 + $0x38] sm:$0xff] }
  0xad   : > { %4294 = vmatmul.msk.bf16.vlgmr.msrb.gmra.mxu1 %vm546_vm1, %v1925_v16  ;;  %v1929_v16 = vsel %vm1922_vm4, %v1926_v37, %v1928_v2  ;;  %v4624_v37 = vld [vmem:[%s5861_s1 + $0xf0] sm:$0xff] }
  0xae   : > { %v660_v22 = vpop.f32.mrf.mxu2  ;;  %2829 = vmatpush.bf16.msra.mxu3 %v4624_v37 }
  0xaf   : > { %v819_v23 = vpop.f32.mrf.mxu3 }
  0xb0   : > { %v4970_v24 = vadd.f32 %v819_v23, %v660_v22  ;;  %v617_v25 = vpop.f32.mrf.mxu0 }
  0xb2   : > { %v776_v27 = vpop.f32.mrf.mxu1 }
  0xb3   : > { %v4972_v31 = vadd.f32 %v776_v27, %v617_v25 }
  0xb6   : > { %v662_v38 = vpop.f32.mrf.mxu2 }
  0xb7   : > { %v821_v39 = vpop.f32.mrf.mxu3 }
  0xb8   : > { %v4975_v40 = vadd.f32 %v821_v39, %v662_v38  ;;  %v620_v43 = vpop.f32.mrf.mxu0  ;;  %v880_v38 = vrot.slane %v4829_v59, 1  ;;  %v1269_v39 = vrot.slane %v5006_v45, 1 }
  0xba   : > { %v779_v44 = vpop.f32.mrf.mxu1  ;;  %v1270_v49 = vsel %vm872_vm2, %v1267_v0, %v1269_v39 }
  0xbb   : > { %v4984_v32 = vadd.f32 %v779_v44, %v620_v43  ;;  %4101 = vmatmul.msk.bf16.gmra.mxu2 %vm546_vm1, %v877_v42  ;;  %4253 = vmatmul.msk.bf16.gmra.mxu0 %vm546_vm1, %v1551_v46  ;;  %v1568_v42 = vor.u32 %v1567_v33, %v1564_v30 }
  0xbc   : > { %4211 = vmatmul.msk.bf16.gmra.mxu3 %vm546_vm1, %v1266_v19  ;;  %v1930_v19 = vrot.slane %v5006_v45, 2 }
  0xbd   : > { %4295 = vmatmul.msk.bf16.gmra.mxu1 %vm546_vm1, %v1927_v47  ;;  %v881_v47 = vsel %vm872_vm2, %v878_v63, %v880_v38 }
  0xbe   : > { %v665_v52 = vpop.f32.mrf.mxu2  ;;  %v1931_v59 = vsel %vm1922_vm4, %v1928_v2, %v1930_v19 }
  0xbf   : > { %v824_v53 = vpop.f32.mrf.mxu3 }
  0xc0   : > { %v4992_v55 = vadd.f32 %v824_v53, %v665_v52  ;;  %v622_v56 = vpop.f32.mrf.mxu0  ;;  %v1569_v52 = vsel %vm1525_vm3, %v1559_v1, %v1568_v42  ;;  %v4576_v53 = vld [vmem:[%s4738_s10 + $0x30] sm:$0xff] }
  0xc1   : > { %v1571_v60 = vshrl.u32 %v4576_v53, 16  ;;  %v1574_v61 = vshll.u32 %v4576_v53, 16 }
  0xc2   : > { %v781_v57 = vpop.f32.mrf.mxu1 }
  0xc3   : > { %v4994_v62 = vadd.f32 %v781_v57, %v622_v56  ;;  %v4628_v57 = vld [vmem:[%s5861_s1 + $0x110] sm:$0xff] }
  0xc4   : > { %3093 = vmatpush.bf16.msra.mxu0 %v4628_v57 }
  0xc6   : > { %v667_v3 = vpop.f32.mrf.mxu2 }
  0xc7   : > { %v826_v4 = vpop.f32.mrf.mxu3 }
  0xc8   : > { %v4999_v5 = vadd.f32 %v826_v4, %v667_v3  ;;  %v625_v9 = vpop.f32.mrf.mxu0  ;;  %v1573_v4 = vrot.slane %v1571_v60, 1 }
  0xca   : > { %v784_v14 = vpop.f32.mrf.mxu1 }
  0xcb   : > { %v5008_v17 = vadd.f32 %v784_v14, %v625_v9  ;;  %4102 = vmatmul.msk.bf16.gmra.mxu2 %vm546_vm1, %v879_v12  ;;  %4254 = vmatmul.msk.bf16.gmra.mxu0 %vm546_vm1, %v1560_v15  ;;  %v1576_v12 = vrot.slane %v1574_v61, 2  ;;  %v882_v9 = vrot.slane %v4845_v11, 1  ;;  %v1271_v14 = vrot.slane %v4576_v53, 1 }
  0xcc   : > { %4212 = vmatmul.msk.bf16.gmra.mxu3 %vm546_vm1, %v1268_v13  ;;  %v1580_v11 = vshrl.u32 %v4577_v35, 16 }
  0xcd   : > { %4296 = vmatmul.msk.bf16.gmra.mxu1 %vm546_vm1, %v1929_v16  ;;  %v1577_v15 = vor.u32 %v1576_v12, %v1573_v4  ;;  %v1932_v16 = vrot.slane %v4576_v53, 2  ;;  %v1934_v53 = vrot.slane %v4577_v35, 2 }
  0xce   : > { %v670_v22 = vpop.f32.mrf.mxu2 }
  0xcf   : > { %v829_v23 = vpop.f32.mrf.mxu3  ;;  %v1578_v30 = vsel %vm1525_vm3, %v1568_v42, %v1577_v15  ;;  %v1933_v33 = vsel %vm1922_vm4, %v1930_v19, %v1932_v16  ;;  %v1582_v19 = vrot.slane %v1580_v11, 1  ;;  %v1935_v12 = vsel %vm1922_vm4, %v1932_v16, %v1934_v53 }
  0xd0   : > { %v5016_v25 = vadd.f32 %v829_v23, %v670_v22  ;;  %v627_v27 = vpop.f32.mrf.mxu0  ;;  %v883_v22 = vsel %vm872_vm2, %v880_v38, %v882_v9  ;;  %v1272_v23 = vsel %vm872_vm2, %v1269_v39, %v1271_v14  ;;  %v1583_v38 = vshll.u32 %v4577_v35, 16 }
  0xd2   : > { %v786_v28 = vpop.f32.mrf.mxu1 }
  0xd3   : > { %v5018_v34 = vadd.f32 %v786_v28, %v627_v27 }
  0xd6   : > { %v672_v43 = vpop.f32.mrf.mxu2 }
  0xd7   : > { %v831_v44 = vpop.f32.mrf.mxu3 }
  0xd8   : > { %v5029_v46 = vadd.f32 %v831_v44, %v672_v43  ;;  %v630_v50 = vpop.f32.mrf.mxu0 }
  0xda   : > { %v789_v51 = vpop.f32.mrf.mxu1 }
  0xdb   : > { %v5036_v56 = vadd.f32 %v789_v51, %v630_v50  ;;  %4103 = vmatmul.msk.bf16.gmra.mxu2 %vm546_vm1, %v881_v47  ;;  %4255 = vmatmul.msk.bf16.gmra.mxu0 %vm546_vm1, %v1569_v52  ;;  %v884_v51 = vrot.slane %v4864_v26, 1  ;;  %v1273_v52 = vrot.slane %v4577_v35, 1 }
  0xdc   : > { %4213 = vmatmul.msk.bf16.gmra.mxu3 %vm546_vm1, %v1270_v49  ;;  %v1585_v49 = vrot.slane %v1583_v38, 2 }
  0xdd   : > { %4297 = vmatmul.msk.bf16.gmra.mxu1 %vm546_vm1, %v1931_v59 }
  0xde   : > { %v675_v63 = vpop.f32.mrf.mxu2  ;;  %v1586_v59 = vor.u32 %v1585_v49, %v1582_v19 }
  0xdf   : > { %v834_v0 = vpop.f32.mrf.mxu3 }
  0xe0   : > { %v5045_v1 = vadd.f32 %v834_v0, %v675_v63  ;;  %v632_v2 = vpop.f32.mrf.mxu0  ;;  %v885_v63 = vsel %vm872_vm2, %v882_v9, %v884_v51  ;;  %v1274_v0 = vsel %vm872_vm2, %v1271_v14, %v1273_v52  ;;  %v1587_v4 = vsel %vm1525_vm3, %v1577_v15, %v1586_v59 }
  0xe2   : > { %v791_v3 = vpop.f32.mrf.mxu1 }
  0xe3   : > { %v5047_v13 = vadd.f32 %v791_v3, %v632_v2 }
  0xe6   : > { %v677_v45 = vpop.f32.mrf.mxu2 }
  0xe7   : > { %v836_v20 = vpop.f32.mrf.mxu3 }
  0xe8   : > { %v5050_v21 = vadd.f32 %v836_v20, %v677_v45  ;;  %v635_v27 = vpop.f32.mrf.mxu0  ;;  %v4578_v45 = vld [vmem:[%s4738_s10 + $0x40] sm:$0xff] }
  0xe9   : > { %v1589_v26 = vshrl.u32 %v4578_v45, 16  ;;  %v1592_v9 = vshll.u32 %v4578_v45, 16  ;;  %v1275_v35 = vrot.slane %v4578_v45, 1  ;;  %v1936_v38 = vrot.slane %v4578_v45, 2 }
  0xea   : > { %v794_v28 = vpop.f32.mrf.mxu1 }
  0xeb   : > { %v5057_v37 = vadd.f32 %v794_v28, %v635_v27  ;;  %4104 = vmatmul.msk.bf16.gmra.mxu2 %vm546_vm1, %v883_v22  ;;  %4256 = vmatmul.msk.bf16.gmra.mxu0 %vm546_vm1, %v1578_v30  ;;  %v1591_v16 = vrot.slane %v1589_v26, 1  ;;  %v1594_v28 = vrot.slane %v1592_v9, 2  ;;  %v1276_v19 = vsel %vm872_vm2, %v1273_v52, %v1275_v35 }
  0xec   : > { %4214 = vmatmul.msk.bf16.gmra.mxu3 %vm546_vm1, %v1272_v23  ;;  %v888_v9 = vrot.slane %v4893_v54, 1  ;;  %v5117_v54 = vld [vmem:[%s4738_s10 + $0x50] sm:$0xff] }
  0xed   : > { %4298 = vmatmul.msk.bf16.gmra.mxu1 %vm546_vm1, %v1933_v33  ;;  %v886_v33 = vrot.slane %v4880_v41, 1  ;;  %v1595_v11 = vor.u32 %v1594_v28, %v1591_v16 }
  0xee   : > { %v680_v39 = vpop.f32.mrf.mxu2 }
  0xef   : > { %v839_v43 = vpop.f32.mrf.mxu3 }
  0xf0   : > { %v5063_v44 = vadd.f32 %v839_v43, %v680_v39  ;;  %v637_v42 = vpop.f32.mrf.mxu0 }
  0xf2   : > { %v796_v47 = vpop.f32.mrf.mxu1 }
  0xf3   : > { %v5065_v50 = vadd.f32 %v796_v47, %v637_v42  ;;  %v887_v47 = vsel %vm872_vm2, %v884_v51, %v886_v33 }
  0xf6   : > { %v682_v57 = vpop.f32.mrf.mxu2 }
  0xf7   : > { %v841_v60 = vpop.f32.mrf.mxu3 }
  0xf8   : > { %v5068_v61 = vadd.f32 %v841_v60, %v682_v57  ;;  %v640_v2 = vpop.f32.mrf.mxu0  ;;  %v1596_v60 = vsel %vm1525_vm3, %v1586_v59, %v1595_v11 }
  0xfa   : > { %v799_v3 = vpop.f32.mrf.mxu1 }
  0xfb   : > { %v5075_v20 = vadd.f32 %v799_v3, %v640_v2  ;;  %4105 = vmatmul.msk.bf16.gmra.mxu2 %vm546_vm1, %v885_v63  ;;  %4257 = vmatmul.msk.bf16.gmra.mxu0 %vm546_vm1, %v1587_v4  ;;  %v1937_v63 = vsel %vm1922_vm4, %v1934_v53, %v1936_v38 }
  0xfc   : > { %4215 = vmatmul.msk.bf16.gmra.mxu3 %vm546_vm1, %v1274_v0  ;;  %v5093_v0 = vld [vmem:[%s4738_s10 + $0x48] sm:$0xff] }
  0xfd   : > { %4299 = vmatmul.msk.bf16.gmra.mxu1 %vm546_vm1, %v1935_v12  ;;  %v1598_v51 = vshrl.u32 %v5093_v0, 16  ;;  %v1601_v52 = vshll.u32 %v5093_v0, 16 }
  0xfe   : > { %v685_v14 = vpop.f32.mrf.mxu2 }
  0xff   : > { %v844_v22 = vpop.f32.mrf.mxu3  ;;  %v1600_v12 = vrot.slane %v1598_v51, 1  ;;  %v1603_v45 = vrot.slane %v1601_v52, 2 }
 0x100   : > { %v5081_v23 = vadd.f32 %v844_v22, %v685_v14  ;;  %v642_v15 = vpop.f32.mrf.mxu0  ;;  %v1277_v14 = vrot.slane %v5093_v0, 1 }
 0x101   : > { %v1604_v22 = vor.u32 %v1603_v45, %v1600_v12  ;;  %v890_v45 = vrot.slane %v4741_v6, 1 }
 0x102   : > { %v801_v27 = vpop.f32.mrf.mxu1 }
 0x103   : > { %v5083_v30 = vadd.f32 %v801_v27, %v642_v15  ;;  %v1938_v15 = vrot.slane %v5093_v0, 2 }
 0x106   : > { %v687_v39 = vpop.f32.mrf.mxu2 }
 0x107   : > { %v846_v43 = vpop.f32.mrf.mxu3 }
 0x108   : > { %v5086_v42 = vadd.f32 %v846_v43, %v687_v39  ;;  %v645_v49 = vpop.f32.mrf.mxu0  ;;  %v889_v39 = vsel %vm872_vm2, %v886_v33, %v888_v9  ;;  %v1278_v43 = vsel %vm872_vm2, %v1275_v35, %v1277_v14  ;;  %v4619_v33 = vld [vmem:[%s5861_s1 + $0xc8] sm:$0xff]  ;;  %v1607_v35 = vshrl.u32 %v5117_v54, 16 }
 0x109   : > { %2433 = vmatpush.bf16.msra.mxu2 %v4619_v33 }
 0x10a   : > { %v804_v57 = vpop.f32.mrf.mxu1 }
 0x10b   : > { %v5095_v41 = vadd.f32 %v804_v57, %v645_v49  ;;  %4106 = vmatmul.msk.bf16.gmra.mxu2 %vm546_vm1, %v887_v47  ;;  %4258 = vmatmul.msk.bf16.gmra.mxu0 %vm546_vm1, %v1596_v60  ;;  %v1605_v49 = vsel %vm1525_vm3, %v1595_v11, %v1604_v22  ;;  %v1939_v57 = vsel %vm1922_vm4, %v1936_v38, %v1938_v15  ;;  %v1610_v11 = vshll.u32 %v5117_v54, 16  ;;  %v4623_v38 = vld [vmem:[%s5861_s1 + $0xe8] sm:$0xff] }
 0x10c   : > { %4216 = vmatmul.msk.bf16.gmra.mxu3 %vm546_vm1, %v1276_v19 }
 0x10d   : > { %4300 = vmatmul.msk.bf16.gmra.mxu1 %vm546_vm1, %v1937_v63  ;;  %2830 = vmatpush.bf16.msra.mxu3 %v4623_v38 }
 0x10e   : > { %v690_v2 = vpop.f32.mrf.mxu2 }
 0x10f   : > { %v849_v59 = vpop.f32.mrf.mxu3 }
 0x110   : > { %v5103_v3 = vadd.f32 %v849_v59, %v690_v2  ;;  %v647_v53 = vpop.f32.mrf.mxu0  ;;  %v1609_v59 = vrot.slane %v1607_v35, 1 }
 0x112   : > { %v806_v4 = vpop.f32.mrf.mxu1 }
 0x113   : > { %v5105_v26 = vadd.f32 %v806_v4, %v647_v53  ;;  %v1612_v53 = vrot.slane %v1610_v11, 2  ;;  %v4633_v4 = vld [vmem:[%s5863_s3 + $0x18] sm:$0xff] }
 0x114   : > { %3411 = vmatpush.bf16.msra.mxu1 %v4633_v4 }
 0x116   : > { %v692_v27 = vpop.f32.mrf.mxu2 }
 0x117   : > { %v851_v16 = vpop.f32.mrf.mxu3 }
 0x118   : > { %v5110_v28 = vadd.f32 %v851_v16, %v692_v27  ;;  %v650_v47 = vpop.f32.mrf.mxu0  ;;  %v1279_v27 = vrot.slane %v5117_v54, 1  ;;  %v1613_v16 = vor.u32 %v1612_v53, %v1609_v59 }
 0x11a   : > { %v809_v19 = vpop.f32.mrf.mxu1  ;;  %v1280_v33 = vsel %vm872_vm2, %v1277_v14, %v1279_v27  ;;  %v1614_v6 = vsel %vm1525_vm3, %v1604_v22, %v1613_v16 }
 0x11b   : > { %v5119_v60 = vadd.f32 %v809_v19, %v650_v47  ;;  %4107 = vmatmul.msk.bf16.gmra.mxu2 %vm546_vm1, %v889_v39  ;;  %4259 = vmatmul.msk.bf16.gmra.mxu0 %vm546_vm1, %v1605_v49  ;;  %v1940_v39 = vrot.slane %v5117_v54, 2  ;;  %v5153_v54 = vld [vmem:[%s4738_s10 + $0x58] sm:$0xff] }
 0x11c   : > { %4217 = vmatmul.msk.bf16.gmra.mxu3 %vm546_vm1, %v1278_v43  ;;  %v4627_v43 = vld [vmem:[%s5861_s1 + $0x108] sm:$0xff]  ;;  %v1619_v14 = vshll.u32 %v5153_v54, 16 }
 0x11d   : > { %4301 = vmatmul.msk.bf16.gmra.mxu1 %vm546_vm1, %v1939_v57  ;;  %3094 = vmatpush.bf16.msra.mxu0 %v4627_v43  ;;  %v891_v57 = vsel %vm872_vm2, %v888_v9, %v890_v45  ;;  %v1941_v38 = vsel %vm1922_vm4, %v1938_v15, %v1940_v39  ;;  %v1616_v9 = vshrl.u32 %v5153_v54, 16  ;;  %v892_v43 = vrot.slane %v4744_v7, 1 }
 0x11e   : > { %v695_v63 = vpop.f32.mrf.mxu2  ;;  %v1621_v53 = vrot.slane %v1619_v14, 2 }
 0x11f   : > { %v854_v0 = vpop.f32.mrf.mxu3  ;;  %v1618_v59 = vrot.slane %v1616_v9, 1 }
 0x120   : > { %v5133_v51 = vadd.f32 %v854_v0, %v695_v63  ;;  %v652_v52 = vpop.f32.mrf.mxu0 }
 0x122   : > { %v811_v2 = vpop.f32.mrf.mxu1 }
 0x123   : > { %v5138_v12 = vadd.f32 %v811_v2, %v652_v52 }
 0x126   : > { %v697_v47 = vpop.f32.mrf.mxu2 }
 0x127   : > { %v856_v19 = vpop.f32.mrf.mxu3 }
 0x128   : > { %v5146_v49 = vadd.f32 %v856_v19, %v697_v47  ;;  %v1783_v35 = vpop.f32.mrf.mxu0  ;;  %v1281_v47 = vrot.slane %v5153_v54, 1 }
 0x12a   : > { %v2047_v11 = vpop.f32.mrf.mxu1  ;;  %v1282_v9 = vsel %vm872_vm2, %v1279_v27, %v1281_v47 }
 0x12b   : > { %4108 = vmatmul.msk.bf16.gmra.mxu2 %vm546_vm1, %v891_v57  ;;  %4260 = vmatmul.msk.bf16.gmra.mxu0 %vm546_vm1, %v1614_v6  ;;  %v1622_v57 = vor.u32 %v1621_v53, %v1618_v59 }
 0x12c   : > { %4218 = vmatmul.msk.bf16.gmra.mxu3 %vm546_vm1, %v1280_v33  ;;  %v1942_v33 = vrot.slane %v5153_v54, 2 }
 0x12d   : > { %4302 = vmatmul.msk.bf16.gmra.mxu1 %vm546_vm1, %v1941_v38 }
 0x12e   : > { %v997_v63 = vpop.f32.mrf.mxu2 }
 0x12f   : > { %v1386_v0 = vpop.f32.mrf.mxu3  ;;  %v1087_v22 = vadd.f32 %v997_v63, %v4938_v36  ;;  %v893_v63 = vsel %vm872_vm2, %v890_v45, %v892_v43 }
 0x130   : > { %v1785_v15 = vpop.f32.mrf.mxu0 }
 0x131   : > { %v1476_v52 = vadd.f32 %v1386_v0, %v1087_v22  ;;  %v1623_v0 = vsel %vm1525_vm3, %v1613_v16, %v1622_v57  ;;  %v1943_v22 = vsel %vm1922_vm4, %v1940_v39, %v1942_v33 }
 0x132   : > { %v2049_v2 = vpop.f32.mrf.mxu1 }
 0x133   : > { %v1873_v4 = vadd.f32 %v1783_v35, %v1476_v52 }
 0x135   : > { %v5164_v19 = vadd.f32 %v2047_v11, %v1873_v4  ;;  %v5173_v11 = vld [vmem:[%s4738_s10 + $0x60] sm:$0xff] }
 0x136   : > { %v999_v6 = vpop.f32.mrf.mxu2  ;;  %v1625_v45 = vshrl.u32 %v5173_v11, 16  ;;  %v1628_v27 = vshll.u32 %v5173_v11, 16 }
 0x137   : > { %v1388_v38 = vpop.f32.mrf.mxu3  ;;  %v1088_v36 = vadd.f32 %v999_v6, %v4952_v58 }
 0x138   : > { %v1788_v35 = vpop.f32.mrf.mxu0  ;;  %v1627_v6 = vrot.slane %v1625_v45, 1 }
 0x139   : > { %v1477_v14 = vadd.f32 %v1388_v38, %v1088_v36  ;;  %v1630_v38 = vrot.slane %v1628_v27, 2  ;;  %v894_v36 = vrot.slane %v4780_v29, 1 }
 0x13a   : > { %v2052_v7 = vpop.f32.mrf.mxu1 }
 0x13b   : > { %4109 = vmatmul.msk.bf16.gmra.mxu2 %vm546_vm1, %v893_v63  ;;  %v1874_v54 = vadd.f32 %v1785_v15, %v1477_v14  ;;  %4261 = vmatmul.msk.bf16.gmra.mxu0 %vm546_vm1, %v1623_v0  ;;  %v1944_v14 = vrot.slane %v5173_v11, 2 }
 0x13c   : > { %4219 = vmatmul.msk.bf16.gmra.mxu3 %vm546_vm1, %v1282_v9  ;;  %v1631_v9 = vor.u32 %v1630_v38, %v1627_v6 }
 0x13d   : > { %4303 = vmatmul.msk.bf16.gmra.mxu1 %vm546_vm1, %v1943_v22  ;;  %v5179_v58 = vadd.f32 %v2049_v2, %v1874_v54  ;;  %v1283_v2 = vrot.slane %v5173_v11, 1  ;;  %v895_v54 = vsel %vm872_vm2, %v892_v43, %v894_v36 }
 0x13e   : > { %v1002_v16 = vpop.f32.mrf.mxu2 }
 0x13f   : > { %v1391_v52 = vpop.f32.mrf.mxu3  ;;  %v1089_v39 = vadd.f32 %v1002_v16, %v4964_v18  ;;  %v1284_v45 = vsel %vm872_vm2, %v1281_v47, %v1283_v2  ;;  %v1632_v16 = vsel %vm1525_vm3, %v1622_v57, %v1631_v9 }
 0x140   : > { %v1790_v53 = vpop.f32.mrf.mxu0 }
 0x141   : > { %v1478_v59 = vadd.f32 %v1391_v52, %v1089_v39  ;;  %v1945_v52 = vsel %vm1922_vm4, %v1942_v33, %v1944_v14 }
 0x142   : > { %v2054_v4 = vpop.f32.mrf.mxu1 }
 0x143   : > { %v1875_v15 = vadd.f32 %v1788_v35, %v1478_v59 }
 0x145   : > { %v5186_v63 = vadd.f32 %v2052_v7, %v1875_v15  ;;  %v5195_v7 = vld [vmem:[%s4738_s10 + $0x68] sm:$0xff] }
 0x146   : > { %v1004_v0 = vpop.f32.mrf.mxu2  ;;  %v1634_v43 = vshrl.u32 %v5195_v7, 16  ;;  %v1637_v47 = vshll.u32 %v5195_v7, 16 }
 0x147   : > { %v1393_v22 = vpop.f32.mrf.mxu3  ;;  %v1090_v18 = vadd.f32 %v1004_v0, %v4972_v31 }
 0x148   : > { %v1793_v35 = vpop.f32.mrf.mxu0  ;;  %v1636_v15 = vrot.slane %v1634_v43, 1  ;;  %v1639_v0 = vrot.slane %v1637_v47, 2 }
 0x149   : > { %v1479_v27 = vadd.f32 %v1393_v22, %v1090_v18  ;;  %v4660_v22 = vld [vmem:[%s4738_s10 + $0x60] sm:$0xff] }
 0x14a   : > { %v2057_v29 = vpop.f32.mrf.mxu1  ;;  %v896_v18 = vrot.slane %v4660_v22, 1 }
 0x14b   : > { %4110 = vmatmul.msk.bf16.gmra.mxu2 %vm546_vm1, %v895_v54  ;;  %v1876_v11 = vadd.f32 %v1790_v53, %v1479_v27  ;;  %4262 = vmatmul.msk.bf16.gmra.mxu0 %vm546_vm1, %v1632_v16  ;;  %v1946_v27 = vrot.slane %v5195_v7, 2 }
 0x14c   : > { %4220 = vmatmul.msk.bf16.gmra.mxu3 %vm546_vm1, %v1284_v45  ;;  %v1640_v45 = vor.u32 %v1639_v0, %v1636_v15 }
 0x14d   : > { %4304 = vmatmul.msk.bf16.gmra.mxu1 %vm546_vm1, %v1945_v52  ;;  %v5201_v31 = vadd.f32 %v2054_v4, %v1876_v11  ;;  %v1285_v4 = vrot.slane %v5195_v7, 1  ;;  %v897_v11 = vsel %vm872_vm2, %v894_v36, %v896_v18 }
 0x14e   : > { %v1007_v57 = vpop.f32.mrf.mxu2 }
 0x14f   : > { %v1396_v33 = vpop.f32.mrf.mxu3  ;;  %v1091_v39 = vadd.f32 %v1007_v57, %v4984_v32  ;;  %v1286_v43 = vsel %vm872_vm2, %v1283_v2, %v1285_v4  ;;  %v1641_v57 = vsel %vm1525_vm3, %v1631_v9, %v1640_v45 }
 0x150   : > { %v1795_v6 = vpop.f32.mrf.mxu0 }
 0x151   : > { %v1480_v59 = vadd.f32 %v1396_v33, %v1091_v39  ;;  %v1947_v39 = vsel %vm1922_vm4, %v1944_v14, %v1946_v27 }
 0x152   : > { %v2059_v38 = vpop.f32.mrf.mxu1 }
 0x153   : > { %v1877_v53 = vadd.f32 %v1793_v35, %v1480_v59 }
 0x155   : > { %v5208_v54 = vadd.f32 %v2057_v29, %v1877_v53  ;;  %v5217_v29 = vld [vmem:[%s4738_s10 + $0x70] sm:$0xff] }
 0x156   : > { %v1009_v16 = vpop.f32.mrf.mxu2  ;;  %v1643_v36 = vshrl.u32 %v5217_v29, 16  ;;  %v1646_v2 = vshll.u32 %v5217_v29, 16 }
 0x157   : > { %v1398_v52 = vpop.f32.mrf.mxu3  ;;  %v1092_v32 = vadd.f32 %v1009_v16, %v4994_v62  ;;  %v4618_v16 = vld [vmem:[%s5861_s1 + $0xc0] sm:$0xff] }
 0x158   : > { %v1798_v35 = vpop.f32.mrf.mxu0  ;;  %v1645_v22 = vrot.slane %v1643_v36, 1  ;;  %2434 = vmatpush.bf16.msra.mxu2 %v4618_v16 }
 0x159   : > { %v1481_v47 = vadd.f32 %v1398_v52, %v1092_v32 }
 0x15a   : > { %v2062_v33 = vpop.f32.mrf.mxu1 }
 0x15b   : > { %4111 = vmatmul.msk.bf16.gmra.mxu2 %vm546_vm1, %v897_v11  ;;  %v1878_v7 = vadd.f32 %v1795_v6, %v1481_v47  ;;  %4263 = vmatmul.msk.bf16.gmra.mxu0 %vm546_vm1, %v1641_v57  ;;  %v1648_v6 = vrot.slane %v1646_v2, 2  ;;  %v1287_v11 = vrot.slane %v5217_v29, 1  ;;  %v4622_v57 = vld [vmem:[%s5861_s1 + $0xe0] sm:$0xff] }
 0x15c   : > { %4221 = vmatmul.msk.bf16.gmra.mxu3 %vm546_vm1, %v1286_v43 }
 0x15d   : > { %4305 = vmatmul.msk.bf16.gmra.mxu1 %vm546_vm1, %v1947_v39  ;;  %v5223_v62 = vadd.f32 %v2059_v38, %v1878_v7  ;;  %v4661_v38 = vld [vmem:[%s4738_s10 + $0x68] sm:$0xff]  ;;  %v1649_v47 = vor.u32 %v1648_v6, %v1645_v22  ;;  %2831 = vmatpush.bf16.msra.mxu3 %v4622_v57  ;;  %v1288_v2 = vsel %vm872_vm2, %v1285_v4, %v1287_v11 }
 0x15e   : > { %v1012_v9 = vpop.f32.mrf.mxu2  ;;  %v898_v32 = vrot.slane %v4661_v38, 1 }
 0x15f   : > { %v1401_v14 = vpop.f32.mrf.mxu3  ;;  %v1093_v59 = vadd.f32 %v1012_v9, %v5008_v17  ;;  %v1948_v17 = vrot.slane %v5217_v29, 2 }
 0x160   : > { %v1800_v0 = vpop.f32.mrf.mxu0 }
 0x161   : > { %v1482_v15 = vadd.f32 %v1401_v14, %v1093_v59  ;;  %v1949_v29 = vsel %vm1922_vm4, %v1946_v27, %v1948_v17  ;;  %v4626_v27 = vld [vmem:[%s5861_s1 + $0x100] sm:$0xff] }
 0x162   : > { %v2064_v53 = vpop.f32.mrf.mxu1  ;;  %3095 = vmatpush.bf16.msra.mxu0 %v4626_v27 }
 0x163   : > { %v1879_v52 = vadd.f32 %v1798_v35, %v1482_v15  ;;  %v899_v35 = vsel %vm872_vm2, %v896_v18, %v898_v32  ;;  %v5245_v15 = vld [vmem:[%s4738_s10 + $0x78] sm:$0xff] }
 0x164   : > { %v1652_v4 = vshrl.u32 %v5245_v15, 16 }
 0x165   : > { %v5233_v43 = vadd.f32 %v2062_v33, %v1879_v52  ;;  %v1650_v33 = vsel %vm1525_vm3, %v1640_v45, %v1649_v47  ;;  %v1655_v45 = vshll.u32 %v5245_v15, 16 }
 0x166   : > { %v1014_v39 = vpop.f32.mrf.mxu2 }
 0x167   : > { %v1403_v7 = vpop.f32.mrf.mxu3  ;;  %v1094_v36 = vadd.f32 %v1014_v39, %v5018_v34  ;;  %v4632_v34 = vld [vmem:[%s5863_s3 + $0x10] sm:$0xff]  ;;  %v1654_v39 = vrot.slane %v1652_v4, 1 }
 0x168   : > { %v1803_v14 = vpop.f32.mrf.mxu0  ;;  %3412 = vmatpush.bf16.msra.mxu1 %v4632_v34 }
 0x169   : > { %v1483_v9 = vadd.f32 %v1403_v7, %v1094_v36  ;;  %v4662_v36 = vld [vmem:[%s4738_s10 + $0x70] sm:$0xff] }
 0x16a   : > { %v2067_v59 = vpop.f32.mrf.mxu1 }
 0x16b   : > { %4112 = vmatmul.msk.bf16.gmra.mxu2 %vm546_vm1, %v899_v35  ;;  %v1880_v22 = vadd.f32 %v1800_v0, %v1483_v9  ;;  %4264 = vmatmul.msk.bf16.gmra.mxu0 %vm546_vm1, %v1650_v33  ;;  %v900_v35 = vrot.slane %v4662_v36, 1 }
 0x16c   : > { %4222 = vmatmul.msk.bf16.gmra.mxu3 %vm546_vm1, %v1288_v2  ;;  %v1289_v2 = vrot.slane %v5245_v15, 1 }
 0x16d   : > { %4306 = vmatmul.msk.bf16.gmra.mxu1 %vm546_vm1, %v1949_v29  ;;  %v5254_v18 = vadd.f32 %v2064_v53, %v1880_v22  ;;  %v1657_v53 = vrot.slane %v1655_v45, 2  ;;  %v1950_v29 = vrot.slane %v5245_v15, 2  ;;  %v901_v27 = vsel %vm872_vm2, %v898_v32, %v900_v35 }
 0x16e   : > { %v1017_v0 = vpop.f32.mrf.mxu2  ;;  %v1290_v4 = vsel %vm872_vm2, %v1287_v11, %v1289_v2 }
 0x16f   : > { %v1406_v6 = vpop.f32.mrf.mxu3  ;;  %v1095_v16 = vadd.f32 %v1017_v0, %v5036_v56  ;;  %v1658_v33 = vor.u32 %v1657_v53, %v1654_v39 }
 0x170   : > { %v1805_v38 = vpop.f32.mrf.mxu0 }
 0x171   : > { %v1484_v52 = vadd.f32 %v1406_v6, %v1095_v16  ;;  %v1659_v0 = vsel %vm1525_vm3, %v1649_v47, %v1658_v33  ;;  %v1951_v16 = vsel %vm1922_vm4, %v1948_v17, %v1950_v29 }
 0x172   : > { %v2069_v57 = vpop.f32.mrf.mxu1 }
 0x173   : > { %v1881_v7 = vadd.f32 %v1803_v14, %v1484_v52 }
 0x175   : > { %v5264_v9 = vadd.f32 %v2067_v59, %v1881_v7  ;;  %v5273_v59 = vld [vmem:[%s4738_s10 + $0x80] sm:$0xff] }
 0x176   : > { %v1019_v22 = vpop.f32.mrf.mxu2  ;;  %v1661_v32 = vshrl.u32 %v5273_v59, 16  ;;  %v1664_v11 = vshll.u32 %v5273_v59, 16 }
 0x177   : > { %v1408_v34 = vpop.f32.mrf.mxu3  ;;  %v1096_v56 = vadd.f32 %v1019_v22, %v5047_v13 }
 0x178   : > { %v1808_v14 = vpop.f32.mrf.mxu0  ;;  %v1663_v36 = vrot.slane %v1661_v32, 1  ;;  %v1666_v22 = vrot.slane %v1664_v11, 2 }
 0x179   : > { %v1485_v45 = vadd.f32 %v1408_v34, %v1096_v56  ;;  %v4663_v34 = vld [vmem:[%s4738_s10 + $0x78] sm:$0xff] }
 0x17a   : > { %v2072_v6 = vpop.f32.mrf.mxu1  ;;  %v902_v56 = vrot.slane %v4663_v34, 1 }
 0x17b   : > { %4113 = vmatmul.msk.bf16.gmra.mxu2 %vm546_vm1, %v901_v27  ;;  %v1882_v15 = vadd.f32 %v1805_v38, %v1485_v45  ;;  %4265 = vmatmul.msk.bf16.gmra.mxu0 %vm546_vm1, %v1659_v0  ;;  %v1952_v45 = vrot.slane %v5273_v59, 2 }
 0x17c   : > { %4223 = vmatmul.msk.bf16.gmra.mxu3 %vm546_vm1, %v1290_v4  ;;  %v1667_v4 = vor.u32 %v1666_v22, %v1663_v36 }
 0x17d   : > { %4307 = vmatmul.msk.bf16.gmra.mxu1 %vm546_vm1, %v1951_v16  ;;  %v5279_v13 = vadd.f32 %v2069_v57, %v1882_v15  ;;  %v1291_v57 = vrot.slane %v5273_v59, 1  ;;  %v903_v15 = vsel %vm872_vm2, %v900_v35, %v902_v56 }
 0x17e   : > { %v1022_v47 = vpop.f32.mrf.mxu2 }
 0x17f   : > { %v1411_v17 = vpop.f32.mrf.mxu3  ;;  %v1097_v52 = vadd.f32 %v1022_v47, %v5057_v37  ;;  %v1292_v32 = vsel %vm872_vm2, %v1289_v2, %v1291_v57  ;;  %v1668_v47 = vsel %vm1525_vm3, %v1658_v33, %v1667_v4 }
 0x180   : > { %v1810_v53 = vpop.f32.mrf.mxu0 }
 0x181   : > { %v1486_v39 = vadd.f32 %v1411_v17, %v1097_v52  ;;  %v1953_v52 = vsel %vm1922_vm4, %v1950_v29, %v1952_v45 }
 0x182   : > { %v2074_v7 = vpop.f32.mrf.mxu1 }
 0x183   : > { %v1883_v38 = vadd.f32 %v1808_v14, %v1486_v39 }
 0x185   : > { %v5286_v27 = vadd.f32 %v2072_v6, %v1883_v38  ;;  %v5295_v6 = vld [vmem:[%s4738_s10 + $0x88] sm:$0xff] }
 0x186   : > { %v1024_v0 = vpop.f32.mrf.mxu2  ;;  %v1670_v35 = vshrl.u32 %v5295_v6, 16  ;;  %v1673_v2 = vshll.u32 %v5295_v6, 16 }
 0x187   : > { %v1413_v16 = vpop.f32.mrf.mxu3  ;;  %v1098_v37 = vadd.f32 %v1024_v0, %v5065_v50 }
 0x188   : > { %v1813_v14 = vpop.f32.mrf.mxu0  ;;  %v1672_v34 = vrot.slane %v1670_v35, 1 }
 0x189   : > { %v1487_v11 = vadd.f32 %v1413_v16, %v1098_v37  ;;  %v4664_v16 = vld [vmem:[%s4738_s10 + $0x80] sm:$0xff] }
 0x18a   : > { %v2077_v17 = vpop.f32.mrf.mxu1  ;;  %v904_v37 = vrot.slane %v4664_v16, 1 }
 0x18b   : > { %4114 = vmatmul.msk.bf16.gmra.mxu2 %vm546_vm1, %v903_v15  ;;  %v1884_v59 = vadd.f32 %v1810_v53, %v1487_v11  ;;  %4266 = vmatmul.msk.bf16.gmra.mxu0 %vm546_vm1, %v1668_v47  ;;  %v1675_v53 = vrot.slane %v1673_v2, 2  ;;  %v1954_v11 = vrot.slane %v5295_v6, 2 }
 0x18c   : > { %4224 = vmatmul.msk.bf16.gmra.mxu3 %vm546_vm1, %v1292_v32 }
 0x18d   : > { %4308 = vmatmul.msk.bf16.gmra.mxu1 %vm546_vm1, %v1953_v52  ;;  %v5301_v50 = vadd.f32 %v2074_v7, %v1884_v59  ;;  %v1293_v7 = vrot.slane %v5295_v6, 1  ;;  %v1676_v32 = vor.u32 %v1675_v53, %v1672_v34  ;;  %v905_v59 = vsel %vm872_vm2, %v902_v56, %v904_v37 }
 0x18e   : > { %v1027_v33 = vpop.f32.mrf.mxu2 }
 0x18f   : > { %v1416_v29 = vpop.f32.mrf.mxu3  ;;  %v1099_v39 = vadd.f32 %v1027_v33, %v5075_v20  ;;  %v1294_v35 = vsel %vm872_vm2, %v1291_v57, %v1293_v7  ;;  %v1677_v33 = vsel %vm1525_vm3, %v1667_v4, %v1676_v32 }
 0x190   : > { %v1815_v22 = vpop.f32.mrf.mxu0 }
 0x191   : > { %v1488_v36 = vadd.f32 %v1416_v29, %v1099_v39  ;;  %v1955_v39 = vsel %vm1922_vm4, %v1952_v45, %v1954_v11 }
 0x192   : > { %v5306_v38 = vpop.f32.mrf.mxu1 }
 0x193   : > { %v1885_v0 = vadd.f32 %v1813_v14, %v1488_v36 }
 0x195   : > { %v5310_v15 = vadd.f32 %v2077_v17, %v1885_v0  ;;  %v5319_v17 = vld [vmem:[%s4738_s10 + $0x90] sm:$0xff] }
 0x196   : > { %v1029_v47 = vpop.f32.mrf.mxu2  ;;  %v1679_v56 = vshrl.u32 %v5319_v17, 16  ;;  %v1682_v57 = vshll.u32 %v5319_v17, 16 }
 0x197   : > { %v1418_v52 = vpop.f32.mrf.mxu3  ;;  %v1100_v20 = vadd.f32 %v1029_v47, %v5083_v30 }
 0x198   : > { %v1818_v14 = vpop.f32.mrf.mxu0  ;;  %v1681_v0 = vrot.slane %v1679_v56, 1  ;;  %v1684_v16 = vrot.slane %v1682_v57, 2 }
 0x199   : > { %v1489_v2 = vadd.f32 %v1418_v52, %v1100_v20  ;;  %v4665_v52 = vld [vmem:[%s4738_s10 + $0x88] sm:$0xff] }
 0x19a   : > { %v2082_v29 = vpop.f32.mrf.mxu1  ;;  %v906_v20 = vrot.slane %v4665_v52, 1 }
 0x19b   : > { %4115 = vmatmul.msk.bf16.gmra.mxu2 %vm546_vm1, %v905_v59  ;;  %v5323_v30 = vadd.f32 %v1815_v22, %v1489_v2  ;;  %4267 = vmatmul.msk.bf16.gmra.mxu0 %vm546_vm1, %v1677_v33  ;;  %v1512_v22 = vld [vmem:[%s4738_s10 + $0x98] sm:$0x3]  ;;  %v1295_v59 = vrot.slane %v5319_v17, 1  ;;  %v1685_v33 = vor.u32 %v1684_v16, %v1681_v0 }
 0x19c   : > { %4225 = vmatmul.msk.bf16.gmra.mxu3 %vm546_vm1, %v1294_v35  ;;  %v1523_v35 = vunpack.c.l.b16 %v1512_v22  ;;  %v907_v56 = vsel %vm872_vm2, %v904_v37, %v906_v20  ;;  %v1159_v22 = vld [vmem:[%s4738_s10 + $0x98] sm:$0x1] }
 0x19d   : > { %4309 = vmatmul.msk.bf16.gmra.mxu1 %vm546_vm1, %v1955_v39  ;;  %v1956_v39 = vrot.slane %v5319_v17, 2  ;;  %v1296_v57 = vsel %vm872_vm2, %v1293_v7, %v1295_v59  ;;  %v1686_v52 = vsel %vm1525_vm3, %v1676_v32, %v1685_v33 }
 0x19e   : > { %v1032_v4 = vpop.f32.mrf.mxu2 }
 0x19f   : > { %v1421_v45 = vpop.f32.mrf.mxu3  ;;  %v1101_v6 = vadd.f32 %v1032_v4, %v5095_v41 }
 0x1a0   : > { %v1820_v34 = vpop.f32.mrf.mxu0 }
 0x1a1   : > { %v1490_v36 = vadd.f32 %v1421_v45, %v1101_v6 }
 0x1a2   : > { %v5330_v53 = vpop.f32.mrf.mxu1 }
 0x1a3   : > { %5866 = vst [vmem:[#allocation2_spill] sm:$0xff] %v5330_v53  ;;  %v1887_v47 = vadd.f32 %v1818_v14, %v1490_v36  ;;  %v1524_v14 = vpack.c.b16 %v1523_v35, %v1523_v35 }
 0x1a5   : > { %v5335_v2 = vadd.f32 %v2082_v29, %v1887_v47  ;;  %v1957_v29 = vsel %vm1922_vm4, %v1954_v11, %v1956_v39  ;;  %v1688_v37 = vshrl.u32 %v1524_v14, 16  ;;  %v1691_v7 = vshll.u32 %v1524_v14, 16 }
 0x1a6   : > { %v1034_v41 = vpop.f32.mrf.mxu2 }
 0x1a7   : > { %v1423_v4 = vpop.f32.mrf.mxu3  ;;  %v1102_v45 = vadd.f32 %v1034_v41, %v5105_v26  ;;  %v1242_v26 = vunpack.c.l.b16 %v1159_v22  ;;  %v1690_v47 = vrot.slane %v1688_v37, 1 }
 0x1a8   : > { %v1823_v36 = vpop.f32.mrf.mxu0 }
 0x1a9   : > { %v1491_v6 = vadd.f32 %v1423_v4, %v1102_v45  ;;  %v1261_v16 = vpack.c.b16 %v1242_v26, %v1242_v26  ;;  %v2173_v45 = vld [vmem:[%s4738_s10 + $0x10] sm:$0xc] }
 0x1aa   : > { %v2087_v53 = vpop.f32.mrf.mxu1 }
 0x1ab   : > { %4116 = vmatmul.msk.bf16.gmra.mxu2 %vm546_vm1, %v907_v56  ;;  %v5346_v17 = vadd.f32 %v1820_v34, %v1491_v6  ;;  %4268 = vmatmul.msk.bf16.gmra.mxu0 %vm546_vm1, %v1686_v52  ;;  %v1693_v34 = vrot.slane %v1691_v7, 2  ;;  %v2174_v56 = vld [vmem:[%s4738_s10 + $0x14] sm:$0xf]  ;;  %v908_v52 = vrot.slane %v4914_v10, 1 }
 0x1ac   : > { %4226 = vmatmul.msk.bf16.gmra.mxu3 %vm546_vm1, %v1296_v57  ;;  %v4631_v57 = vld [vmem:[%s5863_s3 + $0x8] sm:$0xff]  ;;  %v2257_v22 = vunpack.c.l.b16 %v2174_v56 }
 0x1ad   : > { %5867 = vst [vmem:[#allocation3_spill] sm:$0xff] %v5346_v17  ;;  %4310 = vmatmul.msk.bf16.gmra.mxu1 %vm546_vm1, %v1957_v29  ;;  %v1297_v29 = vrot.slane %v1261_v16, 1  ;;  %v1694_v37 = vor.u32 %v1693_v34, %v1690_v47  ;;  %v2959_v47 = vld [vmem:[%s4738_s10 + $0x10] sm:$0x8] }
 0x1ae   : > { %v1037_v32 = vpop.f32.mrf.mxu2  ;;  %3413 = vmatpush.bf16.msra.mxu1 %v4631_v57  ;;  %v2970_v34 = vunpack.c.l.b16 %v2959_v47 }
 0x1af   : > { %v1426_v0 = vpop.f32.mrf.mxu3  ;;  %v1103_v11 = vadd.f32 %v1037_v32, %v5119_v60  ;;  %v2256_v60 = vunpack.c.l.b16 %v2173_v45  ;;  %v1958_v32 = vrot.slane %v1524_v14, 2  ;;  %v1298_v17 = vsel %vm872_vm2, %v1295_v59, %v1297_v29 }
 0x1b0   : > { %v1825_v41 = vpop.f32.mrf.mxu0  ;;  %v1695_v45 = vsel %vm1525_vm3, %v1685_v33, %v1694_v37 }
 0x1b1   : > { %v1492_v35 = vadd.f32 %v1426_v0, %v1103_v11 }
 0x1b2   : > { %v5351_v4 = vpop.f32.mrf.mxu1 }
 0x1b3   : > { %5868 = vst [vmem:[#allocation4_spill] sm:$0xff] %v5351_v4  ;;  %v1889_v6 = vadd.f32 %v1823_v36, %v1492_v35  ;;  %v909_v4 = vsel %vm872_vm2, %v906_v20, %v908_v52  ;;  %v5365_v36 = vld [vmem:[%s4738_s10 + $0x18] sm:$0xff]  ;;  %v2293_v35 = vpack.c.b16 %v2257_v22, %v2256_v60 }
 0x1b4   : > { %v2585_v14 = vshrl.u32 %v5365_v36, 16  ;;  %v2588_v33 = vshll.u32 %v5365_v36, 16  ;;  %v2974_v47 = vrot.slane %v5365_v36, 3 }
 0x1b5   : > { %v5359_v26 = vadd.f32 %v2087_v53, %v1889_v6  ;;  %v1959_v53 = vsel %vm1922_vm4, %v1956_v39, %v1958_v32  ;;  %v2577_v20 = vshrl.u32 %v2293_v35, 16  ;;  %v2580_v59 = vshll.u32 %v2293_v35, 16 }
 0x1b6   : > { %v1039_v7 = vpop.f32.mrf.mxu2  ;;  %v2971_v32 = vpack.c.b16 %v2257_v22, %v2970_v34 }
 0x1b7   : > { %v1428_v0 = vpop.f32.mrf.mxu3  ;;  %v1104_v11 = vadd.f32 %v1039_v7, %v5138_v12  ;;  %v2582_v52 = vrot.slane %v2580_v59, 3 }
 0x1b8   : > { %v1828_v16 = vpop.f32.mrf.mxu0 }
 0x1b9   : > { %v1493_v10 = vadd.f32 %v1428_v0, %v1104_v11  ;;  %v2312_v0 = vrot.slane %v2293_v35, 2  ;;  %v2313_v11 = vrot.slane %v5365_v36, 2  ;;  %v5389_v35 = vld [vmem:[%s4738_s10 + $0x20] sm:$0xff] }
 0x1ba   : > { %v2092_v56 = vpop.f32.mrf.mxu1 }
 0x1bb   : > { %4117 = vmatmul.msk.bf16.gmra.mxu2 %vm546_vm1, %v909_v4  ;;  %v5372_v12 = vadd.f32 %v1825_v41, %v1493_v10  ;;  %4269 = vmatmul.msk.bf16.gmra.mxu0 %vm546_vm1, %v1695_v45  ;;  %v2579_v4 = vrot.slane %v2577_v20, 2  ;;  %v2590_v41 = vrot.slane %v2588_v33, 3  ;;  %v2314_v22 = vsel %vm1922_vm4, %v2312_v0, %v2313_v11 }
 0x1bc   : > { %4227 = vmatmul.msk.bf16.gmra.mxu3 %vm546_vm1, %v1298_v17  ;;  %v2587_v17 = vrot.slane %v2585_v14, 2 }
 0x1bd   : > { %4311 = vmatmul.msk.bf16.gmra.mxu1 %vm546_vm1, %v1959_v53  ;;  %v2583_v10 = vor.u32 %v2582_v52, %v2579_v4 }
 0x1be   : > { %v1042_v57 = vpop.f32.mrf.mxu2  ;;  %v2591_v45 = vor.u32 %v2590_v41, %v2587_v17 }
 0x1bf   : > { %v1431_v39 = vpop.f32.mrf.mxu3  ;;  %v1105_v6 = vadd.f32 %v1042_v57, %v4950_v48  ;;  %v2973_v48 = vrot.slane %v2971_v32, 3 }
 0x1c0   : > { %v1830_v60 = vpop.f32.mrf.mxu0 }
 0x1c1   : > { %v1494_v29 = vadd.f32 %v1431_v39, %v1105_v6  ;;  %v2597_v39 = vshll.u32 %v5389_v35, 16 }
 0x1c2   : > { %v5379_v37 = vpop.f32.mrf.mxu1 }
 0x1c3   : > { %v1891_v7 = vadd.f32 %v1828_v16, %v1494_v29  ;;  %v2592_v16 = vsel %vm2575_vm5, %v2583_v10, %v2591_v45  ;;  %v2599_v41 = vrot.slane %v2597_v39, 3 }
 0x1c5   : > { %v5382_v53 = vadd.f32 %v2092_v56, %v1891_v7  ;;  %v2975_v56 = vsel %vm2972_vm6, %v2973_v48, %v2974_v47 }
 0x1c6   : > { %v1044_v20 = vpop.f32.mrf.mxu2 }
 0x1c7   : > { %v1433_v59 = vpop.f32.mrf.mxu3  ;;  %v1106_v14 = vadd.f32 %v1044_v20, %v4957_v8  ;;  %v2594_v8 = vshrl.u32 %v5389_v35, 16  ;;  %v2976_v20 = vrot.slane %v5389_v35, 3 }
 0x1c8   : > { %v1833_v34 = vpop.f32.mrf.mxu0 }
 0x1c9   : > { %v1495_v33 = vadd.f32 %v1433_v59, %v1106_v14  ;;  %v2596_v17 = vrot.slane %v2594_v8, 2 }
 0x1ca   : > { %v2097_v57 = vpop.f32.mrf.mxu1 }
 0x1cb   : > { %4404 = vmatmul.msk.bf16.vlgmr.msra.gmra.mxu2 %vm546_vm1, %v2314_v22  ;;  %v5394_v36 = vadd.f32 %v1830_v60, %v1495_v33  ;;  %4488 = vmatmul.msk.bf16.vlgmr.msra.gmra.mxu0 %vm546_vm1, %v2975_v56  ;;  %v2315_v60 = vrot.slane %v5389_v35, 2  ;;  %v2600_v10 = vor.u32 %v2599_v41, %v2596_v17  ;;  %v5410_v33 = vld [vmem:[%s4738_s10 + $0x28] sm:$0xff] }
 0x1cc   : > { %4446 = vmatmul.msk.bf16.vlgmr.msra.gmra.mxu3 %vm546_vm1, %v2592_v16 }
 0x1cd   : > { %v2601_v16 = vsel %vm2575_vm5, %v2591_v45, %v2600_v10 }
 0x1ce   : > { %v1047_v6 = vpop.f32.mrf.mxu2 }
 0x1cf   : > { %v1436_v4 = vpop.f32.mrf.mxu3  ;;  %v1107_v52 = vadd.f32 %v1047_v6, %v4970_v24  ;;  %v2316_v24 = vsel %vm1922_vm4, %v2313_v11, %v2315_v60  ;;  %v2606_v11 = vshll.u32 %v5410_v33, 16 }
 0x1d0   : > { %v1835_v32 = vpop.f32.mrf.mxu0 }
 0x1d1   : > { %v1496_v29 = vadd.f32 %v1436_v4, %v1107_v52 }
 0x1d2   : > { %v5400_v7 = vpop.f32.mrf.mxu1 }
 0x1d3   : > { %v1893_v0 = vadd.f32 %v1833_v34, %v1496_v29  ;;  %v2977_v34 = vsel %vm2972_vm6, %v2974_v47, %v2976_v20  ;;  %v2608_v47 = vrot.slane %v2606_v11, 3 }
 0x1d5   : > { %v5403_v48 = vadd.f32 %v2097_v57, %v1893_v0 }
 0x1d6   : > { %v1049_v59 = vpop.f32.mrf.mxu2 }
 0x1d7   : > { %v1438_v14 = vpop.f32.mrf.mxu3  ;;  %v1108_v22 = vadd.f32 %v1049_v59, %v4975_v40  ;;  %v2603_v40 = vshrl.u32 %v5410_v33, 16 }
 0x1d8   : > { %v1838_v8 = vpop.f32.mrf.mxu0 }
 0x1d9   : > { %v1497_v56 = vadd.f32 %v1438_v14, %v1108_v22  ;;  %v2605_v4 = vrot.slane %v2603_v40, 2  ;;  %v2978_v14 = vrot.slane %v5410_v33, 3 }
 0x1da   : > { %v2102_v39 = vpop.f32.mrf.mxu1 }
 0x1db   : > { %4405 = vmatmul.msk.bf16.gmra.mxu2 %vm546_vm1, %v2316_v24  ;;  %v5415_v35 = vadd.f32 %v1835_v32, %v1497_v56  ;;  %4489 = vmatmul.msk.bf16.gmra.mxu0 %vm546_vm1, %v2977_v34  ;;  %v2317_v32 = vrot.slane %v5410_v33, 2  ;;  %v2609_v0 = vor.u32 %v2608_v47, %v2605_v4  ;;  %v5431_v34 = vld [vmem:[%s4738_s10 + $0x30] sm:$0xff] }
 0x1dc   : > { %4447 = vmatmul.msk.bf16.gmra.mxu3 %vm546_vm1, %v2601_v16 }
 0x1dd   : > { %v2610_v56 = vsel %vm2575_vm5, %v2600_v10, %v2609_v0 }
 0x1de   : > { %v1052_v45 = vpop.f32.mrf.mxu2 }
 0x1df   : > { %v1441_v57 = vpop.f32.mrf.mxu3  ;;  %v1109_v6 = vadd.f32 %v1052_v45, %v4992_v55  ;;  %v2318_v55 = vsel %vm1922_vm4, %v2315_v60, %v2317_v32  ;;  %v2615_v60 = vshll.u32 %v5431_v34, 16 }
 0x1e0   : > { %v1840_v17 = vpop.f32.mrf.mxu0 }
 0x1e1   : > { %v1498_v52 = vadd.f32 %v1441_v57, %v1109_v6 }
 0x1e2   : > { %v5421_v41 = vpop.f32.mrf.mxu1 }
 0x1e3   : > { %v1895_v29 = vadd.f32 %v1838_v8, %v1498_v52  ;;  %v2979_v8 = vsel %vm2972_vm6, %v2976_v20, %v2978_v14  ;;  %v2617_v20 = vrot.slane %v2615_v60, 3 }
 0x1e5   : > { %v5424_v59 = vadd.f32 %v2102_v39, %v1895_v29 }
 0x1e6   : > { %v1054_v22 = vpop.f32.mrf.mxu2 }
 0x1e7   : > { %v1443_v24 = vpop.f32.mrf.mxu3  ;;  %v1110_v16 = vadd.f32 %v1054_v22, %v4999_v5  ;;  %v2612_v5 = vshrl.u32 %v5431_v34, 16 }
 0x1e8   : > { %v1843_v11 = vpop.f32.mrf.mxu0 }
 0x1e9   : > { %v1499_v40 = vadd.f32 %v1443_v24, %v1110_v16  ;;  %v2614_v6 = vrot.slane %v2612_v5, 2  ;;  %v2980_v16 = vrot.slane %v5431_v34, 3  ;;  %v5452_v5 = vld [vmem:[%s4738_s10 + $0x38] sm:$0xff] }
 0x1ea   : > { %v2107_v45 = vpop.f32.mrf.mxu1 }
 0x1eb   : > { %4406 = vmatmul.msk.bf16.gmra.mxu2 %vm546_vm1, %v2318_v55  ;;  %v5436_v33 = vadd.f32 %v1840_v17, %v1499_v40  ;;  %4490 = vmatmul.msk.bf16.gmra.mxu0 %vm546_vm1, %v2979_v8  ;;  %v2319_v17 = vrot.slane %v5431_v34, 2  ;;  %v2618_v22 = vor.u32 %v2617_v20, %v2614_v6 }
 0x1ec   : > { %4448 = vmatmul.msk.bf16.gmra.mxu3 %vm546_vm1, %v2610_v56 }
 0x1ed   : > { %v2619_v8 = vsel %vm2575_vm5, %v2609_v0, %v2618_v22  ;;  %v2624_v0 = vshll.u32 %v5452_v5, 16 }
 0x1ee   : > { %v1057_v10 = vpop.f32.mrf.mxu2 }
 0x1ef   : > { %v1446_v39 = vpop.f32.mrf.mxu3  ;;  %v1111_v57 = vadd.f32 %v1057_v10, %v5016_v25  ;;  %v2320_v25 = vsel %vm1922_vm4, %v2317_v32, %v2319_v17  ;;  %v2621_v32 = vshrl.u32 %v5452_v5, 16  ;;  %v2626_v20 = vrot.slane %v2624_v0, 3  ;;  %v5476_v0 = vld [vmem:[%s4738_s10 + $0x40] sm:$0xff] }
 0x1f0   : > { %v1845_v47 = vpop.f32.mrf.mxu0 }
 0x1f1   : > { %v1500_v4 = vadd.f32 %v1446_v39, %v1111_v57  ;;  %v2623_v6 = vrot.slane %v2621_v32, 2 }
 0x1f2   : > { %v5442_v52 = vpop.f32.mrf.mxu1 }
 0x1f3   : > { %v1897_v29 = vadd.f32 %v1843_v11, %v1500_v4  ;;  %v2981_v11 = vsel %vm2972_vm6, %v2978_v14, %v2980_v16 }
 0x1f5   : > { %v5445_v24 = vadd.f32 %v2107_v45, %v1897_v29 }
 0x1f6   : > { %v1059_v55 = vpop.f32.mrf.mxu2 }
 0x1f7   : > { %v1448_v56 = vpop.f32.mrf.mxu3  ;;  %v1112_v40 = vadd.f32 %v1059_v55, %v5029_v46  ;;  %v4630_v46 = vld [vmem:[%s5863_s3] sm:$0xff] }
 0x1f8   : > { %v1848_v10 = vpop.f32.mrf.mxu0  ;;  %3414 = vmatpush.bf16.msra.mxu1 %v4630_v46 }
 0x1f9   : > { %v1501_v60 = vadd.f32 %v1448_v56, %v1112_v40  ;;  %v2321_v56 = vrot.slane %v5452_v5, 2  ;;  %v2627_v40 = vor.u32 %v2626_v20, %v2623_v6 }
 0x1fa   : > { %v2112_v39 = vpop.f32.mrf.mxu1 }
 0x1fb   : > { %4407 = vmatmul.msk.bf16.gmra.mxu2 %vm546_vm1, %v2320_v25  ;;  %v5457_v34 = vadd.f32 %v1845_v47, %v1501_v60  ;;  %4491 = vmatmul.msk.bf16.gmra.mxu0 %vm546_vm1, %v2981_v11  ;;  %v2628_v32 = vsel %vm2575_vm5, %v2618_v22, %v2627_v40 }
 0x1fc   : > { %4449 = vmatmul.msk.bf16.gmra.mxu3 %vm546_vm1, %v2619_v8  ;;  %v2982_v8 = vrot.slane %v5452_v5, 3 }
 0x1fe   : > { %v1062_v45 = vpop.f32.mrf.mxu2 }
 0x1ff   : > { %v1451_v14 = vpop.f32.mrf.mxu3  ;;  %v1113_v57 = vadd.f32 %v1062_v45, %v5045_v1  ;;  %v2322_v1 = vsel %vm1922_vm4, %v2319_v17, %v2321_v56  ;;  %v2633_v17 = vshll.u32 %v5476_v0, 16 }
 0x200   : > { %v1850_v47 = vpop.f32.mrf.mxu0 }
 0x201   : > { %v1502_v4 = vadd.f32 %v1451_v14, %v1113_v57 }
 0x202   : > { %v5466_v29 = vpop.f32.mrf.mxu1 }
 0x203   : > { %5869 = vst [vmem:[#allocation5_spill] sm:$0xff] %v5466_v29  ;;  %v1899_v55 = vadd.f32 %v1848_v10, %v1502_v4  ;;  %v2983_v10 = vsel %vm2972_vm6, %v2980_v16, %v2982_v8  ;;  %v2635_v16 = vrot.slane %v2633_v17, 3  ;;  %v5497_v17 = vld [vmem:[%s4738_s10 + $0x48] sm:$0xff] }
 0x205   : > { %v5469_v25 = vadd.f32 %v2112_v39, %v1899_v55 }
 0x206   : > { %v1064_v60 = vpop.f32.mrf.mxu2 }
 0x207   : > { %v1453_v11 = vpop.f32.mrf.mxu3  ;;  %v1114_v46 = vadd.f32 %v1064_v60, %v5050_v21  ;;  %v2630_v21 = vshrl.u32 %v5476_v0, 16 }
 0x208   : > { %v1853_v14 = vpop.f32.mrf.mxu0 }
 0x209   : > { %v1503_v45 = vadd.f32 %v1453_v11, %v1114_v46  ;;  %v2632_v20 = vrot.slane %v2630_v21, 2 }
 0x20a   : > { %v2117_v57 = vpop.f32.mrf.mxu1 }
 0x20b   : > { %4408 = vmatmul.msk.bf16.gmra.mxu2 %vm546_vm1, %v2322_v1  ;;  %v5481_v5 = vadd.f32 %v1850_v47, %v1503_v45  ;;  %4492 = vmatmul.msk.bf16.gmra.mxu0 %vm546_vm1, %v2983_v10  ;;  %v2323_v47 = vrot.slane %v5476_v0, 2  ;;  %v2636_v46 = vor.u32 %v2635_v16, %v2632_v20 }
 0x20c   : > { %4450 = vmatmul.msk.bf16.gmra.mxu3 %vm546_vm1, %v2628_v32  ;;  %v2984_v32 = vrot.slane %v5476_v0, 3 }
 0x20d   : > { %v2637_v21 = vsel %vm2575_vm5, %v2627_v40, %v2636_v46 }
 0x20e   : > { %v1067_v22 = vpop.f32.mrf.mxu2 }
 0x20f   : > { %v1456_v39 = vpop.f32.mrf.mxu3  ;;  %v1115_v6 = vadd.f32 %v1067_v22, %v5063_v44  ;;  %v2324_v44 = vsel %vm1922_vm4, %v2321_v56, %v2323_v47  ;;  %v2642_v56 = vshll.u32 %v5497_v17, 16 }
 0x210   : > { %v1855_v55 = vpop.f32.mrf.mxu0 }
 0x211   : > { %v1504_v4 = vadd.f32 %v1456_v39, %v1115_v6 }
 0x212   : > { %v5487_v60 = vpop.f32.mrf.mxu1 }
 0x213   : > { %5870 = vst [vmem:[#allocation6_spill] sm:$0xff] %v5487_v60  ;;  %v1901_v11 = vadd.f32 %v1853_v14, %v1504_v4  ;;  %v2985_v14 = vsel %vm2972_vm6, %v2982_v8, %v2984_v32  ;;  %v2644_v8 = vrot.slane %v2642_v56, 3  ;;  %v4608_v56 = vld [vmem:[%s4738_s10 + $0x50] sm:$0xff] }
 0x215   : > { %v5490_v1 = vadd.f32 %v2117_v57, %v1901_v11 }
 0x216   : > { %v1069_v45 = vpop.f32.mrf.mxu2 }
 0x217   : > { %v1458_v10 = vpop.f32.mrf.mxu3  ;;  %v1116_v29 = vadd.f32 %v1069_v45, %v5068_v61  ;;  %v2639_v61 = vshrl.u32 %v5497_v17, 16 }
 0x218   : > { %v1858_v39 = vpop.f32.mrf.mxu0 }
 0x219   : > { %v1505_v22 = vadd.f32 %v1458_v10, %v1116_v29  ;;  %v2641_v20 = vrot.slane %v2639_v61, 2 }
 0x21a   : > { %v2122_v6 = vpop.f32.mrf.mxu1 }
 0x21b   : > { %4409 = vmatmul.msk.bf16.gmra.mxu2 %vm546_vm1, %v2324_v44  ;;  %v5502_v0 = vadd.f32 %v1855_v55, %v1505_v22  ;;  %4493 = vmatmul.msk.bf16.gmra.mxu0 %vm546_vm1, %v2985_v14  ;;  %v2325_v55 = vrot.slane %v5497_v17, 2  ;;  %v2645_v10 = vor.u32 %v2644_v8, %v2641_v20 }
 0x21c   : > { %4451 = vmatmul.msk.bf16.gmra.mxu3 %vm546_vm1, %v2637_v21  ;;  %v2986_v21 = vrot.slane %v5497_v17, 3  ;;  %v2648_v17 = vshrl.u32 %v4608_v56, 16 }
 0x21d   : > { %v2646_v61 = vsel %vm2575_vm5, %v2636_v46, %v2645_v10 }
 0x21e   : > { %v1072_v40 = vpop.f32.mrf.mxu2 }
 0x21f   : > { %v1461_v57 = vpop.f32.mrf.mxu3  ;;  %v1117_v29 = vadd.f32 %v1072_v40, %v5081_v23  ;;  %v2326_v23 = vsel %vm1922_vm4, %v2323_v47, %v2325_v55 }
 0x220   : > { %v1860_v4 = vpop.f32.mrf.mxu0 }
 0x221   : > { %v1506_v16 = vadd.f32 %v1461_v57, %v1117_v29  ;;  %v2987_v57 = vsel %vm2972_vm6, %v2984_v32, %v2986_v21  ;;  %v2651_v29 = vshll.u32 %v4608_v56, 16 }
 0x222   : > { %v5508_v45 = vpop.f32.mrf.mxu1 }
 0x223   : > { %v1903_v11 = vadd.f32 %v1858_v39, %v1506_v16  ;;  %5871 = vst [vmem:[#allocation7_spill] sm:$0xff] %v5508_v45  ;;  %v2653_v8 = vrot.slane %v2651_v29, 3 }
 0x225   : > { %v5511_v44 = vadd.f32 %v2122_v6, %v1903_v11 }
 0x226   : > { %v1074_v22 = vpop.f32.mrf.mxu2 }
 0x227   : > { %v1463_v14 = vpop.f32.mrf.mxu3  ;;  %v1118_v60 = vadd.f32 %v1074_v22, %v5086_v42  ;;  %v2327_v22 = vrot.slane %v4608_v56, 2 }
 0x228   : > { %v1863_v39 = vpop.f32.mrf.mxu0 }
 0x229   : > { %v1507_v40 = vadd.f32 %v1463_v14, %v1118_v60  ;;  %v2650_v60 = vrot.slane %v2648_v17, 2  ;;  %v2328_v45 = vsel %vm1922_vm4, %v2325_v55, %v2327_v22  ;;  %v4609_v17 = vld [vmem:[%s4738_s10 + $0x58] sm:$0xff] }
 0x22a   : > { %v2127_v42 = vpop.f32.mrf.mxu1 }
 0x22b   : > { %4410 = vmatmul.msk.bf16.gmra.mxu2 %vm546_vm1, %v2326_v23  ;;  %v5521_v6 = vadd.f32 %v1860_v4, %v1507_v40  ;;  %4494 = vmatmul.msk.bf16.gmra.mxu0 %vm546_vm1, %v2987_v57  ;;  %v2654_v14 = vor.u32 %v2653_v8, %v2650_v60  ;;  %v2988_v4 = vrot.slane %v4608_v56, 3 }
 0x22c   : > { %4452 = vmatmul.msk.bf16.gmra.mxu3 %vm546_vm1, %v2646_v61 }
 0x22d   : > { %5872 = vst [vmem:[#allocation8_spill] sm:$0xff] %v5521_v6  ;;  %v2655_v6 = vsel %vm2575_vm5, %v2645_v10, %v2654_v14 }
 0x22e   : > { %v1077_v20 = vpop.f32.mrf.mxu2 }
 0x22f   : > { %v1466_v47 = vpop.f32.mrf.mxu3  ;;  %v1119_v46 = vadd.f32 %v1077_v20, %v5103_v3 }
 0x230   : > { %v1865_v32 = vpop.f32.mrf.mxu0 }
 0x231   : > { %v1508_v16 = vadd.f32 %v1466_v47, %v1119_v46 }
 0x232   : > { %v5530_v3 = vpop.f32.mrf.mxu1 }
 0x233   : > { %v1905_v11 = vadd.f32 %v1863_v39, %v1508_v16  ;;  %v2989_v39 = vsel %vm2972_vm6, %v2986_v21, %v2988_v4 }
 0x235   : > { %v5525_v23 = vadd.f32 %v2127_v42, %v1905_v11  ;;  %v2660_v42 = vshll.u32 %v4609_v17, 16 }
 0x236   : > { %v1079_v61 = vpop.f32.mrf.mxu2 }
 0x237   : > { %v1468_v40 = vpop.f32.mrf.mxu3  ;;  %v1120_v57 = vadd.f32 %v1079_v61, %v5110_v28  ;;  %v2657_v28 = vshrl.u32 %v4609_v17, 16  ;;  %v2662_v60 = vrot.slane %v2660_v42, 3 }
 0x238   : > { %v1868_v20 = vpop.f32.mrf.mxu0 }
 0x239   : > { %v1509_v29 = vadd.f32 %v1468_v40, %v1120_v57  ;;  %v2659_v46 = vrot.slane %v2657_v28, 2 }
 0x23a   : > { %v2132_v21 = vpop.f32.mrf.mxu1 }
 0x23b   : > { %4411 = vmatmul.msk.bf16.gmra.mxu2 %vm546_vm1, %v2328_v45  ;;  %v5536_v56 = vadd.f32 %v1865_v32, %v1509_v29  ;;  %4495 = vmatmul.msk.bf16.gmra.mxu0 %vm546_vm1, %v2989_v39  ;;  %v2329_v45 = vrot.slane %v4609_v17, 2  ;;  %v2663_v61 = vor.u32 %v2662_v60, %v2659_v46  ;;  %v2990_v32 = vrot.slane %v4609_v17, 3 }
 0x23c   : > { %4453 = vmatmul.msk.bf16.gmra.mxu3 %vm546_vm1, %v2655_v6 }
 0x23d   : > { %v2330_v39 = vsel %vm1922_vm4, %v2327_v22, %v2329_v45 }
 0x23e   : > { %v1082_v55 = vpop.f32.mrf.mxu2 }
 0x23f   : > { %v1471_v47 = vpop.f32.mrf.mxu3  ;;  %v1121_v10 = vadd.f32 %v1082_v55, %v5133_v51  ;;  %v2664_v51 = vsel %vm2575_vm5, %v2654_v14, %v2663_v61  ;;  %v5546_v55 = vld [vmem:[%s4738_s10 + $0x60] sm:$0xff] }
 0x240   : > { %v1870_v16 = vpop.f32.mrf.mxu0  ;;  %v2669_v22 = vshll.u32 %v5546_v55, 16 }
 0x241   : > { %v1510_v8 = vadd.f32 %v1471_v47, %v1121_v10  ;;  %v2991_v47 = vsel %vm2972_vm6, %v2988_v4, %v2990_v32 }
 0x242   : > { %v2671_v60 = vrot.slane %v2669_v22, 3 }
 0x243   : > { %v1907_v11 = vadd.f32 %v1868_v20, %v1510_v8 }
 0x245   : > { %v5540_v6 = vadd.f32 %v2132_v21, %v1907_v11  ;;  %v2331_v21 = vrot.slane %v5546_v55, 2 }
 0x246   : > { %v1084_v40 = vpop.f32.mrf.mxu2 }
 0x247   : > { %v1473_v57 = vpop.f32.mrf.mxu3  ;;  %v1122_v29 = vadd.f32 %v1084_v40, %v5146_v49  ;;  %v2666_v49 = vshrl.u32 %v5546_v55, 16 }
 0x248   : > { %v3097_v42 = vpop.f32.mrf.mxu0 }
 0x249   : > { %v1511_v28 = vadd.f32 %v1473_v57, %v1122_v29  ;;  %v2668_v46 = vrot.slane %v2666_v49, 2 }
 0x24b   : > { %4412 = vmatmul.msk.bf16.gmra.mxu2 %vm546_vm1, %v2330_v39  ;;  %v5551_v20 = vadd.f32 %v1870_v16, %v1511_v28  ;;  %4496 = vmatmul.msk.bf16.gmra.mxu0 %vm546_vm1, %v2991_v47  ;;  %v2672_v11 = vor.u32 %v2671_v60, %v2668_v46  ;;  %v2992_v16 = vrot.slane %v5546_v55, 3  ;;  %v5562_v39 = vld [vmem:[%s5862_s2] ss:$0 sm:$0xff]  ;;  %v5568_v47 = vld [vmem:[%s4738_s10 + $0x68] sm:$0xff] }
 0x24c   : > { %4454 = vmatmul.msk.bf16.gmra.mxu3 %vm546_vm1, %v2664_v51 }
 0x24d   : > { %v2673_v28 = vsel %vm2575_vm5, %v2663_v61, %v2672_v11  ;;  %v2993_v55 = vsel %vm2972_vm6, %v2990_v32, %v2992_v16 }
 0x24e   : > { %v2436_v17 = vpop.f32.mrf.mxu2 }
 0x24f   : > { %v2833_v14 = vpop.f32.mrf.mxu3  ;;  %v2526_v10 = vadd.f32 %v2436_v17, %v5164_v19  ;;  %v2332_v19 = vsel %vm1922_vm4, %v2329_v45, %v2331_v21  ;;  %v2678_v45 = vshll.u32 %v5568_v47, 16 }
 0x250   : > { %v3099_v4 = vpop.f32.mrf.mxu0 }
 0x251   : > { %v2923_v8 = vadd.f32 %v2833_v14, %v2526_v10 }
 0x253   : > { %v3187_v29 = vadd.f32 %v3097_v42, %v2923_v8  ;;  %v2680_v8 = vrot.slane %v2678_v45, 3  ;;  %v5586_v45 = vld [vmem:[%s4738_s10 + $0x70] sm:$0xff] }
 0x255   : > { %v3227_v17 = vadd.f32 %v5562_v39, %v3187_v29 }
 0x256   : > { %v2438_v40 = vpop.f32.mrf.mxu2 }
 0x257   : > { %v2835_v57 = vpop.f32.mrf.mxu3  ;;  %v2527_v51 = vadd.f32 %v2438_v40, %v5179_v58  ;;  %v2675_v58 = vshrl.u32 %v5568_v47, 16  ;;  %v3263_v46 = vmax.f32 %v3227_v17, 0.0 }
 0x258   : > { %v3102_v22 = vpop.f32.mrf.mxu0 }
 0x259   : > { %v2924_v49 = vadd.f32 %v2835_v57, %v2527_v51  ;;  %v2333_v51 = vrot.slane %v5568_v47, 2 }
 0x25b   : > { %v3188_v42 = vadd.f32 %v3099_v4, %v2924_v49  ;;  %4413 = vmatmul.msk.bf16.gmra.mxu2 %vm546_vm1, %v2332_v19  ;;  %4497 = vmatmul.msk.bf16.gmra.mxu0 %vm546_vm1, %v2993_v55  ;;  %v2677_v4 = vrot.slane %v2675_v58, 2 }
 0x25c   : > { %4455 = vmatmul.msk.bf16.gmra.mxu3 %vm546_vm1, %v2673_v28  ;;  %v2994_v28 = vrot.slane %v5568_v47, 3 }
 0x25d   : > { %v3228_v61 = vadd.f32 %v5562_v39, %v3188_v42  ;;  %v2681_v19 = vor.u32 %v2680_v8, %v2677_v4 }
 0x25e   : > { %v2441_v14 = vpop.f32.mrf.mxu2 }
 0x25f   : > { %v2838_v10 = vpop.f32.mrf.mxu3  ;;  %v3264_v60 = vmax.f32 %v3228_v61, 0.0  ;;  %v2528_v32 = vadd.f32 %v2441_v14, %v5186_v63  ;;  %v2334_v63 = vsel %vm1922_vm4, %v2331_v21, %v2333_v51  ;;  %v2682_v58 = vsel %vm2575_vm5, %v2672_v11, %v2681_v19 }
 0x260   : > { %v3104_v57 = vpop.f32.mrf.mxu0  ;;  %v2687_v21 = vshll.u32 %v5586_v45, 16 }
 0x261   : > { %v3299_v40 = vpack.c.bf16 %v3264_v60, %v3263_v46  ;;  %v2925_v29 = vadd.f32 %v2838_v10, %v2528_v32  ;;  %v2995_v10 = vsel %vm2972_vm6, %v2992_v16, %v2994_v28 }
 0x263   : > { %4522 = vmatmul.msk.bf16.vlgmr.msra.gmra.mxu1 %vm546_vm1, %v3299_v40  ;;  %v3189_v42 = vadd.f32 %v3102_v22, %v2925_v29  ;;  %v2689_v40 = vrot.slane %v2687_v21, 3 }
 0x265   : > { %v3229_v46 = vadd.f32 %v5562_v39, %v3189_v42 }
 0x266   : > { %v2443_v49 = vpop.f32.mrf.mxu2 }
 0x267   : > { %v2840_v55 = vpop.f32.mrf.mxu3  ;;  %v2529_v17 = vadd.f32 %v2443_v49, %v5201_v31  ;;  %v2684_v31 = vshrl.u32 %v5586_v45, 16  ;;  %v3265_v32 = vmax.f32 %v3229_v46, 0.0 }
 0x268   : > { %v3107_v14 = vpop.f32.mrf.mxu0 }
 0x269   : > { %v2926_v61 = vadd.f32 %v2840_v55, %v2529_v17  ;;  %v2686_v8 = vrot.slane %v2684_v31, 2  ;;  %v2335_v55 = vrot.slane %v5586_v45, 2  ;;  %v2996_v17 = vrot.slane %v5586_v45, 3 }
 0x26b   : > { %v3190_v60 = vadd.f32 %v3104_v57, %v2926_v61  ;;  %4414 = vmatmul.msk.bf16.gmra.mxu2 %vm546_vm1, %v2334_v63  ;;  %4498 = vmatmul.msk.bf16.gmra.mxu0 %vm546_vm1, %v2995_v10  ;;  %v2690_v42 = vor.u32 %v2689_v40, %v2686_v8 }
 0x26c   : > { %4456 = vmatmul.msk.bf16.gmra.mxu3 %vm546_vm1, %v2682_v58 }
 0x26d   : > { %v3230_v11 = vadd.f32 %v5562_v39, %v3190_v60  ;;  %v2691_v46 = vsel %vm2575_vm5, %v2681_v19, %v2690_v42  ;;  %v5604_v60 = vld [vmem:[%s4738_s10 + $0x78] sm:$0xff] }
 0x26e   : > { %v2446_v47 = vpop.f32.mrf.mxu2 }
 0x26f   : > { %v2843_v22 = vpop.f32.mrf.mxu3  ;;  %v3266_v4 = vmax.f32 %v3230_v11, 0.0  ;;  %v2530_v16 = vadd.f32 %v2446_v47, %v5208_v54  ;;  %v2336_v54 = vsel %vm1922_vm4, %v2333_v51, %v2335_v55  ;;  %v2997_v11 = vsel %vm2972_vm6, %v2994_v28, %v2996_v17 }
 0x270   : > { %v3109_v57 = vpop.f32.mrf.mxu0  ;;  %v2696_v51 = vshll.u32 %v5604_v60, 16 }
 0x271   : > { %v3300_v29 = vpack.c.bf16 %v3266_v4, %v3265_v32  ;;  %v2927_v49 = vadd.f32 %v2843_v22, %v2530_v16 }
 0x272   : > { %v2698_v8 = vrot.slane %v2696_v51, 3 }
 0x273   : > { %4523 = vmatmul.msk.bf16.gmra.mxu1 %vm546_vm1, %v3300_v29  ;;  %v3191_v61 = vadd.f32 %v3107_v14, %v2927_v49  ;;  %v2337_v49 = vrot.slane %v5604_v60, 2 }
 0x275   : > { %v3231_v47 = vadd.f32 %v5562_v39, %v3191_v61 }
 0x276   : > { %v2448_v63 = vpop.f32.mrf.mxu2 }
 0x277   : > { %v2845_v58 = vpop.f32.mrf.mxu3  ;;  %v2531_v10 = vadd.f32 %v2448_v63, %v5223_v62  ;;  %v2693_v62 = vshrl.u32 %v5604_v60, 16  ;;  %v3267_v32 = vmax.f32 %v3231_v47, 0.0 }
 0x278   : > { %v3112_v21 = vpop.f32.mrf.mxu0 }
 0x279   : > { %v2928_v31 = vadd.f32 %v2845_v58, %v2531_v10  ;;  %v2695_v16 = vrot.slane %v2693_v62, 2  ;;  %v2998_v58 = vrot.slane %v5604_v60, 3 }
 0x27b   : > { %v3192_v22 = vadd.f32 %v3109_v57, %v2928_v31  ;;  %4415 = vmatmul.msk.bf16.gmra.mxu2 %vm546_vm1, %v2336_v54  ;;  %4499 = vmatmul.msk.bf16.gmra.mxu0 %vm546_vm1, %v2997_v11  ;;  %v2699_v63 = vor.u32 %v2698_v8, %v2695_v16  ;;  %v5622_v11 = vld [vmem:[%s4738_s10 + $0x80] sm:$0xff]  ;;  %v2999_v62 = vsel %vm2972_vm6, %v2996_v17, %v2998_v58 }
 0x27c   : > { %4457 = vmatmul.msk.bf16.gmra.mxu3 %vm546_vm1, %v2691_v46 }
 0x27d   : > { %v3232_v19 = vadd.f32 %v5562_v39, %v3192_v22  ;;  %v2700_v31 = vsel %vm2575_vm5, %v2690_v42, %v2699_v63 }
 0x27e   : > { %v2451_v45 = vpop.f32.mrf.mxu2 }
 0x27f   : > { %v2848_v14 = vpop.f32.mrf.mxu3  ;;  %v3268_v4 = vmax.f32 %v3232_v19, 0.0  ;;  %v2532_v28 = vadd.f32 %v2451_v45, %v5233_v43  ;;  %v2338_v43 = vsel %vm1922_vm4, %v2335_v55, %v2337_v49  ;;  %v2705_v55 = vshll.u32 %v5622_v11, 16 }
 0x280   : > { %v3114_v40 = vpop.f32.mrf.mxu0 }
 0x281   : > { %v3301_v57 = vpack.c.bf16 %v3268_v4, %v3267_v32  ;;  %v2929_v29 = vadd.f32 %v2848_v14, %v2532_v28  ;;  %v2707_v4 = vrot.slane %v2705_v55, 3 }
 0x283   : > { %4524 = vmatmul.msk.bf16.gmra.mxu1 %vm546_vm1, %v3301_v57  ;;  %v3193_v54 = vadd.f32 %v3112_v21, %v2929_v29  ;;  %v3000_v29 = vrot.slane %v5622_v11, 3 }
 0x285   : > { %v3233_v51 = vadd.f32 %v5562_v39, %v3193_v54 }
 0x286   : > { %v2453_v61 = vpop.f32.mrf.mxu2 }
 0x287   : > { %v2850_v10 = vpop.f32.mrf.mxu3  ;;  %v2533_v46 = vadd.f32 %v2453_v61, %v5254_v18  ;;  %v2702_v18 = vshrl.u32 %v5622_v11, 16  ;;  %v3269_v45 = vmax.f32 %v3233_v51, 0.0  ;;  %v3001_v51 = vsel %vm2972_vm6, %v2998_v58, %v3000_v29 }
 0x288   : > { %v3117_v22 = vpop.f32.mrf.mxu0 }
 0x289   : > { %v2930_v47 = vadd.f32 %v2850_v10, %v2533_v46  ;;  %v2704_v32 = vrot.slane %v2702_v18, 2 }
 0x28b   : > { %v3194_v19 = vadd.f32 %v3114_v40, %v2930_v47  ;;  %4416 = vmatmul.msk.bf16.gmra.mxu2 %vm546_vm1, %v2338_v43  ;;  %4500 = vmatmul.msk.bf16.gmra.mxu0 %vm546_vm1, %v2999_v62  ;;  %v2339_v40 = vrot.slane %v5622_v11, 2  ;;  %v2708_v57 = vor.u32 %v2707_v4, %v2704_v32 }
 0x28c   : > { %4458 = vmatmul.msk.bf16.gmra.mxu3 %vm546_vm1, %v2700_v31  ;;  %v5640_v31 = vld [vmem:[%s4738_s10 + $0x88] sm:$0xff] }
 0x28d   : > { %v3234_v42 = vadd.f32 %v5562_v39, %v3194_v19  ;;  %v2709_v43 = vsel %vm2575_vm5, %v2699_v63, %v2708_v57  ;;  %v2341_v32 = vrot.slane %v5640_v31, 2 }
 0x28e   : > { %v2456_v60 = vpop.f32.mrf.mxu2 }
 0x28f   : > { %v2853_v21 = vpop.f32.mrf.mxu3  ;;  %v3270_v14 = vmax.f32 %v3234_v42, 0.0  ;;  %v2534_v17 = vadd.f32 %v2456_v60, %v5264_v9  ;;  %v2340_v9 = vsel %vm1922_vm4, %v2337_v49, %v2339_v40  ;;  %v2714_v49 = vshll.u32 %v5640_v31, 16 }
 0x290   : > { %v3119_v28 = vpop.f32.mrf.mxu0 }
 0x291   : > { %v3302_v16 = vpack.c.bf16 %v3270_v14, %v3269_v45  ;;  %v2931_v8 = vadd.f32 %v2853_v21, %v2534_v17  ;;  %v2716_v21 = vrot.slane %v2714_v49, 3 }
 0x293   : > { %4525 = vmatmul.msk.bf16.gmra.mxu1 %vm546_vm1, %v3302_v16  ;;  %v3195_v54 = vadd.f32 %v3117_v22, %v2931_v8 }
 0x295   : > { %v3235_v19 = vadd.f32 %v5562_v39, %v3195_v54 }
 0x296   : > { %v2458_v61 = vpop.f32.mrf.mxu2 }
 0x297   : > { %v2855_v10 = vpop.f32.mrf.mxu3  ;;  %v2535_v46 = vadd.f32 %v2458_v61, %v5279_v13  ;;  %v2711_v13 = vshrl.u32 %v5640_v31, 16  ;;  %v3271_v55 = vmax.f32 %v3235_v19, 0.0 }
 0x298   : > { %v3122_v62 = vpop.f32.mrf.mxu0 }
 0x299   : > { %v2932_v47 = vadd.f32 %v2855_v10, %v2535_v46  ;;  %v2713_v60 = vrot.slane %v2711_v13, 2  ;;  %v5658_v46 = vld [vmem:[%s4738_s10 + $0x90] sm:$0xff] }
 0x29b   : > { %v3196_v18 = vadd.f32 %v3119_v28, %v2932_v47  ;;  %4417 = vmatmul.msk.bf16.gmra.mxu2 %vm546_vm1, %v2340_v9  ;;  %4501 = vmatmul.msk.bf16.gmra.mxu0 %vm546_vm1, %v3001_v51  ;;  %v2717_v4 = vor.u32 %v2716_v21, %v2713_v60  ;;  %v3002_v28 = vrot.slane %v5640_v31, 3  ;;  %v2150_v60 = vadd.f32 %v5306_v38, %v5323_v30 }
 0x29c   : > { %4459 = vmatmul.msk.bf16.gmra.mxu3 %vm546_vm1, %v2709_v43  ;;  %v3004_v21 = vrot.slane %v5658_v46, 3 }
 0x29d   : > { %v3236_v63 = vadd.f32 %v5562_v39, %v3196_v18  ;;  %v2718_v54 = vsel %vm2575_vm5, %v2708_v57, %v2717_v4  ;;  %v3003_v47 = vsel %vm2972_vm6, %v3000_v29, %v3002_v28 }
 0x29e   : > { %v2461_v11 = vpop.f32.mrf.mxu2 }
 0x29f   : > { %v2858_v22 = vpop.f32.mrf.mxu3  ;;  %v3272_v42 = vmax.f32 %v3236_v63, 0.0  ;;  %v2536_v58 = vadd.f32 %v2461_v11, %v5286_v27  ;;  %v2342_v27 = vsel %vm1922_vm4, %v2339_v40, %v2341_v32  ;;  %v2723_v40 = vshll.u32 %v5658_v46, 16 }
 0x2a0   : > { %v3124_v45 = vpop.f32.mrf.mxu0 }
 0x2a1   : > { %v3303_v14 = vpack.c.bf16 %v3272_v42, %v3271_v55  ;;  %v2933_v17 = vadd.f32 %v2858_v22, %v2536_v58  ;;  %v2725_v63 = vrot.slane %v2723_v40, 3  ;;  %v2343_v42 = vrot.slane %v5658_v46, 2 }
 0x2a3   : > { %4526 = vmatmul.msk.bf16.gmra.mxu1 %vm546_vm1, %v3303_v14  ;;  %v3197_v61 = vadd.f32 %v3122_v62, %v2933_v17 }
 0x2a5   : > { %v3237_v51 = vadd.f32 %v5562_v39, %v3197_v61  ;;  %v5677_v61 = vld [vmem:[%s4738_s10 + $0x98] sm:$0xff] }
 0x2a6   : > { %v2463_v16 = vpop.f32.mrf.mxu2  ;;  %v2729_v38 = vshrl.u32 %v5677_v61, 16  ;;  %v2732_v30 = vshll.u32 %v5677_v61, 16 }
 0x2a7   : > { %v2860_v8 = vpop.f32.mrf.mxu3  ;;  %v2537_v10 = vadd.f32 %v2463_v16, %v5301_v50  ;;  %v2720_v50 = vshrl.u32 %v5658_v46, 16  ;;  %v3273_v18 = vmax.f32 %v3237_v51, 0.0  ;;  %v2344_v16 = vsel %vm1922_vm4, %v2341_v32, %v2343_v42 }
 0x2a8   : > { %v3127_v43 = vpop.f32.mrf.mxu0 }
 0x2a9   : > { %v2934_v9 = vadd.f32 %v2860_v8, %v2537_v10  ;;  %v2722_v49 = vrot.slane %v2720_v50, 2  ;;  %v2734_v50 = vrot.slane %v2732_v30, 3 }
 0x2ab   : > { %v3198_v19 = vadd.f32 %v3124_v45, %v2934_v9  ;;  %4418 = vmatmul.msk.bf16.gmra.mxu2 %vm546_vm1, %v2342_v27  ;;  %4502 = vmatmul.msk.bf16.gmra.mxu0 %vm546_vm1, %v3003_v47  ;;  %v2726_v58 = vor.u32 %v2725_v63, %v2722_v49  ;;  %v5873_v49 = vld [vmem:[#allocation3_spill] sm:$0xff]  ;;  %v5874_v63 = vld [vmem:[#allocation2_spill] sm:$0xff] }
 0x2ac   : > { %4460 = vmatmul.msk.bf16.gmra.mxu3 %vm546_vm1, %v2718_v54  ;;  %v3005_v54 = vsel %vm2972_vm6, %v3002_v28, %v3004_v21 }
 0x2ad   : > { %v3238_v57 = vadd.f32 %v5562_v39, %v3198_v19  ;;  %v2727_v8 = vsel %vm2575_vm5, %v2717_v4, %v2726_v58  ;;  %v2731_v19 = vrot.slane %v2729_v38, 2 }
 0x2ae   : > { %v2466_v31 = vpop.f32.mrf.mxu2 }
 0x2af   : > { %v2863_v62 = vpop.f32.mrf.mxu3  ;;  %v3274_v13 = vmax.f32 %v3238_v57, 0.0  ;;  %v2538_v29 = vadd.f32 %v2466_v31, %v5310_v15  ;;  %v2562_v31 = vld [vmem:[%s4738_s10 + $0xa0] sm:$0x7] }
 0x2b0   : > { %v3129_v11 = vpop.f32.mrf.mxu0 }
 0x2b1   : > { %v3304_v22 = vpack.c.bf16 %v3274_v13, %v3273_v18  ;;  %v2935_v55 = vadd.f32 %v2863_v62, %v2538_v29  ;;  %v2345_v18 = vrot.slane %v5677_v61, 2  ;;  %v2735_v13 = vor.u32 %v2734_v50, %v2731_v19 }
 0x2b2   : > { %v2573_v29 = vunpack.c.l.b16 %v2562_v31  ;;  %v5875_v31 = vld [vmem:[#allocation4_spill] sm:$0xff] }
 0x2b3   : > { %4527 = vmatmul.msk.bf16.gmra.mxu1 %vm546_vm1, %v3304_v22  ;;  %v3199_v17 = vadd.f32 %v3127_v43, %v2935_v55  ;;  %v3006_v22 = vrot.slane %v5677_v61, 3 }
 0x2b5   : > { %v3239_v9 = vadd.f32 %v5562_v39, %v3199_v17  ;;  %v2736_v17 = vsel %vm2575_vm5, %v2726_v58, %v2735_v13 }
 0x2b6   : > { %v2468_v45 = vpop.f32.mrf.mxu2 }
 0x2b7   : > { %v2865_v14 = vpop.f32.mrf.mxu3  ;;  %v2539_v15 = vadd.f32 %v2468_v45, %v2150_v60  ;;  %v3275_v43 = vmax.f32 %v3239_v9, 0.0 }
 0x2b8   : > { %v3132_v27 = vpop.f32.mrf.mxu0 }
 0x2b9   : > { %v2936_v10 = vadd.f32 %v2865_v14, %v2539_v15  ;;  %v2346_v14 = vsel %vm1922_vm4, %v2343_v42, %v2345_v18  ;;  %v2574_v15 = vpack.c.b16 %v2573_v29, %v2573_v29 }
 0x2bb   : > { %v3200_v47 = vadd.f32 %v3129_v11, %v2936_v10  ;;  %4419 = vmatmul.msk.bf16.gmra.mxu2 %vm546_vm1, %v2344_v16  ;;  %4503 = vmatmul.msk.bf16.gmra.mxu0 %vm546_vm1, %v3005_v54  ;;  %v2152_v11 = vadd.f32 %v5874_v63, %v5873_v49  ;;  %v3007_v10 = vsel %vm2972_vm6, %v3004_v21, %v3006_v22  ;;  %v2209_v54 = vld [vmem:[%s4738_s10 + $0xa0] sm:$0x3]  ;;  %v2741_v42 = vshll.u32 %v2574_v15, 16 }
 0x2bc   : > { %4461 = vmatmul.msk.bf16.gmra.mxu3 %vm546_vm1, %v2727_v8  ;;  %v2292_v61 = vunpack.c.l.b16 %v2209_v54  ;;  %v3008_v29 = vrot.slane %v2574_v15, 3 }
 0x2bd   : > { %v3240_v32 = vadd.f32 %v5562_v39, %v3200_v47 }
 0x2be   : > { %v2471_v4 = vpop.f32.mrf.mxu2 }
 0x2bf   : > { %v2868_v46 = vpop.f32.mrf.mxu3  ;;  %v3276_v28 = vmax.f32 %v3240_v32, 0.0  ;;  %v2540_v51 = vadd.f32 %v2471_v4, %v5335_v2 }
 0x2c0   : > { %v3134_v57 = vpop.f32.mrf.mxu0 }
 0x2c1   : > { %v3305_v40 = vpack.c.bf16 %v3276_v28, %v3275_v43  ;;  %v2937_v62 = vadd.f32 %v2868_v46, %v2540_v51  ;;  %v2311_v46 = vpack.c.b16 %v2292_v61, %v2292_v61  ;;  %v2743_v28 = vrot.slane %v2741_v42, 3 }
 0x2c3   : > { %4528 = vmatmul.msk.bf16.gmra.mxu1 %vm546_vm1, %v3305_v40  ;;  %v3201_v60 = vadd.f32 %v3132_v27, %v2937_v62  ;;  %v2738_v27 = vshrl.u32 %v2574_v15, 16  ;;  %v2347_v40 = vrot.slane %v2311_v46, 2  ;;  %v2154_v62 = vadd.f32 %v5875_v31, %v5372_v12 }
 0x2c5   : > { %v3241_v9 = vadd.f32 %v5562_v39, %v3201_v60  ;;  %v2740_v43 = vrot.slane %v2738_v27, 2 }
 0x2c6   : > { %v2473_v55 = vpop.f32.mrf.mxu2 }
 0x2c7   : > { %v2870_v2 = vpop.f32.mrf.mxu3  ;;  %v2541_v45 = vadd.f32 %v2473_v55, %v2152_v11  ;;  %v3277_v32 = vmax.f32 %v3241_v9, 0.0 }
 0x2c8   : > { %v3137_v8 = vpop.f32.mrf.mxu0 }
 0x2c9   : > { %v2938_v16 = vadd.f32 %v2870_v2, %v2541_v45  ;;  %v5707_v2 = vpop.f32.mrf.mxu1 }
 0x2cb   : > { %v3202_v47 = vadd.f32 %v3134_v57, %v2938_v16  ;;  %4420 = vmatmul.msk.bf16.gmra.mxu2 %vm546_vm1, %v2346_v14  ;;  %4504 = vmatmul.msk.bf16.gmra.mxu0 %vm546_vm1, %v3007_v10  ;;  %v2744_v57 = vor.u32 %v2743_v28, %v2740_v43 }
 0x2cc   : > { %4462 = vmatmul.msk.bf16.gmra.mxu3 %vm546_vm1, %v2736_v17  ;;  %v3009_v17 = vsel %vm2972_vm6, %v3006_v22, %v3008_v29 }
 0x2cd   : > { %v3242_v58 = vadd.f32 %v5562_v39, %v3202_v47  ;;  %v2745_v60 = vsel %vm2575_vm5, %v2735_v13, %v2744_v57 }
 0x2ce   : > { %v2476_v38 = vpop.f32.mrf.mxu2 }
 0x2cf   : > { %v2873_v30 = vpop.f32.mrf.mxu3  ;;  %v3278_v4 = vmax.f32 %v3242_v58, 0.0  ;;  %v2542_v21 = vadd.f32 %v2476_v38, %v5359_v26  ;;  %v2348_v26 = vsel %vm1922_vm4, %v2345_v18, %v2347_v40  ;;  %v5720_v18 = vld [vmem:[%s5864_s4] ss:$0 sm:$0xff] }
 0x2d0   : > { %v3139_v19 = vpop.f32.mrf.mxu0 }
 0x2d1   : > { %v3306_v51 = vpack.c.bf16 %v3278_v4, %v3277_v32  ;;  %v2939_v50 = vadd.f32 %v2873_v30, %v2542_v21  ;;  %v2156_v32 = vadd.f32 %v5379_v37, %v5394_v36 }
 0x2d3   : > { %4529 = vmatmul.msk.bf16.gmra.mxu1 %vm546_vm1, %v3306_v51  ;;  %v3203_v11 = vadd.f32 %v3137_v8, %v2939_v50 }
 0x2d5   : > { %v3243_v16 = vadd.f32 %v5562_v39, %v3203_v11 }
 0x2d6   : > { %v2478_v49 = vpop.f32.mrf.mxu2 }
 0x2d7   : > { %v2875_v63 = vpop.f32.mrf.mxu3  ;;  %v2543_v55 = vadd.f32 %v2478_v49, %v2154_v62  ;;  %v3279_v8 = vmax.f32 %v3243_v16, 0.0 }
 0x2d8   : > { %v3142_v14 = vpop.f32.mrf.mxu0 }
 0x2d9   : > { %v2940_v45 = vadd.f32 %v2875_v63, %v2543_v55 }
 0x2db   : > { %v3204_v10 = vadd.f32 %v3139_v19, %v2940_v45  ;;  %4421 = vmatmul.msk.bf16.gmra.mxu2 %vm546_vm1, %v2348_v26  ;;  %4505 = vmatmul.msk.bf16.gmra.mxu0 %vm546_vm1, %v3009_v17 }
 0x2dc   : > { %4463 = vmatmul.msk.bf16.gmra.mxu3 %vm546_vm1, %v2745_v60 }
 0x2dd   : > { %v3244_v12 = vadd.f32 %v5562_v39, %v3204_v10 }
 0x2de   : > { %v2481_v13 = vpop.f32.mrf.mxu2 }
 0x2df   : > { %v2878_v15 = vpop.f32.mrf.mxu3  ;;  %v3280_v22 = vmax.f32 %v3244_v12, 0.0  ;;  %v2544_v54 = vadd.f32 %v2481_v13, %v5382_v53  ;;  %v2158_v13 = vadd.f32 %v5400_v7, %v5415_v35 }
 0x2e0   : > { %v3416_v9 = vpop.f32.mrf.mxu1  ;;  %v3144_v27 = vpop.f32.mrf.mxu0 }
 0x2e1   : > { %v3307_v47 = vpack.c.bf16 %v3280_v22, %v3279_v8  ;;  %v3417_v61 = vadd.f32 %v5720_v18, %v3416_v9  ;;  %v2941_v42 = vadd.f32 %v2878_v15, %v2544_v54 }
 0x2e3   : > { %v3542_v58 = vrot.slane %v3417_v61, 2  ;;  %v3543_v38 = vrot.slane %v3417_v61, 4  ;;  %v3544_v30 = vrot.slane %v3417_v61, 6  ;;  %3638 = vst [vmem:[#allocation1] ss:$4 sm:$0xff] %v3417_v61  ;;  %4530 = vmatmul.msk.bf16.gmra.mxu1 %vm546_vm1, %v3307_v47  ;;  %v3205_v4 = vadd.f32 %v3142_v14, %v2941_v42 }
 0x2e5   : > { %3640 = vst [vmem:[#allocation1 + $0x1] ss:$4 sm:$0xff] %v3542_v58  ;;  %v3245_v50 = vadd.f32 %v5562_v39, %v3205_v4 }
 0x2e6   : > { %3642 = vst [vmem:[#allocation1 + $0x2] ss:$4 sm:$0xff] %v3543_v38  ;;  %v2483_v53 = vpop.f32.mrf.mxu2 }
 0x2e7   : > { %v2880_v21 = vpop.f32.mrf.mxu3  ;;  %3644 = vst [vmem:[#allocation1 + $0x3] ss:$4 sm:$0xff] %v3544_v30  ;;  %v2545_v46 = vadd.f32 %v2483_v53, %v2156_v32  ;;  %v3281_v63 = vmax.f32 %v3245_v50, 0.0 }
 0x2e8   : > { %v3418_v43 = vpop.f32.mrf.mxu1  ;;  %v3147_v19 = vpop.f32.mrf.mxu0 }
 0x2e9   : > { %v2942_v28 = vadd.f32 %v2880_v21, %v2545_v46  ;;  %v3419_v51 = vadd.f32 %v5720_v18, %v3418_v43 }
 0x2eb   : > { %v3206_v40 = vadd.f32 %v3144_v27, %v2942_v28  ;;  %v3545_v57 = vrot.slane %v3419_v51, 2  ;;  %v3546_v31 = vrot.slane %v3419_v51, 4  ;;  %3646 = vst [vmem:[#allocation1 + $0x20] ss:$4 sm:$0xff] %v3419_v51  ;;  %v3547_v37 = vrot.slane %v3419_v51, 6 }
 0x2ed   : > { %v3246_v36 = vadd.f32 %v5562_v39, %v3206_v40  ;;  %3648 = vst [vmem:[#allocation1 + $0x21] ss:$4 sm:$0xff] %v3545_v57 }
 0x2ee   : > { %v3653_v62 = vld.sshfl [vmem:[#allocation1] sm:$0xff pattern:$0x73625140]  ;;  %3650 = vst [vmem:[#allocation1 + $0x22] ss:$4 sm:$0xff] %v3546_v31  ;;  %v2486_v29 = vpop.f32.mrf.mxu2 }
 0x2ef   : > { %v2883_v49 = vpop.f32.mrf.mxu3  ;;  %v3282_v11 = vmax.f32 %v3246_v36, 0.0  ;;  %v2546_v55 = vadd.f32 %v2486_v29, %v5403_v48  ;;  %3652 = vst [vmem:[#allocation1 + $0x23] ss:$4 sm:$0xff] %v3547_v37  ;;  %v2160_v37 = vadd.f32 %v5421_v41, %v5436_v33 }
 0x2f0   : > { %v3421_v26 = vpop.f32.mrf.mxu1  ;;  %3837 = vst [vmem:[%s5734_s21] sm:$0xff] %v3653_v62  ;;  %v3149_v14 = vpop.f32.mrf.mxu0 }
 0x2f1   : > { %v3308_v60 = vpack.c.bf16 %v3282_v11, %v3281_v63  ;;  %v3422_v45 = vadd.f32 %v5720_v18, %v3421_v26  ;;  %v2943_v17 = vadd.f32 %v2883_v49, %v2546_v55 }
 0x2f3   : > { %v3548_v16 = vrot.slane %v3422_v45, 2  ;;  %v3549_v10 = vrot.slane %v3422_v45, 4  ;;  %v3550_v12 = vrot.slane %v3422_v45, 6  ;;  %4531 = vmatmul.msk.bf16.gmra.mxu1 %vm546_vm1, %v3308_v60  ;;  %v3207_v15 = vadd.f32 %v3147_v19, %v2943_v17 }
 0x2f5   : > { %3655 = vst [vmem:[#allocation1] ss:$4 sm:$0xff] %v3548_v16  ;;  %v3247_v42 = vadd.f32 %v5562_v39, %v3207_v15 }
 0x2f6   : > { %3656 = vst [vmem:[#allocation1 + $0x1] ss:$4 sm:$0xff] %v3549_v10  ;;  %v2488_v48 = vpop.f32.mrf.mxu2  ;;  %v3654_v22 = vld.sshfl [vmem:[#allocation1 + $0x20] sm:$0xff pattern:$0x73625140] }
 0x2f7   : > { %v2885_v8 = vpop.f32.mrf.mxu3  ;;  %3657 = vst [vmem:[#allocation1 + $0x2] ss:$4 sm:$0xff] %v3550_v12  ;;  %v2547_v54 = vadd.f32 %v2488_v48, %v2158_v13  ;;  %v3283_v53 = vmax.f32 %v3247_v42, 0.0  ;;  %v2162_v42 = vadd.f32 %v5442_v52, %v5457_v34 }
 0x2f8   : > { %v3423_v9 = vpop.f32.mrf.mxu1  ;;  %3838 = vst [vmem:[%s5734_s21 + $0x8] sm:$0xff] %v3654_v22  ;;  %v3152_v27 = vpop.f32.mrf.mxu0 }
 0x2f9   : > { %v2944_v47 = vadd.f32 %v2885_v8, %v2547_v54  ;;  %v3424_v61 = vadd.f32 %v5720_v18, %v3423_v9 }
 0x2fb   : > { %v3208_v58 = vadd.f32 %v3149_v14, %v2944_v47  ;;  %v3551_v38 = vrot.slane %v3424_v61, 2  ;;  %v3552_v30 = vrot.slane %v3424_v61, 4  ;;  %v3553_v7 = vrot.slane %v3424_v61, 6  ;;  %3658 = vst [vmem:[#allocation1 + $0x3] ss:$4 sm:$0xff] %v3424_v61 }
 0x2fd   : > { %v3248_v35 = vadd.f32 %v5562_v39, %v3208_v58  ;;  %3659 = vst [vmem:[#allocation1 + $0x20] ss:$4 sm:$0xff] %v3551_v38 }
 0x2fe   : > { %v2491_v32 = vpop.f32.mrf.mxu2  ;;  %3660 = vst [vmem:[#allocation1 + $0x21] ss:$4 sm:$0xff] %v3552_v30 }
 0x2ff   : > { %v2888_v4 = vpop.f32.mrf.mxu3  ;;  %v3284_v21 = vmax.f32 %v3248_v35, 0.0  ;;  %v2548_v46 = vadd.f32 %v2491_v32, %v5424_v59  ;;  %3661 = vst [vmem:[#allocation1 + $0x22] ss:$4 sm:$0xff] %v3553_v7 }
 0x300   : > { %v3426_v43 = vpop.f32.mrf.mxu1  ;;  %v3154_v19 = vpop.f32.mrf.mxu0 }
 0x301   : > { %v3309_v28 = vpack.c.bf16 %v3284_v21, %v3283_v53  ;;  %v3427_v51 = vadd.f32 %v5720_v18, %v3426_v43  ;;  %v2945_v40 = vadd.f32 %v2888_v4, %v2548_v46 }
 0x302   : > { %v3663_v50 = vld.sshfl [vmem:[#allocation1] sm:$0xff pattern:$0x73625140] }
 0x303   : > { %v3554_v57 = vrot.slane %v3427_v51, 4  ;;  %v3555_v31 = vrot.slane %v3427_v51, 6  ;;  %3662 = vst [vmem:[#allocation1 + $0x23] ss:$4 sm:$0xff] %v3427_v51  ;;  %4532 = vmatmul.msk.bf16.gmra.mxu1 %vm546_vm1, %v3309_v28  ;;  %v3209_v36 = vadd.f32 %v3152_v27, %v2945_v40 }
 0x304   : > { %3839 = vst [vmem:[%s5734_s21 + $0x10] sm:$0xff] %v3663_v50 }
 0x305   : > { %3665 = vst [vmem:[#allocation1] ss:$4 sm:$0xff] %v3554_v57  ;;  %v3249_v26 = vadd.f32 %v5562_v39, %v3209_v36 }
 0x306   : > { %3666 = vst [vmem:[#allocation1 + $0x1] ss:$4 sm:$0xff] %v3555_v31  ;;  %v2493_v59 = vpop.f32.mrf.mxu2 }
 0x307   : > { %v2890_v62 = vpop.f32.mrf.mxu3  ;;  %v2549_v29 = vadd.f32 %v2493_v59, %v2160_v37  ;;  %v3285_v12 = vmax.f32 %v3249_v26, 0.0 }
 0x308   : > { %v3428_v49 = vpop.f32.mrf.mxu1  ;;  %v3157_v55 = vpop.f32.mrf.mxu0 }
 0x309   : > { %v2946_v63 = vadd.f32 %v2890_v62, %v2549_v29  ;;  %v3429_v11 = vadd.f32 %v5720_v18, %v3428_v49 }
 0x30a   : > { %v3664_v60 = vld.sshfl [vmem:[#allocation1 + $0x20] sm:$0xff pattern:$0x73625140] }
 0x30b   : > { %v3210_v45 = vadd.f32 %v3154_v19, %v2946_v63  ;;  %v3556_v14 = vrot.slane %v3429_v11, 2  ;;  %v3557_v17 = vrot.slane %v3429_v11, 4  ;;  %v3558_v16 = vrot.slane %v3429_v11, 6  ;;  %3667 = vst [vmem:[#allocation1 + $0x2] ss:$4 sm:$0xff] %v3429_v11  ;;  %v5876_v63 = vld [vmem:[#allocation5_spill] sm:$0xff] }
 0x30c   : > { %3840 = vst [vmem:[%s5734_s21 + $0x18] sm:$0xff] %v3664_v60  ;;  %v2164_v11 = vadd.f32 %v5876_v63, %v5481_v5 }
 0x30d   : > { %v3250_v41 = vadd.f32 %v5562_v39, %v3210_v45  ;;  %3668 = vst [vmem:[#allocation1 + $0x3] ss:$4 sm:$0xff] %v3556_v14 }
 0x30e   : > { %v2496_v33 = vpop.f32.mrf.mxu2  ;;  %3669 = vst [vmem:[#allocation1 + $0x20] ss:$4 sm:$0xff] %v3557_v17 }
 0x30f   : > { %v2893_v10 = vpop.f32.mrf.mxu3  ;;  %v3286_v13 = vmax.f32 %v3250_v41, 0.0  ;;  %v2550_v15 = vadd.f32 %v2496_v33, %v5445_v24  ;;  %3670 = vst [vmem:[#allocation1 + $0x21] ss:$4 sm:$0xff] %v3558_v16 }
 0x310   : > { %v3431_v48 = vpop.f32.mrf.mxu1  ;;  %v3159_v54 = vpop.f32.mrf.mxu0 }
 0x311   : > { %v3310_v8 = vpack.c.bf16 %v3286_v13, %v3285_v12  ;;  %v3432_v22 = vadd.f32 %v5720_v18, %v3431_v48  ;;  %v2947_v9 = vadd.f32 %v2893_v10, %v2550_v15 }
 0x313   : > { %v3559_v47 = vrot.slane %v3432_v22, 2  ;;  %v3560_v61 = vrot.slane %v3432_v22, 6  ;;  %3671 = vst [vmem:[#allocation1 + $0x22] ss:$4 sm:$0xff] %v3432_v22  ;;  %4533 = vmatmul.msk.bf16.gmra.mxu1 %vm546_vm1, %v3310_v8  ;;  %v3211_v58 = vadd.f32 %v3157_v55, %v2947_v9 }
 0x314   : > { %v3673_v27 = vld.sshfl [vmem:[#allocation1] sm:$0xff pattern:$0x73625140] }
 0x315   : > { %3672 = vst [vmem:[#allocation1 + $0x23] ss:$4 sm:$0xff] %v3559_v47  ;;  %v3251_v53 = vadd.f32 %v5562_v39, %v3211_v58 }
 0x316   : > { %3675 = vst [vmem:[#allocation1] ss:$4 sm:$0xff] %v3560_v61  ;;  %v2498_v24 = vpop.f32.mrf.mxu2 }
 0x317   : > { %v2895_v38 = vpop.f32.mrf.mxu3  ;;  %v2551_v30 = vadd.f32 %v2498_v24, %v2162_v42  ;;  %3841 = vst [vmem:[%s5734_s21 + $0x20] sm:$0xff] %v3673_v27  ;;  %v3287_v50 = vmax.f32 %v3251_v53, 0.0 }
 0x318   : > { %v3433_v7 = vpop.f32.mrf.mxu1  ;;  %v3162_v4 = vpop.f32.mrf.mxu0 }
 0x319   : > { %v2948_v35 = vadd.f32 %v2895_v38, %v2551_v30  ;;  %v3434_v32 = vadd.f32 %v5720_v18, %v3433_v7 }
 0x31b   : > { %v3212_v21 = vadd.f32 %v3159_v54, %v2948_v35  ;;  %v3561_v46 = vrot.slane %v3434_v32, 2  ;;  %v3562_v43 = vrot.slane %v3434_v32, 4  ;;  %v3563_v28 = vrot.slane %v3434_v32, 6  ;;  %3676 = vst [vmem:[#allocation1 + $0x1] ss:$4 sm:$0xff] %v3434_v32  ;;  %v5877_v35 = vld [vmem:[#allocation6_spill] sm:$0xff] }
 0x31c   : > { %v3674_v52 = vld.sshfl [vmem:[#allocation1 + $0x20] sm:$0xff pattern:$0x73625140]  ;;  %v2166_v32 = vadd.f32 %v5877_v35, %v5502_v0 }
 0x31d   : > { %v3252_v34 = vadd.f32 %v5562_v39, %v3212_v21  ;;  %3677 = vst [vmem:[#allocation1 + $0x2] ss:$4 sm:$0xff] %v3561_v46 }
 0x31e   : > { %3678 = vst [vmem:[#allocation1 + $0x3] ss:$4 sm:$0xff] %v3562_v43  ;;  %v2501_v51 = vpop.f32.mrf.mxu2 }
 0x31f   : > { %v2898_v19 = vpop.f32.mrf.mxu3  ;;  %v3288_v40 = vmax.f32 %v3252_v34, 0.0  ;;  %v2552_v57 = vadd.f32 %v2501_v51, %v5469_v25  ;;  %3679 = vst [vmem:[#allocation1 + $0x20] ss:$4 sm:$0xff] %v3563_v28 }
 0x320   : > { %v3436_v31 = vpop.f32.mrf.mxu1  ;;  %3842 = vst [vmem:[%s5734_s21 + $0x28] sm:$0xff] %v3674_v52  ;;  %v3164_v59 = vpop.f32.mrf.mxu0 }
 0x321   : > { %v3311_v37 = vpack.c.bf16 %v3288_v40, %v3287_v50  ;;  %v3437_v36 = vadd.f32 %v5720_v18, %v3436_v31  ;;  %v2949_v62 = vadd.f32 %v2898_v19, %v2552_v57 }
 0x323   : > { %v3564_v29 = vrot.slane %v3437_v36, 2  ;;  %v3565_v49 = vrot.slane %v3437_v36, 4  ;;  %3680 = vst [vmem:[#allocation1 + $0x21] ss:$4 sm:$0xff] %v3437_v36  ;;  %4534 = vmatmul.msk.bf16.gmra.mxu1 %vm546_vm1, %v3311_v37  ;;  %v3213_v25 = vadd.f32 %v3162_v4, %v2949_v62 }
 0x325   : > { %v3683_v55 = vld.sshfl [vmem:[#allocation1] sm:$0xff pattern:$0x73625140]  ;;  %3681 = vst [vmem:[#allocation1 + $0x22] ss:$4 sm:$0xff] %v3564_v29  ;;  %v3253_v33 = vadd.f32 %v5562_v39, %v3213_v25 }
 0x326   : > { %3682 = vst [vmem:[#allocation1 + $0x23] ss:$4 sm:$0xff] %v3565_v49  ;;  %v2503_v26 = vpop.f32.mrf.mxu2 }
 0x327   : > { %v2900_v60 = vpop.f32.mrf.mxu3  ;;  %v2553_v45 = vadd.f32 %v2503_v26, %v2164_v11  ;;  %3843 = vst [vmem:[%s5734_s21 + $0x30] sm:$0xff] %v3683_v55  ;;  %v3289_v54 = vmax.f32 %v3253_v33, 0.0 }
 0x328   : > { %v3438_v14 = vpop.f32.mrf.mxu1  ;;  %v3167_v41 = vpop.f32.mrf.mxu0 }
 0x329   : > { %v2950_v17 = vadd.f32 %v2900_v60, %v2553_v45  ;;  %v3439_v16 = vadd.f32 %v5720_v18, %v3438_v14  ;;  %v5878_v45 = vld [vmem:[#allocation8_spill] sm:$0xff]  ;;  %v5879_v14 = vld [vmem:[#allocation7_spill] sm:$0xff] }
 0x32b   : > { %v3214_v10 = vadd.f32 %v3164_v59, %v2950_v17  ;;  %v3566_v12 = vrot.slane %v3439_v16, 2  ;;  %v3567_v13 = vrot.slane %v3439_v16, 4  ;;  %v3568_v5 = vrot.slane %v3439_v16, 6  ;;  %3685 = vst [vmem:[#allocation1] ss:$4 sm:$0xff] %v3439_v16 }
 0x32c   : > { %v2168_v17 = vadd.f32 %v5879_v14, %v5878_v45 }
 0x32d   : > { %v3254_v15 = vadd.f32 %v5562_v39, %v3214_v10  ;;  %3686 = vst [vmem:[#allocation1 + $0x1] ss:$4 sm:$0xff] %v3566_v12  ;;  %v3684_v48 = vld.sshfl [vmem:[#allocation1 + $0x20] sm:$0xff pattern:$0x73625140] }
 0x32e   : > { %3687 = vst [vmem:[#allocation1 + $0x2] ss:$4 sm:$0xff] %v3567_v13  ;;  %v2506_v8 = vpop.f32.mrf.mxu2 }
 0x32f   : > { %v2903_v22 = vpop.f32.mrf.mxu3  ;;  %v3290_v9 = vmax.f32 %v3254_v15, 0.0  ;;  %3688 = vst [vmem:[#allocation1 + $0x3] ss:$4 sm:$0xff] %v3568_v5  ;;  %v2554_v47 = vadd.f32 %v2506_v8, %v5490_v1  ;;  %v5795_v15 = vld [vmem:[%s5862_s2] ss:$0 sm:$0xff] }
 0x330   : > { %v3441_v61 = vpop.f32.mrf.mxu1  ;;  %3844 = vst [vmem:[%s5734_s21 + $0x38] sm:$0xff] %v3684_v48  ;;  %v3169_v58 = vpop.f32.mrf.mxu0 }
 0x331   : > { %v3312_v27 = vpack.c.bf16 %v3290_v9, %v3289_v54  ;;  %v3442_v42 = vadd.f32 %v5720_v18, %v3441_v61  ;;  %v2951_v24 = vadd.f32 %v2903_v22, %v2554_v47 }
 0x333   : > { %v3569_v38 = vrot.slane %v3442_v42, 2  ;;  %v3570_v30 = vrot.slane %v3442_v42, 4  ;;  %v3571_v7 = vrot.slane %v3442_v42, 6  ;;  %3689 = vst [vmem:[#allocation1 + $0x20] ss:$4 sm:$0xff] %v3442_v42  ;;  %4535 = vmatmul.msk.bf16.gmra.mxu1 %vm546_vm1, %v3312_v27  ;;  %v3215_v1 = vadd.f32 %v3167_v41, %v2951_v24 }
 0x335   : > { %3690 = vst [vmem:[#allocation1 + $0x21] ss:$4 sm:$0xff] %v3569_v38  ;;  %v3255_v51 = vadd.f32 %v5562_v39, %v3215_v1 }
 0x336   : > { %v3693_v4 = vld.sshfl [vmem:[#allocation1] sm:$0xff pattern:$0x73625140]  ;;  %3691 = vst [vmem:[#allocation1 + $0x22] ss:$4 sm:$0xff] %v3570_v30  ;;  %v2508_v53 = vpop.f32.mrf.mxu2 }
 0x337   : > { %v2905_v21 = vpop.f32.mrf.mxu3  ;;  %3692 = vst [vmem:[#allocation1 + $0x23] ss:$4 sm:$0xff] %v3571_v7  ;;  %v2555_v46 = vadd.f32 %v2508_v53, %v2166_v32  ;;  %v3291_v59 = vmax.f32 %v3255_v51, 0.0 }
 0x338   : > { %v3443_v43 = vpop.f32.mrf.mxu1  ;;  %3845 = vst [vmem:[%s5734_s21 + $0x40] sm:$0xff] %v3693_v4  ;;  %v3172_v34 = vpop.f32.mrf.mxu0 }
 0x339   : > { %v2952_v28 = vadd.f32 %v2905_v21, %v2555_v46  ;;  %v3444_v52 = vadd.f32 %v5720_v18, %v3443_v43  ;;  %v2170_v21 = vadd.f32 %v5530_v3, %v5536_v56 }
 0x33b   : > { %v3216_v19 = vadd.f32 %v3169_v58, %v2952_v28  ;;  %v3572_v50 = vrot.slane %v3444_v52, 2  ;;  %v3573_v0 = vrot.slane %v3444_v52, 4  ;;  %v3574_v40 = vrot.slane %v3444_v52, 6 }
 0x33d   : > { %v3256_v57 = vadd.f32 %v5562_v39, %v3216_v19  ;;  %3695 = vst [vmem:[#allocation1] ss:$4 sm:$0xff] %v3572_v50 }
 0x33e   : > { %v3694_v31 = vld.sshfl [vmem:[#allocation1 + $0x20] sm:$0xff pattern:$0x73625140]  ;;  %3696 = vst [vmem:[#allocation1 + $0x1] ss:$4 sm:$0xff] %v3573_v0  ;;  %v2511_v37 = vpop.f32.mrf.mxu2 }
 0x33f   : > { %v2908_v36 = vpop.f32.mrf.mxu3  ;;  %v3292_v62 = vmax.f32 %v3256_v57, 0.0  ;;  %3697 = vst [vmem:[#allocation1 + $0x2] ss:$4 sm:$0xff] %v3574_v40  ;;  %v2556_v29 = vadd.f32 %v2511_v37, %v5511_v44 }
 0x340   : > { %v3446_v49 = vpop.f32.mrf.mxu1  ;;  %3846 = vst [vmem:[%s5734_s21 + $0x48] sm:$0xff] %v3694_v31  ;;  %v3174_v55 = vpop.f32.mrf.mxu0 }
 0x341   : > { %v3313_v63 = vpack.c.bf16 %v3292_v62, %v3291_v59  ;;  %v3447_v11 = vadd.f32 %v5720_v18, %v3446_v49  ;;  %v2953_v25 = vadd.f32 %v2908_v36, %v2556_v29 }
 0x343   : > { %v3575_v26 = vrot.slane %v3447_v11, 2  ;;  %v3576_v60 = vrot.slane %v3447_v11, 4  ;;  %v3577_v39 = vrot.slane %v3447_v11, 6  ;;  %3698 = vst [vmem:[#allocation1 + $0x3] ss:$4 sm:$0xff] %v3447_v11  ;;  %4536 = vmatmul.msk.bf16.gmra.mxu1 %vm546_vm1, %v3313_v63  ;;  %v3217_v41 = vadd.f32 %v3172_v34, %v2953_v25 }
 0x345   : > { %3699 = vst [vmem:[#allocation1 + $0x20] ss:$4 sm:$0xff] %v3575_v26  ;;  %v3257_v48 = vadd.f32 %v5795_v15, %v3217_v41 }
 0x346   : > { %3700 = vst [vmem:[#allocation1 + $0x21] ss:$4 sm:$0xff] %v3576_v60  ;;  %v2513_v16 = vpop.f32.mrf.mxu2 }
 0x347   : > { %v2910_v44 = vpop.f32.mrf.mxu3  ;;  %3701 = vst [vmem:[#allocation1 + $0x22] ss:$4 sm:$0xff] %v3577_v39  ;;  %v2557_v33 = vadd.f32 %v2513_v16, %v2168_v17  ;;  %v3293_v42 = vmax.f32 %v3257_v48, 0.0  ;;  %v2172_v39 = vadd.f32 %v5707_v2, %v5551_v20 }
 0x348   : > { %v3448_v10 = vpop.f32.mrf.mxu1  ;;  %v3177_v9 = vpop.f32.mrf.mxu0 }
 0x349   : > { %v2954_v12 = vadd.f32 %v2910_v44, %v2557_v33  ;;  %v3449_v13 = vadd.f32 %v5720_v18, %v3448_v10 }
 0x34a   : > { %v3703_v5 = vld.sshfl [vmem:[#allocation1] sm:$0xff pattern:$0x73625140] }
 0x34b   : > { %v3218_v8 = vadd.f32 %v3174_v55, %v2954_v12  ;;  %v3578_v22 = vrot.slane %v3449_v13, 4  ;;  %v3579_v54 = vrot.slane %v3449_v13, 6  ;;  %3702 = vst [vmem:[#allocation1 + $0x23] ss:$4 sm:$0xff] %v3449_v13 }
 0x34c   : > { %3847 = vst [vmem:[%s5734_s21 + $0x50] sm:$0xff] %v3703_v5 }
 0x34d   : > { %v3258_v47 = vadd.f32 %v5795_v15, %v3218_v8  ;;  %3705 = vst [vmem:[#allocation1] ss:$4 sm:$0xff] %v3578_v22 }
 0x34e   : > { %3706 = vst [vmem:[#allocation1 + $0x1] ss:$4 sm:$0xff] %v3579_v54  ;;  %v2516_v61 = vpop.f32.mrf.mxu2 }
 0x34f   : > { %v2913_v27 = vpop.f32.mrf.mxu3  ;;  %v3294_v58 = vmax.f32 %v3258_v47, 0.0  ;;  %v2558_v24 = vadd.f32 %v2516_v61, %v5525_v23 }
 0x350   : > { %v3451_v38 = vpop.f32.mrf.mxu1  ;;  %v3179_v46 = vpop.f32.mrf.mxu0 }
 0x351   : > { %v3314_v30 = vpack.c.bf16 %v3294_v58, %v3293_v42  ;;  %v3452_v7 = vadd.f32 %v5720_v18, %v3451_v38  ;;  %v2955_v32 = vadd.f32 %v2913_v27, %v2558_v24 }
 0x352   : > { %v3704_v35 = vld.sshfl [vmem:[#allocation1 + $0x20] sm:$0xff pattern:$0x73625140] }
 0x353   : > { %v3580_v4 = vrot.slane %v3452_v7, 2  ;;  %v3581_v1 = vrot.slane %v3452_v7, 4  ;;  %v3582_v53 = vrot.slane %v3452_v7, 6  ;;  %3707 = vst [vmem:[#allocation1 + $0x2] ss:$4 sm:$0xff] %v3452_v7  ;;  %4537 = vmatmul.msk.bf16.gmra.mxu1 %vm546_vm1, %v3314_v30  ;;  %v3219_v28 = vadd.f32 %v3177_v9, %v2955_v32 }
 0x354   : > { %3848 = vst [vmem:[%s5734_s21 + $0x58] sm:$0xff] %v3704_v35 }
 0x355   : > { %3708 = vst [vmem:[#allocation1 + $0x3] ss:$4 sm:$0xff] %v3580_v4  ;;  %v3259_v50 = vadd.f32 %v5795_v15, %v3219_v28 }
 0x356   : > { %3709 = vst [vmem:[#allocation1 + $0x20] ss:$4 sm:$0xff] %v3581_v1  ;;  %v2518_v23 = vpop.f32.mrf.mxu2 }
 0x357   : > { %v2915_v43 = vpop.f32.mrf.mxu3  ;;  %3710 = vst [vmem:[#allocation1 + $0x21] ss:$4 sm:$0xff] %v3582_v53  ;;  %v2559_v52 = vadd.f32 %v2518_v23, %v2170_v21  ;;  %v3295_v36 = vmax.f32 %v3259_v50, 0.0 }
 0x358   : > { %v3453_v34 = vpop.f32.mrf.mxu1  ;;  %v3182_v29 = vpop.f32.mrf.mxu0 }
 0x359   : > { %v2956_v51 = vadd.f32 %v2915_v43, %v2559_v52  ;;  %v3454_v19 = vadd.f32 %v5720_v18, %v3453_v34 }
 0x35b   : > { %v3220_v0 = vadd.f32 %v3179_v46, %v2956_v51  ;;  %v3583_v40 = vrot.slane %v3454_v19, 2  ;;  %v3584_v57 = vrot.slane %v3454_v19, 6  ;;  %3711 = vst [vmem:[#allocation1 + $0x22] ss:$4 sm:$0xff] %v3454_v19 }
 0x35c   : > { %v3713_v3 = vld.sshfl [vmem:[#allocation1] sm:$0xff pattern:$0x73625140] }
 0x35d   : > { %3849 = vst [vmem:[%s5734_s21 + $0x60] sm:$0xff] %v3713_v3  ;;  %v3260_v56 = vadd.f32 %v5795_v15, %v3220_v0 }
 0x35e   : > { %3712 = vst [vmem:[#allocation1 + $0x23] ss:$4 sm:$0xff] %v3583_v40  ;;  %v2521_v31 = vpop.f32.mrf.mxu2 }
 0x35f   : > { %v2918_v37 = vpop.f32.mrf.mxu3  ;;  %v3296_v59 = vmax.f32 %v3260_v56, 0.0  ;;  %3715 = vst [vmem:[#allocation1] ss:$4 sm:$0xff] %v3584_v57  ;;  %v2560_v62 = vadd.f32 %v2521_v31, %v5540_v6 }
 0x360   : > { %v3456_v49 = vpop.f32.mrf.mxu1  ;;  %v3184_v10 = vpop.f32.mrf.mxu0 }
 0x361   : > { %v3315_v63 = vpack.c.bf16 %v3296_v59, %v3295_v36  ;;  %v3457_v11 = vadd.f32 %v5720_v18, %v3456_v49  ;;  %v2957_v55 = vadd.f32 %v2918_v37, %v2560_v62 }
 0x363   : > { %v3585_v25 = vrot.slane %v3457_v11, 2  ;;  %v3586_v26 = vrot.slane %v3457_v11, 4  ;;  %3716 = vst [vmem:[#allocation1 + $0x1] ss:$4 sm:$0xff] %v3457_v11  ;;  %4538 = vmatmul.msk.bf16.gmra.mxu1 %vm546_vm1, %v3315_v63  ;;  %v3587_v60 = vrot.slane %v3457_v11, 6  ;;  %v3221_v6 = vadd.f32 %v3182_v29, %v2957_v55 }
 0x365   : > { %v3714_v45 = vld.sshfl [vmem:[#allocation1 + $0x20] sm:$0xff pattern:$0x73625140]  ;;  %3717 = vst [vmem:[#allocation1 + $0x2] ss:$4 sm:$0xff] %v3585_v25  ;;  %v3261_v12 = vadd.f32 %v5795_v15, %v3221_v6 }
 0x366   : > { %3850 = vst [vmem:[%s5734_s21 + $0x68] sm:$0xff] %v3714_v45  ;;  %v2523_v14 = vpop.f32.mrf.mxu2 }
 0x367   : > { %3718 = vst [vmem:[#allocation1 + $0x3] ss:$4 sm:$0xff] %v3586_v26  ;;  %v2561_v17 = vadd.f32 %v2523_v14, %v2172_v39  ;;  %v2920_v16 = vpop.f32.mrf.mxu3  ;;  %v3297_v8 = vmax.f32 %v3261_v12, 0.0 }
 0x368   : > { %3719 = vst [vmem:[#allocation1 + $0x20] ss:$4 sm:$0xff] %v3587_v60  ;;  %v3458_v44 = vpop.f32.mrf.mxu1 }
 0x369   : > { %v2958_v41 = vadd.f32 %v2920_v16, %v2561_v17  ;;  %v3459_v33 = vadd.f32 %v5720_v18, %v3458_v44 }
 0x36b   : > { %v3222_v13 = vadd.f32 %v3184_v10, %v2958_v41  ;;  %v3588_v5 = vrot.slane %v3459_v33, 2  ;;  %v3589_v20 = vrot.slane %v3459_v33, 4  ;;  %3720 = vst [vmem:[#allocation1 + $0x21] ss:$4 sm:$0xff] %v3459_v33 }
 0x36d   : > { %v3262_v2 = vadd.f32 %v5795_v15, %v3222_v13  ;;  %3721 = vst [vmem:[#allocation1 + $0x22] ss:$4 sm:$0xff] %v3588_v5 }
 0x36e   : > { %v3723_v48 = vld.sshfl [vmem:[#allocation1] sm:$0xff pattern:$0x73625140]  ;;  %3722 = vst [vmem:[#allocation1 + $0x23] ss:$4 sm:$0xff] %v3589_v20 }
 0x36f   : > { %3851 = vst [vmem:[%s5734_s21 + $0x70] sm:$0xff] %v3723_v48  ;;  %v3298_v22 = vmax.f32 %v3262_v2, 0.0 }
 0x370   : > { %v3461_v54 = vpop.f32.mrf.mxu1 }
 0x371   : > { %v3316_v9 = vpack.c.bf16 %v3298_v22, %v3297_v8  ;;  %v3462_v47 = vadd.f32 %v5720_v18, %v3461_v54 }
 0x373   : > { %v3590_v61 = vrot.slane %v3462_v47, 2  ;;  %v3591_v27 = vrot.slane %v3462_v47, 4  ;;  %3725 = vst [vmem:[#allocation1] ss:$4 sm:$0xff] %v3462_v47  ;;  %4539 = vmatmul.msk.bf16.gmra.mxu1 %vm546_vm1, %v3316_v9  ;;  %v3592_v42 = vrot.slane %v3462_v47, 6 }
 0x375   : > { %v3724_v58 = vld.sshfl [vmem:[#allocation1 + $0x20] sm:$0xff pattern:$0x73625140]  ;;  %3726 = vst [vmem:[#allocation1 + $0x1] ss:$4 sm:$0xff] %v3590_v61 }
 0x376   : > { %3852 = vst [vmem:[%s5734_s21 + $0x78] sm:$0xff] %v3724_v58 }
 0x377   : > { %3727 = vst [vmem:[#allocation1 + $0x2] ss:$4 sm:$0xff] %v3591_v27 }
 0x378   : > { %3728 = vst [vmem:[#allocation1 + $0x3] ss:$4 sm:$0xff] %v3592_v42  ;;  %v3463_v15 = vpop.f32.mrf.mxu1 }
 0x379   : > { %v3464_v24 = vadd.f32 %v5720_v18, %v3463_v15 }
 0x37b   : > { %v3593_v38 = vrot.slane %v3464_v24, 2  ;;  %v3594_v30 = vrot.slane %v3464_v24, 4  ;;  %v3595_v7 = vrot.slane %v3464_v24, 6  ;;  %3729 = vst [vmem:[#allocation1 + $0x20] ss:$4 sm:$0xff] %v3464_v24 }
 0x37d   : > { %3730 = vst [vmem:[#allocation1 + $0x21] ss:$4 sm:$0xff] %v3593_v38 }
 0x37e   : > { %3731 = vst [vmem:[#allocation1 + $0x22] ss:$4 sm:$0xff] %v3594_v30 }
 0x37f   : > { %v3733_v35 = vld.sshfl [vmem:[#allocation1] sm:$0xff pattern:$0x73625140]  ;;  %3732 = vst [vmem:[#allocation1 + $0x23] ss:$4 sm:$0xff] %v3595_v7 }
 0x380   : > { %3853 = vst [vmem:[%s5734_s21 + $0x80] sm:$0xff] %v3733_v35  ;;  %v3466_v32 = vpop.f32.mrf.mxu1 }
 0x381   : > { %v3467_v4 = vadd.f32 %v5720_v18, %v3466_v32 }
 0x383   : > { %v3596_v1 = vrot.slane %v3467_v4, 2  ;;  %v3597_v53 = vrot.slane %v3467_v4, 4  ;;  %v3598_v21 = vrot.slane %v3467_v4, 6 }
 0x385   : > { %3735 = vst [vmem:[#allocation1] ss:$4 sm:$0xff] %v3596_v1 }
 0x386   : > { %v3734_v46 = vld.sshfl [vmem:[#allocation1 + $0x20] sm:$0xff pattern:$0x73625140]  ;;  %3736 = vst [vmem:[#allocation1 + $0x1] ss:$4 sm:$0xff] %v3597_v53 }
 0x387   : > { %3854 = vst [vmem:[%s5734_s21 + $0x88] sm:$0xff] %v3734_v46 }
 0x388   : > { %3737 = vst [vmem:[#allocation1 + $0x2] ss:$4 sm:$0xff] %v3598_v21  ;;  %v3468_v23 = vpop.f32.mrf.mxu1 }
 0x389   : > { %v3469_v43 = vadd.f32 %v5720_v18, %v3468_v23 }
 0x38b   : > { %v3599_v28 = vrot.slane %v3469_v43, 2  ;;  %v3600_v52 = vrot.slane %v3469_v43, 4  ;;  %v3601_v34 = vrot.slane %v3469_v43, 6  ;;  %3738 = vst [vmem:[#allocation1 + $0x3] ss:$4 sm:$0xff] %v3469_v43 }
 0x38d   : > { %3739 = vst [vmem:[#allocation1 + $0x20] ss:$4 sm:$0xff] %v3599_v28 }
 0x38e   : > { %3740 = vst [vmem:[#allocation1 + $0x21] ss:$4 sm:$0xff] %v3600_v52 }
 0x38f   : > { %3741 = vst [vmem:[#allocation1 + $0x22] ss:$4 sm:$0xff] %v3601_v34 }
 0x390   : > { %v3471_v51 = vpop.f32.mrf.mxu1 }
 0x391   : > { %v3472_v19 = vadd.f32 %v5720_v18, %v3471_v51 }
 0x392   : > { %v3743_v50 = vld.sshfl [vmem:[#allocation1] sm:$0xff pattern:$0x73625140] }
 0x393   : > { %3855 = vst [vmem:[%s5734_s21 + $0x90] sm:$0xff] %v3743_v50  ;;  %v3602_v0 = vrot.slane %v3472_v19, 4  ;;  %v3603_v40 = vrot.slane %v3472_v19, 6 }
 0x394   : > { %3742 = vst [vmem:[#allocation1 + $0x23] ss:$4 sm:$0xff] %v3472_v19 }
 0x395   : > { %3745 = vst [vmem:[#allocation1] ss:$4 sm:$0xff] %v3602_v0 }
 0x396   : > { %3746 = vst [vmem:[#allocation1 + $0x1] ss:$4 sm:$0xff] %v3603_v40  ;;  %v4667_v40 = vld [vmem:[%s5864_s4] ss:$0 sm:$0xff] }
 0x398   : > { %v3473_v57 = vpop.f32.mrf.mxu1 }
 0x399   : > { %v3474_v3 = vadd.f32 %v5720_v18, %v3473_v57 }
 0x39b   : > { %v3744_v56 = vld.sshfl [vmem:[#allocation1 + $0x20] sm:$0xff pattern:$0x73625140]  ;;  %v3604_v31 = vrot.slane %v3474_v3, 2  ;;  %v3605_v37 = vrot.slane %v3474_v3, 4  ;;  %v3606_v36 = vrot.slane %v3474_v3, 6 }
 0x39c   : > { %3856 = vst [vmem:[%s5734_s21 + $0x98] sm:$0xff] %v3744_v56 }
 0x39d   : > { %3747 = vst [vmem:[#allocation1 + $0x2] ss:$4 sm:$0xff] %v3474_v3 }
 0x39e   : > { %3748 = vst [vmem:[#allocation1 + $0x3] ss:$4 sm:$0xff] %v3604_v31 }
 0x39f   : > { %3749 = vst [vmem:[#allocation1 + $0x20] ss:$4 sm:$0xff] %v3605_v37 }
 0x3a0   : > { %3750 = vst [vmem:[#allocation1 + $0x21] ss:$4 sm:$0xff] %v3606_v36  ;;  %v3476_v59 = vpop.f32.mrf.mxu1 }
 0x3a1   : > { %v3477_v62 = vadd.f32 %v5720_v18, %v3476_v59 }
 0x3a3   : > { %v3607_v29 = vrot.slane %v3477_v62, 2  ;;  %v3608_v49 = vrot.slane %v3477_v62, 6  ;;  %3751 = vst [vmem:[#allocation1 + $0x22] ss:$4 sm:$0xff] %v3477_v62 }
 0x3a5   : > { %v3753_v63 = vld.sshfl [vmem:[#allocation1] sm:$0xff pattern:$0x73625140]  ;;  %3752 = vst [vmem:[#allocation1 + $0x23] ss:$4 sm:$0xff] %v3607_v29 }
 0x3a6   : > { %3857 = vst [vmem:[%s5734_s21 + $0xa0] sm:$0xff] %v3753_v63 }
 0x3a7   : > { %3755 = vst [vmem:[#allocation1] ss:$4 sm:$0xff] %v3608_v49 }
 0x3a8   : > { %v3478_v11 = vpop.f32.mrf.mxu1 }
 0x3a9   : > { %v3479_v55 = vadd.f32 %v5720_v18, %v3478_v11 }
 0x3ab   : > { %v3609_v25 = vrot.slane %v3479_v55, 2  ;;  %v3610_v26 = vrot.slane %v3479_v55, 4  ;;  %3756 = vst [vmem:[#allocation1 + $0x1] ss:$4 sm:$0xff] %v3479_v55  ;;  %v3611_v39 = vrot.slane %v3479_v55, 6 }
 0x3ac   : > { %v3754_v60 = vld.sshfl [vmem:[#allocation1 + $0x20] sm:$0xff pattern:$0x73625140] }
 0x3ad   : > { %3858 = vst [vmem:[%s5734_s21 + $0xa8] sm:$0xff] %v3754_v60 }
 0x3ae   : > { %3757 = vst [vmem:[#allocation1 + $0x2] ss:$4 sm:$0xff] %v3609_v25 }
 0x3af   : > { %3758 = vst [vmem:[#allocation1 + $0x3] ss:$4 sm:$0xff] %v3610_v26 }
 0x3b0   : > { %3759 = vst [vmem:[#allocation1 + $0x20] ss:$4 sm:$0xff] %v3611_v39  ;;  %v3481_v45 = vpop.f32.mrf.mxu1 }
 0x3b1   : > { %v3482_v14 = vadd.f32 %v5720_v18, %v3481_v45 }
 0x3b3   : > { %v3612_v6 = vrot.slane %v3482_v14, 2  ;;  %v3613_v17 = vrot.slane %v3482_v14, 4  ;;  %3760 = vst [vmem:[#allocation1 + $0x21] ss:$4 sm:$0xff] %v3482_v14 }
 0x3b5   : > { %3761 = vst [vmem:[#allocation1 + $0x22] ss:$4 sm:$0xff] %v3612_v6 }
 0x3b6   : > { %v3763_v16 = vld.sshfl [vmem:[#allocation1] sm:$0xff pattern:$0x73625140]  ;;  %3762 = vst [vmem:[#allocation1 + $0x23] ss:$4 sm:$0xff] %v3613_v17 }
 0x3b7   : > { %3859 = vst [vmem:[%s5734_s21 + $0xb0] sm:$0xff] %v3763_v16 }
 0x3b8   : > { %v3483_v44 = vpop.f32.mrf.mxu1 }
 0x3b9   : > { %v3484_v41 = vadd.f32 %v5720_v18, %v3483_v44 }
 0x3bb   : > { %v3614_v33 = vrot.slane %v3484_v41, 2  ;;  %v3615_v10 = vrot.slane %v3484_v41, 4  ;;  %3765 = vst [vmem:[#allocation1] ss:$4 sm:$0xff] %v3484_v41  ;;  %v3616_v12 = vrot.slane %v3484_v41, 6 }
 0x3bd   : > { %v3764_v13 = vld.sshfl [vmem:[#allocation1 + $0x20] sm:$0xff pattern:$0x73625140]  ;;  %3766 = vst [vmem:[#allocation1 + $0x1] ss:$4 sm:$0xff] %v3614_v33 }
 0x3be   : > { %3860 = vst [vmem:[%s5734_s21 + $0xb8] sm:$0xff] %v3764_v13 }
 0x3bf   : > { %3767 = vst [vmem:[#allocation1 + $0x2] ss:$4 sm:$0xff] %v3615_v10 }
 0x3c0   : > { %3768 = vst [vmem:[#allocation1 + $0x3] ss:$4 sm:$0xff] %v3616_v12  ;;  %v3486_v5 = vpop.f32.mrf.mxu1 }
 0x3c1   : > { %v3487_v20 = vadd.f32 %v5720_v18, %v3486_v5 }
 0x3c3   : > { %v3617_v2 = vrot.slane %v3487_v20, 2  ;;  %v3618_v48 = vrot.slane %v3487_v20, 4  ;;  %v3619_v8 = vrot.slane %v3487_v20, 6  ;;  %3769 = vst [vmem:[#allocation1 + $0x20] ss:$4 sm:$0xff] %v3487_v20 }
 0x3c5   : > { %3770 = vst [vmem:[#allocation1 + $0x21] ss:$4 sm:$0xff] %v3617_v2 }
 0x3c6   : > { %3771 = vst [vmem:[#allocation1 + $0x22] ss:$4 sm:$0xff] %v3618_v48 }
 0x3c7   : > { %v3773_v22 = vld.sshfl [vmem:[#allocation1] sm:$0xff pattern:$0x73625140]  ;;  %3772 = vst [vmem:[#allocation1 + $0x23] ss:$4 sm:$0xff] %v3619_v8 }
 0x3c8   : > { %3861 = vst [vmem:[%s5734_s21 + $0xc0] sm:$0xff] %v3773_v22  ;;  %v3488_v54 = vpop.f32.mrf.mxu1 }
 0x3c9   : > { %v3489_v9 = vadd.f32 %v5720_v18, %v3488_v54 }
 0x3cb   : > { %v3620_v47 = vrot.slane %v3489_v9, 2  ;;  %v3621_v61 = vrot.slane %v3489_v9, 4  ;;  %v3622_v27 = vrot.slane %v3489_v9, 6 }
 0x3cd   : > { %3775 = vst [vmem:[#allocation1] ss:$4 sm:$0xff] %v3620_v47 }
 0x3ce   : > { %v3774_v42 = vld.sshfl [vmem:[#allocation1 + $0x20] sm:$0xff pattern:$0x73625140]  ;;  %3776 = vst [vmem:[#allocation1 + $0x1] ss:$4 sm:$0xff] %v3621_v61 }
 0x3cf   : > { %3862 = vst [vmem:[%s5734_s21 + $0xc8] sm:$0xff] %v3774_v42 }
 0x3d0   : > { %3777 = vst [vmem:[#allocation1 + $0x2] ss:$4 sm:$0xff] %v3622_v27  ;;  %v3491_v58 = vpop.f32.mrf.mxu1 }
 0x3d1   : > { %v3492_v15 = vadd.f32 %v5720_v18, %v3491_v58 }
 0x3d3   : > { %v3623_v24 = vrot.slane %v3492_v15, 2  ;;  %v3624_v38 = vrot.slane %v3492_v15, 4  ;;  %v3625_v30 = vrot.slane %v3492_v15, 6  ;;  %3778 = vst [vmem:[#allocation1 + $0x3] ss:$4 sm:$0xff] %v3492_v15 }
 0x3d5   : > { %3779 = vst [vmem:[#allocation1 + $0x20] ss:$4 sm:$0xff] %v3623_v24 }
 0x3d6   : > { %3780 = vst [vmem:[#allocation1 + $0x21] ss:$4 sm:$0xff] %v3624_v38 }
 0x3d7   : > { %3781 = vst [vmem:[#allocation1 + $0x22] ss:$4 sm:$0xff] %v3625_v30 }
 0x3d8   : > { %v3493_v7 = vpop.f32.mrf.mxu1 }
 0x3d9   : > { %v3494_v35 = vadd.f32 %v5720_v18, %v3493_v7 }
 0x3da   : > { %v3783_v32 = vld.sshfl [vmem:[#allocation1] sm:$0xff pattern:$0x73625140] }
 0x3db   : > { %3863 = vst [vmem:[%s5734_s21 + $0xd0] sm:$0xff] %v3783_v32  ;;  %v3626_v4 = vrot.slane %v3494_v35, 4  ;;  %v3627_v1 = vrot.slane %v3494_v35, 6 }
 0x3dc   : > { %3782 = vst [vmem:[#allocation1 + $0x23] ss:$4 sm:$0xff] %v3494_v35 }
 0x3dd   : > { %3785 = vst [vmem:[#allocation1] ss:$4 sm:$0xff] %v3626_v4 }
 0x3de   : > { %3786 = vst [vmem:[#allocation1 + $0x1] ss:$4 sm:$0xff] %v3627_v1 }
 0x3e0   : > { %v3496_v53 = vpop.f32.mrf.mxu1 }
 0x3e1   : > { %v3497_v21 = vadd.f32 %v5720_v18, %v3496_v53 }
 0x3e3   : > { %v3784_v46 = vld.sshfl [vmem:[#allocation1 + $0x20] sm:$0xff pattern:$0x73625140]  ;;  %v3628_v23 = vrot.slane %v3497_v21, 2  ;;  %v3629_v43 = vrot.slane %v3497_v21, 4  ;;  %v3630_v28 = vrot.slane %v3497_v21, 6 }
 0x3e4   : > { %3864 = vst [vmem:[%s5734_s21 + $0xd8] sm:$0xff] %v3784_v46 }
 0x3e5   : > { %3787 = vst [vmem:[#allocation1 + $0x2] ss:$4 sm:$0xff] %v3497_v21 }
 0x3e6   : > { %3788 = vst [vmem:[#allocation1 + $0x3] ss:$4 sm:$0xff] %v3628_v23 }
 0x3e7   : > { %3789 = vst [vmem:[#allocation1 + $0x20] ss:$4 sm:$0xff] %v3629_v43 }
 0x3e8   : > { %3790 = vst [vmem:[#allocation1 + $0x21] ss:$4 sm:$0xff] %v3630_v28  ;;  %v3498_v52 = vpop.f32.mrf.mxu1 }
 0x3e9   : > { %v3499_v34 = vadd.f32 %v5720_v18, %v3498_v52 }
 0x3eb   : > { %v3631_v51 = vrot.slane %v3499_v34, 2  ;;  %v3632_v19 = vrot.slane %v3499_v34, 6  ;;  %3791 = vst [vmem:[#allocation1 + $0x22] ss:$4 sm:$0xff] %v3499_v34 }
 0x3ed   : > { %v3793_v50 = vld.sshfl [vmem:[#allocation1] sm:$0xff pattern:$0x73625140]  ;;  %3792 = vst [vmem:[#allocation1 + $0x23] ss:$4 sm:$0xff] %v3631_v51 }
 0x3ee   : > { %3865 = vst [vmem:[%s5734_s21 + $0xe0] sm:$0xff] %v3793_v50 }
 0x3ef   : > { %3795 = vst [vmem:[#allocation1] ss:$4 sm:$0xff] %v3632_v19 }
 0x3f0   : > { %v3501_v0 = vpop.f32.mrf.mxu1 }
 0x3f1   : > { %v3502_v57 = vadd.f32 %v4667_v40, %v3501_v0 }
 0x3f3   : > { %v3633_v3 = vrot.slane %v3502_v57, 2  ;;  %v3634_v56 = vrot.slane %v3502_v57, 4  ;;  %3796 = vst [vmem:[#allocation1 + $0x1] ss:$4 sm:$0xff] %v3502_v57  ;;  %v3635_v18 = vrot.slane %v3502_v57, 6 }
 0x3f4   : > { %v3794_v31 = vld.sshfl [vmem:[#allocation1 + $0x20] sm:$0xff pattern:$0x73625140] }
 0x3f5   : > { %3866 = vst [vmem:[%s5734_s21 + $0xe8] sm:$0xff] %v3794_v31 }
 0x3f6   : > { %3797 = vst [vmem:[#allocation1 + $0x2] ss:$4 sm:$0xff] %v3633_v3 }
 0x3f7   : > { %3798 = vst [vmem:[#allocation1 + $0x3] ss:$4 sm:$0xff] %v3634_v56 }
 0x3f8   : > { %3799 = vst [vmem:[#allocation1 + $0x20] ss:$4 sm:$0xff] %v3635_v18  ;;  %v3503_v37 = vpop.f32.mrf.mxu1 }
 0x3f9   : > { %v3504_v36 = vadd.f32 %v4667_v40, %v3503_v37 }
 0x3fb   : > { %v3636_v59 = vrot.slane %v3504_v36, 2  ;;  %v3637_v62 = vrot.slane %v3504_v36, 4  ;;  %3800 = vst [vmem:[#allocation1 + $0x21] ss:$4 sm:$0xff] %v3504_v36 }
 0x3fd   : > { %3801 = vst [vmem:[#allocation1 + $0x22] ss:$4 sm:$0xff] %v3636_v59 }
 0x3fe   : > { %v3803_v29 = vld.sshfl [vmem:[#allocation1] sm:$0xff pattern:$0x73625140]  ;;  %3802 = vst [vmem:[#allocation1 + $0x23] ss:$4 sm:$0xff] %v3637_v62 }
 0x3ff   : > { %3867 = vst [vmem:[%s5734_s21 + $0xf0] sm:$0xff] %v3803_v29 }
 0x405   : > { %v3804_v49 = vld.sshfl [vmem:[#allocation1 + $0x20] sm:$0xff pattern:$0x73625140] }
 0x406   : > { %3868 = vst [vmem:[%s5734_s21 + $0xf8] sm:$0xff] %v3804_v49 }
 0x407 PF: > { %s15_s18 = sadd.s32 1, %s4674_s18  }
 0x408   : > { %p12_p4 = scmp.ge.s32.totalorder %s15_s18, 4  }
 0x40a   :  { %14 = sbr.rel (!%p12_p4) target bundleno = 1 (0x1), region = 85 }

</bundles_post_ra>
